<compile_context>
chip_gen: v7x
topology: tpu7x:2x2x1
jax: 0.10.0
libtpu: 0.0.40
codegen_flags: <defaults>
</compile_context>

<pallas_src>
import jax
import jax.numpy as jnp
from jax.experimental import pallas as pl
from jax.experimental.pallas import tpu as pltpu


# ---------------------------------------------------------------------------
# Kernel 1: single-shot conv-as-matmul  out = relu(x @ w + b), M tiled.
# ---------------------------------------------------------------------------
def _conv_matmul_kernel(x_ref, w_ref, b_ref, o_ref):
    o_ref[...] = jnp.maximum(
        jnp.dot(x_ref[...], w_ref[...], preferred_element_type=jnp.float32)
        + b_ref[...],
        0.0,
    ).astype(o_ref.dtype)


def _pick_tm(m, target=384):
    """Largest divisor of m that is <= target and a multiple of 8 (or m itself)."""
    if m <= target:
        return m
    for tm in range(target, 7, -1):
        if m % tm == 0 and tm % 8 == 0:
            return tm
    return m


def conv_matmul_bias_relu(x, w, b):
    """x: (M, K) patches, w: (K, N), b: (1, N) -> relu(x @ w + b)."""
    M, K = x.shape
    _, N = w.shape
    tm = _pick_tm(M)
    return pl.pallas_call(
        _conv_matmul_kernel,
        out_shape=jax.ShapeDtypeStruct((M, N), jnp.float32),
        grid_spec=pltpu.PrefetchScalarGridSpec(
            num_scalar_prefetch=0,
            grid=(M // tm,),
            in_specs=[
                pl.BlockSpec((tm, K), lambda i: (i, 0)),
                pl.BlockSpec((K, N), lambda i: (0, 0)),
                pl.BlockSpec((1, N), lambda i: (0, 0)),
            ],
            out_specs=pl.BlockSpec((tm, N), lambda i: (i, 0)),
        ),
        compiler_params=pltpu.CompilerParams(
            dimension_semantics=("parallel",),
        ),
    )(x, w, b)


# ---------------------------------------------------------------------------
# Kernel 2: fused MLP head
#   out = log_softmax(relu(x @ W1t + b1) @ W2t + b2, axis=-1)
# fc1's K (=16384) is tiled; fc2 + log_softmax run in the last-step epilogue.
# ---------------------------------------------------------------------------
def _mlp_head_kernel(x_ref, w1_ref, b1_ref, w2_ref, b2_ref, o_ref, acc_ref):
    k = pl.program_id(0)

    @pl.when(k == 0)
    def _():
        acc_ref[...] = jnp.zeros_like(acc_ref)

    acc_ref[...] += jnp.dot(
        x_ref[...], w1_ref[...], preferred_element_type=jnp.float32
    )

    @pl.when(k == pl.num_programs(0) - 1)
    def _():
        h = jnp.maximum(acc_ref[...] + b1_ref[...], 0.0)              # (M, 256)
        logits = (
            jnp.dot(h, w2_ref[...], preferred_element_type=jnp.float32)
            + b2_ref[...]
        )                                                             # (M, 10)
        m = jnp.max(logits, axis=-1, keepdims=True)
        s = logits - m
        lse = jnp.log(jnp.sum(jnp.exp(s), axis=-1, keepdims=True))
        o_ref[...] = (s - lse).astype(o_ref.dtype)


def mlp_head(x, w1t, b1, w2t, b2, *, tk=4096):
    M, K = x.shape
    _, N1 = w1t.shape
    _, N2 = w2t.shape
    if K % tk != 0:
        tk = K
    nk = K // tk
    return pl.pallas_call(
        _mlp_head_kernel,
        out_shape=jax.ShapeDtypeStruct((M, N2), jnp.float32),
        grid_spec=pltpu.PrefetchScalarGridSpec(
            num_scalar_prefetch=0,
            grid=(nk,),
            in_specs=[
                pl.BlockSpec((M, tk), lambda k: (0, k)),
                pl.BlockSpec((tk, N1), lambda k: (k, 0)),
                pl.BlockSpec((1, N1), lambda k: (0, 0)),
                pl.BlockSpec((N1, N2), lambda k: (0, 0)),
                pl.BlockSpec((1, N2), lambda k: (0, 0)),
            ],
            out_specs=pl.BlockSpec((M, N2), lambda k: (0, 0)),
            scratch_shapes=[pltpu.VMEM((M, N1), jnp.float32)],
        ),
        compiler_params=pltpu.CompilerParams(
            dimension_semantics=("arbitrary",),
            vmem_limit_bytes=32 * 1024 * 1024,   # headroom for (4096,256) f32 x2 buffers
        ),
    )(x, w1t, b1, w2t, b2)


# ---------------------------------------------------------------------------
# Glue: im2col (pure data rearrangement, valid convolution, stride 1)
# ---------------------------------------------------------------------------
def im2col(x_nhwc, kh, kw):
    """x: (B, H, W, C) -> (B*Ho*Wo, kh*kw*C) with (kh, kw) major, C minor."""
    B, H, W, C = x_nhwc.shape
    Ho, Wo = H - kh + 1, W - kw + 1
    cols = []
    for i in range(kh):
        for j in range(kw):
            cols.append(x_nhwc[:, i:i + Ho, j:j + Wo, :])  # (B, Ho, Wo, C)
    patches = jnp.stack(cols, axis=3)                      # (B, Ho, Wo, kh*kw, C)
    return patches.reshape(B * Ho * Wo, kh * kw * C), (B, Ho, Wo)


# ---------------------------------------------------------------------------
# One-time parameter preparation (call ONCE, outside jit): conv weight reshape,
# fc weight transposes, the NCHW-flatten column permutation for W1, and bias
# reshapes all happen here so the per-call forward does zero weight transposes.
# ---------------------------------------------------------------------------
def prepare_params(params):
    prepped = {}
    for name in ("conv1", "conv2", "conv3"):
        W, b = params[name]                     # (Cout, Cin, KH, KW), (Cout,)
        Cout, Cin, KH, KW = W.shape
        wmat = jnp.transpose(W, (2, 3, 1, 0)).reshape(KH * KW * Cin, Cout)
        prepped[name] = (wmat.astype(jnp.float32),
                         b.reshape(1, Cout).astype(jnp.float32))

    W1, b1 = params["fc1"]                      # (256, 16384), (256,)
    W2, b2 = params["fc2"]                      # (10, 256), (10,)
    N1, K1 = W1.shape
    Cout3 = params["conv3"][0].shape[0]         # 64
    hw = int(round((K1 // Cout3) ** 0.5))       # 16
    # PyTorch flattens conv3's output in NCHW order; our conv path produces
    # NHWC. Permute W1's columns once from (c, h, w) to (h, w, c) order and
    # transpose to (K, N) so fc1 consumes the NHWC flatten with a free reshape.
    W1t = (W1.reshape(N1, Cout3, hw, hw)
             .transpose(2, 3, 1, 0)
             .reshape(K1, N1)
             .astype(jnp.float32))                              # (16384, 256)
    W2t = W2.T.astype(jnp.float32)                              # (256, 10)
    prepped["fc1"] = (W1t, b1.reshape(1, N1).astype(jnp.float32))
    prepped["fc2"] = (W2t, b2.reshape(1, W2.shape[0]).astype(jnp.float32))
    return prepped


# ---------------------------------------------------------------------------
# Full forward pass (expects prepare_params() output)
# ---------------------------------------------------------------------------
def classifier_forward(x_nchw, prepped):
    x = jnp.transpose(x_nchw, (0, 2, 3, 1))      # NCHW -> NHWC (C=1, ~free)

    for name in ("conv1", "conv2", "conv3"):
        wmat, b = prepped[name]
        C = x.shape[-1]
        k = int(round((wmat.shape[0] // C) ** 0.5))            # kernel size (5)
        patches, (B, Ho, Wo) = im2col(x, k, k)
        y = conv_matmul_bias_relu(patches, wmat, b)            # fused matmul+bias+relu
        x = y.reshape(B, Ho, Wo, wmat.shape[1])
        # dropout(p=0.5): identity at inference

    B = x.shape[0]
    feat = x.reshape(B, -1)      # NHWC flatten; W1 columns were pre-permuted to match

    W1t, b1 = prepped["fc1"]
    W2t, b2 = prepped["fc2"]
    # fused: relu(feat @ W1t + b1) @ W2t + b2 -> log_softmax, one pallas_call
    return mlp_head(feat, W1t, b1, W2t, b2, tk=4096)


# ---------------------------------------------------------------------------
# Pure-JAX reference with PyTorch semantics (for the numerical self-check)
# ---------------------------------------------------------------------------
def classifier_reference(x_nchw, params):
    hi = jax.lax.Precision.HIGHEST
    x = jnp.transpose(x_nchw, (0, 2, 3, 1))
    for name in ("conv1", "conv2", "conv3"):
        W, b = params[name]
        Cout, Cin, KH, KW = W.shape
        patches, (B, Ho, Wo) = im2col(x, KH, KW)
        wmat = jnp.transpose(W, (2, 3, 1, 0)).reshape(KH * KW * Cin, Cout)
        y = jnp.maximum(jnp.dot(patches, wmat, precision=hi) + b, 0.0)
        x = y.reshape(B, Ho, Wo, Cout)
    B, Ho, Wo, C = x.shape
    feat = jnp.transpose(x, (0, 3, 1, 2)).reshape(B, C * Ho * Wo)   # NCHW flatten
    W1, b1 = params["fc1"]
    h = jnp.maximum(jnp.dot(feat, W1.T, precision=hi) + b1, 0.0)
    W2, b2 = params["fc2"]
    logits = jnp.dot(h, W2.T, precision=hi) + b2
    return jax.nn.log_softmax(logits, axis=1)


# ---------------------------------------------------------------------------
# Deterministic parameter init (PyTorch-style uniform(-1/sqrt(fan_in), +))
# ---------------------------------------------------------------------------
def init_params(key):
    def uinit(k, shape, fan_in):
        bound = 1.0 / (fan_in ** 0.5)
        return jax.random.uniform(k, shape, jnp.float32, -bound, bound)

    ks = jax.random.split(key, 10)
    return {
        "conv1": (uinit(ks[0], (32, 1, 5, 5), 1 * 5 * 5),
                  uinit(ks[1], (32,), 1 * 5 * 5)),
        "conv2": (uinit(ks[2], (32, 32, 5, 5), 32 * 5 * 5),
                  uinit(ks[3], (32,), 32 * 5 * 5)),
        "conv3": (uinit(ks[4], (64, 32, 5, 5), 32 * 5 * 5),
                  uinit(ks[5], (64,), 32 * 5 * 5)),
        "fc1": (uinit(ks[6], (256, 16384), 16384),
                uinit(ks[7], (256,), 16384)),
        "fc2": (uinit(ks[8], (10, 256), 256),
                uinit(ks[9], (10,), 256)),
    }


if __name__ == "__main__":
    key = jax.random.PRNGKey(0)
    k_x, k_p = jax.random.split(key)

    # Input spatial must be 28x28 so that three valid 5x5 convs yield
    # 64*16*16 = 16384 features, as hard-coded by fc1 = Linear(16384, 256).
    x = jax.random.normal(k_x, (2, 1, 28, 28), dtype=jnp.float32)
    params = init_params(k_p)

    prepped = prepare_params(params)        # one-time layout work, outside jit

    fwd = jax.jit(classifier_forward)
    out = jax.block_until_ready(fwd(x, prepped))

    assert out.shape == (2, 10), out.shape
    # rows of log_softmax must exp-sum to ~1
    assert bool(jnp.allclose(jnp.exp(out).sum(axis=1), 1.0, atol=1e-4))
    # numerical check vs. a pure-JAX reference of the PyTorch module
    ref = classifier_reference(x, params)
    assert bool(jnp.allclose(out, ref, atol=5e-3, rtol=5e-3)), (
        float(jnp.max(jnp.abs(out - ref))))
    print("KERNEL_OK")
</pallas_src>

<mosaic_0001>
module attributes {stable_mosaic.version = 11 : i64} {
  func.func @_conv_matmul_kernel(%arg0: i32, %arg1: memref<384x25xf32, #tpu.memory_space<vmem>>, %arg2: memref<25x32xf32, #tpu.memory_space<vmem>>, %arg3: memref<1x32xf32, #tpu.memory_space<vmem>>, %arg4: memref<384x32xf32, #tpu.memory_space<vmem>>) attributes {dimension_semantics = [#tpu.dimension_semantics<parallel>], iteration_bounds = array<i64: 3>, scalar_prefetch = 0 : i64, scratch_operands = 0 : i64, tpu.core_type = #tpu.core_type<tc>, window_params = [{transform_indices = @transform_0, window_bounds = array<i64: 384, 25>}, {pipeline_mode = #tpu.pipeline_mode<synchronous>, transform_indices = @transform_1, window_bounds = array<i64: 25, 32>}, {pipeline_mode = #tpu.pipeline_mode<synchronous>, transform_indices = @transform_2, window_bounds = array<i64: 1, 32>}, {transform_indices = @transform_3, window_bounds = array<i64: 384, 32>}]} {
    %c0 = arith.constant 0 : index
    %c0_0 = arith.constant 0 : index
    %0 = vector.load %arg1[%c0, %c0_0] : memref<384x25xf32, #tpu.memory_space<vmem>>, vector<384x25xf32>
    %c0_1 = arith.constant 0 : index
    %c0_2 = arith.constant 0 : index
    %1 = vector.load %arg2[%c0_1, %c0_2] : memref<25x32xf32, #tpu.memory_space<vmem>>, vector<25x32xf32>
    %cst = arith.constant dense<0.000000e+00> : vector<384x32xf32>
    %2 = tpu.matmul %0, %1, %cst {dimension_numbers = #tpu.dot_dimension_numbers<[1], [0], [0], [1], [0, 0, 1, 1], [], []>} : vector<384x25xf32>, vector<25x32xf32>, vector<384x32xf32> -> vector<384x32xf32>
    %c0_3 = arith.constant 0 : index
    %c0_4 = arith.constant 0 : index
    %3 = vector.load %arg3[%c0_3, %c0_4] : memref<1x32xf32, #tpu.memory_space<vmem>>, vector<1x32xf32>
    %4 = vector.broadcast %3 : vector<1x32xf32> to vector<384x32xf32>
    %5 = arith.addf %2, %4 : vector<384x32xf32>
    %cst_5 = arith.constant 0.000000e+00 : f32
    %6 = vector.broadcast %cst_5 : f32 to vector<384x32xf32>
    %7 = arith.maximumf %5, %6 : vector<384x32xf32>
    %c0_6 = arith.constant 0 : index
    %c0_7 = arith.constant 0 : index
    %8 = vector.load %arg4[%c0_6, %c0_7] : memref<384x32xf32, #tpu.memory_space<vmem>>, vector<384x32xf32>
    tpu.vector_store %arg4[%c0_6, %c0_7], %7 {strides = array<i32>} : memref<384x32xf32, #tpu.memory_space<vmem>>, vector<384x32xf32>,
    return
  }
  func.func @transform_0(%arg0: i32) -> (i32, i32) {
    %c0_i32 = arith.constant 0 : i32
    %c0_i32_0 = arith.constant 0 : i32
    return %arg0, %c0_i32 : i32, i32
  }
  func.func @transform_1(%arg0: i32) -> (i32, i32) {
    %c0_i32 = arith.constant 0 : i32
    %c0_i32_0 = arith.constant 0 : i32
    %c0_i32_1 = arith.constant 0 : i32
    return %c0_i32, %c0_i32_0 : i32, i32
  }
  func.func @transform_2(%arg0: i32) -> (i32, i32) {
    %c0_i32 = arith.constant 0 : i32
    %c0_i32_0 = arith.constant 0 : i32
    %c0_i32_1 = arith.constant 0 : i32
    return %c0_i32, %c0_i32_0 : i32, i32
  }
  func.func @transform_3(%arg0: i32) -> (i32, i32) {
    %c0_i32 = arith.constant 0 : i32
    %c0_i32_0 = arith.constant 0 : i32
    return %arg0, %c0_i32 : i32, i32
  }
}

module attributes {stable_mosaic.version = 11 : i64} {
  func.func @_conv_matmul_kernel(%arg0: i32, %arg1: memref<200x800xf32, #tpu.memory_space<vmem>>, %arg2: memref<800x32xf32, #tpu.memory_space<vmem>>, %arg3: memref<1x32xf32, #tpu.memory_space<vmem>>, %arg4: memref<200x32xf32, #tpu.memory_space<vmem>>) attributes {dimension_semantics = [#tpu.dimension_semantics<parallel>], iteration_bounds = array<i64: 4>, scalar_prefetch = 0 : i64, scratch_operands = 0 : i64, tpu.core_type = #tpu.core_type<tc>, window_params = [{transform_indices = @transform_0, window_bounds = array<i64: 200, 800>}, {pipeline_mode = #tpu.pipeline_mode<synchronous>, transform_indices = @transform_1, window_bounds = array<i64: 800, 32>}, {pipeline_mode = #tpu.pipeline_mode<synchronous>, transform_indices = @transform_2, window_bounds = array<i64: 1, 32>}, {transform_indices = @transform_3, window_bounds = array<i64: 200, 32>}]} {
    %c0 = arith.constant 0 : index
    %c0_0 = arith.constant 0 : index
    %0 = vector.load %arg1[%c0, %c0_0] : memref<200x800xf32, #tpu.memory_space<vmem>>, vector<200x800xf32>
    %c0_1 = arith.constant 0 : index
    %c0_2 = arith.constant 0 : index
    %1 = vector.load %arg2[%c0_1, %c0_2] : memref<800x32xf32, #tpu.memory_space<vmem>>, vector<800x32xf32>
    %cst = arith.constant dense<0.000000e+00> : vector<200x32xf32>
    %2 = tpu.matmul %0, %1, %cst {dimension_numbers = #tpu.dot_dimension_numbers<[1], [0], [0], [1], [0, 0, 1, 1], [], []>} : vector<200x800xf32>, vector<800x32xf32>, vector<200x32xf32> -> vector<200x32xf32>
    %c0_3 = arith.constant 0 : index
    %c0_4 = arith.constant 0 : index
    %3 = vector.load %arg3[%c0_3, %c0_4] : memref<1x32xf32, #tpu.memory_space<vmem>>, vector<1x32xf32>
    %4 = vector.broadcast %3 : vector<1x32xf32> to vector<200x32xf32>
    %5 = arith.addf %2, %4 : vector<200x32xf32>
    %cst_5 = arith.constant 0.000000e+00 : f32
    %6 = vector.broadcast %cst_5 : f32 to vector<200x32xf32>
    %7 = arith.maximumf %5, %6 : vector<200x32xf32>
    %c0_6 = arith.constant 0 : index
    %c0_7 = arith.constant 0 : index
    %8 = vector.load %arg4[%c0_6, %c0_7] : memref<200x32xf32, #tpu.memory_space<vmem>>, vector<200x32xf32>
    tpu.vector_store %arg4[%c0_6, %c0_7], %7 {strides = array<i32>} : memref<200x32xf32, #tpu.memory_space<vmem>>, vector<200x32xf32>,
    return
  }
  func.func @transform_0(%arg0: i32) -> (i32, i32) {
    %c0_i32 = arith.constant 0 : i32
    %c0_i32_0 = arith.constant 0 : i32
    return %arg0, %c0_i32 : i32, i32
  }
  func.func @transform_1(%arg0: i32) -> (i32, i32) {
    %c0_i32 = arith.constant 0 : i32
    %c0_i32_0 = arith.constant 0 : i32
    %c0_i32_1 = arith.constant 0 : i32
    return %c0_i32, %c0_i32_0 : i32, i32
  }
  func.func @transform_2(%arg0: i32) -> (i32, i32) {
    %c0_i32 = arith.constant 0 : i32
    %c0_i32_0 = arith.constant 0 : i32
    %c0_i32_1 = arith.constant 0 : i32
    return %c0_i32, %c0_i32_0 : i32, i32
  }
  func.func @transform_3(%arg0: i32) -> (i32, i32) {
    %c0_i32 = arith.constant 0 : i32
    %c0_i32_0 = arith.constant 0 : i32
    return %arg0, %c0_i32 : i32, i32
  }
}

module attributes {stable_mosaic.version = 11 : i64} {
  func.func @_conv_matmul_kernel(%arg0: i32, %arg1: memref<256x800xf32, #tpu.memory_space<vmem>>, %arg2: memref<800x64xf32, #tpu.memory_space<vmem>>, %arg3: memref<1x64xf32, #tpu.memory_space<vmem>>, %arg4: memref<256x64xf32, #tpu.memory_space<vmem>>) attributes {dimension_semantics = [#tpu.dimension_semantics<parallel>], iteration_bounds = array<i64: 2>, scalar_prefetch = 0 : i64, scratch_operands = 0 : i64, tpu.core_type = #tpu.core_type<tc>, window_params = [{transform_indices = @transform_0, window_bounds = array<i64: 256, 800>}, {pipeline_mode = #tpu.pipeline_mode<synchronous>, transform_indices = @transform_1, window_bounds = array<i64: 800, 64>}, {pipeline_mode = #tpu.pipeline_mode<synchronous>, transform_indices = @transform_2, window_bounds = array<i64: 1, 64>}, {transform_indices = @transform_3, window_bounds = array<i64: 256, 64>}]} {
    %c0 = arith.constant 0 : index
    %c0_0 = arith.constant 0 : index
    %0 = vector.load %arg1[%c0, %c0_0] : memref<256x800xf32, #tpu.memory_space<vmem>>, vector<256x800xf32>
    %c0_1 = arith.constant 0 : index
    %c0_2 = arith.constant 0 : index
    %1 = vector.load %arg2[%c0_1, %c0_2] : memref<800x64xf32, #tpu.memory_space<vmem>>, vector<800x64xf32>
    %cst = arith.constant dense<0.000000e+00> : vector<256x64xf32>
    %2 = tpu.matmul %0, %1, %cst {dimension_numbers = #tpu.dot_dimension_numbers<[1], [0], [0], [1], [0, 0, 1, 1], [], []>} : vector<256x800xf32>, vector<800x64xf32>, vector<256x64xf32> -> vector<256x64xf32>
    %c0_3 = arith.constant 0 : index
    %c0_4 = arith.constant 0 : index
    %3 = vector.load %arg3[%c0_3, %c0_4] : memref<1x64xf32, #tpu.memory_space<vmem>>, vector<1x64xf32>
    %4 = vector.broadcast %3 : vector<1x64xf32> to vector<256x64xf32>
    %5 = arith.addf %2, %4 : vector<256x64xf32>
    %cst_5 = arith.constant 0.000000e+00 : f32
    %6 = vector.broadcast %cst_5 : f32 to vector<256x64xf32>
    %7 = arith.maximumf %5, %6 : vector<256x64xf32>
    %c0_6 = arith.constant 0 : index
    %c0_7 = arith.constant 0 : index
    %8 = vector.load %arg4[%c0_6, %c0_7] : memref<256x64xf32, #tpu.memory_space<vmem>>, vector<256x64xf32>
    tpu.vector_store %arg4[%c0_6, %c0_7], %7 {strides = array<i32>} : memref<256x64xf32, #tpu.memory_space<vmem>>, vector<256x64xf32>,
    return
  }
  func.func @transform_0(%arg0: i32) -> (i32, i32) {
    %c0_i32 = arith.constant 0 : i32
    %c0_i32_0 = arith.constant 0 : i32
    return %arg0, %c0_i32 : i32, i32
  }
  func.func @transform_1(%arg0: i32) -> (i32, i32) {
    %c0_i32 = arith.constant 0 : i32
    %c0_i32_0 = arith.constant 0 : i32
    %c0_i32_1 = arith.constant 0 : i32
    return %c0_i32, %c0_i32_0 : i32, i32
  }
  func.func @transform_2(%arg0: i32) -> (i32, i32) {
    %c0_i32 = arith.constant 0 : i32
    %c0_i32_0 = arith.constant 0 : i32
    %c0_i32_1 = arith.constant 0 : i32
    return %c0_i32, %c0_i32_0 : i32, i32
  }
  func.func @transform_3(%arg0: i32) -> (i32, i32) {
    %c0_i32 = arith.constant 0 : i32
    %c0_i32_0 = arith.constant 0 : i32
    return %arg0, %c0_i32 : i32, i32
  }
}

module attributes {stable_mosaic.version = 11 : i64} {
  func.func @_mlp_head_kernel(%arg0: i32, %arg1: memref<2x4096xf32, #tpu.memory_space<vmem>>, %arg2: memref<4096x256xf32, #tpu.memory_space<vmem>>, %arg3: memref<1x256xf32, #tpu.memory_space<vmem>>, %arg4: memref<256x10xf32, #tpu.memory_space<vmem>>, %arg5: memref<1x10xf32, #tpu.memory_space<vmem>>, %arg6: memref<2x10xf32, #tpu.memory_space<vmem>>, %arg7: memref<2x256xf32, #tpu.memory_space<vmem>>) attributes {dimension_semantics = [#tpu.dimension_semantics<arbitrary>], iteration_bounds = array<i64: 4>, scalar_prefetch = 0 : i64, scratch_operands = 1 : i64, tpu.core_type = #tpu.core_type<tc>, window_params = [{transform_indices = @transform_0, window_bounds = array<i64: 2, 4096>}, {transform_indices = @transform_1, window_bounds = array<i64: 4096, 256>}, {pipeline_mode = #tpu.pipeline_mode<synchronous>, transform_indices = @transform_2, window_bounds = array<i64: 1, 256>}, {pipeline_mode = #tpu.pipeline_mode<synchronous>, transform_indices = @transform_3, window_bounds = array<i64: 256, 10>}, {pipeline_mode = #tpu.pipeline_mode<synchronous>, transform_indices = @transform_4, window_bounds = array<i64: 1, 10>}, {pipeline_mode = #tpu.pipeline_mode<synchronous>, transform_indices = @transform_5, window_bounds = array<i64: 2, 10>}]} {
    %c0_i32 = arith.constant 0 : i32
    %0 = arith.cmpi eq, %arg0, %c0_i32 : i32
    %1 = arith.extui %0 : i1 to i32
    %c0_i32_0 = arith.constant 0 : i32
    %2 = arith.cmpi ne, %1, %c0_i32_0 : i32
    scf.if %2 {
      %cst_9 = arith.constant 0.000000e+00 : f32
      %12 = vector.broadcast %cst_9 : f32 to vector<2x256xf32>
      %c0_10 = arith.constant 0 : index
      %c0_11 = arith.constant 0 : index
      %13 = vector.load %arg7[%c0_10, %c0_11] : memref<2x256xf32, #tpu.memory_space<vmem>>, vector<2x256xf32>
      tpu.vector_store %arg7[%c0_10, %c0_11], %12 {strides = array<i32>} : memref<2x256xf32, #tpu.memory_space<vmem>>, vector<2x256xf32>,
    } else {
    }
    %c0 = arith.constant 0 : index
    %c0_1 = arith.constant 0 : index
    %3 = vector.load %arg7[%c0, %c0_1] : memref<2x256xf32, #tpu.memory_space<vmem>>, vector<2x256xf32>
    %c0_2 = arith.constant 0 : index
    %c0_3 = arith.constant 0 : index
    %4 = vector.load %arg1[%c0_2, %c0_3] : memref<2x4096xf32, #tpu.memory_space<vmem>>, vector<2x4096xf32>
    %c0_4 = arith.constant 0 : index
    %c0_5 = arith.constant 0 : index
    %5 = vector.load %arg2[%c0_4, %c0_5] : memref<4096x256xf32, #tpu.memory_space<vmem>>, vector<4096x256xf32>
    %cst = arith.constant dense<0.000000e+00> : vector<2x256xf32>
    %6 = tpu.matmul %4, %5, %cst {dimension_numbers = #tpu.dot_dimension_numbers<[1], [0], [0], [1], [0, 0, 1, 1], [], []>} : vector<2x4096xf32>, vector<4096x256xf32>, vector<2x256xf32> -> vector<2x256xf32>
    %7 = arith.addf %3, %6 : vector<2x256xf32>
    %c0_6 = arith.constant 0 : index
    %c0_7 = arith.constant 0 : index
    %8 = vector.load %arg7[%c0_6, %c0_7] : memref<2x256xf32, #tpu.memory_space<vmem>>, vector<2x256xf32>
    tpu.vector_store %arg7[%c0_6, %c0_7], %7 {strides = array<i32>} : memref<2x256xf32, #tpu.memory_space<vmem>>, vector<2x256xf32>,
    %c3_i32 = arith.constant 3 : i32
    %9 = arith.cmpi eq, %arg0, %c3_i32 : i32
    %10 = arith.extui %9 : i1 to i32
    %c0_i32_8 = arith.constant 0 : i32
    %11 = arith.cmpi ne, %10, %c0_i32_8 : i32
    scf.if %11 {
      %c0_9 = arith.constant 0 : index
      %c0_10 = arith.constant 0 : index
      %12 = vector.load %arg7[%c0_9, %c0_10] : memref<2x256xf32, #tpu.memory_space<vmem>>, vector<2x256xf32>
      %c0_11 = arith.constant 0 : index
      %c0_12 = arith.constant 0 : index
      %13 = vector.load %arg3[%c0_11, %c0_12] : memref<1x256xf32, #tpu.memory_space<vmem>>, vector<1x256xf32>
      %14 = vector.broadcast %13 : vector<1x256xf32> to vector<2x256xf32>
      %15 = arith.addf %12, %14 : vector<2x256xf32>
      %cst_13 = arith.constant 0.000000e+00 : f32
      %16 = vector.broadcast %cst_13 : f32 to vector<2x256xf32>
      %17 = arith.maximumf %15, %16 : vector<2x256xf32>
      %c0_14 = arith.constant 0 : index
      %c0_15 = arith.constant 0 : index
      %18 = vector.load %arg4[%c0_14, %c0_15] : memref<256x10xf32, #tpu.memory_space<vmem>>, vector<256x10xf32>
      %cst_16 = arith.constant dense<0.000000e+00> : vector<2x10xf32>
      %19 = tpu.matmul %17, %18, %cst_16 {dimension_numbers = #tpu.dot_dimension_numbers<[1], [0], [0], [1], [0, 0, 1, 1], [], []>} : vector<2x256xf32>, vector<256x10xf32>, vector<2x10xf32> -> vector<2x10xf32>
      %c0_17 = arith.constant 0 : index
      %c0_18 = arith.constant 0 : index
      %20 = vector.load %arg5[%c0_17, %c0_18] : memref<1x10xf32, #tpu.memory_space<vmem>>, vector<1x10xf32>
      %21 = vector.broadcast %20 : vector<1x10xf32> to vector<2x10xf32>
      %22 = arith.addf %19, %21 : vector<2x10xf32>
      %cst_19 = arith.constant dense<0xFF800000> : vector<2xf32>
      %23 = vector.multi_reduction <maximumf>, %22, %cst_19 [1] : vector<2x10xf32> to vector<2xf32>
      %24 = vector.shape_cast %23 : vector<2xf32> to vector<2x1xf32>
      %25 = vector.broadcast %24 : vector<2x1xf32> to vector<2x10xf32>
      %26 = arith.subf %22, %25 : vector<2x10xf32>
      %27 = math.exp %26 : vector<2x10xf32>
      %cst_20 = arith.constant dense<0.000000e+00> : vector<2xf32>
      %28 = vector.multi_reduction <add>, %27, %cst_20 [1] : vector<2x10xf32> to vector<2xf32>
      %29 = vector.shape_cast %28 : vector<2xf32> to vector<2x1xf32>
      %30 = math.log %29 : vector<2x1xf32>
      %31 = vector.broadcast %30 : vector<2x1xf32> to vector<2x10xf32>
      %32 = arith.subf %26, %31 : vector<2x10xf32>
      %c0_21 = arith.constant 0 : index
      %c0_22 = arith.constant 0 : index
      %33 = vector.load %arg6[%c0_21, %c0_22] : memref<2x10xf32, #tpu.memory_space<vmem>>, vector<2x10xf32>
      tpu.vector_store %arg6[%c0_21, %c0_22], %32 {strides = array<i32>} : memref<2x10xf32, #tpu.memory_space<vmem>>, vector<2x10xf32>,
    } else {
    }
    return
  }
  func.func @transform_0(%arg0: i32) -> (i32, i32) {
    %c0_i32 = arith.constant 0 : i32
    %c0_i32_0 = arith.constant 0 : i32
    return %c0_i32, %arg0 : i32, i32
  }
  func.func @transform_1(%arg0: i32) -> (i32, i32) {
    %c0_i32 = arith.constant 0 : i32
    %c0_i32_0 = arith.constant 0 : i32
    return %arg0, %c0_i32 : i32, i32
  }
  func.func @transform_2(%arg0: i32) -> (i32, i32) {
    %c0_i32 = arith.constant 0 : i32
    %c0_i32_0 = arith.constant 0 : i32
    %c0_i32_1 = arith.constant 0 : i32
    return %c0_i32, %c0_i32_0 : i32, i32
  }
  func.func @transform_3(%arg0: i32) -> (i32, i32) {
    %c0_i32 = arith.constant 0 : i32
    %c0_i32_0 = arith.constant 0 : i32
    %c0_i32_1 = arith.constant 0 : i32
    return %c0_i32, %c0_i32_0 : i32, i32
  }
  func.func @transform_4(%arg0: i32) -> (i32, i32) {
    %c0_i32 = arith.constant 0 : i32
    %c0_i32_0 = arith.constant 0 : i32
    %c0_i32_1 = arith.constant 0 : i32
    return %c0_i32, %c0_i32_0 : i32, i32
  }
  func.func @transform_5(%arg0: i32) -> (i32, i32) {
    %c0_i32 = arith.constant 0 : i32
    %c0_i32_0 = arith.constant 0 : i32
    %c0_i32_1 = arith.constant 0 : i32
    return %c0_i32, %c0_i32_0 : i32, i32
  }
}

</mosaic_0001>

<bundles_post_ra>
// kernel: classifier_forward.4
= control target key start
LH: loop header
LB: loop body
LE: loop exit
PB: predicated region body
PF: predicated region fallthrough
CT: control target
= control target key end

     0   :  { %8 = vsyncpa [#allocation3], 0  ;;  %s1578_s0 = inlined_call_operand.vmem [shape: f32[1152,25], index: 0, kind: input, shape index: {}]   ;;  %s1579_s1 = inlined_call_operand.hbm [shape: f32[25,32], index: 1, kind: input, shape index: {}]   ;;  %s1580_s2 = inlined_call_operand.hbm [shape: f32[1,32], index: 2, kind: input, shape index: {}]   ;;  %s1581_s3 = inlined_call_operand.vmem [shape: f32[1152,32], index: 3, kind: output, shape index: {}]  }
   0x1   :  { %9 = vsyncpa [#allocation5], 0  ;;  %s1228_s12 = smov 0  }
   0x2 LB: > { %s890_s13 = sadd.s32 4294967295, %s1201_s12   ;;  %p892_p0 = scmp.ge.s32.totalorder %s1201_s12, 1  ;;  %s1201_s12 = sphi %s1228_s12, %s15_s12  }
   0x3   : > { %p114_p1 = scmp.lt.s32.totalorder %s1201_s12, 4  ;;  %s1203_s14 = smov [#allocation2]  }
   0x4   : > { %s126_s15 = sshll.u32 %s1203_s14, 4  ;;  %p1242_p3 = scmp.eq.s32.totalorder %s890_s13, 0  ;;  %s127_s15 = int_to_ptr.vmem [resolvable:$true] %s126_s15 }
   0x5   : > { %p1236_p2 = pnand %p892_p0, %p114_p1  ;;  %s1204_s18 = smov [#allocation4]  }
   0x6   : > { %s1586_s17 = scalar_select %p1242_p3, 1, 0 }
   0x7   : > { %s1585_s16 = scalar_select %p1236_p2, 1, 0 }
   0x8   : > { %p1107_p4 = pneg %p1236_p2  ;;  %s140_s19 = sshll.u32 %s1204_s18, 4  ;;  %s1254_s19 = int_to_ptr.vmem [resolvable:$true] %s140_s19 }
   0x9   : > { %s1131_s23 = scalar_lea.hbm %s1579_s1, 512 }
   0xa   : > { %p1250_p5 = pnand %p1242_p3, %p1107_p4  ;;  %p1132_p6 = scmp.ne.s32.totalorder %s1579_s1, %s1131_s23 }
   0xb   : > { %p1138_p10 = scmp.lt.u32.totalorder %s1131_s23, %s1579_s1 }
   0xc   : > { %p1133_p7 = pneg %p1250_p5 }
   0xe   : > { %p1134_p8 = pnand %p1133_p7, %p1132_p6 }
  0x10   : > { %p1135_p9 = pneg %p1134_p8 }
  0x12   : > { %p1140_p11 = pnand %p1138_p10, %p1135_p9 }
  0x14   : > { %1143 = shalt.err (!%p1140_p11)
}
  0x15   : > { %s1144_s28 = scalar_lea.vmem %s127_s15, 512  ;;  %p1152_p1 = scmp.lt.s32.totalorder %s127_s15, %s127_s15 }
  0x16   : > { %p1145_p12 = scmp.ne.s32.totalorder %s127_s15, %s1144_s28  ;;  %p1153_p4 = scmp.lt.s32.totalorder %s1144_s28, %s1144_s28 }
  0x18   : > { %p1147_p13 = pnand %p1145_p12, %p1133_p7  ;;  %p1154_p3 = por %p1153_p4, %p1152_p1 }
  0x1a   : > { %p1148_p0 = pneg %p1147_p13 }
  0x1c   : > { %p1155_p2 = pnand %p1154_p3, %p1148_p0 }
  0x1e   : > { %1158 = shalt.err (!%p1155_p2)
}
  0x1f   : > { %s1205_s29 = smov 128   ;;  %s1206_s30 = smov 8  }
  0x20   : > { %1110 = dma.hbm_to_vmem [thread:$0]  (!%p1250_p5), %s1579_s1, 512, %s127_s15, [#allocation3], %s1205_s29, %s1205_s29, %s1206_s30  }
  0x21   : > { %s1159_s8 = scalar_lea.hbm %s1580_s2, 16 }
  0x22   : > { %p1160_p6 = scmp.ne.s32.totalorder %s1580_s2, %s1159_s8  ;;  %p1166_p8 = scmp.lt.u32.totalorder %s1159_s8, %s1580_s2 }
  0x24   : > { %p1162_p2 = pnand %p1160_p6, %p1133_p7 }
  0x26   : > { %p1163_p3 = pneg %p1162_p2 }
  0x28   : > { %p1168_p9 = pnand %p1166_p8, %p1163_p3 }
  0x2a   : > { %1171 = shalt.err (!%p1168_p9)
}
  0x2b   : > { %s1172_s15 = scalar_lea.vmem %s1254_s19, 16  ;;  %s1179_s18 = scalar_lea.vmem %s1254_s19, 32 }
  0x2c   : > { %p1173_p10 = scmp.ne.s32.totalorder %s1254_s19, %s1172_s15  ;;  %p1180_p13 = scmp.lt.s32.totalorder %s1254_s19, %s1254_s19 }
  0x2d   : > { %p1181_p0 = scmp.lt.s32.totalorder %s1179_s18, %s1172_s15 }
  0x2e   : > { %p1175_p11 = pnand %p1173_p10, %p1133_p7 }
  0x2f   : > { %p1182_p1 = por %p1181_p0, %p1180_p13 }
  0x30   : > { %p1176_p12 = pneg %p1175_p11 }
  0x32   : > { %p1183_p4 = pnand %p1182_p1, %p1176_p12 }
  0x34   : > { %1186 = shalt.err (!%p1183_p4)
}
  0x35   : > { %1113 = dma.hbm_to_vmem [thread:$0]  (!%p1250_p5), %s1580_s2, 16, %s1254_s19, [#allocation5]  }
  0x36   : > { %p1588_p6 = scmp.ne.s32.totalorder %s1585_s16, 0 }
  0x37   : > { %p1589_p7 = scmp.ne.s32.totalorder (!%p1588_p6), %s1586_s17, 0 }
  0x38   : > { %162 = sbr.rel (%p1588_p6) target bundleno = 341 (0x155), region = 32 }
  0x3f   : > { %1192 = dma.done.wait (%p1589_p7), [#allocation3], 512  }
  0x40   : > { %1194 = vsyncadd (%p1589_p7), [#allocation3], 4294966784 }
  0x41   : > { %1196 = dma.done.wait (%p1589_p7), [#allocation5], 16  }
  0x42   : > { %1198 = vsyncadd (%p1589_p7), [#allocation5], 4294967280  ;;  %s190_s20 = smul.u32 48, %s890_s13  ;;  %vm406_vm0 = vcmask 1040384   ;;  %vm261_vm1 = vcmask 203776   ;;  %v250_v0 = vld [vmem:[#allocation2] sm:$0xff] }
  0x43   : > { %v251_v1 = vld [vmem:[#allocation2 + $0x8] sm:$0xff]  ;;  %v252_v2 = vld [vmem:[#allocation2 + $0x10] sm:$0xff]  ;;  %v253_v4 = vld [vmem:[#allocation2 + $0x18] sm:$0x1]  ;;  %vm1207_vm2 = vmmov 1   ;;  %vm763_vm4 = vcmask 261120  }
  0x44   : > { %p191_p2 = scmp.lt.s32.totalorder %s190_s20, 143  ;;  %v1085_v3 = vpack.c.bf16 %v251_v1, %v250_v0  ;;  %v1089_v7 = vpack.c.bf16 %v253_v4, %v252_v2  ;;  %vm1090_vm3 = vmpackc.low %vm406_vm0, %vm1207_vm2  ;;  %v1422_v54 = vld [vmem:[#allocation4] ss:$0 sm:$0xff] }
  0x46   : > { %s1591_s20 = smov (!%p191_p2, %s190_s20), 143  ;;  %1086 = vmatprep.subr.bf16.mxu0 %v1085_v3  ;;  %1095 = vmatprep.subr.bf16.mxu1 %v1085_v3 }
  0x47   : > { %s899_s16 = sshll.u32 %s1591_s20, 3  ;;  %1088 = vmatpush3.bf16.msra.mxu0 %v1085_v3  ;;  %1097 = vmatpush3.bf16.msra.mxu1 %v1085_v3 }
  0x48   : > { %s1324_s17 = scalar_lea.vmem %s1578_s0, %s899_s16  ;;  %1091 = vmatprep.subr.msk.bf16.mxu0 %vm1090_vm3, %v1089_v7  ;;  %1096 = vmatprep.subr.msk.bf16.mxu1 %vm1090_vm3, %v1089_v7  ;;  %s1431_s25 = scalar_lea.vmem %s1581_s3, %s899_s16 }
  0x49   : > { %v202_v5 = vld [vmem:[%s1324_s17] sm:$0xff]  ;;  %v203_v8 = vld [vmem:[%s1324_s17 + $0x8] sm:$0xff]  ;;  %v204_v10 = vld [vmem:[%s1324_s17 + $0x10] sm:$0xff] }
  0x4a   : > { %v226_v6 = vld [vmem:[%s1324_s17 + $0xc0] sm:$0xff]  ;;  %1013 = vmatprep.mubr.msk.f32.mxu0 %vm261_vm1, %v202_v5  ;;  %v227_v9 = vld [vmem:[%s1324_s17 + $0xc8] sm:$0xff]  ;;  %v228_v11 = vld [vmem:[%s1324_s17 + $0xd0] sm:$0xff] }
  0x4b   : > { %1049 = vmatprep.mubr.msk.f32.mxu1 %vm261_vm1, %v226_v6  ;;  %1094 = vmatpush3.bf16.msk.msra.mxu0 %vm1090_vm3, %v1089_v7  ;;  %v205_v12 = vld [vmem:[%s1324_s17 + $0x18] sm:$0xff]  ;;  %v206_v14 = vld [vmem:[%s1324_s17 + $0x20] sm:$0xff]  ;;  %v207_v16 = vld [vmem:[%s1324_s17 + $0x28] sm:$0xff] }
  0x4c   : > { %1098 = vmatpush3.bf16.msk.msra.mxu1 %vm1090_vm3, %v1089_v7  ;;  %v229_v13 = vld [vmem:[%s1324_s17 + $0xd8] sm:$0xff]  ;;  %v230_v15 = vld [vmem:[%s1324_s17 + $0xe0] sm:$0xff]  ;;  %v231_v17 = vld [vmem:[%s1324_s17 + $0xe8] sm:$0xff] }
  0x4d   : > { %v208_v18 = vld [vmem:[%s1324_s17 + $0x30] sm:$0xff]  ;;  %v209_v20 = vld [vmem:[%s1324_s17 + $0x38] sm:$0xff]  ;;  %v210_v22 = vld [vmem:[%s1324_s17 + $0x40] sm:$0xff] }
  0x4e   : > { %1014 = vmatmul.mubr.msk.f32.vlgmr.msra.gmra.mrb[0].mxu0 %vm261_vm1, %v203_v8  ;;  %v232_v19 = vld [vmem:[%s1324_s17 + $0xf0] sm:$0xff]  ;;  %v233_v21 = vld [vmem:[%s1324_s17 + $0xf8] sm:$0xff]  ;;  %v234_v23 = vld [vmem:[%s1324_s17 + $0x100] sm:$0xff] }
  0x4f   : > { %1050 = vmatmul.mubr.msk.f32.vlgmr.msra.gmra.mrb[0].mxu1 %vm261_vm1, %v227_v9  ;;  %1016 = vmatprep.mubr.msk.f32.mxu0 %vm261_vm1, %v204_v10  ;;  %v211_v24 = vld [vmem:[%s1324_s17 + $0x48] sm:$0xff]  ;;  %v212_v26 = vld [vmem:[%s1324_s17 + $0x50] sm:$0xff]  ;;  %v213_v28 = vld [vmem:[%s1324_s17 + $0x58] sm:$0xff] }
  0x50   : > { %1052 = vmatprep.mubr.msk.f32.mxu1 %vm261_vm1, %v228_v11  ;;  %v235_v25 = vld [vmem:[%s1324_s17 + $0x108] sm:$0xff]  ;;  %v236_v27 = vld [vmem:[%s1324_s17 + $0x110] sm:$0xff]  ;;  %v237_v29 = vld [vmem:[%s1324_s17 + $0x118] sm:$0xff] }
  0x51   : > { %v214_v30 = vld [vmem:[%s1324_s17 + $0x60] sm:$0xff]  ;;  %v215_v32 = vld [vmem:[%s1324_s17 + $0x68] sm:$0xff]  ;;  %v216_v34 = vld [vmem:[%s1324_s17 + $0x70] sm:$0xff] }
  0x52   : > { %1017 = vmatmul.mubr.msk.f32.gmra.mrb[2].mxu0 %vm261_vm1, %v205_v12  ;;  %v238_v31 = vld [vmem:[%s1324_s17 + $0x120] sm:$0xff]  ;;  %v239_v33 = vld [vmem:[%s1324_s17 + $0x128] sm:$0xff]  ;;  %v240_v35 = vld [vmem:[%s1324_s17 + $0x130] sm:$0xff] }
  0x53   : > { %1053 = vmatmul.mubr.msk.f32.gmra.mrb[2].mxu1 %vm261_vm1, %v229_v13  ;;  %1019 = vmatprep.mubr.msk.f32.mxu0 %vm261_vm1, %v206_v14  ;;  %v217_v36 = vld [vmem:[%s1324_s17 + $0x78] sm:$0xff]  ;;  %v218_v38 = vld [vmem:[%s1324_s17 + $0x80] sm:$0xff]  ;;  %v219_v40 = vld [vmem:[%s1324_s17 + $0x88] sm:$0xff] }
  0x54   : > { %1055 = vmatprep.mubr.msk.f32.mxu1 %vm261_vm1, %v230_v15  ;;  %v241_v37 = vld [vmem:[%s1324_s17 + $0x138] sm:$0xff]  ;;  %v242_v39 = vld [vmem:[%s1324_s17 + $0x140] sm:$0xff]  ;;  %v243_v41 = vld [vmem:[%s1324_s17 + $0x148] sm:$0xff] }
  0x55   : > { %v220_v42 = vld [vmem:[%s1324_s17 + $0x90] sm:$0xff]  ;;  %v221_v44 = vld [vmem:[%s1324_s17 + $0x98] sm:$0xff]  ;;  %v222_v46 = vld [vmem:[%s1324_s17 + $0xa0] sm:$0xff] }
  0x56   : > { %1020 = vmatmul.mubr.msk.f32.gmra.mrb[4].mxu0 %vm261_vm1, %v207_v16  ;;  %v244_v43 = vld [vmem:[%s1324_s17 + $0x150] sm:$0xff]  ;;  %v245_v45 = vld [vmem:[%s1324_s17 + $0x158] sm:$0xff]  ;;  %v246_v47 = vld [vmem:[%s1324_s17 + $0x160] sm:$0xff] }
  0x57   : > { %1056 = vmatmul.mubr.msk.f32.gmra.mrb[4].mxu1 %vm261_vm1, %v231_v17  ;;  %1022 = vmatprep.mubr.msk.f32.mxu0 %vm261_vm1, %v208_v18  ;;  %v223_v48 = vld [vmem:[%s1324_s17 + $0xa8] sm:$0xff]  ;;  %v224_v50 = vld [vmem:[%s1324_s17 + $0xb0] sm:$0xff]  ;;  %v225_v52 = vld [vmem:[%s1324_s17 + $0xb8] sm:$0xff] }
  0x58   : > { %1058 = vmatprep.mubr.msk.f32.mxu1 %vm261_vm1, %v232_v19  ;;  %v247_v49 = vld [vmem:[%s1324_s17 + $0x168] sm:$0xff]  ;;  %v248_v51 = vld [vmem:[%s1324_s17 + $0x170] sm:$0xff]  ;;  %v249_v53 = vld [vmem:[%s1324_s17 + $0x178] sm:$0xff] }
  0x5a   : > { %1023 = vmatmul.mubr.msk.f32.gmra.mrb[6].mxu0 %vm261_vm1, %v209_v20 }
  0x5b   : > { %1059 = vmatmul.mubr.msk.f32.gmra.mrb[6].mxu1 %vm261_vm1, %v233_v21  ;;  %1025 = vmatprep.mubr.msk.f32.mxu0 %vm261_vm1, %v210_v22 }
  0x5c   : > { %1061 = vmatprep.mubr.msk.f32.mxu1 %vm261_vm1, %v234_v23 }
  0x5e   : > { %1026 = vmatmul.mubr.msk.f32.gmra.mrb[8].mxu0 %vm261_vm1, %v211_v24 }
  0x5f   : > { %1062 = vmatmul.mubr.msk.f32.gmra.mrb[8].mxu1 %vm261_vm1, %v235_v25  ;;  %1028 = vmatprep.mubr.msk.f32.mxu0 %vm261_vm1, %v212_v26 }
  0x60   : > { %1064 = vmatprep.mubr.msk.f32.mxu1 %vm261_vm1, %v236_v27 }
  0x62   : > { %1029 = vmatmul.mubr.msk.f32.gmra.mrb[10].mxu0 %vm261_vm1, %v213_v28 }
  0x63   : > { %1065 = vmatmul.mubr.msk.f32.gmra.mrb[10].mxu1 %vm261_vm1, %v237_v29  ;;  %1031 = vmatprep.mubr.msk.f32.mxu0 %vm261_vm1, %v214_v30 }
  0x64   : > { %1067 = vmatprep.mubr.msk.f32.mxu1 %vm261_vm1, %v238_v31 }
  0x66   : > { %1032 = vmatmul.mubr.msk.f32.gmra.mrb[12].mxu0 %vm261_vm1, %v215_v32 }
  0x67   : > { %1068 = vmatmul.mubr.msk.f32.gmra.mrb[12].mxu1 %vm261_vm1, %v239_v33  ;;  %1034 = vmatprep.mubr.msk.f32.mxu0 %vm261_vm1, %v216_v34 }
  0x68   : > { %1070 = vmatprep.mubr.msk.f32.mxu1 %vm261_vm1, %v240_v35 }
  0x6a   : > { %1035 = vmatmul.mubr.msk.f32.gmra.mrb[14].mxu0 %vm261_vm1, %v217_v36 }
  0x6b   : > { %1071 = vmatmul.mubr.msk.f32.gmra.mrb[14].mxu1 %vm261_vm1, %v241_v37  ;;  %1037 = vmatprep.mubr.msk.f32.mxu0 %vm261_vm1, %v218_v38 }
  0x6c   : > { %1073 = vmatprep.mubr.msk.f32.mxu1 %vm261_vm1, %v242_v39 }
  0x6e   : > { %1038 = vmatmul.mubr.msk.f32.gmra.mrb[16].mxu0 %vm261_vm1, %v219_v40 }
  0x6f   : > { %1074 = vmatmul.mubr.msk.f32.gmra.mrb[16].mxu1 %vm261_vm1, %v243_v41  ;;  %1040 = vmatprep.mubr.msk.f32.mxu0 %vm261_vm1, %v220_v42 }
  0x70   : > { %1076 = vmatprep.mubr.msk.f32.mxu1 %vm261_vm1, %v244_v43 }
  0x72   : > { %1041 = vmatmul.mubr.msk.f32.gmra.mrb[18].mxu0 %vm261_vm1, %v221_v44 }
  0x73   : > { %1077 = vmatmul.mubr.msk.f32.gmra.mrb[18].mxu1 %vm261_vm1, %v245_v45  ;;  %1043 = vmatprep.mubr.msk.f32.mxu0 %vm261_vm1, %v222_v46 }
  0x74   : > { %1079 = vmatprep.mubr.msk.f32.mxu1 %vm261_vm1, %v246_v47 }
  0x76   : > { %1044 = vmatmul.mubr.msk.f32.gmra.mrb[20].mxu0 %vm261_vm1, %v223_v48 }
  0x77   : > { %1080 = vmatmul.mubr.msk.f32.gmra.mrb[20].mxu1 %vm261_vm1, %v247_v49  ;;  %1046 = vmatprep.mubr.msk.f32.mxu0 %vm261_vm1, %v224_v50 }
  0x78   : > { %1082 = vmatprep.mubr.msk.f32.mxu1 %vm261_vm1, %v248_v51 }
  0x7a   : > { %1047 = vmatmul.mubr.msk.f32.gmra.mrb[22].mxu0 %vm261_vm1, %v225_v52 }
  0x7b   : > { %1083 = vmatmul.mubr.msk.f32.gmra.mrb[22].mxu1 %vm261_vm1, %v249_v53 }
 0x121   : > { %v1015_v55 = vpop.f32.mrb[0].mxu0 }
 0x122   : > { %v1051_v56 = vpop.f32.mrb[0].mxu1  ;;  %v482_v57 = vadd.f32 %v1015_v55, %v1422_v54  ;;  %v476_v59 = vpop.f32.mrb[1].mxu0 }
 0x123   : > { %v602_v58 = vadd.f32 %v1051_v56, %v1422_v54  ;;  %v596_v60 = vpop.f32.mrb[1].mxu1  ;;  %v477_v61 = vadd.f32 %v1422_v54, %v476_v59 }
 0x124   : > { %v597_v62 = vadd.f32 %v1422_v54, %v596_v60  ;;  %v716_v63 = vmax.f32 %v482_v57, 0.0 }
 0x125   : > { %v740_v0 = vmax.f32 %v602_v58, 0.0  ;;  %v715_v1 = vmax.f32 %v477_v61, 0.0  ;;  %v1018_v3 = vpop.f32.mrb[2].mxu0 }
 0x126   : > { %v739_v2 = vmax.f32 %v597_v62, 0.0  ;;  %v1054_v4 = vpop.f32.mrb[2].mxu1  ;;  %765 = vst.msk [vmem:[%s1431_s25 + $0x8] sm:$0xff] %vm763_vm4, %v716_v63  ;;  %v492_v5 = vadd.f32 %v1018_v3, %v1422_v54  ;;  %v486_v7 = vpop.f32.mrb[3].mxu0 }
 0x127   : > { %789 = vst.msk [vmem:[%s1431_s25 + $0xc8] sm:$0xff] %vm763_vm4, %v740_v0  ;;  %v612_v6 = vadd.f32 %v1054_v4, %v1422_v54  ;;  %v606_v8 = vpop.f32.mrb[3].mxu1  ;;  %764 = vst.msk [vmem:[%s1431_s25] sm:$0xff] %vm763_vm4, %v715_v1  ;;  %v487_v9 = vadd.f32 %v1422_v54, %v486_v7 }
 0x128   : > { %788 = vst.msk [vmem:[%s1431_s25 + $0xc0] sm:$0xff] %vm763_vm4, %v739_v2  ;;  %v607_v10 = vadd.f32 %v1422_v54, %v606_v8  ;;  %v718_v11 = vmax.f32 %v492_v5, 0.0 }
 0x129   : > { %v742_v12 = vmax.f32 %v612_v6, 0.0  ;;  %v717_v13 = vmax.f32 %v487_v9, 0.0  ;;  %v1021_v15 = vpop.f32.mrb[4].mxu0 }
 0x12a   : > { %v741_v14 = vmax.f32 %v607_v10, 0.0  ;;  %v1057_v16 = vpop.f32.mrb[4].mxu1  ;;  %767 = vst.msk [vmem:[%s1431_s25 + $0x18] sm:$0xff] %vm763_vm4, %v718_v11  ;;  %v502_v17 = vadd.f32 %v1021_v15, %v1422_v54  ;;  %v496_v19 = vpop.f32.mrb[5].mxu0 }
 0x12b   : > { %791 = vst.msk [vmem:[%s1431_s25 + $0xd8] sm:$0xff] %vm763_vm4, %v742_v12  ;;  %v622_v18 = vadd.f32 %v1057_v16, %v1422_v54  ;;  %v616_v20 = vpop.f32.mrb[5].mxu1  ;;  %766 = vst.msk [vmem:[%s1431_s25 + $0x10] sm:$0xff] %vm763_vm4, %v717_v13  ;;  %v497_v21 = vadd.f32 %v1422_v54, %v496_v19 }
 0x12c   : > { %790 = vst.msk [vmem:[%s1431_s25 + $0xd0] sm:$0xff] %vm763_vm4, %v741_v14  ;;  %v617_v22 = vadd.f32 %v1422_v54, %v616_v20  ;;  %v720_v23 = vmax.f32 %v502_v17, 0.0 }
 0x12d   : > { %v744_v24 = vmax.f32 %v622_v18, 0.0  ;;  %v719_v25 = vmax.f32 %v497_v21, 0.0  ;;  %v1024_v27 = vpop.f32.mrb[6].mxu0 }
 0x12e   : > { %v743_v26 = vmax.f32 %v617_v22, 0.0  ;;  %v1060_v28 = vpop.f32.mrb[6].mxu1  ;;  %769 = vst.msk [vmem:[%s1431_s25 + $0x28] sm:$0xff] %vm763_vm4, %v720_v23  ;;  %v512_v29 = vadd.f32 %v1024_v27, %v1422_v54  ;;  %v506_v31 = vpop.f32.mrb[7].mxu0 }
 0x12f   : > { %793 = vst.msk [vmem:[%s1431_s25 + $0xe8] sm:$0xff] %vm763_vm4, %v744_v24  ;;  %v632_v30 = vadd.f32 %v1060_v28, %v1422_v54  ;;  %v626_v32 = vpop.f32.mrb[7].mxu1  ;;  %768 = vst.msk [vmem:[%s1431_s25 + $0x20] sm:$0xff] %vm763_vm4, %v719_v25  ;;  %v507_v33 = vadd.f32 %v1422_v54, %v506_v31 }
 0x130   : > { %792 = vst.msk [vmem:[%s1431_s25 + $0xe0] sm:$0xff] %vm763_vm4, %v743_v26  ;;  %v627_v34 = vadd.f32 %v1422_v54, %v626_v32  ;;  %v722_v35 = vmax.f32 %v512_v29, 0.0 }
 0x131   : > { %v746_v36 = vmax.f32 %v632_v30, 0.0  ;;  %v721_v37 = vmax.f32 %v507_v33, 0.0  ;;  %v1027_v39 = vpop.f32.mrb[8].mxu0 }
 0x132   : > { %v745_v38 = vmax.f32 %v627_v34, 0.0  ;;  %v1063_v40 = vpop.f32.mrb[8].mxu1  ;;  %771 = vst.msk [vmem:[%s1431_s25 + $0x38] sm:$0xff] %vm763_vm4, %v722_v35  ;;  %v522_v41 = vadd.f32 %v1027_v39, %v1422_v54  ;;  %v516_v43 = vpop.f32.mrb[9].mxu0 }
 0x133   : > { %795 = vst.msk [vmem:[%s1431_s25 + $0xf8] sm:$0xff] %vm763_vm4, %v746_v36  ;;  %v642_v42 = vadd.f32 %v1063_v40, %v1422_v54  ;;  %v636_v44 = vpop.f32.mrb[9].mxu1  ;;  %770 = vst.msk [vmem:[%s1431_s25 + $0x30] sm:$0xff] %vm763_vm4, %v721_v37  ;;  %v517_v45 = vadd.f32 %v1422_v54, %v516_v43 }
 0x134   : > { %794 = vst.msk [vmem:[%s1431_s25 + $0xf0] sm:$0xff] %vm763_vm4, %v745_v38  ;;  %v637_v46 = vadd.f32 %v1422_v54, %v636_v44  ;;  %v724_v47 = vmax.f32 %v522_v41, 0.0 }
 0x135   : > { %v748_v48 = vmax.f32 %v642_v42, 0.0  ;;  %v723_v49 = vmax.f32 %v517_v45, 0.0  ;;  %v1030_v51 = vpop.f32.mrb[10].mxu0 }
 0x136   : > { %v747_v50 = vmax.f32 %v637_v46, 0.0  ;;  %v1066_v52 = vpop.f32.mrb[10].mxu1  ;;  %773 = vst.msk [vmem:[%s1431_s25 + $0x48] sm:$0xff] %vm763_vm4, %v724_v47  ;;  %v532_v53 = vadd.f32 %v1030_v51, %v1422_v54  ;;  %v526_v56 = vpop.f32.mrb[11].mxu0 }
 0x137   : > { %797 = vst.msk [vmem:[%s1431_s25 + $0x108] sm:$0xff] %vm763_vm4, %v748_v48  ;;  %v652_v55 = vadd.f32 %v1066_v52, %v1422_v54  ;;  %v646_v57 = vpop.f32.mrb[11].mxu1  ;;  %772 = vst.msk [vmem:[%s1431_s25 + $0x40] sm:$0xff] %vm763_vm4, %v723_v49  ;;  %v527_v58 = vadd.f32 %v1422_v54, %v526_v56 }
 0x138   : > { %796 = vst.msk [vmem:[%s1431_s25 + $0x100] sm:$0xff] %vm763_vm4, %v747_v50  ;;  %v647_v59 = vadd.f32 %v1422_v54, %v646_v57  ;;  %v726_v60 = vmax.f32 %v532_v53, 0.0 }
 0x139   : > { %v750_v61 = vmax.f32 %v652_v55, 0.0  ;;  %v725_v62 = vmax.f32 %v527_v58, 0.0  ;;  %v1033_v0 = vpop.f32.mrb[12].mxu0 }
 0x13a   : > { %v749_v63 = vmax.f32 %v647_v59, 0.0  ;;  %v1069_v1 = vpop.f32.mrb[12].mxu1  ;;  %775 = vst.msk [vmem:[%s1431_s25 + $0x58] sm:$0xff] %vm763_vm4, %v726_v60  ;;  %v542_v2 = vadd.f32 %v1033_v0, %v1422_v54  ;;  %v536_v4 = vpop.f32.mrb[13].mxu0 }
 0x13b   : > { %799 = vst.msk [vmem:[%s1431_s25 + $0x118] sm:$0xff] %vm763_vm4, %v750_v61  ;;  %v662_v3 = vadd.f32 %v1069_v1, %v1422_v54  ;;  %v656_v5 = vpop.f32.mrb[13].mxu1  ;;  %774 = vst.msk [vmem:[%s1431_s25 + $0x50] sm:$0xff] %vm763_vm4, %v725_v62  ;;  %v537_v6 = vadd.f32 %v1422_v54, %v536_v4 }
 0x13c   : > { %798 = vst.msk [vmem:[%s1431_s25 + $0x110] sm:$0xff] %vm763_vm4, %v749_v63  ;;  %v657_v7 = vadd.f32 %v1422_v54, %v656_v5  ;;  %v728_v8 = vmax.f32 %v542_v2, 0.0 }
 0x13d   : > { %v752_v9 = vmax.f32 %v662_v3, 0.0  ;;  %v727_v10 = vmax.f32 %v537_v6, 0.0  ;;  %v1036_v12 = vpop.f32.mrb[14].mxu0 }
 0x13e   : > { %v751_v11 = vmax.f32 %v657_v7, 0.0  ;;  %v1072_v13 = vpop.f32.mrb[14].mxu1  ;;  %777 = vst.msk [vmem:[%s1431_s25 + $0x68] sm:$0xff] %vm763_vm4, %v728_v8  ;;  %v552_v14 = vadd.f32 %v1036_v12, %v1422_v54  ;;  %v546_v16 = vpop.f32.mrb[15].mxu0 }
 0x13f   : > { %801 = vst.msk [vmem:[%s1431_s25 + $0x128] sm:$0xff] %vm763_vm4, %v752_v9  ;;  %v672_v15 = vadd.f32 %v1072_v13, %v1422_v54  ;;  %v666_v17 = vpop.f32.mrb[15].mxu1  ;;  %776 = vst.msk [vmem:[%s1431_s25 + $0x60] sm:$0xff] %vm763_vm4, %v727_v10  ;;  %v547_v18 = vadd.f32 %v1422_v54, %v546_v16 }
 0x140   : > { %800 = vst.msk [vmem:[%s1431_s25 + $0x120] sm:$0xff] %vm763_vm4, %v751_v11  ;;  %v667_v19 = vadd.f32 %v1422_v54, %v666_v17  ;;  %v730_v20 = vmax.f32 %v552_v14, 0.0 }
 0x141   : > { %v754_v21 = vmax.f32 %v672_v15, 0.0  ;;  %v729_v22 = vmax.f32 %v547_v18, 0.0  ;;  %v1039_v24 = vpop.f32.mrb[16].mxu0 }
 0x142   : > { %v753_v23 = vmax.f32 %v667_v19, 0.0  ;;  %v1075_v25 = vpop.f32.mrb[16].mxu1  ;;  %779 = vst.msk [vmem:[%s1431_s25 + $0x78] sm:$0xff] %vm763_vm4, %v730_v20  ;;  %v562_v26 = vadd.f32 %v1039_v24, %v1422_v54  ;;  %v556_v28 = vpop.f32.mrb[17].mxu0 }
 0x143   : > { %803 = vst.msk [vmem:[%s1431_s25 + $0x138] sm:$0xff] %vm763_vm4, %v754_v21  ;;  %v682_v27 = vadd.f32 %v1075_v25, %v1422_v54  ;;  %v676_v29 = vpop.f32.mrb[17].mxu1  ;;  %778 = vst.msk [vmem:[%s1431_s25 + $0x70] sm:$0xff] %vm763_vm4, %v729_v22  ;;  %v557_v30 = vadd.f32 %v1422_v54, %v556_v28 }
 0x144   : > { %802 = vst.msk [vmem:[%s1431_s25 + $0x130] sm:$0xff] %vm763_vm4, %v753_v23  ;;  %v677_v31 = vadd.f32 %v1422_v54, %v676_v29  ;;  %v732_v32 = vmax.f32 %v562_v26, 0.0 }
 0x145   : > { %v756_v33 = vmax.f32 %v682_v27, 0.0  ;;  %v731_v34 = vmax.f32 %v557_v30, 0.0  ;;  %v1042_v36 = vpop.f32.mrb[18].mxu0 }
 0x146   : > { %v755_v35 = vmax.f32 %v677_v31, 0.0  ;;  %v1078_v37 = vpop.f32.mrb[18].mxu1  ;;  %781 = vst.msk [vmem:[%s1431_s25 + $0x88] sm:$0xff] %vm763_vm4, %v732_v32  ;;  %v572_v38 = vadd.f32 %v1042_v36, %v1422_v54  ;;  %v566_v40 = vpop.f32.mrb[19].mxu0 }
 0x147   : > { %805 = vst.msk [vmem:[%s1431_s25 + $0x148] sm:$0xff] %vm763_vm4, %v756_v33  ;;  %v692_v39 = vadd.f32 %v1078_v37, %v1422_v54  ;;  %v686_v41 = vpop.f32.mrb[19].mxu1  ;;  %780 = vst.msk [vmem:[%s1431_s25 + $0x80] sm:$0xff] %vm763_vm4, %v731_v34  ;;  %v567_v42 = vadd.f32 %v1422_v54, %v566_v40 }
 0x148   : > { %804 = vst.msk [vmem:[%s1431_s25 + $0x140] sm:$0xff] %vm763_vm4, %v755_v35  ;;  %v687_v43 = vadd.f32 %v1422_v54, %v686_v41  ;;  %v734_v44 = vmax.f32 %v572_v38, 0.0 }
 0x149   : > { %v758_v45 = vmax.f32 %v692_v39, 0.0  ;;  %v733_v46 = vmax.f32 %v567_v42, 0.0  ;;  %v1045_v48 = vpop.f32.mrb[20].mxu0 }
 0x14a   : > { %v757_v47 = vmax.f32 %v687_v43, 0.0  ;;  %v1081_v49 = vpop.f32.mrb[20].mxu1  ;;  %783 = vst.msk [vmem:[%s1431_s25 + $0x98] sm:$0xff] %vm763_vm4, %v734_v44  ;;  %v582_v50 = vadd.f32 %v1045_v48, %v1422_v54  ;;  %v576_v52 = vpop.f32.mrb[21].mxu0 }
 0x14b   : > { %807 = vst.msk [vmem:[%s1431_s25 + $0x158] sm:$0xff] %vm763_vm4, %v758_v45  ;;  %v702_v51 = vadd.f32 %v1081_v49, %v1422_v54  ;;  %v696_v53 = vpop.f32.mrb[21].mxu1  ;;  %782 = vst.msk [vmem:[%s1431_s25 + $0x90] sm:$0xff] %vm763_vm4, %v733_v46  ;;  %v577_v55 = vadd.f32 %v1422_v54, %v576_v52 }
 0x14c   : > { %806 = vst.msk [vmem:[%s1431_s25 + $0x150] sm:$0xff] %vm763_vm4, %v757_v47  ;;  %v697_v56 = vadd.f32 %v1422_v54, %v696_v53  ;;  %v736_v57 = vmax.f32 %v582_v50, 0.0 }
 0x14d   : > { %v760_v58 = vmax.f32 %v702_v51, 0.0  ;;  %v735_v59 = vmax.f32 %v577_v55, 0.0  ;;  %v1048_v61 = vpop.f32.mrb[22].mxu0 }
 0x14e   : > { %v759_v60 = vmax.f32 %v697_v56, 0.0  ;;  %v1084_v62 = vpop.f32.mrb[22].mxu1  ;;  %785 = vst.msk [vmem:[%s1431_s25 + $0xa8] sm:$0xff] %vm763_vm4, %v736_v57  ;;  %v592_v63 = vadd.f32 %v1048_v61, %v1422_v54  ;;  %v586_v1 = vpop.f32.mrb[23].mxu0 }
 0x14f   : > { %809 = vst.msk [vmem:[%s1431_s25 + $0x168] sm:$0xff] %vm763_vm4, %v760_v58  ;;  %v712_v0 = vadd.f32 %v1084_v62, %v1422_v54  ;;  %v706_v2 = vpop.f32.mrb[23].mxu1  ;;  %784 = vst.msk [vmem:[%s1431_s25 + $0xa0] sm:$0xff] %vm763_vm4, %v735_v59  ;;  %v587_v3 = vadd.f32 %v1422_v54, %v586_v1 }
 0x150   : > { %808 = vst.msk [vmem:[%s1431_s25 + $0x160] sm:$0xff] %vm763_vm4, %v759_v60  ;;  %v707_v4 = vadd.f32 %v1422_v54, %v706_v2  ;;  %v738_v5 = vmax.f32 %v592_v63, 0.0 }
 0x151   : > { %v762_v6 = vmax.f32 %v712_v0, 0.0  ;;  %v737_v7 = vmax.f32 %v587_v3, 0.0 }
 0x152   : > { %v761_v8 = vmax.f32 %v707_v4, 0.0  ;;  %787 = vst.msk [vmem:[%s1431_s25 + $0xb8] sm:$0xff] %vm763_vm4, %v738_v5 }
 0x153   : > { %811 = vst.msk [vmem:[%s1431_s25 + $0x178] sm:$0xff] %vm763_vm4, %v762_v6  ;;  %786 = vst.msk [vmem:[%s1431_s25 + $0xb0] sm:$0xff] %vm763_vm4, %v737_v7 }
 0x154   : > { %810 = vst.msk [vmem:[%s1431_s25 + $0x170] sm:$0xff] %vm763_vm4, %v761_v8 }
 0x155 PF: > { %s15_s12 = sadd.s32 1, %s1201_s12  }
 0x156   : > { %p12_p5 = scmp.ge.s32.totalorder %s15_s12, 5  }
 0x158   :  { %14 = sbr.rel (!%p12_p5) target bundleno = 2 (0x2), region = 71 }
 0x15f   :  { %834 = vsyncpa [#allocation3], 1 }
 0x160   :  { %836 = vsyncpa [#allocation3 + $0x1], 1 }
 0x161   :  { %837 = vsyncpa [#allocation5], 1 }

// kernel: classifier_forward.5
= control target key start
LH: loop header
LB: loop body
LE: loop exit
PB: predicated region body
PF: predicated region fallthrough
CT: control target
= control target key end

     0   :  { %s1891_s12 = smov 0   ;;  %s2596_s0 = inlined_call_operand.vmem [shape: f32[800,800], index: 0, kind: input, shape index: {}]   ;;  %s2597_s1 = inlined_call_operand.vmem [shape: f32[800,32], index: 1, kind: input, shape index: {}]   ;;  %s2598_s2 = inlined_call_operand.vmem [shape: f32[1,32], index: 2, kind: input, shape index: {}]   ;;  %s2599_s3 = inlined_call_operand.vmem [shape: f32[800,32], index: 3, kind: output, shape index: {}]  }
   0x1 LB: > { %s1401_s13 = sadd.s32 4294967295, %s1866_s12   ;;  %p1405_p0 = scmp.ge.s32.totalorder %s1866_s12, 1  ;;  %s1866_s12 = sphi %s1891_s12, %s13_s12  }
   0x2   : > { %p139_p1 = scmp.lt.s32.totalorder %s1866_s12, 5 }
   0x4   : > { %p140_p2 = pnand %p1405_p0, %p139_p1 }
   0x5   : > { %v352_v0 = vld [vmem:[%s2597_s1] sm:$0xff] (!%p140_p2)  ;;  %v353_v1 = vld [vmem:[%s2597_s1 + $0x8] sm:$0xff] (!%p140_p2)  ;;  %v1868_v3 = vmov (!%p140_p2), 0.0|0.0   ;;  %v354_v6 = vld [vmem:[%s2597_s1 + $0x10] sm:$0xff] (!%p140_p2)  ;;  %s164_s30 = smul.u32 (!%p140_p2), 25, %s1401_s13  ;;  %vm1869_vm0 = vmmov (!%p140_p2), 0  }
   0x6   : > { %143 = sbr.rel (%p140_p2) target bundleno = 486 (0x1e6), region = 32  ;;  %v416_v2 = vld [vmem:[%s2597_s1 + $0x200] sm:$0xff] (!%p140_p2)  ;;  %1548 = vmatprep.subr.bf16.mxu1 (!%p140_p2), %v1868_v3  ;;  %1644 = vmatprep.subr.bf16.mxu0 (!%p140_p2), %v1868_v3  ;;  %v1549_v4 = vpack.c.bf16 (!%p140_p2), %v353_v1, %v352_v0  ;;  %v417_v5 = vld [vmem:[%s2597_s1 + $0x208] sm:$0xff] (!%p140_p2)  ;;  %v355_v7 = vld [vmem:[%s2597_s1 + $0x18] sm:$0xff] (!%p140_p2)  ;;  %vm459_vm1 = vcmask (!%p140_p2), 261120  }
   0x7   : > { %v1645_v8 = vpack.c.bf16 (!%p140_p2), %v417_v5, %v416_v2  ;;  %v418_v9 = vld [vmem:[%s2597_s1 + $0x210] sm:$0xff] (!%p140_p2)  ;;  %v419_v10 = vld [vmem:[%s2597_s1 + $0x218] sm:$0xff] (!%p140_p2)  ;;  %v1552_v11 = vpack.c.bf16 (!%p140_p2), %v355_v7, %v354_v6  ;;  %v356_v13 = vld [vmem:[%s2597_s1 + $0x20] sm:$0xff] (!%p140_p2)  ;;  %p165_p3 = scmp.lt.s32.totalorder (!%p140_p2), %s164_s30, 99 }
   0x8   : > { %1550 = vmatpush1.bf16.msra.mxu1 (!%p140_p2), %v1549_v4  ;;  %v1648_v12 = vpack.c.bf16 (!%p140_p2), %v419_v10, %v418_v9  ;;  %v357_v14 = vld [vmem:[%s2597_s1 + $0x28] sm:$0xff] (!%p140_p2)  ;;  %v420_v15 = vld [vmem:[%s2597_s1 + $0x220] sm:$0xff] (!%p140_p2)  ;;  %v358_v19 = vld [vmem:[%s2597_s1 + $0x30] sm:$0xff] (!%p140_p2) }
   0x9   : > { %1646 = vmatpush1.bf16.msra.mxu0 (!%p140_p2), %v1645_v8  ;;  %1551 = vmatprep.subr.bf16.mxu1 (!%p140_p2), %v1868_v3  ;;  %v421_v16 = vld [vmem:[%s2597_s1 + $0x228] sm:$0xff] (!%p140_p2)  ;;  %v1555_v17 = vpack.c.bf16 (!%p140_p2), %v357_v14, %v356_v13  ;;  %v359_v20 = vld [vmem:[%s2597_s1 + $0x38] sm:$0xff] (!%p140_p2)  ;;  %v422_v21 = vld [vmem:[%s2597_s1 + $0x230] sm:$0xff] (!%p140_p2) }
   0xa   : > { %1647 = vmatprep.subr.bf16.mxu0 (!%p140_p2), %v1868_v3  ;;  %v1651_v18 = vpack.c.bf16 (!%p140_p2), %v421_v16, %v420_v15  ;;  %v423_v22 = vld [vmem:[%s2597_s1 + $0x238] sm:$0xff] (!%p140_p2)  ;;  %v1558_v23 = vpack.c.bf16 (!%p140_p2), %v359_v20, %v358_v19  ;;  %v360_v25 = vld [vmem:[%s2597_s1 + $0x40] sm:$0xff] (!%p140_p2)  ;;  %v361_v26 = vld [vmem:[%s2597_s1 + $0x48] sm:$0xff] (!%p140_p2) }
   0xb   : > { %v1654_v24 = vpack.c.bf16 (!%p140_p2), %v423_v22, %v422_v21  ;;  %v424_v27 = vld [vmem:[%s2597_s1 + $0x240] sm:$0xff] (!%p140_p2)  ;;  %v425_v28 = vld [vmem:[%s2597_s1 + $0x248] sm:$0xff] (!%p140_p2)  ;;  %v1561_v29 = vpack.c.bf16 (!%p140_p2), %v361_v26, %v360_v25  ;;  %v362_v31 = vld [vmem:[%s2597_s1 + $0x50] sm:$0xff] (!%p140_p2) }
   0xc   : > { %1553 = vmatpush1.bf16.msra.mxu1 (!%p140_p2), %v1552_v11  ;;  %v1657_v30 = vpack.c.bf16 (!%p140_p2), %v425_v28, %v424_v27  ;;  %v363_v32 = vld [vmem:[%s2597_s1 + $0x58] sm:$0xff] (!%p140_p2)  ;;  %v426_v33 = vld [vmem:[%s2597_s1 + $0x250] sm:$0xff] (!%p140_p2)  ;;  %v364_v37 = vld [vmem:[%s2597_s1 + $0x60] sm:$0xff] (!%p140_p2) }
   0xd   : > { %1649 = vmatpush1.bf16.msra.mxu0 %v1648_v12  ;;  %1554 = vmatprep.subr.bf16.mxu1 %v1868_v3  ;;  %s2601_s30 = smov (!%p165_p3, %s164_s30), 99  ;;  %v427_v34 = vld [vmem:[%s2597_s1 + $0x258] sm:$0xff]  ;;  %v1564_v35 = vpack.c.bf16 %v363_v32, %v362_v31  ;;  %v365_v38 = vld [vmem:[%s2597_s1 + $0x68] sm:$0xff]  ;;  %v428_v39 = vld [vmem:[%s2597_s1 + $0x260] sm:$0xff] }
   0xe   : > { %1650 = vmatprep.subr.bf16.mxu0 %v1868_v3  ;;  %s1848_s29 = smul.u32 56, %s2601_s30  ;;  %v1660_v36 = vpack.c.bf16 %v427_v34, %v426_v33  ;;  %v429_v40 = vld [vmem:[%s2597_s1 + $0x268] sm:$0xff]  ;;  %v1567_v43 = vpack.c.bf16 %v365_v38, %v364_v37  ;;  %v366_v45 = vld [vmem:[%s2597_s1 + $0x70] sm:$0xff]  ;;  %v367_v46 = vld [vmem:[%s2597_s1 + $0x78] sm:$0xff]  ;;  %s1407_s26 = sshll.u32 %s2601_s30, 3 }
   0xf   : > { %v1663_v44 = vpack.c.bf16 %v429_v40, %v428_v39  ;;  %v430_v47 = vld [vmem:[%s2597_s1 + $0x270] sm:$0xff]  ;;  %v431_v48 = vld [vmem:[%s2597_s1 + $0x278] sm:$0xff]  ;;  %v1570_v49 = vpack.c.bf16 %v367_v46, %v366_v45  ;;  %v368_v51 = vld [vmem:[%s2597_s1 + $0x80] sm:$0xff] }
  0x10   : > { %1556 = vmatpush1.bf16.msra.mxu1 %v1555_v17  ;;  %s1987_s15 = scalar_lea.vmem %s2596_s0, %s1848_s29  ;;  %v1666_v50 = vpack.c.bf16 %v431_v48, %v430_v47  ;;  %v369_v52 = vld [vmem:[%s2597_s1 + $0x88] sm:$0xff]  ;;  %v432_v53 = vld [vmem:[%s2597_s1 + $0x280] sm:$0xff]  ;;  %v370_v57 = vld [vmem:[%s2597_s1 + $0x90] sm:$0xff] }
  0x11   : > { %1652 = vmatpush1.bf16.msra.mxu0 %v1651_v18  ;;  %1557 = vmatprep.subr.bf16.mxu1 %v1868_v3  ;;  %v178_v41 = vld [vmem:[%s1987_s15 + $0x8] sm:$0xff]  ;;  %v1573_v55 = vpack.c.bf16 %v369_v52, %v368_v51  ;;  %v371_v58 = vld [vmem:[%s2597_s1 + $0x98] sm:$0xff]  ;;  %v434_v59 = vld [vmem:[%s2597_s1 + $0x290] sm:$0xff] }
  0x12   : > { %1653 = vmatprep.subr.bf16.mxu0 %v1868_v3  ;;  %v182_v42 = vld [vmem:[%s1987_s15 + $0x28] sm:$0xff]  ;;  %599 = vmatprep.mubr.f32.mxu1 %v178_v41  ;;  %v435_v60 = vld [vmem:[%s2597_s1 + $0x298] sm:$0xff]  ;;  %v1576_v61 = vpack.c.bf16 %v371_v58, %v370_v57  ;;  %v372_v63 = vld [vmem:[%s2597_s1 + $0xa0] sm:$0xff] }
  0x13   : > { %979 = vmatprep.mubr.f32.mxu0 %v182_v42  ;;  %v433_v54 = vld [vmem:[%s2597_s1 + $0x288] sm:$0xff]  ;;  %v1672_v62 = vpack.c.bf16 %v435_v60, %v434_v59  ;;  %v436_v1 = vld [vmem:[%s2597_s1 + $0x2a0] sm:$0xff]  ;;  %v374_v6 = vld [vmem:[%s2597_s1 + $0xb0] sm:$0xff] }
  0x14   : > { %1559 = vmatpush1.bf16.msra.mxu1 %v1558_v23  ;;  %v1669_v56 = vpack.c.bf16 %v433_v54, %v432_v53  ;;  %v373_v0 = vld [vmem:[%s2597_s1 + $0xa8] sm:$0xff]  ;;  %v375_v7 = vld [vmem:[%s2597_s1 + $0xb8] sm:$0xff]  ;;  %v438_v8 = vld [vmem:[%s2597_s1 + $0x2b0] sm:$0xff] }
  0x15   : > { %1655 = vmatpush1.bf16.msra.mxu0 %v1654_v24  ;;  %1560 = vmatprep.subr.bf16.mxu1 %v1868_v3  ;;  %v437_v2 = vld [vmem:[%s2597_s1 + $0x2a8] sm:$0xff]  ;;  %v1579_v4 = vpack.c.bf16 %v373_v0, %v372_v63  ;;  %v439_v9 = vld [vmem:[%s2597_s1 + $0x2b8] sm:$0xff]  ;;  %v1582_v10 = vpack.c.bf16 %v375_v7, %v374_v6  ;;  %v376_v12 = vld [vmem:[%s2597_s1 + $0xc0] sm:$0xff] }
  0x16   : > { %1656 = vmatprep.subr.bf16.mxu0 %v1868_v3  ;;  %v1675_v5 = vpack.c.bf16 %v437_v2, %v436_v1  ;;  %v1678_v11 = vpack.c.bf16 %v439_v9, %v438_v8  ;;  %v377_v13 = vld [vmem:[%s2597_s1 + $0xc8] sm:$0xff]  ;;  %v440_v14 = vld [vmem:[%s2597_s1 + $0x2c0] sm:$0xff]  ;;  %v378_v18 = vld [vmem:[%s2597_s1 + $0xd0] sm:$0xff] }
  0x17   : > { %v441_v15 = vld [vmem:[%s2597_s1 + $0x2c8] sm:$0xff]  ;;  %v1585_v16 = vpack.c.bf16 %v377_v13, %v376_v12  ;;  %v379_v19 = vld [vmem:[%s2597_s1 + $0xd8] sm:$0xff]  ;;  %v442_v20 = vld [vmem:[%s2597_s1 + $0x2d0] sm:$0xff] }
  0x18   : > { %1562 = vmatpush1.bf16.msra.mxu1 %v1561_v29  ;;  %v1681_v17 = vpack.c.bf16 %v441_v15, %v440_v14  ;;  %v443_v21 = vld [vmem:[%s2597_s1 + $0x2d8] sm:$0xff]  ;;  %v1588_v22 = vpack.c.bf16 %v379_v19, %v378_v18  ;;  %v380_v24 = vld [vmem:[%s2597_s1 + $0xe0] sm:$0xff]  ;;  %v381_v25 = vld [vmem:[%s2597_s1 + $0xe8] sm:$0xff] }
  0x19   : > { %1658 = vmatpush1.bf16.msra.mxu0 %v1657_v30  ;;  %1563 = vmatprep.subr.bf16.mxu1 %v1868_v3  ;;  %v1684_v23 = vpack.c.bf16 %v443_v21, %v442_v20  ;;  %v444_v26 = vld [vmem:[%s2597_s1 + $0x2e0] sm:$0xff]  ;;  %v445_v27 = vld [vmem:[%s2597_s1 + $0x2e8] sm:$0xff]  ;;  %v1591_v28 = vpack.c.bf16 %v381_v25, %v380_v24  ;;  %v382_v30 = vld [vmem:[%s2597_s1 + $0xf0] sm:$0xff] }
  0x1a   : > { %1659 = vmatprep.subr.bf16.mxu0 %v1868_v3  ;;  %v1687_v29 = vpack.c.bf16 %v445_v27, %v444_v26  ;;  %v383_v31 = vld [vmem:[%s2597_s1 + $0xf8] sm:$0xff]  ;;  %v446_v32 = vld [vmem:[%s2597_s1 + $0x2f0] sm:$0xff]  ;;  %v385_v37 = vld [vmem:[%s2597_s1 + $0x108] sm:$0xff] }
  0x1b   : > { %v447_v33 = vld [vmem:[%s2597_s1 + $0x2f8] sm:$0xff]  ;;  %v1594_v34 = vpack.c.bf16 %v383_v31, %v382_v30  ;;  %v448_v38 = vld [vmem:[%s2597_s1 + $0x300] sm:$0xff]  ;;  %v449_v39 = vld [vmem:[%s2597_s1 + $0x308] sm:$0xff] }
  0x1c   : > { %1565 = vmatpush1.bf16.msra.mxu1 %v1564_v35  ;;  %v1690_v35 = vpack.c.bf16 %v447_v33, %v446_v32  ;;  %v177_v40 = vld [vmem:[%s1987_s15] sm:$0xff]  ;;  %v1693_v45 = vpack.c.bf16 %v449_v39, %v448_v38  ;;  %v386_v46 = vld [vmem:[%s2597_s1 + $0x110] sm:$0xff]  ;;  %v387_v47 = vld [vmem:[%s2597_s1 + $0x118] sm:$0xff] }
  0x1d   : > { %1661 = vmatpush1.bf16.msra.mxu0 %v1660_v36  ;;  %1566 = vmatprep.subr.bf16.mxu1 %v1868_v3  ;;  %v384_v36 = vld [vmem:[%s2597_s1 + $0x100] sm:$0xff]  ;;  %v450_v48 = vld [vmem:[%s2597_s1 + $0x310] sm:$0xff]  ;;  %v188_v51 = vld [vmem:[%s1987_s15 + $0x58] sm:$0xff]  ;;  %v1600_v53 = vpack.c.bf16 %v387_v47, %v386_v46 }
  0x1e   : > { %1662 = vmatprep.subr.bf16.mxu0 %v1868_v3  ;;  %v1597_v41 = vpack.c.bf16 %v385_v37, %v384_v36  ;;  %v181_v42 = vld [vmem:[%s1987_s15 + $0x20] sm:$0xff]  ;;  %v192_v52 = vld [vmem:[%s1987_s15 + $0x78] sm:$0xff]  ;;  %v191_v58 = vld [vmem:[%s1987_s15 + $0x70] sm:$0xff] }
  0x1f   : > { %v196_v54 = vld [vmem:[%s1987_s15 + $0x98] sm:$0xff]  ;;  %v195_v59 = vld [vmem:[%s1987_s15 + $0x90] sm:$0xff]  ;;  %v198_v1 = vld [vmem:[%s1987_s15 + $0xa8] sm:$0xff] }
  0x20   : > { %1568 = vmatpush1.bf16.msra.mxu1 %v1567_v43  ;;  %v185_v43 = vld [vmem:[%s1987_s15 + $0x40] sm:$0xff]  ;;  %v199_v60 = vld [vmem:[%s1987_s15 + $0xb0] sm:$0xff]  ;;  %v391_v0 = vld [vmem:[%s2597_s1 + $0x138] sm:$0xff] }
  0x21   : > { %1664 = vmatpush1.bf16.msra.mxu0 %v1663_v44  ;;  %1569 = vmatprep.subr.bf16.mxu1 %v1868_v3  ;;  %v189_v44 = vld [vmem:[%s1987_s15 + $0x60] sm:$0xff]  ;;  %v390_v63 = vld [vmem:[%s2597_s1 + $0x130] sm:$0xff]  ;;  %v202_v2 = vld [vmem:[%s1987_s15 + $0xc8] sm:$0xff] }
  0x22   : > { %1665 = vmatprep.subr.bf16.mxu0 %v1868_v3  ;;  %v210_v6 = vld [vmem:[%s1987_s15 + $0x108] sm:$0xff]  ;;  %v392_v7 = vld [vmem:[%s2597_s1 + $0x140] sm:$0xff]  ;;  %v394_v14 = vld [vmem:[%s2597_s1 + $0x150] sm:$0xff] }
  0x23   : > { %v393_v8 = vld [vmem:[%s2597_s1 + $0x148] sm:$0xff]  ;;  %v205_v9 = vld [vmem:[%s1987_s15 + $0xe0] sm:$0xff]  ;;  %v395_v15 = vld [vmem:[%s2597_s1 + $0x158] sm:$0xff] }
  0x24   : > { %1571 = vmatpush1.bf16.msra.mxu1 %v1570_v49  ;;  %v451_v49 = vld [vmem:[%s2597_s1 + $0x318] sm:$0xff]  ;;  %v1609_v12 = vpack.c.bf16 %v393_v8, %v392_v7  ;;  %v217_v13 = vld [vmem:[%s1987_s15 + $0x140] sm:$0xff]  ;;  %v1612_v19 = vpack.c.bf16 %v395_v15, %v394_v14  ;;  %v223_v24 = vld [vmem:[%s1987_s15 + $0x170] sm:$0xff] }
  0x25   : > { %1667 = vmatpush1.bf16.msra.mxu0 %v1666_v50  ;;  %1572 = vmatprep.subr.bf16.mxu1 %v1868_v3  ;;  %v184_v50 = vld [vmem:[%s1987_s15 + $0x38] sm:$0xff]  ;;  %v1696_v57 = vpack.c.bf16 %v451_v49, %v450_v48  ;;  %v396_v21 = vld [vmem:[%s2597_s1 + $0x160] sm:$0xff]  ;;  %v227_v25 = vld [vmem:[%s1987_s15 + $0x190] sm:$0xff] }
  0x26   : > { %1668 = vmatprep.subr.bf16.mxu0 %v1868_v3  ;;  %v220_v18 = vld [vmem:[%s1987_s15 + $0x158] sm:$0xff]  ;;  %v231_v27 = vld [vmem:[%s1987_s15 + $0x1b0] sm:$0xff]  ;;  %v226_v30 = vld [vmem:[%s1987_s15 + $0x188] sm:$0xff] }
  0x27   : > { %v224_v20 = vld [vmem:[%s1987_s15 + $0x178] sm:$0xff]  ;;  %v230_v31 = vld [vmem:[%s1987_s15 + $0x1a8] sm:$0xff]  ;;  %v233_v37 = vld [vmem:[%s1987_s15 + $0x1c0] sm:$0xff] }
  0x28   : > { %1574 = vmatpush1.bf16.msra.mxu1 %v1573_v55  ;;  %v388_v55 = vld [vmem:[%s2597_s1 + $0x120] sm:$0xff]  ;;  %v234_v32 = vld [vmem:[%s1987_s15 + $0x1c8] sm:$0xff]  ;;  %v248_v46 = vld [vmem:[%s1987_s15 + $0x238] sm:$0xff] }
  0x29   : > { %1670 = vmatpush1.bf16.msra.mxu0 %v1669_v56  ;;  %1575 = vmatprep.subr.bf16.mxu1 %v1868_v3  ;;  %v389_v56 = vld [vmem:[%s2597_s1 + $0x128] sm:$0xff]  ;;  %v237_v38 = vld [vmem:[%s1987_s15 + $0x1e0] sm:$0xff]  ;;  %v252_v48 = vld [vmem:[%s1987_s15 + $0x258] sm:$0xff] }
  0x2a   : > { %1671 = vmatprep.subr.bf16.mxu0 %v1868_v3  ;;  %v401_v36 = vld [vmem:[%s2597_s1 + $0x188] sm:$0xff]  ;;  %v241_v39 = vld [vmem:[%s1987_s15 + $0x200] sm:$0xff]  ;;  %v410_v7 = vld [vmem:[%s2597_s1 + $0x1d0] sm:$0xff] }
  0x2b   : > { %v404_v49 = vld [vmem:[%s2597_s1 + $0x1a0] sm:$0xff]  ;;  %v411_v8 = vld [vmem:[%s2597_s1 + $0x1d8] sm:$0xff]  ;;  %v413_v15 = vld [vmem:[%s2597_s1 + $0x1e8] sm:$0xff] }
  0x2c   : > { %1577 = vmatpush1.bf16.msra.mxu1 %v1576_v61  ;;  %v1603_v61 = vpack.c.bf16 %v389_v56, %v388_v55  ;;  %v259_v55 = vld [vmem:[%s1987_s15 + $0x290] sm:$0xff]  ;;  %v412_v14 = vld [vmem:[%s2597_s1 + $0x1e0] sm:$0xff] }
  0x2d   : > { %1673 = vmatpush1.bf16.msra.mxu0 %v1672_v62  ;;  %1578 = vmatprep.subr.bf16.mxu1 %v1868_v3  ;;  %v203_v62 = vld [vmem:[%s1987_s15 + $0xd0] sm:$0xff] }
  0x2e   : > { %1674 = vmatprep.subr.bf16.mxu0 %v1868_v3  ;;  %v406_v56 = vld [vmem:[%s2597_s1 + $0x1b0] sm:$0xff] }
  0x30   : > { %1580 = vmatpush1.bf16.msra.mxu1 %v1579_v4  ;;  %v206_v4 = vld [vmem:[%s1987_s15 + $0xe8] sm:$0xff] }
  0x31   : > { %1676 = vmatpush1.bf16.msra.mxu0 %v1675_v5  ;;  %1581 = vmatprep.subr.bf16.mxu1 %v1868_v3  ;;  %v1606_v5 = vpack.c.bf16 %v391_v0, %v390_v63  ;;  %v408_v63 = vld [vmem:[%s2597_s1 + $0x1c0] sm:$0xff]  ;;  %v409_v0 = vld [vmem:[%s2597_s1 + $0x1c8] sm:$0xff] }
  0x32   : > { %1677 = vmatprep.subr.bf16.mxu0 %v1868_v3 }
  0x34   : > { %1583 = vmatpush1.bf16.msra.mxu1 %v1582_v10  ;;  %v209_v10 = vld [vmem:[%s1987_s15 + $0x100] sm:$0xff] }
  0x35   : > { %1679 = vmatpush1.bf16.msra.mxu0 %v1678_v11  ;;  %1584 = vmatprep.subr.bf16.mxu1 %v1868_v3  ;;  %v213_v11 = vld [vmem:[%s1987_s15 + $0x120] sm:$0xff] }
  0x36   : > { %1680 = vmatprep.subr.bf16.mxu0 %v1868_v3 }
  0x38   : > { %1586 = vmatpush1.bf16.msra.mxu1 %v1585_v16  ;;  %v212_v16 = vld [vmem:[%s1987_s15 + $0x118] sm:$0xff] }
  0x39   : > { %1682 = vmatpush1.bf16.msra.mxu0 %v1681_v17  ;;  %1587 = vmatprep.subr.bf16.mxu1 %v1868_v3  ;;  %v216_v17 = vld [vmem:[%s1987_s15 + $0x138] sm:$0xff] }
  0x3a   : > { %1683 = vmatprep.subr.bf16.mxu0 %v1868_v3 }
  0x3c   : > { %1589 = vmatpush1.bf16.msra.mxu1 %v1588_v22  ;;  %v397_v22 = vld [vmem:[%s2597_s1 + $0x168] sm:$0xff] }
  0x3d   : > { %1685 = vmatpush1.bf16.msra.mxu0 %v1684_v23  ;;  %1590 = vmatprep.subr.bf16.mxu1 %v1868_v3  ;;  %v219_v23 = vld [vmem:[%s1987_s15 + $0x150] sm:$0xff]  ;;  %v1615_v26 = vpack.c.bf16 %v397_v22, %v396_v21  ;;  %v415_v22 = vld [vmem:[%s2597_s1 + $0x1f8] sm:$0xff] }
  0x3e   : > { %1686 = vmatprep.subr.bf16.mxu0 %v1868_v3  ;;  %v414_v21 = vld [vmem:[%s2597_s1 + $0x1f0] sm:$0xff] }
  0x40   : > { %1592 = vmatpush1.bf16.msra.mxu1 %v1591_v28  ;;  %v398_v28 = vld [vmem:[%s2597_s1 + $0x170] sm:$0xff] }
  0x41   : > { %1688 = vmatpush1.bf16.msra.mxu0 %v1687_v29  ;;  %1593 = vmatprep.subr.bf16.mxu1 %v1868_v3  ;;  %v399_v29 = vld [vmem:[%s2597_s1 + $0x178] sm:$0xff] }
  0x42   : > { %1689 = vmatprep.subr.bf16.mxu0 %v1868_v3  ;;  %v1618_v33 = vpack.c.bf16 %v399_v29, %v398_v28  ;;  %v289_v28 = vld [vmem:[%s1987_s15 + $0x380] sm:$0xff] }
  0x43   : > { %v293_v29 = vld [vmem:[%s1987_s15 + $0x3a0] sm:$0xff] }
  0x44   : > { %1595 = vmatpush1.bf16.msra.mxu1 %v1594_v34  ;;  %v238_v34 = vld [vmem:[%s1987_s15 + $0x1e8] sm:$0xff] }
  0x45   : > { %1691 = vmatpush1.bf16.msra.mxu0 %v1690_v35  ;;  %1596 = vmatprep.subr.bf16.mxu1 %v1868_v3  ;;  %v400_v35 = vld [vmem:[%s2597_s1 + $0x180] sm:$0xff] }
  0x46   : > { %1692 = vmatprep.subr.bf16.mxu0 %v1868_v3 }
  0x47   : > { %600 = vmatmul.mubr.f32.vlgmr.msra.gmra.mrb[0].mxu1 %v177_v40  ;;  %v1621_v40 = vpack.c.bf16 %v401_v36, %v400_v35  ;;  %v303_v35 = vld [vmem:[%s1987_s15 + $0x3f0] sm:$0xff] }
  0x48   : > { %980 = vmatmul.mubr.f32.vlgmr.msra.gmra.mrb[0].mxu0 %v181_v42  ;;  %1598 = vmatpush1.bf16.msra.mxu1 %v1597_v41  ;;  %v245_v41 = vld [vmem:[%s1987_s15 + $0x220] sm:$0xff]  ;;  %v402_v42 = vld [vmem:[%s2597_s1 + $0x190] sm:$0xff] }
  0x49   : > { %604 = vmatprep.mubr.f32.mxu1 %v185_v43  ;;  %984 = vmatprep.mubr.f32.mxu0 %v189_v44  ;;  %v403_v43 = vld [vmem:[%s2597_s1 + $0x198] sm:$0xff]  ;;  %v307_v36 = vld [vmem:[%s1987_s15 + $0x410] sm:$0xff] }
  0x4a   : > { %1694 = vmatpush3.bf16.msra.mxu0 %v1693_v45  ;;  %1599 = vmatprep.subr.bf16.mxu1 %v1868_v3  ;;  %v240_v44 = vld [vmem:[%s1987_s15 + $0x1f8] sm:$0xff]  ;;  %v1624_v47 = vpack.c.bf16 %v403_v43, %v402_v42  ;;  %v322_v42 = vld [vmem:[%s1987_s15 + $0x488] sm:$0xff]  ;;  %v317_v43 = vld [vmem:[%s1987_s15 + $0x460] sm:$0xff] }
  0x4b   : > { %605 = vmatmul.mubr.f32.gmra.mrb[2].mxu1 %v184_v50  ;;  %1695 = vmatprep.subr.bf16.mxu0 %v1868_v3  ;;  %v244_v45 = vld [vmem:[%s1987_s15 + $0x218] sm:$0xff]  ;;  %v405_v50 = vld [vmem:[%s2597_s1 + $0x1a8] sm:$0xff] }
  0x4c   : > { %985 = vmatmul.mubr.f32.gmra.mrb[2].mxu0 %v188_v51  ;;  %609 = vmatprep.mubr.f32.mxu1 %v192_v52  ;;  %v247_v51 = vld [vmem:[%s1987_s15 + $0x230] sm:$0xff] }
  0x4d   : > { %989 = vmatprep.mubr.f32.mxu0 %v196_v54  ;;  %1601 = vmatpush1.bf16.msra.mxu1 %v1600_v53  ;;  %v251_v52 = vld [vmem:[%s1987_s15 + $0x250] sm:$0xff]  ;;  %v1627_v54 = vpack.c.bf16 %v405_v50, %v404_v49  ;;  %v332_v49 = vld [vmem:[%s1987_s15 + $0x4d8] sm:$0xff] }
  0x4e   : > { %1602 = vmatprep.subr.bf16.mxu1 %v1868_v3  ;;  %1697 = vmatpush3.bf16.msra.mxu0 %v1696_v57  ;;  %v255_v53 = vld [vmem:[%s1987_s15 + $0x270] sm:$0xff]  ;;  %v407_v57 = vld [vmem:[%s2597_s1 + $0x1b8] sm:$0xff] }
  0x4f   : > { %610 = vmatmul.mubr.f32.gmra.mrb[4].mxu1 %v191_v58  ;;  %v254_v58 = vld [vmem:[%s1987_s15 + $0x268] sm:$0xff]  ;;  %v336_v50 = vld [vmem:[%s1987_s15 + $0x4f8] sm:$0xff] }
  0x50   : > { %990 = vmatmul.mubr.f32.gmra.mrb[4].mxu0 %v195_v59  ;;  %614 = vmatprep.mubr.f32.mxu1 %v199_v60  ;;  %v258_v59 = vld [vmem:[%s1987_s15 + $0x288] sm:$0xff] }
  0x51   : > { %994 = vmatprep.mubr.f32.mxu0 %v203_v62  ;;  %1604 = vmatpush1.bf16.msra.mxu1 %v1603_v61  ;;  %v262_v60 = vld [vmem:[%s1987_s15 + $0x2a8] sm:$0xff]  ;;  %v1630_v61 = vpack.c.bf16 %v407_v57, %v406_v56 }
  0x52   : > { %1605 = vmatprep.subr.bf16.mxu1 %v1868_v3  ;;  %v266_v62 = vld [vmem:[%s1987_s15 + $0x2c8] sm:$0xff] }
  0x53   : > { %615 = vmatmul.mubr.f32.gmra.mrb[6].mxu1 %v198_v1  ;;  %v261_v1 = vld [vmem:[%s1987_s15 + $0x2a0] sm:$0xff]  ;;  %v342_v56 = vld [vmem:[%s1987_s15 + $0x528] sm:$0xff] }
  0x54   : > { %995 = vmatmul.mubr.f32.gmra.mrb[6].mxu0 %v202_v2  ;;  %619 = vmatprep.mubr.f32.mxu1 %v206_v4  ;;  %v265_v2 = vld [vmem:[%s1987_s15 + $0x2c0] sm:$0xff]  ;;  %v346_v57 = vld [vmem:[%s1987_s15 + $0x548] sm:$0xff] }
  0x55   : > { %999 = vmatprep.mubr.f32.mxu0 %v210_v6  ;;  %1607 = vmatpush1.bf16.msra.mxu1 %v1606_v5  ;;  %v269_v4 = vld [vmem:[%s1987_s15 + $0x2e0] sm:$0xff]  ;;  %v1633_v5 = vpack.c.bf16 %v409_v0, %v408_v63  ;;  %v1870_v63 = vmov 0.0   ;;  %v183_v0 = vld [vmem:[%s1987_s15 + $0x30] sm:$0xff] }
  0x56   : > { %1608 = vmatprep.subr.bf16.mxu1 %v1868_v3  ;;  %v273_v6 = vld [vmem:[%s1987_s15 + $0x300] sm:$0xff] }
  0x57   : > { %620 = vmatmul.mubr.f32.gmra.mrb[8].mxu1 %v205_v9  ;;  %v268_v9 = vld [vmem:[%s1987_s15 + $0x2d8] sm:$0xff] }
  0x58   : > { %1000 = vmatmul.mubr.f32.gmra.mrb[8].mxu0 %v209_v10  ;;  %624 = vmatprep.mubr.f32.mxu1 %v213_v11  ;;  %v272_v10 = vld [vmem:[%s1987_s15 + $0x2f8] sm:$0xff] }
  0x59   : > { %1004 = vmatprep.mubr.f32.mxu0 %v217_v13  ;;  %1610 = vmatpush1.bf16.msra.mxu1 %v1609_v12  ;;  %v276_v11 = vld [vmem:[%s1987_s15 + $0x318] sm:$0xff]  ;;  %v1636_v12 = vpack.c.bf16 %v411_v8, %v410_v7  ;;  %v197_v7 = vld [vmem:[%s1987_s15 + $0xa0] sm:$0xff] }
  0x5a   : > { %1611 = vmatprep.subr.bf16.mxu1 %v1868_v3  ;;  %v280_v13 = vld [vmem:[%s1987_s15 + $0x338] sm:$0xff]  ;;  %v201_v8 = vld [vmem:[%s1987_s15 + $0xc0] sm:$0xff] }
  0x5b   : > { %625 = vmatmul.mubr.f32.gmra.mrb[10].mxu1 %v212_v16  ;;  %v275_v16 = vld [vmem:[%s1987_s15 + $0x310] sm:$0xff] }
  0x5c   : > { %1005 = vmatmul.mubr.f32.gmra.mrb[10].mxu0 %v216_v17  ;;  %629 = vmatprep.mubr.f32.mxu1 %v220_v18  ;;  %v279_v17 = vld [vmem:[%s1987_s15 + $0x330] sm:$0xff] }
  0x5d   : > { %1009 = vmatprep.mubr.f32.mxu0 %v224_v20  ;;  %1613 = vmatpush1.bf16.msra.mxu1 %v1612_v19  ;;  %v283_v18 = vld [vmem:[%s1987_s15 + $0x350] sm:$0xff]  ;;  %v1639_v19 = vpack.c.bf16 %v413_v15, %v412_v14  ;;  %v214_v15 = vld [vmem:[%s1987_s15 + $0x128] sm:$0xff] }
  0x5e   : > { %1614 = vmatprep.subr.bf16.mxu1 %v1868_v3  ;;  %v287_v20 = vld [vmem:[%s1987_s15 + $0x370] sm:$0xff] }
  0x5f   : > { %630 = vmatmul.mubr.f32.gmra.mrb[12].mxu1 %v219_v23  ;;  %v282_v23 = vld [vmem:[%s1987_s15 + $0x348] sm:$0xff]  ;;  %v215_v14 = vld [vmem:[%s1987_s15 + $0x130] sm:$0xff] }
  0x60   : > { %1010 = vmatmul.mubr.f32.gmra.mrb[12].mxu0 %v223_v24  ;;  %634 = vmatprep.mubr.f32.mxu1 %v227_v25  ;;  %v286_v24 = vld [vmem:[%s1987_s15 + $0x368] sm:$0xff] }
  0x61   : > { %1014 = vmatprep.mubr.f32.mxu0 %v231_v27  ;;  %1616 = vmatpush1.bf16.msra.mxu1 %v1615_v26  ;;  %v290_v25 = vld [vmem:[%s1987_s15 + $0x388] sm:$0xff]  ;;  %v1642_v26 = vpack.c.bf16 %v415_v22, %v414_v21  ;;  %v228_v21 = vld [vmem:[%s1987_s15 + $0x198] sm:$0xff] }
  0x62   : > { %1617 = vmatprep.subr.bf16.mxu1 %v1868_v3  ;;  %v294_v27 = vld [vmem:[%s1987_s15 + $0x3a8] sm:$0xff]  ;;  %v232_v22 = vld [vmem:[%s1987_s15 + $0x1b8] sm:$0xff] }
  0x63   : > { %635 = vmatmul.mubr.f32.gmra.mrb[14].mxu1 %v226_v30  ;;  %v297_v30 = vld [vmem:[%s1987_s15 + $0x3c0] sm:$0xff] }
  0x64   : > { %1015 = vmatmul.mubr.f32.gmra.mrb[14].mxu0 %v230_v31  ;;  %639 = vmatprep.mubr.f32.mxu1 %v234_v32  ;;  %v301_v31 = vld [vmem:[%s1987_s15 + $0x3e0] sm:$0xff]  ;;  %v296_v32 = vld [vmem:[%s1987_s15 + $0x3b8] sm:$0xff] }
  0x65   : > { %1019 = vmatprep.mubr.f32.mxu0 %v238_v34  ;;  %1619 = vmatpush1.bf16.msra.mxu1 %v1618_v33  ;;  %v304_v33 = vld [vmem:[%s1987_s15 + $0x3f8] sm:$0xff] }
  0x66   : > { %1620 = vmatprep.subr.bf16.mxu1 %v1868_v3  ;;  %v308_v34 = vld [vmem:[%s1987_s15 + $0x418] sm:$0xff] }
  0x67   : > { %640 = vmatmul.mubr.f32.gmra.mrb[16].mxu1 %v233_v37  ;;  %v311_v37 = vld [vmem:[%s1987_s15 + $0x430] sm:$0xff] }
  0x68   : > { %1020 = vmatmul.mubr.f32.gmra.mrb[16].mxu0 %v237_v38  ;;  %644 = vmatprep.mubr.f32.mxu1 %v241_v39  ;;  %v315_v38 = vld [vmem:[%s1987_s15 + $0x450] sm:$0xff]  ;;  %v310_v39 = vld [vmem:[%s1987_s15 + $0x428] sm:$0xff] }
  0x69   : > { %1024 = vmatprep.mubr.f32.mxu0 %v245_v41  ;;  %1622 = vmatpush1.bf16.msra.mxu1 %v1621_v40  ;;  %v314_v40 = vld [vmem:[%s1987_s15 + $0x448] sm:$0xff] }
  0x6a   : > { %1623 = vmatprep.subr.bf16.mxu1 %v1868_v3  ;;  %v318_v41 = vld [vmem:[%s1987_s15 + $0x468] sm:$0xff] }
  0x6b   : > { %645 = vmatmul.mubr.f32.gmra.mrb[18].mxu1 %v240_v44  ;;  %v321_v44 = vld [vmem:[%s1987_s15 + $0x480] sm:$0xff] }
  0x6c   : > { %1025 = vmatmul.mubr.f32.gmra.mrb[18].mxu0 %v244_v45  ;;  %649 = vmatprep.mubr.f32.mxu1 %v248_v46  ;;  %v325_v45 = vld [vmem:[%s1987_s15 + $0x4a0] sm:$0xff] }
  0x6d   : > { %1029 = vmatprep.mubr.f32.mxu0 %v252_v48  ;;  %1625 = vmatpush1.bf16.msra.mxu1 %v1624_v47  ;;  %v329_v46 = vld [vmem:[%s1987_s15 + $0x4c0] sm:$0xff]  ;;  %v324_v47 = vld [vmem:[%s1987_s15 + $0x498] sm:$0xff] }
  0x6e   : > { %1626 = vmatprep.subr.bf16.mxu1 %v1868_v3  ;;  %v328_v48 = vld [vmem:[%s1987_s15 + $0x4b8] sm:$0xff] }
  0x6f   : > { %650 = vmatmul.mubr.f32.gmra.mrb[20].mxu1 %v247_v51  ;;  %v331_v51 = vld [vmem:[%s1987_s15 + $0x4d0] sm:$0xff] }
  0x70   : > { %1030 = vmatmul.mubr.f32.gmra.mrb[20].mxu0 %v251_v52  ;;  %654 = vmatprep.mubr.f32.mxu1 %v255_v53  ;;  %v335_v52 = vld [vmem:[%s1987_s15 + $0x4f0] sm:$0xff] }
  0x71   : > { %1034 = vmatprep.mubr.f32.mxu0 %v259_v55  ;;  %1628 = vmatpush1.bf16.msra.mxu1 %v1627_v54  ;;  %v339_v53 = vld [vmem:[%s1987_s15 + $0x510] sm:$0xff]  ;;  %v338_v55 = vld [vmem:[%s1987_s15 + $0x508] sm:$0xff] }
  0x72   : > { %1629 = vmatprep.subr.bf16.mxu1 %v1868_v3  ;;  %v343_v54 = vld [vmem:[%s1987_s15 + $0x530] sm:$0xff] }
  0x73   : > { %655 = vmatmul.mubr.f32.gmra.mrb[22].mxu1 %v254_v58  ;;  %v350_v58 = vld [vmem:[%s1987_s15 + $0x568] sm:$0xff] }
  0x74   : > { %1035 = vmatmul.mubr.f32.gmra.mrb[22].mxu0 %v258_v59  ;;  %659 = vmatprep.mubr.f32.mxu1 %v262_v60  ;;  %v345_v59 = vld [vmem:[%s1987_s15 + $0x540] sm:$0xff] }
  0x75   : > { %1039 = vmatprep.mubr.f32.mxu0 %v266_v62  ;;  %1631 = vmatpush1.bf16.msra.mxu1 %v1630_v61  ;;  %v349_v60 = vld [vmem:[%s1987_s15 + $0x560] sm:$0xff]  ;;  %v180_v61 = vld [vmem:[%s1987_s15 + $0x18] sm:$0xff]  ;;  %v179_v62 = vld [vmem:[%s1987_s15 + $0x10] sm:$0xff] }
  0x76   : > { %1632 = vmatprep.subr.bf16.mxu1 %v1868_v3 }
  0x77   : > { %660 = vmatmul.mubr.f32.gmra.mrb[24].mxu1 %v261_v1  ;;  %v187_v1 = vld [vmem:[%s1987_s15 + $0x50] sm:$0xff] }
  0x78   : > { %1040 = vmatmul.mubr.f32.gmra.mrb[24].mxu0 %v265_v2  ;;  %664 = vmatprep.mubr.f32.mxu1 %v269_v4  ;;  %v186_v2 = vld [vmem:[%s1987_s15 + $0x48] sm:$0xff] }
  0x79   : > { %1044 = vmatprep.mubr.f32.mxu0 %v273_v6  ;;  %1634 = vmatpush1.bf16.msra.mxu1 %v1633_v5  ;;  %v190_v4 = vld [vmem:[%s1987_s15 + $0x68] sm:$0xff]  ;;  %v193_v6 = vld [vmem:[%s1987_s15 + $0x80] sm:$0xff] }
  0x7a   : > { %1635 = vmatprep.subr.bf16.mxu1 %v1868_v3  ;;  %v194_v5 = vld [vmem:[%s1987_s15 + $0x88] sm:$0xff] }
  0x7b   : > { %665 = vmatmul.mubr.f32.gmra.mrb[26].mxu1 %v268_v9  ;;  %v200_v9 = vld [vmem:[%s1987_s15 + $0xb8] sm:$0xff] }
  0x7c   : > { %1045 = vmatmul.mubr.f32.gmra.mrb[26].mxu0 %v272_v10  ;;  %669 = vmatprep.mubr.f32.mxu1 %v276_v11  ;;  %v204_v10 = vld [vmem:[%s1987_s15 + $0xd8] sm:$0xff] }
  0x7d   : > { %1049 = vmatprep.mubr.f32.mxu0 %v280_v13  ;;  %1637 = vmatpush1.bf16.msra.mxu1 %v1636_v12  ;;  %v208_v11 = vld [vmem:[%s1987_s15 + $0xf8] sm:$0xff]  ;;  %v207_v12 = vld [vmem:[%s1987_s15 + $0xf0] sm:$0xff] }
  0x7e   : > { %1638 = vmatprep.subr.bf16.mxu1 %v1868_v3  ;;  %v211_v13 = vld [vmem:[%s1987_s15 + $0x110] sm:$0xff] }
  0x7f   : > { %670 = vmatmul.mubr.f32.gmra.mrb[28].mxu1 %v275_v16  ;;  %v218_v16 = vld [vmem:[%s1987_s15 + $0x148] sm:$0xff] }
  0x80   : > { %1050 = vmatmul.mubr.f32.gmra.mrb[28].mxu0 %v279_v17  ;;  %674 = vmatprep.mubr.f32.mxu1 %v283_v18  ;;  %v222_v17 = vld [vmem:[%s1987_s15 + $0x168] sm:$0xff]  ;;  %v221_v18 = vld [vmem:[%s1987_s15 + $0x160] sm:$0xff] }
  0x81   : > { %1054 = vmatprep.mubr.f32.mxu0 %v287_v20  ;;  %1640 = vmatpush1.bf16.msra.mxu1 %v1639_v19  ;;  %v225_v19 = vld [vmem:[%s1987_s15 + $0x180] sm:$0xff] }
  0x82   : > { %1641 = vmatprep.subr.bf16.mxu1 %v1868_v3  ;;  %v300_v3 = vld [vmem:[%s1987_s15 + $0x3d8] sm:$0xff]  ;;  %v229_v20 = vld [vmem:[%s1987_s15 + $0x1a0] sm:$0xff] }
  0x83   : > { %675 = vmatmul.mubr.f32.gmra.mrb[30].mxu1 %v282_v23  ;;  %v236_v23 = vld [vmem:[%s1987_s15 + $0x1d8] sm:$0xff] }
  0x84   : > { %1055 = vmatmul.mubr.f32.gmra.mrb[30].mxu0 %v286_v24  ;;  %679 = vmatprep.mubr.f32.mxu1 %v290_v25  ;;  %v235_v24 = vld [vmem:[%s1987_s15 + $0x1d0] sm:$0xff] }
  0x85   : > { %1059 = vmatprep.mubr.f32.mxu0 %v294_v27  ;;  %1643 = vmatpush1.bf16.msra.mxu1 %v1642_v26  ;;  %v239_v25 = vld [vmem:[%s1987_s15 + $0x1f0] sm:$0xff]  ;;  %v242_v27 = vld [vmem:[%s1987_s15 + $0x208] sm:$0xff] }
  0x86   : > { %v243_v26 = vld [vmem:[%s1987_s15 + $0x210] sm:$0xff] }
  0x87   : > { %680 = vmatmul.mubr.f32.gmra.mrb[32].mxu1 %v289_v28  ;;  %v246_v28 = vld [vmem:[%s1987_s15 + $0x228] sm:$0xff] }
  0x88   : > { %1060 = vmatmul.mubr.f32.gmra.mrb[32].mxu0 %v293_v29  ;;  %684 = vmatprep.mubr.f32.mxu1 %v297_v30  ;;  %v250_v29 = vld [vmem:[%s1987_s15 + $0x248] sm:$0xff]  ;;  %v249_v30 = vld [vmem:[%s1987_s15 + $0x240] sm:$0xff] }
  0x89   : > { %1064 = vmatprep.mubr.f32.mxu0 %v301_v31  ;;  %v253_v31 = vld [vmem:[%s1987_s15 + $0x260] sm:$0xff] }
  0x8b   : > { %685 = vmatmul.mubr.f32.gmra.mrb[34].mxu1 %v296_v32  ;;  %v257_v32 = vld [vmem:[%s1987_s15 + $0x280] sm:$0xff] }
  0x8c   : > { %1065 = vmatmul.mubr.f32.gmra.mrb[34].mxu0 %v300_v3  ;;  %689 = vmatprep.mubr.f32.mxu1 %v304_v33  ;;  %v256_v3 = vld [vmem:[%s1987_s15 + $0x278] sm:$0xff] }
  0x8d   : > { %1069 = vmatprep.mubr.f32.mxu0 %v308_v34  ;;  %v260_v33 = vld [vmem:[%s1987_s15 + $0x298] sm:$0xff] }
  0x8e   : > { %v264_v34 = vld [vmem:[%s1987_s15 + $0x2b8] sm:$0xff] }
  0x8f   : > { %690 = vmatmul.mubr.f32.gmra.mrb[36].mxu1 %v303_v35  ;;  %v263_v35 = vld [vmem:[%s1987_s15 + $0x2b0] sm:$0xff] }
  0x90   : > { %1070 = vmatmul.mubr.f32.gmra.mrb[36].mxu0 %v307_v36  ;;  %694 = vmatprep.mubr.f32.mxu1 %v311_v37  ;;  %v267_v36 = vld [vmem:[%s1987_s15 + $0x2d0] sm:$0xff] }
  0x91   : > { %1074 = vmatprep.mubr.f32.mxu0 %v315_v38  ;;  %v271_v37 = vld [vmem:[%s1987_s15 + $0x2f0] sm:$0xff]  ;;  %v270_v38 = vld [vmem:[%s1987_s15 + $0x2e8] sm:$0xff] }
  0x93   : > { %695 = vmatmul.mubr.f32.gmra.mrb[38].mxu1 %v310_v39  ;;  %v274_v39 = vld [vmem:[%s1987_s15 + $0x308] sm:$0xff] }
  0x94   : > { %1075 = vmatmul.mubr.f32.gmra.mrb[38].mxu0 %v314_v40  ;;  %699 = vmatprep.mubr.f32.mxu1 %v318_v41  ;;  %v278_v40 = vld [vmem:[%s1987_s15 + $0x328] sm:$0xff]  ;;  %v277_v41 = vld [vmem:[%s1987_s15 + $0x320] sm:$0xff] }
  0x95   : > { %1079 = vmatprep.mubr.f32.mxu0 %v322_v42  ;;  %v281_v42 = vld [vmem:[%s1987_s15 + $0x340] sm:$0xff] }
  0x97   : > { %700 = vmatmul.mubr.f32.gmra.mrb[40].mxu1 %v317_v43  ;;  %v285_v43 = vld [vmem:[%s1987_s15 + $0x360] sm:$0xff] }
  0x98   : > { %1080 = vmatmul.mubr.f32.gmra.mrb[40].mxu0 %v321_v44  ;;  %704 = vmatprep.mubr.f32.mxu1 %v325_v45  ;;  %v284_v44 = vld [vmem:[%s1987_s15 + $0x358] sm:$0xff] }
  0x99   : > { %1084 = vmatprep.mubr.f32.mxu0 %v329_v46  ;;  %v288_v45 = vld [vmem:[%s1987_s15 + $0x378] sm:$0xff] }
  0x9a   : > { %v292_v46 = vld [vmem:[%s1987_s15 + $0x398] sm:$0xff] }
  0x9b   : > { %705 = vmatmul.mubr.f32.gmra.mrb[42].mxu1 %v324_v47  ;;  %v291_v47 = vld [vmem:[%s1987_s15 + $0x390] sm:$0xff] }
  0x9c   : > { %1085 = vmatmul.mubr.f32.gmra.mrb[42].mxu0 %v328_v48  ;;  %709 = vmatprep.mubr.f32.mxu1 %v332_v49  ;;  %v295_v48 = vld [vmem:[%s1987_s15 + $0x3b0] sm:$0xff] }
  0x9d   : > { %1089 = vmatprep.mubr.f32.mxu0 %v336_v50  ;;  %v299_v49 = vld [vmem:[%s1987_s15 + $0x3d0] sm:$0xff]  ;;  %v298_v50 = vld [vmem:[%s1987_s15 + $0x3c8] sm:$0xff] }
  0x9f   : > { %710 = vmatmul.mubr.f32.gmra.mrb[44].mxu1 %v331_v51  ;;  %v302_v51 = vld [vmem:[%s1987_s15 + $0x3e8] sm:$0xff] }
  0xa0   : > { %1090 = vmatmul.mubr.f32.gmra.mrb[44].mxu0 %v335_v52  ;;  %714 = vmatprep.mubr.f32.mxu1 %v339_v53  ;;  %v306_v52 = vld [vmem:[%s1987_s15 + $0x408] sm:$0xff]  ;;  %v305_v53 = vld [vmem:[%s1987_s15 + $0x400] sm:$0xff] }
  0xa1   : > { %1094 = vmatprep.mubr.f32.mxu0 %v343_v54  ;;  %v309_v54 = vld [vmem:[%s1987_s15 + $0x420] sm:$0xff] }
  0xa3   : > { %715 = vmatmul.mubr.f32.gmra.mrb[46].mxu1 %v338_v55  ;;  %v313_v55 = vld [vmem:[%s1987_s15 + $0x440] sm:$0xff] }
  0xa4   : > { %1095 = vmatmul.mubr.f32.gmra.mrb[46].mxu0 %v342_v56  ;;  %719 = vmatprep.mubr.f32.mxu1 %v346_v57  ;;  %v312_v56 = vld [vmem:[%s1987_s15 + $0x438] sm:$0xff] }
  0xa5   : > { %1099 = vmatprep.mubr.f32.mxu0 %v350_v58  ;;  %v316_v57 = vld [vmem:[%s1987_s15 + $0x458] sm:$0xff] }
  0xa6   : > { %v320_v58 = vld [vmem:[%s1987_s15 + $0x478] sm:$0xff] }
  0xa7   : > { %720 = vmatmul.mubr.f32.gmra.mrb[48].mxu1 %v345_v59  ;;  %v319_v59 = vld [vmem:[%s1987_s15 + $0x470] sm:$0xff] }
  0xa8   : > { %1100 = vmatmul.mubr.f32.gmra.mrb[48].mxu0 %v349_v60  ;;  %789 = vmatprep.mubr.f32.mxu1 %v180_v61  ;;  %v323_v60 = vld [vmem:[%s1987_s15 + $0x490] sm:$0xff] }
  0xa9   : > { %1473 = vmatprep.mubr.msk.f32.mxu0 %vm1869_vm0, %v1870_v63  ;;  %v327_v61 = vld [vmem:[%s1987_s15 + $0x4b0] sm:$0xff] }
  0xab   : > { %790 = vmatmul.mubr.f32.vlgmr.msra.gmra.mrb[0].mxu1 %v179_v62  ;;  %v326_v62 = vld [vmem:[%s1987_s15 + $0x4a8] sm:$0xff] }
  0xac   : > { %1474 = vmatmul.mubr.msk.f32.vlgmr.msra.gmra.mrb[0].mxu0 %vm459_vm1, %v183_v0  ;;  %794 = vmatprep.mubr.f32.mxu1 %v187_v1  ;;  %v330_v0 = vld [vmem:[%s1987_s15 + $0x4c8] sm:$0xff] }
  0xad   : > { %1476 = vmatprep.mubr.msk.f32.mxu0 %vm1869_vm0, %v1870_v63  ;;  %v334_v1 = vld [vmem:[%s1987_s15 + $0x4e8] sm:$0xff] }
  0xaf   : > { %795 = vmatmul.mubr.f32.gmra.mrb[2].mxu1 %v186_v2  ;;  %v333_v2 = vld [vmem:[%s1987_s15 + $0x4e0] sm:$0xff] }
  0xb0   : > { %1477 = vmatmul.mubr.msk.f32.gmra.mrb[2].mxu0 %vm459_vm1, %v190_v4  ;;  %799 = vmatprep.mubr.f32.mxu1 %v194_v5  ;;  %v337_v4 = vld [vmem:[%s1987_s15 + $0x500] sm:$0xff] }
  0xb1   : > { %1479 = vmatprep.mubr.msk.f32.mxu0 %vm1869_vm0, %v1870_v63  ;;  %v341_v5 = vld [vmem:[%s1987_s15 + $0x520] sm:$0xff] }
  0xb3   : > { %800 = vmatmul.mubr.f32.gmra.mrb[4].mxu1 %v193_v6  ;;  %v340_v6 = vld [vmem:[%s1987_s15 + $0x518] sm:$0xff] }
  0xb4   : > { %1480 = vmatmul.mubr.msk.f32.gmra.mrb[4].mxu0 %vm459_vm1, %v197_v7  ;;  %804 = vmatprep.mubr.f32.mxu1 %v201_v8  ;;  %v344_v7 = vld [vmem:[%s1987_s15 + $0x538] sm:$0xff] }
  0xb5   : > { %1482 = vmatprep.mubr.msk.f32.mxu0 %vm1869_vm0, %v1870_v63  ;;  %v348_v8 = vld [vmem:[%s1987_s15 + $0x558] sm:$0xff] }
  0xb7   : > { %805 = vmatmul.mubr.f32.gmra.mrb[6].mxu1 %v200_v9  ;;  %v347_v9 = vld [vmem:[%s1987_s15 + $0x550] sm:$0xff] }
  0xb8   : > { %1483 = vmatmul.mubr.msk.f32.gmra.mrb[6].mxu0 %vm459_vm1, %v204_v10  ;;  %809 = vmatprep.mubr.f32.mxu1 %v208_v11  ;;  %v351_v10 = vld [vmem:[%s1987_s15 + $0x570] sm:$0xff]  ;;  %v2510_v11 = vld [vmem:[%s2598_s2] ss:$0 sm:$0xff]  ;;  %s2517_s15 = scalar_lea.vmem %s2599_s3, %s1407_s26 }
  0xb9   : > { %1485 = vmatprep.mubr.msk.f32.mxu0 %vm1869_vm0, %v1870_v63 }
  0xbb   : > { %810 = vmatmul.mubr.f32.gmra.mrb[8].mxu1 %v207_v12 }
  0xbc   : > { %1486 = vmatmul.mubr.msk.f32.gmra.mrb[8].mxu0 %vm459_vm1, %v211_v13  ;;  %814 = vmatprep.mubr.f32.mxu1 %v215_v14 }
  0xbd   : > { %1488 = vmatprep.mubr.msk.f32.mxu0 %vm1869_vm0, %v1870_v63 }
  0xbf   : > { %815 = vmatmul.mubr.f32.gmra.mrb[10].mxu1 %v214_v15 }
  0xc0   : > { %1489 = vmatmul.mubr.msk.f32.gmra.mrb[10].mxu0 %vm459_vm1, %v218_v16  ;;  %819 = vmatprep.mubr.f32.mxu1 %v222_v17 }
  0xc1   : > { %1491 = vmatprep.mubr.msk.f32.mxu0 %vm1869_vm0, %v1870_v63 }
  0xc3   : > { %820 = vmatmul.mubr.f32.gmra.mrb[12].mxu1 %v221_v18 }
  0xc4   : > { %1492 = vmatmul.mubr.msk.f32.gmra.mrb[12].mxu0 %vm459_vm1, %v225_v19  ;;  %824 = vmatprep.mubr.f32.mxu1 %v229_v20 }
  0xc5   : > { %1494 = vmatprep.mubr.msk.f32.mxu0 %vm1869_vm0, %v1870_v63 }
  0xc7   : > { %825 = vmatmul.mubr.f32.gmra.mrb[14].mxu1 %v228_v21 }
  0xc8   : > { %1495 = vmatmul.mubr.msk.f32.gmra.mrb[14].mxu0 %vm459_vm1, %v232_v22  ;;  %829 = vmatprep.mubr.f32.mxu1 %v236_v23 }
  0xc9   : > { %1497 = vmatprep.mubr.msk.f32.mxu0 %vm1869_vm0, %v1870_v63 }
  0xcb   : > { %830 = vmatmul.mubr.f32.gmra.mrb[16].mxu1 %v235_v24 }
  0xcc   : > { %1498 = vmatmul.mubr.msk.f32.gmra.mrb[16].mxu0 %vm459_vm1, %v239_v25  ;;  %834 = vmatprep.mubr.f32.mxu1 %v243_v26 }
  0xcd   : > { %1500 = vmatprep.mubr.msk.f32.mxu0 %vm1869_vm0, %v1870_v63 }
  0xcf   : > { %835 = vmatmul.mubr.f32.gmra.mrb[18].mxu1 %v242_v27 }
  0xd0   : > { %1501 = vmatmul.mubr.msk.f32.gmra.mrb[18].mxu0 %vm459_vm1, %v246_v28  ;;  %839 = vmatprep.mubr.f32.mxu1 %v250_v29 }
  0xd1   : > { %1503 = vmatprep.mubr.msk.f32.mxu0 %vm1869_vm0, %v1870_v63 }
  0xd3   : > { %840 = vmatmul.mubr.f32.gmra.mrb[20].mxu1 %v249_v30 }
  0xd4   : > { %1504 = vmatmul.mubr.msk.f32.gmra.mrb[20].mxu0 %vm459_vm1, %v253_v31  ;;  %844 = vmatprep.mubr.f32.mxu1 %v257_v32 }
  0xd5   : > { %1506 = vmatprep.mubr.msk.f32.mxu0 %vm1869_vm0, %v1870_v63 }
  0xd7   : > { %845 = vmatmul.mubr.f32.gmra.mrb[22].mxu1 %v256_v3 }
  0xd8   : > { %1507 = vmatmul.mubr.msk.f32.gmra.mrb[22].mxu0 %vm459_vm1, %v260_v33  ;;  %849 = vmatprep.mubr.f32.mxu1 %v264_v34 }
  0xd9   : > { %1509 = vmatprep.mubr.msk.f32.mxu0 %vm1869_vm0, %v1870_v63 }
  0xdb   : > { %850 = vmatmul.mubr.f32.gmra.mrb[24].mxu1 %v263_v35 }
  0xdc   : > { %1510 = vmatmul.mubr.msk.f32.gmra.mrb[24].mxu0 %vm459_vm1, %v267_v36  ;;  %854 = vmatprep.mubr.f32.mxu1 %v271_v37 }
  0xdd   : > { %1512 = vmatprep.mubr.msk.f32.mxu0 %vm1869_vm0, %v1870_v63 }
  0xdf   : > { %855 = vmatmul.mubr.f32.gmra.mrb[26].mxu1 %v270_v38 }
  0xe0   : > { %1513 = vmatmul.mubr.msk.f32.gmra.mrb[26].mxu0 %vm459_vm1, %v274_v39  ;;  %859 = vmatprep.mubr.f32.mxu1 %v278_v40 }
  0xe1   : > { %1515 = vmatprep.mubr.msk.f32.mxu0 %vm1869_vm0, %v1870_v63 }
  0xe3   : > { %860 = vmatmul.mubr.f32.gmra.mrb[28].mxu1 %v277_v41 }
  0xe4   : > { %1516 = vmatmul.mubr.msk.f32.gmra.mrb[28].mxu0 %vm459_vm1, %v281_v42  ;;  %864 = vmatprep.mubr.f32.mxu1 %v285_v43 }
  0xe5   : > { %1518 = vmatprep.mubr.msk.f32.mxu0 %vm1869_vm0, %v1870_v63 }
  0xe7   : > { %865 = vmatmul.mubr.f32.gmra.mrb[30].mxu1 %v284_v44 }
  0xe8   : > { %1519 = vmatmul.mubr.msk.f32.gmra.mrb[30].mxu0 %vm459_vm1, %v288_v45  ;;  %869 = vmatprep.mubr.f32.mxu1 %v292_v46 }
  0xe9   : > { %1521 = vmatprep.mubr.msk.f32.mxu0 %vm1869_vm0, %v1870_v63 }
  0xeb   : > { %870 = vmatmul.mubr.f32.gmra.mrb[32].mxu1 %v291_v47 }
  0xec   : > { %1522 = vmatmul.mubr.msk.f32.gmra.mrb[32].mxu0 %vm459_vm1, %v295_v48  ;;  %874 = vmatprep.mubr.f32.mxu1 %v299_v49 }
  0xed   : > { %1524 = vmatprep.mubr.msk.f32.mxu0 %vm1869_vm0, %v1870_v63 }
  0xef   : > { %875 = vmatmul.mubr.f32.gmra.mrb[34].mxu1 %v298_v50 }
  0xf0   : > { %1525 = vmatmul.mubr.msk.f32.gmra.mrb[34].mxu0 %vm459_vm1, %v302_v51  ;;  %879 = vmatprep.mubr.f32.mxu1 %v306_v52 }
  0xf1   : > { %1527 = vmatprep.mubr.msk.f32.mxu0 %vm1869_vm0, %v1870_v63 }
  0xf3   : > { %880 = vmatmul.mubr.f32.gmra.mrb[36].mxu1 %v305_v53 }
  0xf4   : > { %1528 = vmatmul.mubr.msk.f32.gmra.mrb[36].mxu0 %vm459_vm1, %v309_v54  ;;  %884 = vmatprep.mubr.f32.mxu1 %v313_v55 }
  0xf5   : > { %1530 = vmatprep.mubr.msk.f32.mxu0 %vm1869_vm0, %v1870_v63 }
  0xf7   : > { %885 = vmatmul.mubr.f32.gmra.mrb[38].mxu1 %v312_v56 }
  0xf8   : > { %1531 = vmatmul.mubr.msk.f32.gmra.mrb[38].mxu0 %vm459_vm1, %v316_v57  ;;  %889 = vmatprep.mubr.f32.mxu1 %v320_v58 }
  0xf9   : > { %1533 = vmatprep.mubr.msk.f32.mxu0 %vm1869_vm0, %v1870_v63 }
  0xfb   : > { %890 = vmatmul.mubr.f32.gmra.mrb[40].mxu1 %v319_v59 }
  0xfc   : > { %1534 = vmatmul.mubr.msk.f32.gmra.mrb[40].mxu0 %vm459_vm1, %v323_v60  ;;  %894 = vmatprep.mubr.f32.mxu1 %v327_v61 }
  0xfd   : > { %1536 = vmatprep.mubr.msk.f32.mxu0 %vm1869_vm0, %v1870_v63 }
  0xff   : > { %895 = vmatmul.mubr.f32.gmra.mrb[42].mxu1 %v326_v62 }
 0x100   : > { %1537 = vmatmul.mubr.msk.f32.gmra.mrb[42].mxu0 %vm459_vm1, %v330_v0  ;;  %899 = vmatprep.mubr.f32.mxu1 %v334_v1 }
 0x101   : > { %1539 = vmatprep.mubr.msk.f32.mxu0 %vm1869_vm0, %v1870_v63 }
 0x103   : > { %900 = vmatmul.mubr.f32.gmra.mrb[44].mxu1 %v333_v2 }
 0x104   : > { %1540 = vmatmul.mubr.msk.f32.gmra.mrb[44].mxu0 %vm459_vm1, %v337_v4  ;;  %904 = vmatprep.mubr.f32.mxu1 %v341_v5 }
 0x105   : > { %1542 = vmatprep.mubr.msk.f32.mxu0 %vm1869_vm0, %v1870_v63 }
 0x107   : > { %905 = vmatmul.mubr.f32.gmra.mrb[46].mxu1 %v340_v6 }
 0x108   : > { %1543 = vmatmul.mubr.msk.f32.gmra.mrb[46].mxu0 %vm459_vm1, %v344_v7  ;;  %909 = vmatprep.mubr.f32.mxu1 %v348_v8 }
 0x109   : > { %1545 = vmatprep.mubr.msk.f32.mxu0 %vm1869_vm0, %v1870_v63 }
 0x10b   : > { %910 = vmatmul.mubr.f32.gmra.mrb[48].mxu1 %v347_v9 }
 0x10c   : > { %1546 = vmatmul.mubr.msk.f32.gmra.mrb[48].mxu0 %vm459_vm1, %v351_v10 }
 0x17e   : > { %v791_v12 = vpop.f32.mrb[0].mxu1 }
 0x17f   : > { %v1698_v13 = vadd.f32 %v2510_v11, %v791_v12  ;;  %v1171_v14 = vpop.f32.mrb[0].mxu0  ;;  %v793_v15 = vpop.f32.mrb[1].mxu1 }
 0x180   : > { %v1475_v16 = vpop.f32.mrb[1].mxu0 }
 0x181   : > { %v1699_v17 = vadd.f32 %v1698_v13, %v1171_v14 }
 0x182   : > { %v796_v63 = vpop.f32.mrb[2].mxu1 }
 0x183   : > { %v1295_v18 = vmax.f32 %v1699_v17, 0.0  ;;  %v1700_v19 = vadd.f32 %v2510_v11, %v796_v63  ;;  %v1176_v20 = vpop.f32.mrb[2].mxu0  ;;  %v798_v21 = vpop.f32.mrb[3].mxu1 }
 0x184   : > { %v1478_v22 = vpop.f32.mrb[3].mxu0 }
 0x185   : > { %1320 = vst.msk [vmem:[%s2517_s15] sm:$0xff] %vm459_vm1, %v1295_v18  ;;  %v1701_v23 = vadd.f32 %v1700_v19, %v1176_v20 }
 0x186   : > { %v801_v24 = vpop.f32.mrb[4].mxu1 }
 0x187   : > { %v1296_v25 = vmax.f32 %v1701_v23, 0.0  ;;  %v1702_v26 = vadd.f32 %v2510_v11, %v801_v24  ;;  %v1181_v27 = vpop.f32.mrb[4].mxu0  ;;  %v803_v28 = vpop.f32.mrb[5].mxu1 }
 0x188   : > { %v1481_v29 = vpop.f32.mrb[5].mxu0 }
 0x189   : > { %1321 = vst.msk [vmem:[%s2517_s15 + $0x8] sm:$0xff] %vm459_vm1, %v1296_v25  ;;  %v1703_v30 = vadd.f32 %v1702_v26, %v1181_v27 }
 0x18a   : > { %v806_v31 = vpop.f32.mrb[6].mxu1 }
 0x18b   : > { %v1297_v32 = vmax.f32 %v1703_v30, 0.0  ;;  %v1704_v3 = vadd.f32 %v2510_v11, %v806_v31  ;;  %v1186_v33 = vpop.f32.mrb[6].mxu0  ;;  %v808_v34 = vpop.f32.mrb[7].mxu1 }
 0x18c   : > { %v1484_v35 = vpop.f32.mrb[7].mxu0 }
 0x18d   : > { %1322 = vst.msk [vmem:[%s2517_s15 + $0x10] sm:$0xff] %vm459_vm1, %v1297_v32  ;;  %v1705_v36 = vadd.f32 %v1704_v3, %v1186_v33 }
 0x18e   : > { %v811_v37 = vpop.f32.mrb[8].mxu1 }
 0x18f   : > { %v1298_v38 = vmax.f32 %v1705_v36, 0.0  ;;  %v1706_v39 = vadd.f32 %v2510_v11, %v811_v37  ;;  %v1191_v40 = vpop.f32.mrb[8].mxu0  ;;  %v813_v41 = vpop.f32.mrb[9].mxu1 }
 0x190   : > { %v1487_v42 = vpop.f32.mrb[9].mxu0 }
 0x191   : > { %1323 = vst.msk [vmem:[%s2517_s15 + $0x18] sm:$0xff] %vm459_vm1, %v1298_v38  ;;  %v1707_v43 = vadd.f32 %v1706_v39, %v1191_v40 }
 0x192   : > { %v816_v44 = vpop.f32.mrb[10].mxu1 }
 0x193   : > { %v1299_v45 = vmax.f32 %v1707_v43, 0.0  ;;  %v1708_v46 = vadd.f32 %v2510_v11, %v816_v44  ;;  %v1196_v47 = vpop.f32.mrb[10].mxu0  ;;  %v818_v48 = vpop.f32.mrb[11].mxu1 }
 0x194   : > { %v1490_v49 = vpop.f32.mrb[11].mxu0 }
 0x195   : > { %1324 = vst.msk [vmem:[%s2517_s15 + $0x20] sm:$0xff] %vm459_vm1, %v1299_v45  ;;  %v1709_v50 = vadd.f32 %v1708_v46, %v1196_v47 }
 0x196   : > { %v821_v51 = vpop.f32.mrb[12].mxu1 }
 0x197   : > { %v1300_v52 = vmax.f32 %v1709_v50, 0.0  ;;  %v1710_v53 = vadd.f32 %v2510_v11, %v821_v51  ;;  %v1201_v54 = vpop.f32.mrb[12].mxu0  ;;  %v823_v55 = vpop.f32.mrb[13].mxu1 }
 0x198   : > { %v1493_v56 = vpop.f32.mrb[13].mxu0 }
 0x199   : > { %1325 = vst.msk [vmem:[%s2517_s15 + $0x28] sm:$0xff] %vm459_vm1, %v1300_v52  ;;  %v1711_v57 = vadd.f32 %v1710_v53, %v1201_v54 }
 0x19a   : > { %v826_v58 = vpop.f32.mrb[14].mxu1 }
 0x19b   : > { %v1301_v59 = vmax.f32 %v1711_v57, 0.0  ;;  %v1712_v60 = vadd.f32 %v2510_v11, %v826_v58  ;;  %v1206_v61 = vpop.f32.mrb[14].mxu0  ;;  %v828_v62 = vpop.f32.mrb[15].mxu1 }
 0x19c   : > { %v1496_v0 = vpop.f32.mrb[15].mxu0 }
 0x19d   : > { %1326 = vst.msk [vmem:[%s2517_s15 + $0x30] sm:$0xff] %vm459_vm1, %v1301_v59  ;;  %v1713_v1 = vadd.f32 %v1712_v60, %v1206_v61 }
 0x19e   : > { %v831_v2 = vpop.f32.mrb[16].mxu1 }
 0x19f   : > { %v1302_v4 = vmax.f32 %v1713_v1, 0.0  ;;  %v1714_v5 = vadd.f32 %v2510_v11, %v831_v2  ;;  %v1211_v6 = vpop.f32.mrb[16].mxu0  ;;  %v833_v7 = vpop.f32.mrb[17].mxu1 }
 0x1a0   : > { %v1499_v8 = vpop.f32.mrb[17].mxu0 }
 0x1a1   : > { %1327 = vst.msk [vmem:[%s2517_s15 + $0x38] sm:$0xff] %vm459_vm1, %v1302_v4  ;;  %v1715_v9 = vadd.f32 %v1714_v5, %v1211_v6 }
 0x1a2   : > { %v836_v10 = vpop.f32.mrb[18].mxu1 }
 0x1a3   : > { %v1303_v12 = vmax.f32 %v1715_v9, 0.0  ;;  %v1716_v13 = vadd.f32 %v2510_v11, %v836_v10  ;;  %v1216_v14 = vpop.f32.mrb[18].mxu0  ;;  %v838_v15 = vpop.f32.mrb[19].mxu1 }
 0x1a4   : > { %v1502_v16 = vpop.f32.mrb[19].mxu0 }
 0x1a5   : > { %1328 = vst.msk [vmem:[%s2517_s15 + $0x40] sm:$0xff] %vm459_vm1, %v1303_v12  ;;  %v1717_v17 = vadd.f32 %v1716_v13, %v1216_v14 }
 0x1a6   : > { %v841_v63 = vpop.f32.mrb[20].mxu1 }
 0x1a7   : > { %v1304_v18 = vmax.f32 %v1717_v17, 0.0  ;;  %v1718_v19 = vadd.f32 %v2510_v11, %v841_v63  ;;  %v1221_v20 = vpop.f32.mrb[20].mxu0  ;;  %v843_v21 = vpop.f32.mrb[21].mxu1 }
 0x1a8   : > { %v1505_v22 = vpop.f32.mrb[21].mxu0 }
 0x1a9   : > { %1329 = vst.msk [vmem:[%s2517_s15 + $0x48] sm:$0xff] %vm459_vm1, %v1304_v18  ;;  %v1719_v23 = vadd.f32 %v1718_v19, %v1221_v20 }
 0x1aa   : > { %v846_v24 = vpop.f32.mrb[22].mxu1 }
 0x1ab   : > { %v1305_v25 = vmax.f32 %v1719_v23, 0.0  ;;  %v1720_v26 = vadd.f32 %v2510_v11, %v846_v24  ;;  %v1226_v27 = vpop.f32.mrb[22].mxu0  ;;  %v848_v28 = vpop.f32.mrb[23].mxu1 }
 0x1ac   : > { %v1508_v29 = vpop.f32.mrb[23].mxu0 }
 0x1ad   : > { %1330 = vst.msk [vmem:[%s2517_s15 + $0x50] sm:$0xff] %vm459_vm1, %v1305_v25  ;;  %v1721_v30 = vadd.f32 %v1720_v26, %v1226_v27 }
 0x1ae   : > { %v851_v31 = vpop.f32.mrb[24].mxu1 }
 0x1af   : > { %v1306_v32 = vmax.f32 %v1721_v30, 0.0  ;;  %v1722_v3 = vadd.f32 %v2510_v11, %v851_v31  ;;  %v1231_v33 = vpop.f32.mrb[24].mxu0  ;;  %v853_v34 = vpop.f32.mrb[25].mxu1 }
 0x1b0   : > { %v1511_v35 = vpop.f32.mrb[25].mxu0 }
 0x1b1   : > { %1331 = vst.msk [vmem:[%s2517_s15 + $0x58] sm:$0xff] %vm459_vm1, %v1306_v32  ;;  %v1723_v36 = vadd.f32 %v1722_v3, %v1231_v33 }
 0x1b2   : > { %v856_v37 = vpop.f32.mrb[26].mxu1 }
 0x1b3   : > { %v1307_v38 = vmax.f32 %v1723_v36, 0.0  ;;  %v1724_v39 = vadd.f32 %v2510_v11, %v856_v37  ;;  %v1236_v40 = vpop.f32.mrb[26].mxu0  ;;  %v858_v41 = vpop.f32.mrb[27].mxu1 }
 0x1b4   : > { %v1514_v42 = vpop.f32.mrb[27].mxu0 }
 0x1b5   : > { %1332 = vst.msk [vmem:[%s2517_s15 + $0x60] sm:$0xff] %vm459_vm1, %v1307_v38  ;;  %v1725_v43 = vadd.f32 %v1724_v39, %v1236_v40 }
 0x1b6   : > { %v861_v44 = vpop.f32.mrb[28].mxu1 }
 0x1b7   : > { %v1308_v45 = vmax.f32 %v1725_v43, 0.0  ;;  %v1726_v46 = vadd.f32 %v2510_v11, %v861_v44  ;;  %v1241_v47 = vpop.f32.mrb[28].mxu0  ;;  %v863_v48 = vpop.f32.mrb[29].mxu1 }
 0x1b8   : > { %v1517_v49 = vpop.f32.mrb[29].mxu0 }
 0x1b9   : > { %1333 = vst.msk [vmem:[%s2517_s15 + $0x68] sm:$0xff] %vm459_vm1, %v1308_v45  ;;  %v1727_v50 = vadd.f32 %v1726_v46, %v1241_v47 }
 0x1ba   : > { %v866_v51 = vpop.f32.mrb[30].mxu1 }
 0x1bb   : > { %v1309_v52 = vmax.f32 %v1727_v50, 0.0  ;;  %v1728_v53 = vadd.f32 %v2510_v11, %v866_v51  ;;  %v1246_v54 = vpop.f32.mrb[30].mxu0  ;;  %v868_v55 = vpop.f32.mrb[31].mxu1 }
 0x1bc   : > { %v1520_v56 = vpop.f32.mrb[31].mxu0 }
 0x1bd   : > { %1334 = vst.msk [vmem:[%s2517_s15 + $0x70] sm:$0xff] %vm459_vm1, %v1309_v52  ;;  %v1729_v57 = vadd.f32 %v1728_v53, %v1246_v54 }
 0x1be   : > { %v871_v58 = vpop.f32.mrb[32].mxu1 }
 0x1bf   : > { %v1310_v59 = vmax.f32 %v1729_v57, 0.0  ;;  %v1730_v60 = vadd.f32 %v2510_v11, %v871_v58  ;;  %v1251_v61 = vpop.f32.mrb[32].mxu0  ;;  %v873_v62 = vpop.f32.mrb[33].mxu1 }
 0x1c0   : > { %v1523_v0 = vpop.f32.mrb[33].mxu0 }
 0x1c1   : > { %1335 = vst.msk [vmem:[%s2517_s15 + $0x78] sm:$0xff] %vm459_vm1, %v1310_v59  ;;  %v1731_v1 = vadd.f32 %v1730_v60, %v1251_v61 }
 0x1c2   : > { %v876_v2 = vpop.f32.mrb[34].mxu1 }
 0x1c3   : > { %v1311_v4 = vmax.f32 %v1731_v1, 0.0  ;;  %v1732_v5 = vadd.f32 %v2510_v11, %v876_v2  ;;  %v1256_v6 = vpop.f32.mrb[34].mxu0  ;;  %v878_v7 = vpop.f32.mrb[35].mxu1 }
 0x1c4   : > { %v1526_v8 = vpop.f32.mrb[35].mxu0 }
 0x1c5   : > { %1336 = vst.msk [vmem:[%s2517_s15 + $0x80] sm:$0xff] %vm459_vm1, %v1311_v4  ;;  %v1733_v9 = vadd.f32 %v1732_v5, %v1256_v6 }
 0x1c6   : > { %v881_v10 = vpop.f32.mrb[36].mxu1 }
 0x1c7   : > { %v1312_v12 = vmax.f32 %v1733_v9, 0.0  ;;  %v1734_v13 = vadd.f32 %v2510_v11, %v881_v10  ;;  %v1261_v14 = vpop.f32.mrb[36].mxu0  ;;  %v883_v15 = vpop.f32.mrb[37].mxu1 }
 0x1c8   : > { %v1529_v16 = vpop.f32.mrb[37].mxu0 }
 0x1c9   : > { %1337 = vst.msk [vmem:[%s2517_s15 + $0x88] sm:$0xff] %vm459_vm1, %v1312_v12  ;;  %v1735_v17 = vadd.f32 %v1734_v13, %v1261_v14 }
 0x1ca   : > { %v886_v63 = vpop.f32.mrb[38].mxu1 }
 0x1cb   : > { %v1313_v18 = vmax.f32 %v1735_v17, 0.0  ;;  %v1736_v19 = vadd.f32 %v2510_v11, %v886_v63  ;;  %v1266_v20 = vpop.f32.mrb[38].mxu0  ;;  %v888_v21 = vpop.f32.mrb[39].mxu1 }
 0x1cc   : > { %v1532_v22 = vpop.f32.mrb[39].mxu0 }
 0x1cd   : > { %1338 = vst.msk [vmem:[%s2517_s15 + $0x90] sm:$0xff] %vm459_vm1, %v1313_v18  ;;  %v1737_v23 = vadd.f32 %v1736_v19, %v1266_v20 }
 0x1ce   : > { %v891_v24 = vpop.f32.mrb[40].mxu1 }
 0x1cf   : > { %v1314_v25 = vmax.f32 %v1737_v23, 0.0  ;;  %v1738_v26 = vadd.f32 %v2510_v11, %v891_v24  ;;  %v1271_v27 = vpop.f32.mrb[40].mxu0  ;;  %v893_v28 = vpop.f32.mrb[41].mxu1 }
 0x1d0   : > { %v1535_v29 = vpop.f32.mrb[41].mxu0 }
 0x1d1   : > { %1339 = vst.msk [vmem:[%s2517_s15 + $0x98] sm:$0xff] %vm459_vm1, %v1314_v25  ;;  %v1739_v30 = vadd.f32 %v1738_v26, %v1271_v27 }
 0x1d2   : > { %v896_v31 = vpop.f32.mrb[42].mxu1 }
 0x1d3   : > { %v1315_v32 = vmax.f32 %v1739_v30, 0.0  ;;  %v1740_v3 = vadd.f32 %v2510_v11, %v896_v31  ;;  %v1276_v33 = vpop.f32.mrb[42].mxu0  ;;  %v898_v34 = vpop.f32.mrb[43].mxu1 }
 0x1d4   : > { %v1538_v35 = vpop.f32.mrb[43].mxu0 }
 0x1d5   : > { %1340 = vst.msk [vmem:[%s2517_s15 + $0xa0] sm:$0xff] %vm459_vm1, %v1315_v32  ;;  %v1741_v36 = vadd.f32 %v1740_v3, %v1276_v33 }
 0x1d6   : > { %v901_v37 = vpop.f32.mrb[44].mxu1 }
 0x1d7   : > { %v1316_v38 = vmax.f32 %v1741_v36, 0.0  ;;  %v1742_v39 = vadd.f32 %v2510_v11, %v901_v37  ;;  %v1281_v40 = vpop.f32.mrb[44].mxu0  ;;  %v903_v41 = vpop.f32.mrb[45].mxu1 }
 0x1d8   : > { %v1541_v42 = vpop.f32.mrb[45].mxu0 }
 0x1d9   : > { %1341 = vst.msk [vmem:[%s2517_s15 + $0xa8] sm:$0xff] %vm459_vm1, %v1316_v38  ;;  %v1743_v43 = vadd.f32 %v1742_v39, %v1281_v40 }
 0x1da   : > { %v906_v44 = vpop.f32.mrb[46].mxu1 }
 0x1db   : > { %v1317_v45 = vmax.f32 %v1743_v43, 0.0  ;;  %v1744_v46 = vadd.f32 %v2510_v11, %v906_v44  ;;  %v1286_v47 = vpop.f32.mrb[46].mxu0  ;;  %v908_v48 = vpop.f32.mrb[47].mxu1 }
 0x1dc   : > { %v1544_v49 = vpop.f32.mrb[47].mxu0 }
 0x1dd   : > { %1342 = vst.msk [vmem:[%s2517_s15 + $0xb0] sm:$0xff] %vm459_vm1, %v1317_v45  ;;  %v1745_v50 = vadd.f32 %v1744_v46, %v1286_v47 }
 0x1de   : > { %v911_v51 = vpop.f32.mrb[48].mxu1 }
 0x1df   : > { %v1318_v52 = vmax.f32 %v1745_v50, 0.0  ;;  %v1746_v53 = vadd.f32 %v2510_v11, %v911_v51  ;;  %v1291_v54 = vpop.f32.mrb[48].mxu0  ;;  %v913_v55 = vpop.f32.mrb[49].mxu1 }
 0x1e0   : > { %v1547_v56 = vpop.f32.mrb[49].mxu0 }
 0x1e1   : > { %1343 = vst.msk [vmem:[%s2517_s15 + $0xb8] sm:$0xff] %vm459_vm1, %v1318_v52  ;;  %v1747_v57 = vadd.f32 %v1746_v53, %v1291_v54 }
 0x1e3   : > { %v1319_v58 = vmax.f32 %v1747_v57, 0.0 }
 0x1e5   : > { %1344 = vst.msk [vmem:[%s2517_s15 + $0xc0] sm:$0xff] %vm459_vm1, %v1319_v58 }
 0x1e6 PF: > { %s13_s12 = sadd.s32 1, %s1866_s12  }
 0x1e7   : > { %p10_p4 = scmp.ge.s32.totalorder %s13_s12, 6  }
 0x1e9   :  { %12 = sbr.rel (!%p10_p4) target bundleno = 1 (0x1), region = 62 }

// kernel: classifier_forward.6
= control target key start
LH: loop header
LB: loop body
LE: loop exit
PB: predicated region body
PF: predicated region fallthrough
CT: control target
= control target key end

     0   :  { %s2113_s12 = smov 0   ;;  %s3068_s0 = inlined_call_operand.vmem [shape: f32[512,800], index: 0, kind: input, shape index: {}]   ;;  %s3069_s1 = inlined_call_operand.vmem [shape: f32[800,64], index: 1, kind: input, shape index: {}]   ;;  %s3070_s2 = inlined_call_operand.vmem [shape: f32[1,64], index: 2, kind: input, shape index: {}]   ;;  %s3071_s3 = inlined_call_operand.vmem [shape: f32[512,64], index: 3, kind: output, shape index: {}]  }
   0x1 LB: > { %s1626_s13 = sadd.s32 4294967295, %s2090_s12   ;;  %p1630_p0 = scmp.ge.s32.totalorder %s2090_s12, 1  ;;  %s2090_s12 = sphi %s2113_s12, %s13_s12  }
   0x2   : > { %p139_p1 = scmp.lt.s32.totalorder %s2090_s12, 3 }
   0x4   : > { %p140_p2 = pnand %p1630_p0, %p139_p1 }
   0x5   : > { %v401_v0 = vld [vmem:[%s3069_s1] sm:$0xff] (!%p140_p2)  ;;  %v402_v1 = vld [vmem:[%s3069_s1 + $0x8] sm:$0xff] (!%p140_p2)  ;;  %v2092_v3 = vmov (!%p140_p2), 0.0|0.0   ;;  %v403_v6 = vld [vmem:[%s3069_s1 + $0x10] sm:$0xff] (!%p140_p2)  ;;  %s1631_s30 = sshll.u32 (!%p140_p2), %s1626_s13, 5  ;;  %vm508_vm0 = vcmask (!%p140_p2), 261120  }
   0x6   : > { %143 = sbr.rel (%p140_p2) target bundleno = 511 (0x1ff), region = 32  ;;  %v433_v2 = vld [vmem:[%s3069_s1 + $0x100] sm:$0xff] (!%p140_p2)  ;;  %1762 = vmatprep.subr.bf16.mxu1 (!%p140_p2), %v2092_v3  ;;  %1810 = vmatprep.subr.bf16.mxu0 (!%p140_p2), %v2092_v3  ;;  %v1763_v4 = vpack.c.bf16 (!%p140_p2), %v402_v1, %v401_v0  ;;  %v434_v5 = vld [vmem:[%s3069_s1 + $0x108] sm:$0xff] (!%p140_p2)  ;;  %v404_v7 = vld [vmem:[%s3069_s1 + $0x18] sm:$0xff] (!%p140_p2)  ;;  %p165_p3 = scmp.lt.s32.totalorder (!%p140_p2), %s1631_s30, 63  ;;  %vm1537_vm1 = vcmask (!%p140_p2), 523264  }
   0x7   : > { %v2141_v8 = vpack.c.bf16 (!%p140_p2), %v434_v5, %v433_v2  ;;  %v435_v9 = vld [vmem:[%s3069_s1 + $0x110] sm:$0xff] (!%p140_p2)  ;;  %v436_v10 = vld [vmem:[%s3069_s1 + $0x118] sm:$0xff] (!%p140_p2)  ;;  %v1766_v11 = vpack.c.bf16 (!%p140_p2), %v404_v7, %v403_v6  ;;  %v405_v13 = vld [vmem:[%s3069_s1 + $0x20] sm:$0xff] (!%p140_p2) }
   0x8   : > { %1764 = vmatpush1.bf16.msra.mxu1 (!%p140_p2), %v1763_v4  ;;  %v2151_v12 = vpack.c.bf16 (!%p140_p2), %v436_v10, %v435_v9  ;;  %v406_v14 = vld [vmem:[%s3069_s1 + $0x28] sm:$0xff] (!%p140_p2)  ;;  %v437_v15 = vld [vmem:[%s3069_s1 + $0x120] sm:$0xff] (!%p140_p2)  ;;  %v407_v19 = vld [vmem:[%s3069_s1 + $0x30] sm:$0xff] (!%p140_p2) }
   0x9   : > { %1812 = vmatpush1.bf16.msra.mxu0 (!%p140_p2), %v2141_v8  ;;  %1765 = vmatprep.subr.bf16.mxu1 (!%p140_p2), %v2092_v3  ;;  %v438_v16 = vld [vmem:[%s3069_s1 + $0x128] sm:$0xff] (!%p140_p2)  ;;  %v1769_v17 = vpack.c.bf16 (!%p140_p2), %v406_v14, %v405_v13  ;;  %v408_v20 = vld [vmem:[%s3069_s1 + $0x38] sm:$0xff] (!%p140_p2)  ;;  %v439_v21 = vld [vmem:[%s3069_s1 + $0x130] sm:$0xff] (!%p140_p2) }
   0xa   : > { %1813 = vmatprep.subr.bf16.mxu0 (!%p140_p2), %v2092_v3  ;;  %v2168_v18 = vpack.c.bf16 (!%p140_p2), %v438_v16, %v437_v15  ;;  %v440_v22 = vld [vmem:[%s3069_s1 + $0x138] sm:$0xff] (!%p140_p2)  ;;  %v1772_v23 = vpack.c.bf16 (!%p140_p2), %v408_v20, %v407_v19  ;;  %v409_v25 = vld [vmem:[%s3069_s1 + $0x40] sm:$0xff] (!%p140_p2)  ;;  %v410_v26 = vld [vmem:[%s3069_s1 + $0x48] sm:$0xff] (!%p140_p2) }
   0xb   : > { %v2187_v24 = vpack.c.bf16 (!%p140_p2), %v440_v22, %v439_v21  ;;  %v441_v27 = vld [vmem:[%s3069_s1 + $0x140] sm:$0xff] (!%p140_p2)  ;;  %v442_v28 = vld [vmem:[%s3069_s1 + $0x148] sm:$0xff] (!%p140_p2)  ;;  %v1775_v29 = vpack.c.bf16 (!%p140_p2), %v410_v26, %v409_v25  ;;  %v411_v31 = vld [vmem:[%s3069_s1 + $0x50] sm:$0xff] (!%p140_p2) }
   0xc   : > { %1767 = vmatpush1.bf16.msra.mxu1 (!%p140_p2), %v1766_v11  ;;  %v2205_v30 = vpack.c.bf16 (!%p140_p2), %v442_v28, %v441_v27  ;;  %v412_v32 = vld [vmem:[%s3069_s1 + $0x58] sm:$0xff] (!%p140_p2)  ;;  %v443_v33 = vld [vmem:[%s3069_s1 + $0x150] sm:$0xff] (!%p140_p2)  ;;  %v413_v37 = vld [vmem:[%s3069_s1 + $0x60] sm:$0xff] (!%p140_p2) }
   0xd   : > { %1815 = vmatpush1.bf16.msra.mxu0 %v2151_v12  ;;  %1768 = vmatprep.subr.bf16.mxu1 %v2092_v3  ;;  %s3073_s30 = smov (!%p165_p3, %s1631_s30), 63  ;;  %v444_v34 = vld [vmem:[%s3069_s1 + $0x158] sm:$0xff]  ;;  %v1778_v35 = vpack.c.bf16 %v412_v32, %v411_v31  ;;  %v414_v38 = vld [vmem:[%s3069_s1 + $0x68] sm:$0xff]  ;;  %v445_v39 = vld [vmem:[%s3069_s1 + $0x160] sm:$0xff] }
   0xe   : > { %1816 = vmatprep.subr.bf16.mxu0 %v2092_v3  ;;  %s2074_s29 = smul.u32 56, %s3073_s30  ;;  %v2227_v36 = vpack.c.bf16 %v444_v34, %v443_v33  ;;  %v446_v40 = vld [vmem:[%s3069_s1 + $0x168] sm:$0xff]  ;;  %v1781_v43 = vpack.c.bf16 %v414_v38, %v413_v37  ;;  %v415_v45 = vld [vmem:[%s3069_s1 + $0x70] sm:$0xff]  ;;  %v416_v46 = vld [vmem:[%s3069_s1 + $0x78] sm:$0xff]  ;;  %s1634_s25 = sshll.u32 %s3073_s30, 3 }
   0xf   : > { %v2246_v44 = vpack.c.bf16 %v446_v40, %v445_v39  ;;  %v447_v47 = vld [vmem:[%s3069_s1 + $0x170] sm:$0xff]  ;;  %v448_v48 = vld [vmem:[%s3069_s1 + $0x178] sm:$0xff]  ;;  %v1784_v49 = vpack.c.bf16 %v416_v46, %v415_v45  ;;  %v417_v51 = vld [vmem:[%s3069_s1 + $0x80] sm:$0xff]  ;;  %s2941_s28 = scalar_lea.vmem %s3071_s3, %s1634_s25 }
  0x10   : > { %1770 = vmatpush1.bf16.msra.mxu1 %v1769_v17  ;;  %s2223_s15 = scalar_lea.vmem %s3068_s0, %s2074_s29  ;;  %v2263_v50 = vpack.c.bf16 %v448_v48, %v447_v47  ;;  %v418_v52 = vld [vmem:[%s3069_s1 + $0x88] sm:$0xff]  ;;  %v449_v53 = vld [vmem:[%s3069_s1 + $0x180] sm:$0xff]  ;;  %v419_v57 = vld [vmem:[%s3069_s1 + $0x90] sm:$0xff] }
  0x11   : > { %1818 = vmatpush1.bf16.msra.mxu0 %v2168_v18  ;;  %1771 = vmatprep.subr.bf16.mxu1 %v2092_v3  ;;  %v178_v41 = vld [vmem:[%s2223_s15 + $0x8] sm:$0xff]  ;;  %v180_v42 = vld [vmem:[%s2223_s15 + $0x18] sm:$0xff]  ;;  %v1787_v55 = vpack.c.bf16 %v418_v52, %v417_v51  ;;  %v451_v59 = vld [vmem:[%s3069_s1 + $0x190] sm:$0xff] }
  0x12   : > { %1819 = vmatprep.subr.bf16.mxu0 %v2092_v3  ;;  %669 = vmatprep.mubr.f32.mxu1 %v178_v41  ;;  %v450_v54 = vld [vmem:[%s3069_s1 + $0x188] sm:$0xff]  ;;  %v420_v58 = vld [vmem:[%s3069_s1 + $0x98] sm:$0xff]  ;;  %v421_v63 = vld [vmem:[%s3069_s1 + $0xa0] sm:$0xff] }
  0x13   : > { %894 = vmatprep.mubr.f32.mxu0 %v180_v42  ;;  %v2280_v56 = vpack.c.bf16 %v450_v54, %v449_v53  ;;  %v452_v60 = vld [vmem:[%s3069_s1 + $0x198] sm:$0xff]  ;;  %v1790_v61 = vpack.c.bf16 %v420_v58, %v419_v57  ;;  %v422_v0 = vld [vmem:[%s3069_s1 + $0xa8] sm:$0xff]  ;;  %v453_v1 = vld [vmem:[%s3069_s1 + $0x1a0] sm:$0xff] }
  0x14   : > { %1773 = vmatpush1.bf16.msra.mxu1 %v1772_v23  ;;  %v2297_v62 = vpack.c.bf16 %v452_v60, %v451_v59  ;;  %v454_v2 = vld [vmem:[%s3069_s1 + $0x1a8] sm:$0xff]  ;;  %v1793_v4 = vpack.c.bf16 %v422_v0, %v421_v63  ;;  %v423_v6 = vld [vmem:[%s3069_s1 + $0xb0] sm:$0xff]  ;;  %v424_v7 = vld [vmem:[%s3069_s1 + $0xb8] sm:$0xff] }
  0x15   : > { %1821 = vmatpush1.bf16.msra.mxu0 %v2187_v24  ;;  %1774 = vmatprep.subr.bf16.mxu1 %v2092_v3  ;;  %v2314_v5 = vpack.c.bf16 %v454_v2, %v453_v1  ;;  %v455_v9 = vld [vmem:[%s3069_s1 + $0x1b0] sm:$0xff]  ;;  %v456_v10 = vld [vmem:[%s3069_s1 + $0x1b8] sm:$0xff]  ;;  %v1796_v11 = vpack.c.bf16 %v424_v7, %v423_v6  ;;  %v425_v14 = vld [vmem:[%s3069_s1 + $0xc0] sm:$0xff] }
  0x16   : > { %1822 = vmatprep.subr.bf16.mxu0 %v2092_v3  ;;  %v2331_v13 = vpack.c.bf16 %v456_v10, %v455_v9  ;;  %v426_v15 = vld [vmem:[%s3069_s1 + $0xc8] sm:$0xff]  ;;  %v457_v16 = vld [vmem:[%s3069_s1 + $0x1c0] sm:$0xff]  ;;  %v427_v21 = vld [vmem:[%s3069_s1 + $0xd0] sm:$0xff] }
  0x17   : > { %v458_v17 = vld [vmem:[%s3069_s1 + $0x1c8] sm:$0xff]  ;;  %v1799_v19 = vpack.c.bf16 %v426_v15, %v425_v14  ;;  %v428_v22 = vld [vmem:[%s3069_s1 + $0xd8] sm:$0xff]  ;;  %v459_v23 = vld [vmem:[%s3069_s1 + $0x1d0] sm:$0xff] }
  0x18   : > { %1776 = vmatpush1.bf16.msra.mxu1 %v1775_v29  ;;  %v2348_v20 = vpack.c.bf16 %v458_v17, %v457_v16  ;;  %v460_v25 = vld [vmem:[%s3069_s1 + $0x1d8] sm:$0xff]  ;;  %v1802_v26 = vpack.c.bf16 %v428_v22, %v427_v21  ;;  %v429_v28 = vld [vmem:[%s3069_s1 + $0xe0] sm:$0xff]  ;;  %v430_v29 = vld [vmem:[%s3069_s1 + $0xe8] sm:$0xff] }
  0x19   : > { %1824 = vmatpush1.bf16.msra.mxu0 %v2205_v30  ;;  %1777 = vmatprep.subr.bf16.mxu1 %v2092_v3  ;;  %v2365_v27 = vpack.c.bf16 %v460_v25, %v459_v23  ;;  %v461_v31 = vld [vmem:[%s3069_s1 + $0x1e0] sm:$0xff]  ;;  %v462_v32 = vld [vmem:[%s3069_s1 + $0x1e8] sm:$0xff]  ;;  %v1805_v33 = vpack.c.bf16 %v430_v29, %v429_v28  ;;  %v432_v37 = vld [vmem:[%s3069_s1 + $0xf8] sm:$0xff] }
  0x1a   : > { %1825 = vmatprep.subr.bf16.mxu0 %v2092_v3  ;;  %v2382_v34 = vpack.c.bf16 %v462_v32, %v461_v31  ;;  %v463_v38 = vld [vmem:[%s3069_s1 + $0x1f0] sm:$0xff]  ;;  %v464_v39 = vld [vmem:[%s3069_s1 + $0x1f8] sm:$0xff]  ;;  %v465_v42 = vld [vmem:[%s3069_s1 + $0x200] sm:$0xff] }
  0x1b   : > { %v2399_v41 = vpack.c.bf16 %v464_v39, %v463_v38  ;;  %v177_v45 = vld [vmem:[%s2223_s15] sm:$0xff]  ;;  %v179_v46 = vld [vmem:[%s2223_s15 + $0x10] sm:$0xff]  ;;  %v468_v51 = vld [vmem:[%s3069_s1 + $0x218] sm:$0xff] }
  0x1c   : > { %1779 = vmatpush1.bf16.msra.mxu1 %v1778_v35  ;;  %v431_v35 = vld [vmem:[%s3069_s1 + $0xf0] sm:$0xff]  ;;  %v185_v48 = vld [vmem:[%s2223_s15 + $0x40] sm:$0xff]  ;;  %v184_v53 = vld [vmem:[%s2223_s15 + $0x38] sm:$0xff] }
  0x1d   : > { %1827 = vmatpush1.bf16.msra.mxu0 %v2227_v36  ;;  %1780 = vmatprep.subr.bf16.mxu1 %v2092_v3  ;;  %v1808_v40 = vpack.c.bf16 %v432_v37, %v431_v35  ;;  %v187_v52 = vld [vmem:[%s2223_s15 + $0x50] sm:$0xff]  ;;  %v186_v54 = vld [vmem:[%s2223_s15 + $0x48] sm:$0xff]  ;;  %v469_v59 = vld [vmem:[%s3069_s1 + $0x220] sm:$0xff] }
  0x1e   : > { %1828 = vmatprep.subr.bf16.mxu0 %v2092_v3  ;;  %v194_v58 = vld [vmem:[%s2223_s15 + $0x88] sm:$0xff]  ;;  %v191_v60 = vld [vmem:[%s2223_s15 + $0x70] sm:$0xff]  ;;  %v201_v1 = vld [vmem:[%s2223_s15 + $0xc0] sm:$0xff] }
  0x1f   : > { %v199_v63 = vld [vmem:[%s2223_s15 + $0xb0] sm:$0xff]  ;;  %v198_v6 = vld [vmem:[%s2223_s15 + $0xa8] sm:$0xff]  ;;  %v208_v10 = vld [vmem:[%s2223_s15 + $0xf8] sm:$0xff] }
  0x20   : > { %1782 = vmatpush1.bf16.msra.mxu1 %v1781_v43  ;;  %v466_v43 = vld [vmem:[%s3069_s1 + $0x208] sm:$0xff]  ;;  %v471_v2 = vld [vmem:[%s3069_s1 + $0x230] sm:$0xff]  ;;  %v205_v15 = vld [vmem:[%s2223_s15 + $0xe0] sm:$0xff] }
  0x21   : > { %1830 = vmatpush1.bf16.msra.mxu0 %v2246_v44  ;;  %1783 = vmatprep.subr.bf16.mxu1 %v2092_v3  ;;  %v1859_v47 = vpack.c.bf16 %v466_v43, %v465_v42  ;;  %v206_v7 = vld [vmem:[%s2223_s15 + $0xe8] sm:$0xff]  ;;  %v213_v16 = vld [vmem:[%s2223_s15 + $0x120] sm:$0xff]  ;;  %v475_v21 = vld [vmem:[%s3069_s1 + $0x250] sm:$0xff] }
  0x22   : > { %1831 = vmatprep.subr.bf16.mxu0 %v2092_v3  ;;  %v474_v14 = vld [vmem:[%s3069_s1 + $0x248] sm:$0xff]  ;;  %v476_v22 = vld [vmem:[%s3069_s1 + $0x258] sm:$0xff]  ;;  %v477_v29 = vld [vmem:[%s3069_s1 + $0x260] sm:$0xff] }
  0x23   : > { %v212_v23 = vld [vmem:[%s2223_s15 + $0x118] sm:$0xff]  ;;  %v214_v25 = vld [vmem:[%s2223_s15 + $0x128] sm:$0xff]  ;;  %v219_v32 = vld [vmem:[%s2223_s15 + $0x150] sm:$0xff] }
  0x24   : > { %1785 = vmatpush1.bf16.msra.mxu1 %v1784_v49  ;;  %v467_v49 = vld [vmem:[%s3069_s1 + $0x210] sm:$0xff]  ;;  %v222_v28 = vld [vmem:[%s2223_s15 + $0x168] sm:$0xff]  ;;  %v229_v37 = vld [vmem:[%s2223_s15 + $0x1a0] sm:$0xff] }
  0x25   : > { %1833 = vmatpush1.bf16.msra.mxu0 %v2263_v50  ;;  %1786 = vmatprep.subr.bf16.mxu1 %v2092_v3  ;;  %v1862_v57 = vpack.c.bf16 %v468_v51, %v467_v49  ;;  %v478_v31 = vld [vmem:[%s3069_s1 + $0x268] sm:$0xff]  ;;  %v479_v38 = vld [vmem:[%s3069_s1 + $0x270] sm:$0xff]  ;;  %v480_v39 = vld [vmem:[%s3069_s1 + $0x278] sm:$0xff] }
  0x26   : > { %1834 = vmatprep.subr.bf16.mxu0 %v2092_v3  ;;  %v1877_v35 = vpack.c.bf16 %v478_v31, %v477_v29  ;;  %v228_v42 = vld [vmem:[%s2223_s15 + $0x198] sm:$0xff]  ;;  %v1880_v43 = vpack.c.bf16 %v480_v39, %v479_v38  ;;  %v235_v49 = vld [vmem:[%s2223_s15 + $0x1d0] sm:$0xff]  ;;  %v241_v51 = vld [vmem:[%s2223_s15 + $0x200] sm:$0xff] }
  0x27   : > { %v277_v29 = vld [vmem:[%s2223_s15 + $0x320] sm:$0xff]  ;;  %v283_v31 = vld [vmem:[%s2223_s15 + $0x350] sm:$0xff]  ;;  %v498_v38 = vld [vmem:[%s3069_s1 + $0x308] sm:$0xff] }
  0x28   : > { %1788 = vmatpush1.bf16.msra.mxu1 %v1787_v55  ;;  %v192_v55 = vld [vmem:[%s2223_s15 + $0x78] sm:$0xff] }
  0x29   : > { %1836 = vmatpush1.bf16.msra.mxu0 %v2280_v56  ;;  %1789 = vmatprep.subr.bf16.mxu1 %v2092_v3  ;;  %v284_v39 = vld [vmem:[%s2223_s15 + $0x358] sm:$0xff] }
  0x2a   : > { %1837 = vmatprep.subr.bf16.mxu0 %v2092_v3 }
  0x2c   : > { %1791 = vmatpush1.bf16.msra.mxu1 %v1790_v61  ;;  %v193_v61 = vld [vmem:[%s2223_s15 + $0x80] sm:$0xff] }
  0x2d   : > { %1839 = vmatpush1.bf16.msra.mxu0 %v2297_v62  ;;  %1792 = vmatprep.subr.bf16.mxu1 %v2092_v3 }
  0x2e   : > { %1840 = vmatprep.subr.bf16.mxu0 %v2092_v3 }
  0x30   : > { %1794 = vmatpush1.bf16.msra.mxu1 %v1793_v4  ;;  %v472_v4 = vld [vmem:[%s3069_s1 + $0x238] sm:$0xff] }
  0x31   : > { %1842 = vmatpush1.bf16.msra.mxu0 %v2314_v5  ;;  %1795 = vmatprep.subr.bf16.mxu1 %v2092_v3  ;;  %v1868_v9 = vpack.c.bf16 %v472_v4, %v471_v2  ;;  %v257_v2 = vld [vmem:[%s2223_s15 + $0x280] sm:$0xff]  ;;  %v488_v4 = vld [vmem:[%s3069_s1 + $0x2b8] sm:$0xff] }
  0x32   : > { %1843 = vmatprep.subr.bf16.mxu0 %v2092_v3 }
  0x34   : > { %1797 = vmatpush1.bf16.msra.mxu1 %v1796_v11  ;;  %v473_v11 = vld [vmem:[%s3069_s1 + $0x240] sm:$0xff] }
  0x35   : > { %1845 = vmatpush1.bf16.msra.mxu0 %v2331_v13  ;;  %1798 = vmatprep.subr.bf16.mxu1 %v2092_v3  ;;  %v1871_v17 = vpack.c.bf16 %v474_v14, %v473_v11  ;;  %v490_v11 = vld [vmem:[%s3069_s1 + $0x2c8] sm:$0xff]  ;;  %v261_v14 = vld [vmem:[%s2223_s15 + $0x2a0] sm:$0xff] }
  0x36   : > { %1846 = vmatprep.subr.bf16.mxu0 %v2092_v3 }
  0x38   : > { %1800 = vmatpush1.bf16.msra.mxu1 %v1799_v19  ;;  %v215_v19 = vld [vmem:[%s2223_s15 + $0x130] sm:$0xff] }
  0x39   : > { %1848 = vmatpush1.bf16.msra.mxu0 %v2348_v20  ;;  %1801 = vmatprep.subr.bf16.mxu1 %v2092_v3 }
  0x3a   : > { %1849 = vmatprep.subr.bf16.mxu0 %v2092_v3 }
  0x3c   : > { %1803 = vmatpush1.bf16.msra.mxu1 %v1802_v26  ;;  %v1874_v26 = vpack.c.bf16 %v476_v22, %v475_v21  ;;  %v268_v21 = vld [vmem:[%s2223_s15 + $0x2d8] sm:$0xff]  ;;  %v270_v22 = vld [vmem:[%s2223_s15 + $0x2e8] sm:$0xff] }
  0x3d   : > { %1851 = vmatpush1.bf16.msra.mxu0 %v2365_v27  ;;  %1804 = vmatprep.subr.bf16.mxu1 %v2092_v3 }
  0x3e   : > { %1852 = vmatprep.subr.bf16.mxu0 %v2092_v3 }
  0x40   : > { %1806 = vmatpush1.bf16.msra.mxu1 %v1805_v33  ;;  %v221_v33 = vld [vmem:[%s2223_s15 + $0x160] sm:$0xff] }
  0x41   : > { %1854 = vmatpush1.bf16.msra.mxu0 %v2382_v34  ;;  %1807 = vmatprep.subr.bf16.mxu1 %v2092_v3 }
  0x42   : > { %1855 = vmatprep.subr.bf16.mxu0 %v2092_v3 }
  0x44   : > { %1809 = vmatpush1.bf16.msra.mxu1 %v1808_v40  ;;  %v226_v40 = vld [vmem:[%s2223_s15 + $0x188] sm:$0xff] }
  0x45   : > { %1857 = vmatpush1.bf16.msra.mxu0 %v2399_v41  ;;  %1914 = vmatprep.subr.bf16.mxu1 %v2092_v3 }
  0x46   : > { %1858 = vmatprep.subr.bf16.mxu0 %v2092_v3 }
  0x47   : > { %670 = vmatmul.mubr.f32.vlgmr.msra.gmra.mrb[0].mxu1 %v177_v45  ;;  %v236_v45 = vld [vmem:[%s2223_s15 + $0x1d8] sm:$0xff] }
  0x48   : > { %895 = vmatmul.mubr.f32.vlgmr.msra.gmra.mrb[0].mxu0 %v179_v46  ;;  %1930 = vmatpush1.bf16.msra.mxu1 %v2141_v8  ;;  %v470_v8 = vld [vmem:[%s3069_s1 + $0x228] sm:$0xff]  ;;  %v481_v46 = vld [vmem:[%s3069_s1 + $0x280] sm:$0xff] }
  0x49   : > { %1860 = vmatpush1.bf16.msra.mxu0 %v1859_v47  ;;  %674 = vmatprep.mubr.f32.mxu1 %v185_v48  ;;  %v1865_v0 = vpack.c.bf16 %v470_v8, %v469_v59  ;;  %v482_v47 = vld [vmem:[%s3069_s1 + $0x288] sm:$0xff]  ;;  %v233_v48 = vld [vmem:[%s2223_s15 + $0x1c0] sm:$0xff] }
  0x4a   : > { %899 = vmatprep.mubr.f32.mxu0 %v187_v52  ;;  %1861 = vmatprep.subr.bf16.mxu0 %v2092_v3  ;;  %v1883_v52 = vpack.c.bf16 %v482_v47, %v481_v46  ;;  %v250_v8 = vld [vmem:[%s2223_s15 + $0x248] sm:$0xff]  ;;  %v297_v46 = vld [vmem:[%s2223_s15 + $0x3c0] sm:$0xff]  ;;  %v299_v47 = vld [vmem:[%s2223_s15 + $0x3d0] sm:$0xff] }
  0x4b   : > { %675 = vmatmul.mubr.f32.gmra.mrb[2].mxu1 %v184_v53  ;;  %1915 = vmatprep.subr.bf16.mxu1 %v2092_v3  ;;  %v243_v53 = vld [vmem:[%s2223_s15 + $0x210] sm:$0xff] }
  0x4c   : > { %900 = vmatmul.mubr.f32.gmra.mrb[2].mxu0 %v186_v54  ;;  %679 = vmatprep.mubr.f32.mxu1 %v192_v55  ;;  %v484_v54 = vld [vmem:[%s3069_s1 + $0x298] sm:$0xff] }
  0x4d   : > { %904 = vmatprep.mubr.f32.mxu0 %v194_v58  ;;  %1863 = vmatpush1.bf16.msra.mxu0 %v1862_v57  ;;  %v240_v55 = vld [vmem:[%s2223_s15 + $0x1f8] sm:$0xff]  ;;  %v242_v57 = vld [vmem:[%s2223_s15 + $0x208] sm:$0xff] }
  0x4e   : > { %1931 = vmatpush1.bf16.msra.mxu1 %v2151_v12  ;;  %1864 = vmatprep.subr.bf16.mxu0 %v2092_v3  ;;  %v200_v12 = vld [vmem:[%s2223_s15 + $0xb8] sm:$0xff] }
  0x4f   : > { %680 = vmatmul.mubr.f32.gmra.mrb[4].mxu1 %v191_v60  ;;  %1916 = vmatprep.subr.bf16.mxu1 %v2092_v3  ;;  %v248_v58 = vld [vmem:[%s2223_s15 + $0x238] sm:$0xff]  ;;  %v486_v60 = vld [vmem:[%s3069_s1 + $0x2a8] sm:$0xff] }
  0x50   : > { %905 = vmatmul.mubr.f32.gmra.mrb[4].mxu0 %v193_v61  ;;  %684 = vmatprep.mubr.f32.mxu1 %v199_v63  ;;  %v247_v61 = vld [vmem:[%s2223_s15 + $0x230] sm:$0xff]  ;;  %v249_v63 = vld [vmem:[%s2223_s15 + $0x240] sm:$0xff] }
  0x51   : > { %909 = vmatprep.mubr.f32.mxu0 %v201_v1  ;;  %1866 = vmatpush1.bf16.msra.mxu0 %v1865_v0  ;;  %v255_v0 = vld [vmem:[%s2223_s15 + $0x270] sm:$0xff] }
  0x52   : > { %1932 = vmatpush1.bf16.msra.mxu1 %v2168_v18  ;;  %1867 = vmatprep.subr.bf16.mxu0 %v2092_v3  ;;  %v207_v18 = vld [vmem:[%s2223_s15 + $0xf0] sm:$0xff] }
  0x53   : > { %685 = vmatmul.mubr.f32.gmra.mrb[6].mxu1 %v198_v6  ;;  %1917 = vmatprep.subr.bf16.mxu1 %v2092_v3  ;;  %v254_v6 = vld [vmem:[%s2223_s15 + $0x268] sm:$0xff] }
  0x54   : > { %910 = vmatmul.mubr.f32.gmra.mrb[6].mxu0 %v200_v12  ;;  %689 = vmatprep.mubr.f32.mxu1 %v206_v7  ;;  %v256_v12 = vld [vmem:[%s2223_s15 + $0x278] sm:$0xff]  ;;  %v262_v7 = vld [vmem:[%s2223_s15 + $0x2a8] sm:$0xff] }
  0x55   : > { %914 = vmatprep.mubr.f32.mxu0 %v208_v10  ;;  %1869 = vmatpush1.bf16.msra.mxu0 %v1868_v9  ;;  %v264_v10 = vld [vmem:[%s2223_s15 + $0x2b8] sm:$0xff] }
  0x56   : > { %1870 = vmatprep.subr.bf16.mxu0 %v2092_v3  ;;  %1933 = vmatpush1.bf16.msra.mxu1 %v2187_v24  ;;  %v220_v24 = vld [vmem:[%s2223_s15 + $0x158] sm:$0xff] }
  0x57   : > { %690 = vmatmul.mubr.f32.gmra.mrb[8].mxu1 %v205_v15  ;;  %1918 = vmatprep.subr.bf16.mxu1 %v2092_v3  ;;  %v263_v15 = vld [vmem:[%s2223_s15 + $0x2b0] sm:$0xff] }
  0x58   : > { %915 = vmatmul.mubr.f32.gmra.mrb[8].mxu0 %v207_v18  ;;  %694 = vmatprep.mubr.f32.mxu1 %v213_v16  ;;  %v269_v18 = vld [vmem:[%s2223_s15 + $0x2e0] sm:$0xff] }
  0x59   : > { %919 = vmatprep.mubr.f32.mxu0 %v215_v19  ;;  %1872 = vmatpush1.bf16.msra.mxu0 %v1871_v17  ;;  %v271_v17 = vld [vmem:[%s2223_s15 + $0x2f0] sm:$0xff]  ;;  %v492_v19 = vld [vmem:[%s3069_s1 + $0x2d8] sm:$0xff] }
  0x5a   : > { %1873 = vmatprep.subr.bf16.mxu0 %v2092_v3  ;;  %1934 = vmatpush1.bf16.msra.mxu1 %v2205_v30  ;;  %v227_v30 = vld [vmem:[%s2223_s15 + $0x190] sm:$0xff] }
  0x5b   : > { %695 = vmatmul.mubr.f32.gmra.mrb[10].mxu1 %v212_v23  ;;  %1919 = vmatprep.subr.bf16.mxu1 %v2092_v3  ;;  %v276_v23 = vld [vmem:[%s2223_s15 + $0x318] sm:$0xff] }
  0x5c   : > { %920 = vmatmul.mubr.f32.gmra.mrb[10].mxu0 %v214_v25  ;;  %699 = vmatprep.mubr.f32.mxu1 %v220_v24  ;;  %v278_v24 = vld [vmem:[%s2223_s15 + $0x328] sm:$0xff] }
  0x5d   : > { %924 = vmatprep.mubr.f32.mxu0 %v222_v28  ;;  %1875 = vmatpush1.bf16.msra.mxu0 %v1874_v26  ;;  %v494_v26 = vld [vmem:[%s3069_s1 + $0x2e8] sm:$0xff]  ;;  %v275_v28 = vld [vmem:[%s2223_s15 + $0x310] sm:$0xff] }
  0x5e   : > { %1876 = vmatprep.subr.bf16.mxu0 %v2092_v3  ;;  %1935 = vmatpush1.bf16.msra.mxu1 %v2227_v36  ;;  %v234_v36 = vld [vmem:[%s2223_s15 + $0x1c8] sm:$0xff] }
  0x5f   : > { %700 = vmatmul.mubr.f32.gmra.mrb[12].mxu1 %v219_v32  ;;  %1920 = vmatprep.subr.bf16.mxu1 %v2092_v3 }
  0x60   : > { %925 = vmatmul.mubr.f32.gmra.mrb[12].mxu0 %v221_v33  ;;  %704 = vmatprep.mubr.f32.mxu1 %v227_v30  ;;  %v285_v33 = vld [vmem:[%s2223_s15 + $0x360] sm:$0xff]  ;;  %v496_v30 = vld [vmem:[%s3069_s1 + $0x2f8] sm:$0xff] }
  0x61   : > { %929 = vmatprep.mubr.f32.mxu0 %v229_v37  ;;  %1878 = vmatpush1.bf16.msra.mxu0 %v1877_v35  ;;  %v282_v35 = vld [vmem:[%s2223_s15 + $0x348] sm:$0xff]  ;;  %v497_v37 = vld [vmem:[%s3069_s1 + $0x300] sm:$0xff] }
  0x62   : > { %1879 = vmatprep.subr.bf16.mxu0 %v2092_v3  ;;  %1936 = vmatpush1.bf16.msra.mxu1 %v2246_v44  ;;  %v483_v44 = vld [vmem:[%s3069_s1 + $0x290] sm:$0xff] }
  0x63   : > { %705 = vmatmul.mubr.f32.gmra.mrb[14].mxu1 %v226_v40  ;;  %1921 = vmatprep.subr.bf16.mxu1 %v2092_v3  ;;  %v1886_v59 = vpack.c.bf16 %v484_v54, %v483_v44  ;;  %v310_v44 = vld [vmem:[%s2223_s15 + $0x428] sm:$0xff]  ;;  %v312_v54 = vld [vmem:[%s2223_s15 + $0x438] sm:$0xff] }
  0x64   : > { %930 = vmatmul.mubr.f32.gmra.mrb[14].mxu0 %v228_v42  ;;  %709 = vmatprep.mubr.f32.mxu1 %v234_v36  ;;  %v292_v42 = vld [vmem:[%s2223_s15 + $0x398] sm:$0xff]  ;;  %v2616_v36 = vpack.c.bf16 %v498_v38, %v497_v37  ;;  %v223_v37 = vld [vmem:[%s2223_s15 + $0x170] sm:$0xff] }
  0x65   : > { %934 = vmatprep.mubr.f32.mxu0 %v236_v45  ;;  %1881 = vmatpush1.bf16.msra.mxu0 %v1880_v43  ;;  %v289_v43 = vld [vmem:[%s2223_s15 + $0x380] sm:$0xff]  ;;  %v291_v45 = vld [vmem:[%s2223_s15 + $0x390] sm:$0xff] }
  0x66   : > { %1882 = vmatprep.subr.bf16.mxu0 %v2092_v3  ;;  %1937 = vmatpush1.bf16.msra.mxu1 %v2263_v50  ;;  %v485_v50 = vld [vmem:[%s3069_s1 + $0x2a0] sm:$0xff]  ;;  %v395_v38 = vld [vmem:[%s2223_s15 + $0x6d0] sm:$0xff] }
  0x67   : > { %710 = vmatmul.mubr.f32.gmra.mrb[16].mxu1 %v233_v48  ;;  %1922 = vmatprep.subr.bf16.mxu1 %v2092_v3  ;;  %v1889_v1 = vpack.c.bf16 %v486_v60, %v485_v50  ;;  %v304_v48 = vld [vmem:[%s2223_s15 + $0x3f8] sm:$0xff]  ;;  %v327_v50 = vld [vmem:[%s2223_s15 + $0x4b0] sm:$0xff] }
  0x68   : > { %935 = vmatmul.mubr.f32.gmra.mrb[16].mxu0 %v235_v49  ;;  %714 = vmatprep.mubr.f32.mxu1 %v241_v51  ;;  %v306_v49 = vld [vmem:[%s2223_s15 + $0x408] sm:$0xff]  ;;  %v305_v51 = vld [vmem:[%s2223_s15 + $0x400] sm:$0xff]  ;;  %v324_v60 = vld [vmem:[%s2223_s15 + $0x498] sm:$0xff] }
  0x69   : > { %939 = vmatprep.mubr.f32.mxu0 %v243_v53  ;;  %1884 = vmatpush1.bf16.msra.mxu0 %v1883_v52  ;;  %v311_v52 = vld [vmem:[%s2223_s15 + $0x430] sm:$0xff]  ;;  %v313_v53 = vld [vmem:[%s2223_s15 + $0x440] sm:$0xff] }
  0x6a   : > { %1885 = vmatprep.subr.bf16.mxu0 %v2092_v3  ;;  %1938 = vmatpush1.bf16.msra.mxu1 %v2280_v56  ;;  %v487_v56 = vld [vmem:[%s3069_s1 + $0x2b0] sm:$0xff] }
  0x6b   : > { %715 = vmatmul.mubr.f32.gmra.mrb[18].mxu1 %v240_v55  ;;  %1923 = vmatprep.subr.bf16.mxu1 %v2092_v3  ;;  %v1892_v9 = vpack.c.bf16 %v488_v4, %v487_v56  ;;  %v318_v55 = vld [vmem:[%s2223_s15 + $0x468] sm:$0xff]  ;;  %v339_v56 = vld [vmem:[%s2223_s15 + $0x510] sm:$0xff]  ;;  %v341_v4 = vld [vmem:[%s2223_s15 + $0x520] sm:$0xff] }
  0x6c   : > { %940 = vmatmul.mubr.f32.gmra.mrb[18].mxu0 %v242_v57  ;;  %719 = vmatprep.mubr.f32.mxu1 %v248_v58  ;;  %v320_v57 = vld [vmem:[%s2223_s15 + $0x478] sm:$0xff]  ;;  %v317_v58 = vld [vmem:[%s2223_s15 + $0x460] sm:$0xff] }
  0x6d   : > { %944 = vmatprep.mubr.f32.mxu0 %v250_v8  ;;  %1887 = vmatpush1.bf16.msra.mxu0 %v1886_v59  ;;  %v319_v59 = vld [vmem:[%s2223_s15 + $0x470] sm:$0xff]  ;;  %v325_v8 = vld [vmem:[%s2223_s15 + $0x4a0] sm:$0xff] }
  0x6e   : > { %1888 = vmatprep.subr.bf16.mxu0 %v2092_v3  ;;  %1939 = vmatpush1.bf16.msra.mxu1 %v2297_v62  ;;  %v489_v62 = vld [vmem:[%s3069_s1 + $0x2c0] sm:$0xff] }
  0x6f   : > { %720 = vmatmul.mubr.f32.gmra.mrb[20].mxu1 %v247_v61  ;;  %1924 = vmatprep.subr.bf16.mxu1 %v2092_v3  ;;  %v1895_v16 = vpack.c.bf16 %v490_v11, %v489_v62  ;;  %v326_v61 = vld [vmem:[%s2223_s15 + $0x4a8] sm:$0xff]  ;;  %v181_v62 = vld [vmem:[%s2223_s15 + $0x20] sm:$0xff] }
  0x70   : > { %945 = vmatmul.mubr.f32.gmra.mrb[20].mxu0 %v249_v63  ;;  %724 = vmatprep.mubr.f32.mxu1 %v255_v0  ;;  %v332_v63 = vld [vmem:[%s2223_s15 + $0x4d8] sm:$0xff]  ;;  %v334_v0 = vld [vmem:[%s2223_s15 + $0x4e8] sm:$0xff]  ;;  %v353_v11 = vld [vmem:[%s2223_s15 + $0x580] sm:$0xff] }
  0x71   : > { %949 = vmatprep.mubr.f32.mxu0 %v257_v2  ;;  %1890 = vmatpush1.bf16.msra.mxu0 %v1889_v1  ;;  %v331_v1 = vld [vmem:[%s2223_s15 + $0x4d0] sm:$0xff]  ;;  %v333_v2 = vld [vmem:[%s2223_s15 + $0x4e0] sm:$0xff] }
  0x72   : > { %1891 = vmatprep.subr.bf16.mxu0 %v2092_v3  ;;  %1940 = vmatpush1.bf16.msra.mxu1 %v2314_v5  ;;  %v491_v5 = vld [vmem:[%s3069_s1 + $0x2d0] sm:$0xff] }
  0x73   : > { %725 = vmatmul.mubr.f32.gmra.mrb[22].mxu1 %v254_v6  ;;  %1925 = vmatprep.subr.bf16.mxu1 %v2092_v3  ;;  %v1898_v25 = vpack.c.bf16 %v492_v19, %v491_v5  ;;  %v338_v6 = vld [vmem:[%s2223_s15 + $0x508] sm:$0xff]  ;;  %v359_v5 = vld [vmem:[%s2223_s15 + $0x5b0] sm:$0xff] }
  0x74   : > { %950 = vmatmul.mubr.f32.gmra.mrb[22].mxu0 %v256_v12  ;;  %729 = vmatprep.mubr.f32.mxu1 %v262_v7  ;;  %v340_v12 = vld [vmem:[%s2223_s15 + $0x518] sm:$0xff]  ;;  %v346_v7 = vld [vmem:[%s2223_s15 + $0x548] sm:$0xff]  ;;  %v195_v19 = vld [vmem:[%s2223_s15 + $0x90] sm:$0xff] }
  0x75   : > { %954 = vmatprep.mubr.f32.mxu0 %v264_v10  ;;  %1893 = vmatpush1.bf16.msra.mxu0 %v1892_v9  ;;  %v182_v9 = vld [vmem:[%s2223_s15 + $0x28] sm:$0xff]  ;;  %v345_v10 = vld [vmem:[%s2223_s15 + $0x540] sm:$0xff] }
  0x76   : > { %1894 = vmatprep.subr.bf16.mxu0 %v2092_v3  ;;  %1941 = vmatpush1.bf16.msra.mxu1 %v2331_v13  ;;  %v493_v13 = vld [vmem:[%s3069_s1 + $0x2e0] sm:$0xff] }
  0x77   : > { %730 = vmatmul.mubr.f32.gmra.mrb[24].mxu1 %v261_v14  ;;  %1926 = vmatprep.subr.bf16.mxu1 %v2092_v3  ;;  %v1901_v32 = vpack.c.bf16 %v494_v26, %v493_v13  ;;  %v189_v14 = vld [vmem:[%s2223_s15 + $0x60] sm:$0xff]  ;;  %v210_v13 = vld [vmem:[%s2223_s15 + $0x108] sm:$0xff] }
  0x78   : > { %955 = vmatmul.mubr.f32.gmra.mrb[24].mxu0 %v263_v15  ;;  %734 = vmatprep.mubr.f32.mxu1 %v269_v18  ;;  %v352_v15 = vld [vmem:[%s2223_s15 + $0x578] sm:$0xff]  ;;  %v373_v26 = vld [vmem:[%s2223_s15 + $0x620] sm:$0xff] }
  0x79   : > { %959 = vmatprep.mubr.f32.mxu0 %v271_v17  ;;  %1896 = vmatpush1.bf16.msra.mxu0 %v1895_v16  ;;  %v188_v18 = vld [vmem:[%s2223_s15 + $0x58] sm:$0xff] }
  0x7a   : > { %1897 = vmatprep.subr.bf16.mxu0 %v2092_v3  ;;  %1942 = vmatpush1.bf16.msra.mxu1 %v2348_v20  ;;  %v495_v20 = vld [vmem:[%s3069_s1 + $0x2f0] sm:$0xff]  ;;  %v360_v16 = vld [vmem:[%s2223_s15 + $0x5b8] sm:$0xff] }
  0x7b   : > { %735 = vmatmul.mubr.f32.gmra.mrb[26].mxu1 %v268_v21  ;;  %1927 = vmatprep.subr.bf16.mxu1 %v2092_v3  ;;  %v1904_v40 = vpack.c.bf16 %v496_v30, %v495_v20  ;;  %v196_v17 = vld [vmem:[%s2223_s15 + $0x98] sm:$0xff]  ;;  %v367_v21 = vld [vmem:[%s2223_s15 + $0x5f0] sm:$0xff] }
  0x7c   : > { %960 = vmatmul.mubr.f32.gmra.mrb[26].mxu0 %v270_v22  ;;  %739 = vmatprep.mubr.f32.mxu1 %v276_v23  ;;  %v203_v22 = vld [vmem:[%s2223_s15 + $0xd0] sm:$0xff]  ;;  %v366_v23 = vld [vmem:[%s2223_s15 + $0x5e8] sm:$0xff]  ;;  %v388_v20 = vld [vmem:[%s2223_s15 + $0x698] sm:$0xff] }
  0x7d   : > { %964 = vmatprep.mubr.f32.mxu0 %v278_v24  ;;  %1899 = vmatpush1.bf16.msra.mxu0 %v1898_v25  ;;  %v202_v25 = vld [vmem:[%s2223_s15 + $0xc8] sm:$0xff]  ;;  %v224_v30 = vld [vmem:[%s2223_s15 + $0x178] sm:$0xff] }
  0x7e   : > { %1900 = vmatprep.subr.bf16.mxu0 %v2092_v3  ;;  %1943 = vmatpush1.bf16.msra.mxu1 %v2365_v27  ;;  %v290_v27 = vld [vmem:[%s2223_s15 + $0x388] sm:$0xff] }
  0x7f   : > { %740 = vmatmul.mubr.f32.gmra.mrb[28].mxu1 %v275_v28  ;;  %1928 = vmatprep.subr.bf16.mxu1 %v2092_v3  ;;  %v374_v24 = vld [vmem:[%s2223_s15 + $0x628] sm:$0xff]  ;;  %v209_v28 = vld [vmem:[%s2223_s15 + $0x100] sm:$0xff] }
  0x80   : > { %965 = vmatmul.mubr.f32.gmra.mrb[28].mxu0 %v277_v29  ;;  %744 = vmatprep.mubr.f32.mxu1 %v283_v31  ;;  %v381_v29 = vld [vmem:[%s2223_s15 + $0x660] sm:$0xff] }
  0x81   : > { %969 = vmatprep.mubr.f32.mxu0 %v285_v33  ;;  %1902 = vmatpush1.bf16.msra.mxu0 %v1901_v32  ;;  %v217_v31 = vld [vmem:[%s2223_s15 + $0x140] sm:$0xff]  ;;  %v380_v32 = vld [vmem:[%s2223_s15 + $0x658] sm:$0xff] }
  0x82   : > { %1903 = vmatprep.subr.bf16.mxu0 %v2092_v3  ;;  %1944 = vmatpush1.bf16.msra.mxu1 %v2382_v34  ;;  %v298_v34 = vld [vmem:[%s2223_s15 + $0x3c8] sm:$0xff]  ;;  %v216_v33 = vld [vmem:[%s2223_s15 + $0x138] sm:$0xff] }
  0x83   : > { %745 = vmatmul.mubr.f32.gmra.mrb[30].mxu1 %v282_v35  ;;  %1929 = vmatprep.subr.bf16.mxu1 %v2092_v3  ;;  %v296_v3 = vld [vmem:[%s2223_s15 + $0x3b8] sm:$0xff]  ;;  %v387_v35 = vld [vmem:[%s2223_s15 + $0x690] sm:$0xff] }
  0x84   : > { %970 = vmatmul.mubr.f32.gmra.mrb[30].mxu0 %v284_v39  ;;  %749 = vmatprep.mubr.f32.mxu1 %v290_v27  ;;  %v231_v39 = vld [vmem:[%s2223_s15 + $0x1b0] sm:$0xff]  ;;  %v394_v27 = vld [vmem:[%s2223_s15 + $0x6c8] sm:$0xff] }
  0x85   : > { %974 = vmatprep.mubr.f32.mxu0 %v292_v42  ;;  %1905 = vmatpush1.bf16.msra.mxu0 %v1904_v40  ;;  %v230_v40 = vld [vmem:[%s2223_s15 + $0x1a8] sm:$0xff]  ;;  %v348_v42 = vld [vmem:[%s2223_s15 + $0x558] sm:$0xff] }
  0x86   : > { %1945 = vmatpush1.bf16.msra.mxu1 %v2399_v41  ;;  %v303_v41 = vld [vmem:[%s2223_s15 + $0x3f0] sm:$0xff] }
  0x87   : > { %750 = vmatmul.mubr.f32.gmra.mrb[32].mxu1 %v289_v43  ;;  %1907 = vmatprep.subr.bf16.mxu1 %v2616_v36  ;;  %v238_v43 = vld [vmem:[%s2223_s15 + $0x1e8] sm:$0xff] }
  0x88   : > { %975 = vmatmul.mubr.f32.gmra.mrb[32].mxu0 %v291_v45  ;;  %754 = vmatprep.mubr.f32.mxu1 %v297_v46  ;;  %v499_v45 = vld [vmem:[%s3069_s1 + $0x310] sm:$0xff]  ;;  %v500_v46 = vld [vmem:[%s3069_s1 + $0x318] sm:$0xff] }
  0x89   : > { %979 = vmatprep.mubr.f32.mxu0 %v299_v47  ;;  %v347_v47 = vld [vmem:[%s2223_s15 + $0x550] sm:$0xff] }
  0x8b   : > { %755 = vmatmul.mubr.f32.gmra.mrb[34].mxu1 %v296_v3  ;;  %v237_v3 = vld [vmem:[%s2223_s15 + $0x1e0] sm:$0xff] }
  0x8c   : > { %980 = vmatmul.mubr.f32.gmra.mrb[34].mxu0 %v298_v34  ;;  %759 = vmatprep.mubr.f32.mxu1 %v304_v48  ;;  %v355_v34 = vld [vmem:[%s2223_s15 + $0x590] sm:$0xff]  ;;  %v245_v48 = vld [vmem:[%s2223_s15 + $0x220] sm:$0xff] }
  0x8d   : > { %984 = vmatprep.mubr.f32.mxu0 %v306_v49  ;;  %v1910_v49 = vpack.c.bf16 %v500_v46, %v499_v45  ;;  %v342_v45 = vld [vmem:[%s2223_s15 + $0x528] sm:$0xff]  ;;  %v295_v46 = vld [vmem:[%s2223_s15 + $0x3b0] sm:$0xff] }
  0x8f   : > { %760 = vmatmul.mubr.f32.gmra.mrb[36].mxu1 %v303_v41  ;;  %v354_v41 = vld [vmem:[%s2223_s15 + $0x588] sm:$0xff] }
  0x90   : > { %985 = vmatmul.mubr.f32.gmra.mrb[36].mxu0 %v305_v51  ;;  %764 = vmatprep.mubr.f32.mxu1 %v311_v52  ;;  %v244_v51 = vld [vmem:[%s2223_s15 + $0x218] sm:$0xff]  ;;  %v362_v52 = vld [vmem:[%s2223_s15 + $0x5c8] sm:$0xff] }
  0x91   : > { %989 = vmatprep.mubr.f32.mxu0 %v313_v53  ;;  %v252_v53 = vld [vmem:[%s2223_s15 + $0x258] sm:$0xff] }
  0x93   : > { %765 = vmatmul.mubr.f32.gmra.mrb[38].mxu1 %v310_v44  ;;  %v361_v44 = vld [vmem:[%s2223_s15 + $0x5c0] sm:$0xff] }
  0x94   : > { %990 = vmatmul.mubr.f32.gmra.mrb[38].mxu0 %v312_v54  ;;  %769 = vmatprep.mubr.f32.mxu1 %v318_v55  ;;  %v251_v54 = vld [vmem:[%s2223_s15 + $0x250] sm:$0xff] }
  0x95   : > { %994 = vmatprep.mubr.f32.mxu0 %v320_v57  ;;  %v259_v55 = vld [vmem:[%s2223_s15 + $0x290] sm:$0xff]  ;;  %v368_v57 = vld [vmem:[%s2223_s15 + $0x5f8] sm:$0xff] }
  0x97   : > { %770 = vmatmul.mubr.f32.gmra.mrb[40].mxu1 %v317_v58  ;;  %v258_v58 = vld [vmem:[%s2223_s15 + $0x288] sm:$0xff] }
  0x98   : > { %995 = vmatmul.mubr.f32.gmra.mrb[40].mxu0 %v319_v59  ;;  %774 = vmatprep.mubr.f32.mxu1 %v325_v8  ;;  %v376_v59 = vld [vmem:[%s2223_s15 + $0x638] sm:$0xff]  ;;  %v266_v8 = vld [vmem:[%s2223_s15 + $0x2c8] sm:$0xff] }
  0x99   : > { %999 = vmatprep.mubr.f32.mxu0 %v327_v50  ;;  %v375_v50 = vld [vmem:[%s2223_s15 + $0x630] sm:$0xff] }
  0x9b   : > { %775 = vmatmul.mubr.f32.gmra.mrb[42].mxu1 %v324_v60  ;;  %v265_v60 = vld [vmem:[%s2223_s15 + $0x2c0] sm:$0xff] }
  0x9c   : > { %1000 = vmatmul.mubr.f32.gmra.mrb[42].mxu0 %v326_v61  ;;  %779 = vmatprep.mubr.f32.mxu1 %v332_v63  ;;  %v383_v61 = vld [vmem:[%s2223_s15 + $0x670] sm:$0xff]  ;;  %v273_v63 = vld [vmem:[%s2223_s15 + $0x300] sm:$0xff] }
  0x9d   : > { %1004 = vmatprep.mubr.f32.mxu0 %v334_v0  ;;  %v382_v0 = vld [vmem:[%s2223_s15 + $0x668] sm:$0xff] }
  0x9f   : > { %780 = vmatmul.mubr.f32.gmra.mrb[44].mxu1 %v331_v1  ;;  %v272_v1 = vld [vmem:[%s2223_s15 + $0x2f8] sm:$0xff] }
  0xa0   : > { %1005 = vmatmul.mubr.f32.gmra.mrb[44].mxu0 %v333_v2  ;;  %784 = vmatprep.mubr.f32.mxu1 %v339_v56  ;;  %v390_v2 = vld [vmem:[%s2223_s15 + $0x6a8] sm:$0xff]  ;;  %v280_v56 = vld [vmem:[%s2223_s15 + $0x338] sm:$0xff] }
  0xa1   : > { %1009 = vmatprep.mubr.f32.mxu0 %v341_v4  ;;  %v389_v4 = vld [vmem:[%s2223_s15 + $0x6a0] sm:$0xff] }
  0xa3   : > { %785 = vmatmul.mubr.f32.gmra.mrb[46].mxu1 %v338_v6  ;;  %v279_v6 = vld [vmem:[%s2223_s15 + $0x330] sm:$0xff] }
  0xa4   : > { %1010 = vmatmul.mubr.f32.gmra.mrb[46].mxu0 %v340_v12  ;;  %789 = vmatprep.mubr.f32.mxu1 %v346_v7  ;;  %v397_v12 = vld [vmem:[%s2223_s15 + $0x6e0] sm:$0xff]  ;;  %v287_v7 = vld [vmem:[%s2223_s15 + $0x370] sm:$0xff] }
  0xa5   : > { %1119 = vmatprep.mubr.f32.mxu0 %v182_v9  ;;  %v396_v9 = vld [vmem:[%s2223_s15 + $0x6d8] sm:$0xff] }
  0xa7   : > { %790 = vmatmul.mubr.f32.gmra.mrb[48].mxu1 %v345_v10  ;;  %v286_v10 = vld [vmem:[%s2223_s15 + $0x368] sm:$0xff] }
  0xa8   : > { %1120 = vmatmul.mubr.f32.vlgmr.msra.gmra.mrb[0].mxu0 %v181_v62  ;;  %794 = vmatprep.mubr.f32.mxu1 %v353_v11  ;;  %v183_v62 = vld [vmem:[%s2223_s15 + $0x30] sm:$0xff]  ;;  %v294_v11 = vld [vmem:[%s2223_s15 + $0x3a8] sm:$0xff] }
  0xa9   : > { %1124 = vmatprep.mubr.f32.mxu0 %v189_v14  ;;  %v190_v14 = vld [vmem:[%s2223_s15 + $0x68] sm:$0xff] }
  0xab   : > { %795 = vmatmul.mubr.f32.gmra.mrb[50].mxu1 %v352_v15  ;;  %v293_v15 = vld [vmem:[%s2223_s15 + $0x3a0] sm:$0xff] }
  0xac   : > { %1125 = vmatmul.mubr.f32.gmra.mrb[2].mxu0 %v188_v18  ;;  %799 = vmatprep.mubr.f32.mxu1 %v360_v16  ;;  %v197_v18 = vld [vmem:[%s2223_s15 + $0xa0] sm:$0xff] }
  0xad   : > { %1129 = vmatprep.mubr.f32.mxu0 %v196_v17  ;;  %v301_v16 = vld [vmem:[%s2223_s15 + $0x3e0] sm:$0xff]  ;;  %v204_v17 = vld [vmem:[%s2223_s15 + $0xd8] sm:$0xff] }
  0xaf   : > { %800 = vmatmul.mubr.f32.gmra.mrb[52].mxu1 %v359_v5  ;;  %v300_v5 = vld [vmem:[%s2223_s15 + $0x3d8] sm:$0xff] }
  0xb0   : > { %1130 = vmatmul.mubr.f32.gmra.mrb[4].mxu0 %v195_v19  ;;  %804 = vmatprep.mubr.f32.mxu1 %v367_v21  ;;  %v211_v19 = vld [vmem:[%s2223_s15 + $0x110] sm:$0xff]  ;;  %v308_v21 = vld [vmem:[%s2223_s15 + $0x418] sm:$0xff] }
  0xb1   : > { %1134 = vmatprep.mubr.f32.mxu0 %v203_v22  ;;  %v218_v22 = vld [vmem:[%s2223_s15 + $0x148] sm:$0xff] }
  0xb3   : > { %805 = vmatmul.mubr.f32.gmra.mrb[54].mxu1 %v366_v23  ;;  %v307_v23 = vld [vmem:[%s2223_s15 + $0x410] sm:$0xff] }
  0xb4   : > { %1135 = vmatmul.mubr.f32.gmra.mrb[6].mxu0 %v202_v25  ;;  %809 = vmatprep.mubr.f32.mxu1 %v374_v24  ;;  %v225_v25 = vld [vmem:[%s2223_s15 + $0x180] sm:$0xff]  ;;  %v315_v24 = vld [vmem:[%s2223_s15 + $0x450] sm:$0xff] }
  0xb5   : > { %1139 = vmatprep.mubr.f32.mxu0 %v210_v13  ;;  %v232_v13 = vld [vmem:[%s2223_s15 + $0x1b8] sm:$0xff] }
  0xb7   : > { %810 = vmatmul.mubr.f32.gmra.mrb[56].mxu1 %v373_v26  ;;  %v314_v26 = vld [vmem:[%s2223_s15 + $0x448] sm:$0xff] }
  0xb8   : > { %1140 = vmatmul.mubr.f32.gmra.mrb[8].mxu0 %v209_v28  ;;  %814 = vmatprep.mubr.f32.mxu1 %v381_v29  ;;  %v239_v28 = vld [vmem:[%s2223_s15 + $0x1f0] sm:$0xff]  ;;  %v322_v29 = vld [vmem:[%s2223_s15 + $0x488] sm:$0xff] }
  0xb9   : > { %1144 = vmatprep.mubr.f32.mxu0 %v217_v31  ;;  %v246_v31 = vld [vmem:[%s2223_s15 + $0x228] sm:$0xff] }
  0xbb   : > { %815 = vmatmul.mubr.f32.gmra.mrb[58].mxu1 %v380_v32  ;;  %v321_v32 = vld [vmem:[%s2223_s15 + $0x480] sm:$0xff] }
  0xbc   : > { %1145 = vmatmul.mubr.f32.gmra.mrb[10].mxu0 %v216_v33  ;;  %819 = vmatprep.mubr.f32.mxu1 %v388_v20  ;;  %v253_v33 = vld [vmem:[%s2223_s15 + $0x260] sm:$0xff] }
  0xbd   : > { %1149 = vmatprep.mubr.f32.mxu0 %v224_v30  ;;  %v329_v20 = vld [vmem:[%s2223_s15 + $0x4c0] sm:$0xff]  ;;  %v260_v30 = vld [vmem:[%s2223_s15 + $0x298] sm:$0xff] }
  0xbf   : > { %820 = vmatmul.mubr.f32.gmra.mrb[60].mxu1 %v387_v35  ;;  %v328_v35 = vld [vmem:[%s2223_s15 + $0x4b8] sm:$0xff] }
  0xc0   : > { %1150 = vmatmul.mubr.f32.gmra.mrb[12].mxu0 %v223_v37  ;;  %824 = vmatprep.mubr.f32.mxu1 %v395_v38  ;;  %v267_v37 = vld [vmem:[%s2223_s15 + $0x2d0] sm:$0xff]  ;;  %v336_v38 = vld [vmem:[%s2223_s15 + $0x4f8] sm:$0xff] }
  0xc1   : > { %1154 = vmatprep.mubr.f32.mxu0 %v231_v39  ;;  %v274_v39 = vld [vmem:[%s2223_s15 + $0x308] sm:$0xff] }
  0xc3   : > { %825 = vmatmul.mubr.f32.gmra.mrb[62].mxu1 %v394_v27  ;;  %v335_v27 = vld [vmem:[%s2223_s15 + $0x4f0] sm:$0xff] }
  0xc4   : > { %1155 = vmatmul.mubr.f32.gmra.mrb[14].mxu0 %v230_v40  ;;  %1014 = vmatprep.mubr.f32.mxu1 %v348_v42  ;;  %v281_v40 = vld [vmem:[%s2223_s15 + $0x340] sm:$0xff]  ;;  %v343_v42 = vld [vmem:[%s2223_s15 + $0x530] sm:$0xff] }
  0xc5   : > { %1159 = vmatprep.mubr.f32.mxu0 %v238_v43  ;;  %v288_v43 = vld [vmem:[%s2223_s15 + $0x378] sm:$0xff] }
  0xc7   : > { %1015 = vmatmul.mubr.f32.vlgmr.msra.gmra.mrb[48].mxu1 %v347_v47  ;;  %v350_v47 = vld [vmem:[%s2223_s15 + $0x568] sm:$0xff] }
  0xc8   : > { %1160 = vmatmul.mubr.f32.gmra.mrb[16].mxu0 %v237_v3  ;;  %1909 = vmatpush3.bf16.msra.mxu1 %v2616_v36  ;;  %v369_v36 = vld [vmem:[%s2223_s15 + $0x600] sm:$0xff]  ;;  %v302_v3 = vld [vmem:[%s2223_s15 + $0x3e8] sm:$0xff] }
  0xc9   : > { %1019 = vmatprep.mubr.f32.mxu1 %v355_v34  ;;  %1164 = vmatprep.mubr.f32.mxu0 %v245_v48  ;;  %v349_v34 = vld [vmem:[%s2223_s15 + $0x560] sm:$0xff] }
  0xca   : > { %1911 = vmatprep.subr.bf16.mxu1 %v1910_v49  ;;  %v309_v48 = vld [vmem:[%s2223_s15 + $0x420] sm:$0xff] }
  0xcb   : > { %1020 = vmatmul.mubr.f32.gmra.mrb[50].mxu1 %v354_v41  ;;  %v316_v41 = vld [vmem:[%s2223_s15 + $0x458] sm:$0xff] }
  0xcc   : > { %1165 = vmatmul.mubr.f32.gmra.mrb[18].mxu0 %v244_v51  ;;  %1024 = vmatprep.mubr.f32.mxu1 %v362_v52  ;;  %v356_v51 = vld [vmem:[%s2223_s15 + $0x598] sm:$0xff]  ;;  %v323_v52 = vld [vmem:[%s2223_s15 + $0x490] sm:$0xff] }
  0xcd   : > { %1169 = vmatprep.mubr.f32.mxu0 %v252_v53  ;;  %1913 = vmatpush3.bf16.msra.mxu1 %v1910_v49  ;;  %v357_v49 = vld [vmem:[%s2223_s15 + $0x5a0] sm:$0xff]  ;;  %v364_v53 = vld [vmem:[%s2223_s15 + $0x5d8] sm:$0xff] }
  0xcf   : > { %1025 = vmatmul.mubr.f32.gmra.mrb[52].mxu1 %v361_v44  ;;  %v330_v44 = vld [vmem:[%s2223_s15 + $0x4c8] sm:$0xff] }
  0xd0   : > { %1170 = vmatmul.mubr.f32.gmra.mrb[20].mxu0 %v251_v54  ;;  %1029 = vmatprep.mubr.f32.mxu1 %v369_v36  ;;  %v363_v54 = vld [vmem:[%s2223_s15 + $0x5d0] sm:$0xff]  ;;  %v337_v36 = vld [vmem:[%s2223_s15 + $0x500] sm:$0xff] }
  0xd1   : > { %1174 = vmatprep.mubr.f32.mxu0 %v259_v55  ;;  %v371_v55 = vld [vmem:[%s2223_s15 + $0x610] sm:$0xff] }
  0xd3   : > { %1030 = vmatmul.mubr.f32.gmra.mrb[54].mxu1 %v368_v57  ;;  %v344_v57 = vld [vmem:[%s2223_s15 + $0x538] sm:$0xff] }
  0xd4   : > { %1175 = vmatmul.mubr.f32.gmra.mrb[22].mxu0 %v258_v58  ;;  %1034 = vmatprep.mubr.f32.mxu1 %v376_v59  ;;  %v370_v58 = vld [vmem:[%s2223_s15 + $0x608] sm:$0xff]  ;;  %v351_v59 = vld [vmem:[%s2223_s15 + $0x570] sm:$0xff] }
  0xd5   : > { %1179 = vmatprep.mubr.f32.mxu0 %v266_v8  ;;  %v378_v8 = vld [vmem:[%s2223_s15 + $0x648] sm:$0xff] }
  0xd7   : > { %1035 = vmatmul.mubr.f32.gmra.mrb[56].mxu1 %v375_v50  ;;  %v358_v50 = vld [vmem:[%s2223_s15 + $0x5a8] sm:$0xff] }
  0xd8   : > { %1180 = vmatmul.mubr.f32.gmra.mrb[24].mxu0 %v265_v60  ;;  %1039 = vmatprep.mubr.f32.mxu1 %v383_v61  ;;  %v377_v60 = vld [vmem:[%s2223_s15 + $0x640] sm:$0xff] }
  0xd9   : > { %1184 = vmatprep.mubr.f32.mxu0 %v273_v63  ;;  %v365_v61 = vld [vmem:[%s2223_s15 + $0x5e0] sm:$0xff] }
  0xda   : > { %v385_v63 = vld [vmem:[%s2223_s15 + $0x680] sm:$0xff] }
  0xdb   : > { %1040 = vmatmul.mubr.f32.gmra.mrb[58].mxu1 %v382_v0  ;;  %v372_v0 = vld [vmem:[%s2223_s15 + $0x618] sm:$0xff] }
  0xdc   : > { %1185 = vmatmul.mubr.f32.gmra.mrb[26].mxu0 %v272_v1  ;;  %1044 = vmatprep.mubr.f32.mxu1 %v390_v2  ;;  %v384_v1 = vld [vmem:[%s2223_s15 + $0x678] sm:$0xff]  ;;  %v379_v2 = vld [vmem:[%s2223_s15 + $0x650] sm:$0xff] }
  0xdd   : > { %1189 = vmatprep.mubr.f32.mxu0 %v280_v56 }
  0xdf   : > { %1045 = vmatmul.mubr.f32.gmra.mrb[60].mxu1 %v389_v4  ;;  %v392_v4 = vld [vmem:[%s2223_s15 + $0x6b8] sm:$0xff] }
  0xe0   : > { %1190 = vmatmul.mubr.f32.gmra.mrb[28].mxu0 %v279_v6  ;;  %1049 = vmatprep.mubr.f32.mxu1 %v397_v12  ;;  %v386_v12 = vld [vmem:[%s2223_s15 + $0x688] sm:$0xff] }
  0xe1   : > { %1194 = vmatprep.mubr.f32.mxu0 %v287_v7  ;;  %v391_v7 = vld [vmem:[%s2223_s15 + $0x6b0] sm:$0xff] }
  0xe3   : > { %1050 = vmatmul.mubr.f32.gmra.mrb[62].mxu1 %v396_v9  ;;  %v393_v9 = vld [vmem:[%s2223_s15 + $0x6c0] sm:$0xff] }
  0xe4   : > { %1195 = vmatmul.mubr.f32.gmra.mrb[30].mxu0 %v286_v10  ;;  %1714 = vmatprep.mubr.msk.f32.mxu1 %vm508_vm0, %v183_v62  ;;  %v399_v62 = vld [vmem:[%s2223_s15 + $0x6f0] sm:$0xff] }
  0xe5   : > { %1199 = vmatprep.mubr.f32.mxu0 %v294_v11 }
  0xe7   : > { %1715 = vmatmul.mubr.msk.f32.vlgmr.msra.gmra.mrb[64].mxu1 %vm508_vm0, %v190_v14  ;;  %v400_v14 = vld [vmem:[%s2223_s15 + $0x6f8] sm:$0xff] }
  0xe8   : > { %1200 = vmatmul.mubr.f32.gmra.mrb[32].mxu0 %v293_v15  ;;  %1717 = vmatprep.mubr.msk.f32.mxu1 %vm508_vm0, %v197_v18  ;;  %v398_v15 = vld [vmem:[%s2223_s15 + $0x6e8] sm:$0xff] }
  0xe9   : > { %1204 = vmatprep.mubr.f32.mxu0 %v301_v16 }
  0xeb   : > { %1718 = vmatmul.mubr.msk.f32.gmra.mrb[66].mxu1 %vm508_vm0, %v204_v17 }
  0xec   : > { %1205 = vmatmul.mubr.f32.gmra.mrb[34].mxu0 %v300_v5  ;;  %1720 = vmatprep.mubr.msk.f32.mxu1 %vm508_vm0, %v211_v19 }
  0xed   : > { %1209 = vmatprep.mubr.f32.mxu0 %v308_v21 }
  0xef   : > { %1721 = vmatmul.mubr.msk.f32.gmra.mrb[68].mxu1 %vm508_vm0, %v218_v22 }
  0xf0   : > { %1210 = vmatmul.mubr.f32.gmra.mrb[36].mxu0 %v307_v23  ;;  %1723 = vmatprep.mubr.msk.f32.mxu1 %vm508_vm0, %v225_v25 }
  0xf1   : > { %1214 = vmatprep.mubr.f32.mxu0 %v315_v24 }
  0xf3   : > { %1724 = vmatmul.mubr.msk.f32.gmra.mrb[70].mxu1 %vm508_vm0, %v232_v13 }
  0xf4   : > { %1215 = vmatmul.mubr.f32.gmra.mrb[38].mxu0 %v314_v26  ;;  %1726 = vmatprep.mubr.msk.f32.mxu1 %vm508_vm0, %v239_v28 }
  0xf5   : > { %1219 = vmatprep.mubr.f32.mxu0 %v322_v29 }
  0xf7   : > { %1727 = vmatmul.mubr.msk.f32.gmra.mrb[72].mxu1 %vm508_vm0, %v246_v31 }
  0xf8   : > { %1220 = vmatmul.mubr.f32.gmra.mrb[40].mxu0 %v321_v32  ;;  %1729 = vmatprep.mubr.msk.f32.mxu1 %vm508_vm0, %v253_v33 }
  0xf9   : > { %1224 = vmatprep.mubr.f32.mxu0 %v329_v20 }
  0xfb   : > { %1730 = vmatmul.mubr.msk.f32.gmra.mrb[74].mxu1 %vm508_vm0, %v260_v30 }
  0xfc   : > { %1225 = vmatmul.mubr.f32.gmra.mrb[42].mxu0 %v328_v35  ;;  %1732 = vmatprep.mubr.msk.f32.mxu1 %vm508_vm0, %v267_v37 }
  0xfd   : > { %1229 = vmatprep.mubr.f32.mxu0 %v336_v38 }
  0xff   : > { %1733 = vmatmul.mubr.msk.f32.gmra.mrb[76].mxu1 %vm508_vm0, %v274_v39 }
 0x100   : > { %1230 = vmatmul.mubr.f32.gmra.mrb[44].mxu0 %v335_v27  ;;  %1735 = vmatprep.mubr.msk.f32.mxu1 %vm508_vm0, %v281_v40 }
 0x101   : > { %1234 = vmatprep.mubr.f32.mxu0 %v343_v42 }
 0x103   : > { %1736 = vmatmul.mubr.msk.f32.gmra.mrb[78].mxu1 %vm508_vm0, %v288_v43 }
 0x104   : > { %1235 = vmatmul.mubr.f32.gmra.mrb[46].mxu0 %v342_v45  ;;  %1738 = vmatprep.mubr.msk.f32.mxu1 %vm508_vm0, %v295_v46 }
 0x105   : > { %1239 = vmatprep.mubr.f32.mxu0 %v350_v47 }
 0x107   : > { %1739 = vmatmul.mubr.msk.f32.gmra.mrb[80].mxu1 %vm508_vm0, %v302_v3 }
 0x108   : > { %1240 = vmatmul.mubr.f32.gmra.mrb[48].mxu0 %v349_v34  ;;  %1741 = vmatprep.mubr.msk.f32.mxu1 %vm508_vm0, %v309_v48 }
 0x109   : > { %1244 = vmatprep.mubr.f32.mxu0 %v357_v49 }
 0x10b   : > { %1742 = vmatmul.mubr.msk.f32.gmra.mrb[82].mxu1 %vm508_vm0, %v316_v41 }
 0x10c   : > { %1245 = vmatmul.mubr.f32.gmra.mrb[50].mxu0 %v356_v51  ;;  %1744 = vmatprep.mubr.msk.f32.mxu1 %vm508_vm0, %v323_v52 }
 0x10d   : > { %1249 = vmatprep.mubr.f32.mxu0 %v364_v53 }
 0x10f   : > { %1745 = vmatmul.mubr.msk.f32.gmra.mrb[84].mxu1 %vm508_vm0, %v330_v44 }
 0x110   : > { %1250 = vmatmul.mubr.f32.gmra.mrb[52].mxu0 %v363_v54  ;;  %1747 = vmatprep.mubr.msk.f32.mxu1 %vm508_vm0, %v337_v36 }
 0x111   : > { %1254 = vmatprep.mubr.f32.mxu0 %v371_v55 }
 0x113   : > { %1748 = vmatmul.mubr.msk.f32.gmra.mrb[86].mxu1 %vm508_vm0, %v344_v57 }
 0x114   : > { %1255 = vmatmul.mubr.f32.gmra.mrb[54].mxu0 %v370_v58  ;;  %1750 = vmatprep.mubr.msk.f32.mxu1 %vm508_vm0, %v351_v59  ;;  %v2856_v58 = vld [vmem:[%s3070_s2] ss:$0 sm:$0xff] }
 0x115   : > { %1259 = vmatprep.mubr.f32.mxu0 %v378_v8 }
 0x117   : > { %1751 = vmatmul.mubr.msk.f32.gmra.mrb[88].mxu1 %vm508_vm0, %v358_v50 }
 0x118   : > { %1260 = vmatmul.mubr.f32.gmra.mrb[56].mxu0 %v377_v60  ;;  %1753 = vmatprep.mubr.msk.f32.mxu1 %vm508_vm0, %v365_v61 }
 0x119   : > { %1264 = vmatprep.mubr.f32.mxu0 %v385_v63 }
 0x11a   : > { %v2805_v56 = vpop.f32.mrb[0].mxu1 }
 0x11b   : > { %1754 = vmatmul.mubr.msk.f32.gmra.mrb[90].mxu1 %vm508_vm0, %v372_v0  ;;  %v673_v6 = vpop.f32.mrb[1].mxu1  ;;  %v672_v8 = vadd.f32 %v2856_v58, %v2805_v56 }
 0x11c   : > { %1265 = vmatmul.mubr.f32.gmra.mrb[58].mxu0 %v384_v1  ;;  %1756 = vmatprep.mubr.msk.f32.mxu1 %vm508_vm0, %v379_v2 }
 0x11d   : > { %1269 = vmatprep.mubr.f32.mxu0 %v392_v4 }
 0x11e   : > { %v676_v10 = vpop.f32.mrb[2].mxu1 }
 0x11f   : > { %1757 = vmatmul.mubr.msk.f32.gmra.mrb[92].mxu1 %vm508_vm0, %v386_v12  ;;  %v678_v11 = vpop.f32.mrb[3].mxu1  ;;  %v677_v63 = vadd.f32 %v2856_v58, %v676_v10 }
 0x120   : > { %1270 = vmatmul.mubr.f32.gmra.mrb[60].mxu0 %v391_v7  ;;  %1759 = vmatprep.mubr.msk.f32.mxu1 %vm508_vm0, %v393_v9 }
 0x121   : > { %1274 = vmatprep.mubr.f32.mxu0 %v399_v62 }
 0x122   : > { %v681_v18 = vpop.f32.mrb[4].mxu1 }
 0x123   : > { %1760 = vmatmul.mubr.msk.f32.gmra.mrb[94].mxu1 %vm508_vm0, %v400_v14  ;;  %v683_v16 = vpop.f32.mrb[5].mxu1  ;;  %v682_v4 = vadd.f32 %v2856_v58, %v681_v18 }
 0x124   : > { %1275 = vmatmul.mubr.f32.gmra.mrb[62].mxu0 %v398_v15 }
 0x126   : > { %v686_v17 = vpop.f32.mrb[6].mxu1 }
 0x127   : > { %v688_v5 = vpop.f32.mrb[7].mxu1  ;;  %v687_v9 = vadd.f32 %v2856_v58, %v686_v17 }
 0x12a   : > { %v691_v19 = vpop.f32.mrb[8].mxu1 }
 0x12b   : > { %v693_v21 = vpop.f32.mrb[9].mxu1  ;;  %v692_v14 = vadd.f32 %v2856_v58, %v691_v19 }
 0x12e   : > { %v696_v22 = vpop.f32.mrb[10].mxu1 }
 0x12f   : > { %v698_v23 = vpop.f32.mrb[11].mxu1  ;;  %v697_v5 = vadd.f32 %v2856_v58, %v696_v22 }
 0x132   : > { %v701_v25 = vpop.f32.mrb[12].mxu1 }
 0x133   : > { %v703_v24 = vpop.f32.mrb[13].mxu1 }
 0x134   : > { %v702_v24 = vadd.f32 %v2856_v58, %v701_v25 }
 0x136   : > { %v2819_v13 = vpop.f32.mrb[14].mxu1 }
 0x137   : > { %v708_v26 = vpop.f32.mrb[15].mxu1 }
 0x13a   : > { %v2821_v28 = vpop.f32.mrb[16].mxu1 }
 0x13b   : > { %v713_v29 = vpop.f32.mrb[17].mxu1  ;;  %v712_v22 = vadd.f32 %v2856_v58, %v2821_v28 }
 0x13e   : > { %v2823_v31 = vpop.f32.mrb[18].mxu1 }
 0x13f   : > { %v718_v32 = vpop.f32.mrb[19].mxu1 }
 0x140   : > { %v707_v32 = vadd.f32 %v2856_v58, %v2819_v13 }
 0x142   : > { %v2825_v33 = vpop.f32.mrb[20].mxu1 }
 0x143   : > { %v723_v20 = vpop.f32.mrb[21].mxu1  ;;  %v722_v28 = vadd.f32 %v2856_v58, %v2825_v33 }
 0x146   : > { %v2827_v30 = vpop.f32.mrb[22].mxu1 }
 0x147   : > { %v728_v35 = vpop.f32.mrb[23].mxu1 }
 0x14a   : > { %v2829_v37 = vpop.f32.mrb[24].mxu1 }
 0x14b   : > { %v733_v38 = vpop.f32.mrb[25].mxu1  ;;  %v732_v33 = vadd.f32 %v2856_v58, %v2829_v37 }
 0x14e   : > { %v2831_v39 = vpop.f32.mrb[26].mxu1 }
 0x14f   : > { %v738_v27 = vpop.f32.mrb[27].mxu1 }
 0x152   : > { %v2833_v40 = vpop.f32.mrb[28].mxu1 }
 0x153   : > { %v743_v42 = vpop.f32.mrb[29].mxu1  ;;  %v742_v37 = vadd.f32 %v2856_v58, %v2833_v40 }
 0x156   : > { %v2835_v43 = vpop.f32.mrb[30].mxu1 }
 0x157   : > { %v748_v45 = vpop.f32.mrb[31].mxu1 }
 0x15a   : > { %v2837_v46 = vpop.f32.mrb[32].mxu1 }
 0x15b   : > { %v753_v47 = vpop.f32.mrb[33].mxu1  ;;  %v752_v40 = vadd.f32 %v2856_v58, %v2837_v46 }
 0x15c   : > { %v717_v47 = vadd.f32 %v2856_v58, %v2823_v31  ;;  %v727_v31 = vadd.f32 %v2856_v58, %v2827_v30  ;;  %v737_v30 = vadd.f32 %v2856_v58, %v2831_v39  ;;  %v747_v39 = vadd.f32 %v2856_v58, %v2835_v43 }
 0x15e   : > { %v2839_v3 = vpop.f32.mrb[34].mxu1 }
 0x15f   : > { %v758_v34 = vpop.f32.mrb[35].mxu1  ;;  %v757_v46 = vadd.f32 %v2856_v58, %v2839_v3 }
 0x162   : > { %v2841_v48 = vpop.f32.mrb[36].mxu1 }
 0x163   : > { %v763_v49 = vpop.f32.mrb[37].mxu1  ;;  %v762_v3 = vadd.f32 %v2856_v58, %v2841_v48 }
 0x166   : > { %v2843_v41 = vpop.f32.mrb[38].mxu1 }
 0x167   : > { %v768_v51 = vpop.f32.mrb[39].mxu1  ;;  %v767_v48 = vadd.f32 %v2856_v58, %v2843_v41 }
 0x16a   : > { %v2845_v52 = vpop.f32.mrb[40].mxu1 }
 0x16b   : > { %v773_v53 = vpop.f32.mrb[41].mxu1  ;;  %v772_v41 = vadd.f32 %v2856_v58, %v2845_v52 }
 0x16e   : > { %v2847_v44 = vpop.f32.mrb[42].mxu1 }
 0x16f   : > { %v778_v54 = vpop.f32.mrb[43].mxu1  ;;  %v777_v52 = vadd.f32 %v2856_v58, %v2847_v44 }
 0x172   : > { %v2849_v36 = vpop.f32.mrb[44].mxu1 }
 0x173   : > { %v783_v55 = vpop.f32.mrb[45].mxu1  ;;  %v782_v44 = vadd.f32 %v2856_v58, %v2849_v36 }
 0x176   : > { %v2851_v57 = vpop.f32.mrb[46].mxu1 }
 0x177   : > { %v788_v59 = vpop.f32.mrb[47].mxu1  ;;  %v787_v36 = vadd.f32 %v2856_v58, %v2851_v57 }
 0x17b   : > { %v1121_v50 = vpop.f32.mrb[0].mxu0 }
 0x17c   : > { %v2860_v60 = vadd.f32 %v1121_v50, %v672_v8  ;;  %v1123_v61 = vpop.f32.mrb[1].mxu0 }
 0x17f   : > { %v1126_v0 = vpop.f32.mrb[2].mxu0 }
 0x180   : > { %v2863_v1 = vadd.f32 %v1126_v0, %v677_v63  ;;  %v1128_v2 = vpop.f32.mrb[3].mxu0 }
 0x183   : > { %v1131_v6 = vpop.f32.mrb[4].mxu0 }
 0x184   : > { %v2866_v12 = vadd.f32 %v1131_v6, %v682_v4  ;;  %v1133_v7 = vpop.f32.mrb[5].mxu0 }
 0x187   : > { %v1136_v62 = vpop.f32.mrb[6].mxu0 }
 0x188   : > { %v2869_v56 = vadd.f32 %v1136_v62, %v687_v9  ;;  %v1138_v11 = vpop.f32.mrb[7].mxu0 }
 0x18b   : > { %v1141_v15 = vpop.f32.mrb[8].mxu0 }
 0x18c   : > { %v2872_v10 = vadd.f32 %v1141_v15, %v692_v14  ;;  %v1143_v16 = vpop.f32.mrb[9].mxu0 }
 0x18f   : > { %v1146_v21 = vpop.f32.mrb[10].mxu0 }
 0x190   : > { %v2875_v18 = vadd.f32 %v1146_v21, %v697_v5  ;;  %v1148_v23 = vpop.f32.mrb[11].mxu0 }
 0x193   : > { %v1151_v26 = vpop.f32.mrb[12].mxu0 }
 0x194   : > { %v2878_v17 = vadd.f32 %v1151_v26, %v702_v24  ;;  %v1153_v29 = vpop.f32.mrb[13].mxu0 }
 0x197   : > { %v1156_v19 = vpop.f32.mrb[14].mxu0 }
 0x198   : > { %v2882_v20 = vadd.f32 %v1156_v19, %v707_v32  ;;  %v1158_v35 = vpop.f32.mrb[15].mxu0 }
 0x19a   : > { %v2886_v38 = vpop.f32.mrb[48].mxu1 }
 0x19b   : > { %v1161_v27 = vpop.f32.mrb[16].mxu0  ;;  %v1018_v42 = vpop.f32.mrb[49].mxu1  ;;  %v1994_v57 = vadd.f32 %v2856_v58, %v2886_v38 }
 0x19c   : > { %v2888_v45 = vadd.f32 %v1161_v27, %v712_v22  ;;  %v1163_v25 = vpop.f32.mrb[17].mxu0 }
 0x19e   : > { %v2892_v34 = vpop.f32.mrb[50].mxu1 }
 0x19f   : > { %v1166_v13 = vpop.f32.mrb[18].mxu0  ;;  %v1023_v49 = vpop.f32.mrb[51].mxu1  ;;  %v1996_v38 = vadd.f32 %v2856_v58, %v2892_v34 }
 0x1a0   : > { %v2894_v51 = vadd.f32 %v1166_v13, %v717_v47  ;;  %v1168_v53 = vpop.f32.mrb[19].mxu0 }
 0x1a2   : > { %v2898_v54 = vpop.f32.mrb[52].mxu1 }
 0x1a3   : > { %v1171_v55 = vpop.f32.mrb[20].mxu0  ;;  %v1028_v59 = vpop.f32.mrb[53].mxu1  ;;  %v1998_v34 = vadd.f32 %v2856_v58, %v2898_v54 }
 0x1a4   : > { %v2900_v8 = vadd.f32 %v1171_v55, %v722_v28  ;;  %v1173_v50 = vpop.f32.mrb[21].mxu0 }
 0x1a6   : > { %v2904_v61 = vpop.f32.mrb[54].mxu1 }
 0x1a7   : > { %v1176_v63 = vpop.f32.mrb[22].mxu0  ;;  %v1033_v0 = vpop.f32.mrb[55].mxu1 }
 0x1a8   : > { %v2906_v2 = vadd.f32 %v1176_v63, %v727_v31  ;;  %v1178_v4 = vpop.f32.mrb[23].mxu0 }
 0x1aa   : > { %v2910_v6 = vpop.f32.mrb[56].mxu1 }
 0x1ab   : > { %v1181_v7 = vpop.f32.mrb[24].mxu0  ;;  %v1038_v9 = vpop.f32.mrb[57].mxu1 }
 0x1ac   : > { %v2912_v62 = vadd.f32 %v1181_v7, %v732_v33  ;;  %v1183_v11 = vpop.f32.mrb[25].mxu0 }
 0x1ae   : > { %v2916_v14 = vpop.f32.mrb[58].mxu1 }
 0x1af   : > { %v1186_v15 = vpop.f32.mrb[26].mxu0  ;;  %v1043_v16 = vpop.f32.mrb[59].mxu1 }
 0x1b0   : > { %v2918_v5 = vadd.f32 %v1186_v15, %v737_v30  ;;  %v1188_v21 = vpop.f32.mrb[27].mxu0 }
 0x1b2   : > { %v2922_v23 = vpop.f32.mrb[60].mxu1 }
 0x1b3   : > { %v1191_v24 = vpop.f32.mrb[28].mxu0  ;;  %v1048_v26 = vpop.f32.mrb[61].mxu1 }
 0x1b4   : > { %v2924_v29 = vadd.f32 %v1191_v24, %v742_v37  ;;  %v1193_v32 = vpop.f32.mrb[29].mxu0 }
 0x1b6   : > { %v2928_v19 = vpop.f32.mrb[62].mxu1 }
 0x1b7   : > { %v1196_v35 = vpop.f32.mrb[30].mxu0  ;;  %v1053_v22 = vpop.f32.mrb[63].mxu1 }
 0x1b8   : > { %v2930_v27 = vadd.f32 %v1196_v35, %v747_v39  ;;  %v1198_v42 = vpop.f32.mrb[31].mxu0 }
 0x1ba   : > { %v1716_v25 = vpop.f32.mrb[64].mxu1 }
 0x1bb   : > { %v1201_v47 = vpop.f32.mrb[32].mxu0  ;;  %v1352_v13 = vadd.f32 %v2863_v1, %v1716_v25  ;;  %v1346_v49 = vpop.f32.mrb[65].mxu1 }
 0x1bc   : > { %v2936_v53 = vadd.f32 %v1201_v47, %v752_v40  ;;  %v1203_v43 = vpop.f32.mrb[33].mxu0  ;;  %v1347_v28 = vadd.f32 %v2860_v60, %v1346_v49 }
 0x1bd   : > { %v1506_v55 = vmax.f32 %v1352_v13, 0.0 }
 0x1be   : > { %v1505_v1 = vmax.f32 %v1347_v28, 0.0  ;;  %v1719_v59 = vpop.f32.mrb[66].mxu1 }
 0x1bf   : > { %1539 = vst.msk [vmem:[%s2941_s28 + $0x8] sm:$0xff] %vm1537_vm1, %v1506_v55  ;;  %v1206_v50 = vpop.f32.mrb[34].mxu0  ;;  %v1362_v31 = vadd.f32 %v2869_v56, %v1719_v59  ;;  %v1356_v63 = vpop.f32.mrb[67].mxu1 }
 0x1c0   : > { %1538 = vst.msk [vmem:[%s2941_s28] sm:$0xff] %vm1537_vm1, %v1505_v1  ;;  %v2951_v0 = vadd.f32 %v1206_v50, %v757_v46  ;;  %v1208_v4 = vpop.f32.mrb[35].mxu0  ;;  %v1357_v60 = vadd.f32 %v2866_v12, %v1356_v63 }
 0x1c1   : > { %v1508_v33 = vmax.f32 %v1362_v31, 0.0 }
 0x1c2   : > { %v1507_v7 = vmax.f32 %v1357_v60, 0.0  ;;  %v1722_v9 = vpop.f32.mrb[68].mxu1 }
 0x1c3   : > { %1541 = vst.msk [vmem:[%s2941_s28 + $0x18] sm:$0xff] %vm1537_vm1, %v1508_v33  ;;  %v1211_v11 = vpop.f32.mrb[36].mxu0  ;;  %v1372_v56 = vadd.f32 %v2875_v18, %v1722_v9  ;;  %v1366_v30 = vpop.f32.mrb[69].mxu1 }
 0x1c4   : > { %1540 = vst.msk [vmem:[%s2941_s28 + $0x10] sm:$0xff] %vm1537_vm1, %v1507_v7  ;;  %v2961_v15 = vadd.f32 %v1211_v11, %v762_v3  ;;  %v1213_v16 = vpop.f32.mrb[37].mxu0  ;;  %v1367_v12 = vadd.f32 %v2872_v10, %v1366_v30 }
 0x1c5   : > { %v1510_v21 = vmax.f32 %v1372_v56, 0.0 }
 0x1c6   : > { %v1509_v37 = vmax.f32 %v1367_v12, 0.0  ;;  %v1725_v24 = vpop.f32.mrb[70].mxu1 }
 0x1c7   : > { %1543 = vst.msk [vmem:[%s2941_s28 + $0x28] sm:$0xff] %vm1537_vm1, %v1510_v21  ;;  %v1216_v26 = vpop.f32.mrb[38].mxu0  ;;  %v1382_v18 = vadd.f32 %v2882_v20, %v1725_v24  ;;  %v1376_v32 = vpop.f32.mrb[71].mxu1 }
 0x1c8   : > { %1542 = vst.msk [vmem:[%s2941_s28 + $0x20] sm:$0xff] %vm1537_vm1, %v1509_v37  ;;  %v2971_v39 = vadd.f32 %v1216_v26, %v767_v48  ;;  %v1218_v35 = vpop.f32.mrb[39].mxu0  ;;  %v1377_v10 = vadd.f32 %v2878_v17, %v1376_v32 }
 0x1c9   : > { %v1512_v22 = vmax.f32 %v1382_v18, 0.0 }
 0x1ca   : > { %v1511_v42 = vmax.f32 %v1377_v10, 0.0  ;;  %v1728_v40 = vpop.f32.mrb[72].mxu1 }
 0x1cb   : > { %1545 = vst.msk [vmem:[%s2941_s28 + $0x38] sm:$0xff] %vm1537_vm1, %v1512_v22  ;;  %v1221_v25 = vpop.f32.mrb[40].mxu0  ;;  %v1392_v20 = vadd.f32 %v2894_v51, %v1728_v40  ;;  %v1386_v47 = vpop.f32.mrb[73].mxu1 }
 0x1cc   : > { %1544 = vst.msk [vmem:[%s2941_s28 + $0x30] sm:$0xff] %vm1537_vm1, %v1511_v42  ;;  %v2981_v13 = vadd.f32 %v1221_v25, %v772_v41  ;;  %v1223_v49 = vpop.f32.mrb[41].mxu0  ;;  %v1387_v17 = vadd.f32 %v2888_v45, %v1386_v47 }
 0x1cd   : > { %v1514_v43 = vmax.f32 %v1392_v20, 0.0 }
 0x1ce   : > { %v1513_v28 = vmax.f32 %v1387_v17, 0.0  ;;  %v1731_v55 = vpop.f32.mrb[74].mxu1 }
 0x1cf   : > { %1547 = vst.msk [vmem:[%s2941_s28 + $0x48] sm:$0xff] %vm1537_vm1, %v1514_v43  ;;  %v1226_v46 = vpop.f32.mrb[42].mxu0  ;;  %v1402_v51 = vadd.f32 %v2906_v2, %v1731_v55  ;;  %v1396_v1 = vpop.f32.mrb[75].mxu1 }
 0x1d0   : > { %1546 = vst.msk [vmem:[%s2941_s28 + $0x40] sm:$0xff] %vm1537_vm1, %v1513_v28  ;;  %v1989_v59 = vadd.f32 %v1226_v46, %v777_v52  ;;  %v1228_v50 = vpop.f32.mrb[43].mxu0  ;;  %v1397_v45 = vadd.f32 %v2900_v8, %v1396_v1 }
 0x1d1   : > { %v1516_v31 = vmax.f32 %v1402_v51, 0.0  ;;  %v2000_v51 = vadd.f32 %v2856_v58, %v2904_v61 }
 0x1d2   : > { %v1515_v63 = vmax.f32 %v1397_v45, 0.0  ;;  %v1734_v4 = vpop.f32.mrb[76].mxu1 }
 0x1d3   : > { %1549 = vst.msk [vmem:[%s2941_s28 + $0x58] sm:$0xff] %vm1537_vm1, %v1516_v31  ;;  %v1231_v60 = vpop.f32.mrb[44].mxu0  ;;  %v1412_v2 = vadd.f32 %v2918_v5, %v1734_v4  ;;  %v1406_v33 = vpop.f32.mrb[77].mxu1 }
 0x1d4   : > { %1548 = vst.msk [vmem:[%s2941_s28 + $0x50] sm:$0xff] %vm1537_vm1, %v1515_v63  ;;  %v1991_v3 = vadd.f32 %v1231_v60, %v782_v44  ;;  %v1233_v7 = vpop.f32.mrb[45].mxu0  ;;  %v1407_v8 = vadd.f32 %v2912_v62, %v1406_v33 }
 0x1d5   : > { %v1518_v9 = vmax.f32 %v1412_v2, 0.0 }
 0x1d6   : > { %v1517_v11 = vmax.f32 %v1407_v8, 0.0  ;;  %v1737_v56 = vpop.f32.mrb[78].mxu1 }
 0x1d7   : > { %1551 = vst.msk [vmem:[%s2941_s28 + $0x68] sm:$0xff] %vm1537_vm1, %v1518_v9  ;;  %v1236_v30 = vpop.f32.mrb[46].mxu0  ;;  %v1422_v5 = vadd.f32 %v2930_v27, %v1737_v56  ;;  %v1416_v16 = vpop.f32.mrb[79].mxu1 }
 0x1d8   : > { %1550 = vst.msk [vmem:[%s2941_s28 + $0x60] sm:$0xff] %vm1537_vm1, %v1517_v11  ;;  %v1993_v12 = vadd.f32 %v1236_v30, %v787_v36  ;;  %v1238_v21 = vpop.f32.mrb[47].mxu0  ;;  %v1417_v62 = vadd.f32 %v2924_v29, %v1416_v16 }
 0x1d9   : > { %v1520_v48 = vmax.f32 %v1422_v5, 0.0 }
 0x1da   : > { %v1519_v37 = vmax.f32 %v1417_v62, 0.0  ;;  %v1740_v24 = vpop.f32.mrb[80].mxu1 }
 0x1db   : > { %1553 = vst.msk [vmem:[%s2941_s28 + $0x78] sm:$0xff] %vm1537_vm1, %v1520_v48  ;;  %v1241_v26 = vpop.f32.mrb[48].mxu0  ;;  %v1432_v27 = vadd.f32 %v2951_v0, %v1740_v24  ;;  %v1426_v18 = vpop.f32.mrb[81].mxu1 }
 0x1dc   : > { %1552 = vst.msk [vmem:[%s2941_s28 + $0x70] sm:$0xff] %vm1537_vm1, %v1519_v37  ;;  %v1995_v32 = vadd.f32 %v1994_v57, %v1241_v26  ;;  %v1243_v35 = vpop.f32.mrb[49].mxu0  ;;  %v1427_v29 = vadd.f32 %v2936_v53, %v1426_v18  ;;  %v2006_v57 = vadd.f32 %v2856_v58, %v2922_v23 }
 0x1dd   : > { %v1522_v10 = vmax.f32 %v1432_v27, 0.0 }
 0x1de   : > { %v1521_v22 = vmax.f32 %v1427_v29, 0.0  ;;  %v1743_v41 = vpop.f32.mrb[82].mxu1 }
 0x1df   : > { %1555 = vst.msk [vmem:[%s2941_s28 + $0x88] sm:$0xff] %vm1537_vm1, %v1522_v10  ;;  %v1246_v42 = vpop.f32.mrb[50].mxu0  ;;  %v1442_v0 = vadd.f32 %v2971_v39, %v1743_v41  ;;  %v1436_v40 = vpop.f32.mrb[83].mxu1  ;;  %v2008_v10 = vadd.f32 %v2856_v58, %v2928_v19 }
 0x1e0   : > { %1554 = vst.msk [vmem:[%s2941_s28 + $0x80] sm:$0xff] %vm1537_vm1, %v1521_v22  ;;  %v1997_v25 = vadd.f32 %v1996_v38, %v1246_v42  ;;  %v1248_v20 = vpop.f32.mrb[51].mxu0  ;;  %v1437_v53 = vadd.f32 %v2961_v15, %v1436_v40 }
 0x1e1   : > { %v1524_v47 = vmax.f32 %v1442_v0, 0.0 }
 0x1e2   : > { %v1523_v49 = vmax.f32 %v1437_v53, 0.0  ;;  %v1746_v17 = vpop.f32.mrb[84].mxu1 }
 0x1e3   : > { %1557 = vst.msk [vmem:[%s2941_s28 + $0x98] sm:$0xff] %vm1537_vm1, %v1524_v47  ;;  %v1251_v43 = vpop.f32.mrb[52].mxu0  ;;  %v1452_v52 = vadd.f32 %v1989_v59, %v1746_v17  ;;  %v1446_v39 = vpop.f32.mrb[85].mxu1 }
 0x1e4   : > { %1556 = vst.msk [vmem:[%s2941_s28 + $0x90] sm:$0xff] %vm1537_vm1, %v1523_v49  ;;  %v1999_v28 = vadd.f32 %v1998_v34, %v1251_v43  ;;  %v1253_v55 = vpop.f32.mrb[53].mxu0  ;;  %v1447_v46 = vadd.f32 %v2981_v13, %v1446_v39  ;;  %v2002_v13 = vadd.f32 %v2856_v58, %v2910_v6 }
 0x1e5   : > { %v1526_v15 = vmax.f32 %v1452_v52, 0.0 }
 0x1e6   : > { %v1525_v54 = vmax.f32 %v1447_v46, 0.0  ;;  %v1749_v1 = vpop.f32.mrb[86].mxu1 }
 0x1e7   : > { %1559 = vst.msk [vmem:[%s2941_s28 + $0xa8] sm:$0xff] %vm1537_vm1, %v1526_v15  ;;  %v1256_v50 = vpop.f32.mrb[54].mxu0  ;;  %v1462_v45 = vadd.f32 %v1993_v12, %v1749_v1  ;;  %v1456_v59 = vpop.f32.mrb[87].mxu1 }
 0x1e8   : > { %1558 = vst.msk [vmem:[%s2941_s28 + $0xa0] sm:$0xff] %vm1537_vm1, %v1525_v54  ;;  %v2001_v31 = vadd.f32 %v2000_v51, %v1256_v50  ;;  %v1258_v44 = vpop.f32.mrb[55].mxu0  ;;  %v1457_v63 = vadd.f32 %v1991_v3, %v1456_v59  ;;  %v2004_v3 = vadd.f32 %v2856_v58, %v2916_v14 }
 0x1e9   : > { %v1528_v4 = vmax.f32 %v1462_v45, 0.0 }
 0x1ea   : > { %v1527_v60 = vmax.f32 %v1457_v63, 0.0  ;;  %v1752_v61 = vpop.f32.mrb[88].mxu1 }
 0x1eb   : > { %1561 = vst.msk [vmem:[%s2941_s28 + $0xb8] sm:$0xff] %vm1537_vm1, %v1528_v4  ;;  %v1261_v2 = vpop.f32.mrb[56].mxu0  ;;  %v1472_v33 = vadd.f32 %v1997_v25, %v1752_v61  ;;  %v1466_v7 = vpop.f32.mrb[89].mxu1 }
 0x1ec   : > { %1560 = vst.msk [vmem:[%s2941_s28 + $0xb0] sm:$0xff] %vm1537_vm1, %v1527_v60  ;;  %v2003_v8 = vadd.f32 %v2002_v13, %v1261_v2  ;;  %v1263_v9 = vpop.f32.mrb[57].mxu0  ;;  %v1467_v36 = vadd.f32 %v1995_v32, %v1466_v7 }
 0x1ed   : > { %v1530_v11 = vmax.f32 %v1472_v33, 0.0 }
 0x1ee   : > { %v1529_v56 = vmax.f32 %v1467_v36, 0.0  ;;  %v1755_v6 = vpop.f32.mrb[90].mxu1 }
 0x1ef   : > { %1563 = vst.msk [vmem:[%s2941_s28 + $0xc8] sm:$0xff] %vm1537_vm1, %v1530_v11  ;;  %v1266_v30 = vpop.f32.mrb[58].mxu0  ;;  %v1482_v5 = vadd.f32 %v2001_v31, %v1755_v6  ;;  %v1476_v16 = vpop.f32.mrb[91].mxu1 }
 0x1f0   : > { %1562 = vst.msk [vmem:[%s2941_s28 + $0xc0] sm:$0xff] %vm1537_vm1, %v1529_v56  ;;  %v2005_v12 = vadd.f32 %v2004_v3, %v1266_v30  ;;  %v1268_v21 = vpop.f32.mrb[59].mxu0  ;;  %v1477_v62 = vadd.f32 %v1999_v28, %v1476_v16 }
 0x1f1   : > { %v1532_v48 = vmax.f32 %v1482_v5, 0.0 }
 0x1f2   : > { %v1531_v37 = vmax.f32 %v1477_v62, 0.0  ;;  %v1758_v14 = vpop.f32.mrb[92].mxu1 }
 0x1f3   : > { %1565 = vst.msk [vmem:[%s2941_s28 + $0xd8] sm:$0xff] %vm1537_vm1, %v1532_v48  ;;  %v1271_v24 = vpop.f32.mrb[60].mxu0  ;;  %v1492_v26 = vadd.f32 %v2005_v12, %v1758_v14  ;;  %v1486_v27 = vpop.f32.mrb[93].mxu1 }
 0x1f4   : > { %1564 = vst.msk [vmem:[%s2941_s28 + $0xd0] sm:$0xff] %vm1537_vm1, %v1531_v37  ;;  %v2007_v18 = vadd.f32 %v2006_v57, %v1271_v24  ;;  %v1273_v32 = vpop.f32.mrb[61].mxu0  ;;  %v1487_v35 = vadd.f32 %v2003_v8, %v1486_v27 }
 0x1f5   : > { %v1534_v29 = vmax.f32 %v1492_v26, 0.0 }
 0x1f6   : > { %v1533_v23 = vmax.f32 %v1487_v35, 0.0  ;;  %v1761_v38 = vpop.f32.mrb[94].mxu1 }
 0x1f7   : > { %1567 = vst.msk [vmem:[%s2941_s28 + $0xe8] sm:$0xff] %vm1537_vm1, %v1534_v29  ;;  %v1276_v22 = vpop.f32.mrb[62].mxu0  ;;  %v1496_v41 = vpop.f32.mrb[95].mxu1 }
 0x1f8   : > { %1566 = vst.msk [vmem:[%s2941_s28 + $0xe0] sm:$0xff] %vm1537_vm1, %v1533_v23  ;;  %v2009_v42 = vadd.f32 %v2008_v10, %v1276_v22  ;;  %v1278_v0 = vpop.f32.mrb[63].mxu0  ;;  %v1497_v40 = vadd.f32 %v2007_v18, %v1496_v41 }
 0x1fa   : > { %v1502_v25 = vadd.f32 %v2009_v42, %v1761_v38  ;;  %v1535_v20 = vmax.f32 %v1497_v40, 0.0 }
 0x1fc   : > { %v1536_v53 = vmax.f32 %v1502_v25, 0.0  ;;  %1568 = vst.msk [vmem:[%s2941_s28 + $0xf0] sm:$0xff] %vm1537_vm1, %v1535_v20 }
 0x1fe   : > { %1569 = vst.msk [vmem:[%s2941_s28 + $0xf8] sm:$0xff] %vm1537_vm1, %v1536_v53 }
 0x1ff PF: > { %s13_s12 = sadd.s32 1, %s2090_s12  }
 0x200   : > { %p10_p4 = scmp.ge.s32.totalorder %s13_s12, 4  }
 0x202   :  { %12 = sbr.rel (!%p10_p4) target bundleno = 1 (0x1), region = 62 }

// kernel: classifier_forward.7
= control target key start
LH: loop header
LB: loop body
LE: loop exit
PB: predicated region body
PF: predicated region fallthrough
CT: control target
= control target key end

     0   :  { %10 = vsyncpa [#allocation4], 0  ;;  %s4057_s18 = smov 0   ;;  %s5390_s0 = inlined_call_operand.vmem [shape: f32[2,16384], index: 0, kind: input, shape index: {}]   ;;  %s5391_s1 = inlined_call_operand.vmem [shape: f32[16384,256], index: 1, kind: input, shape index: {}]   ;;  %s5392_s2 = inlined_call_operand.vmem [shape: f32[1,256], index: 2, kind: input, shape index: {}]   ;;  %s5393_s3 = inlined_call_operand.vmem [shape: f32[256,10], index: 3, kind: input, shape index: {}]   ;;  %s5394_s4 = inlined_call_operand.vmem [shape: f32[1,10], index: 4, kind: input, shape index: {}]   ;;  %s5395_s5 = inlined_call_operand.hbm [shape: f32[2,10], index: 5, kind: output, shape index: {}]  }
   0x1 LB: > { %s4063_s19 = sadd.s32 4294967295, %s4022_s18   ;;  %p2822_p0 = scmp.ge.s32.totalorder %s4022_s18, 1  ;;  %s4022_s18 = sphi %s4057_s18, %s16_s18  }
   0x2   : > { %p196_p1 = scmp.lt.s32.totalorder %s4022_s18, 5 }
   0x4   : > { %p197_p2 = pnand %p2822_p0, %p196_p1 }
   0x5   : > { %s2823_s20 = sshll.u32 (!%p197_p2), %s4063_s19, 5  ;;  %s2825_s21 = sshll.u32 (!%p197_p2), %s4063_s19, 9 }
   0x6   : > { %200 = sbr.rel (%p197_p2) target bundleno = 1336 (0x538), region = 40  ;;  %p226_p3 = scmp.lt.s32.totalorder (!%p197_p2), %s2823_s20, 127 }
   0x7   : > { %p232_p4 = scmp.lt.s32.totalorder (!%p197_p2), %s2825_s21, 2047  ;;  %p2828_p5 = scmp.ne.s32.totalorder (!%p197_p2), %s4063_s19, 0 }
   0xd   : > { %s5397_s20 = smov (!%p226_p3, %s2823_s20), 127  ;;  %s5399_s21 = smov (!%p232_p4, %s2825_s21), 2047 }
   0xe   : > { %s2824_s22 = sshll.u32 %s5397_s20, 1  ;;  %s2835_s26 = sshll.u32 %s5399_s21, 4  ;;  %v4024_v0 = vmov (!%p2828_p5), 0.0  }
   0xf   : > { %s4072_s25 = scalar_lea.vmem %s5390_s0, %s2824_s22  ;;  %s4077_s29 = scalar_lea.vmem %s5391_s1, %s2835_s26  ;;  %242 = vst [vmem:[#allocation2] sm:$0xf] (!%p2828_p5), %v4024_v0 }
  0x10   : > { %241 = sbr.rel (%p2828_p5) target bundleno = 23 (0x17), region = 44 }
  0x17 PF: > { %v253_v1 = vld [vmem:[%s4077_s29 + $0x8] sm:$0xff]  ;;  %v255_v2 = vld [vmem:[%s4077_s29 + $0x18] sm:$0xff]  ;;  %v252_v6 = vld [vmem:[%s4077_s29] sm:$0xff]  ;;  %p2829_p6 = scmp.ne.s32.totalorder %s4063_s19, 3 }
  0x18   : > { %v765_v3 = vld [vmem:[%s4077_s29 + $0x1008] sm:$0xff]  ;;  %v2871_v4 = vpack.c.bf16 %v255_v2, %v253_v1  ;;  %v767_v5 = vld [vmem:[%s4077_s29 + $0x1018] sm:$0xff]  ;;  %v254_v7 = vld [vmem:[%s4077_s29 + $0x10] sm:$0xff]  ;;  %vm2747_vm0 = vcmask (!%p2829_p6), 74752  }
  0x19   : > { %v3383_v8 = vpack.c.bf16 %v767_v5, %v765_v3  ;;  %v2873_v9 = vpack.c.bf16 %v254_v7, %v252_v6  ;;  %v764_v10 = vld [vmem:[%s4077_s29 + $0x1000] sm:$0xff]  ;;  %v766_v11 = vld [vmem:[%s4077_s29 + $0x1010] sm:$0xff]  ;;  %v257_v12 = vld [vmem:[%s4077_s29 + $0x28] sm:$0xff] }
  0x1a   : > { %2872 = vmatprep.subr.bf16.mxu1 %v2871_v4  ;;  %v3385_v13 = vpack.c.bf16 %v766_v11, %v764_v10  ;;  %v259_v14 = vld [vmem:[%s4077_s29 + $0x38] sm:$0xff]  ;;  %v769_v15 = vld [vmem:[%s4077_s29 + $0x1028] sm:$0xff]  ;;  %v256_v19 = vld [vmem:[%s4077_s29 + $0x20] sm:$0xff] }
  0x1b   : > { %v771_v16 = vld [vmem:[%s4077_s29 + $0x1038] sm:$0xff]  ;;  %3384 = vmatprep.subr.bf16.mxu0 %v3383_v8  ;;  %2874 = vmatpush1.bf16.msra.mxu1 %v2873_v9  ;;  %v2875_v17 = vpack.c.bf16 %v259_v14, %v257_v12  ;;  %v258_v20 = vld [vmem:[%s4077_s29 + $0x30] sm:$0xff]  ;;  %v768_v21 = vld [vmem:[%s4077_s29 + $0x1020] sm:$0xff] }
  0x1c   : > { %v3387_v18 = vpack.c.bf16 %v771_v16, %v769_v15  ;;  %3386 = vmatpush1.bf16.msra.mxu0 %v3385_v13  ;;  %v2877_v22 = vpack.c.bf16 %v258_v20, %v256_v19  ;;  %v770_v23 = vld [vmem:[%s4077_s29 + $0x1030] sm:$0xff]  ;;  %v261_v24 = vld [vmem:[%s4077_s29 + $0x48] sm:$0xff]  ;;  %v263_v25 = vld [vmem:[%s4077_s29 + $0x58] sm:$0xff] }
  0x1d   : > { %2876 = vmatprep.subr.bf16.mxu1 %v2875_v17  ;;  %v3389_v26 = vpack.c.bf16 %v770_v23, %v768_v21  ;;  %v2879_v27 = vpack.c.bf16 %v263_v25, %v261_v24  ;;  %v773_v28 = vld [vmem:[%s4077_s29 + $0x1048] sm:$0xff]  ;;  %v775_v29 = vld [vmem:[%s4077_s29 + $0x1058] sm:$0xff]  ;;  %v260_v30 = vld [vmem:[%s4077_s29 + $0x40] sm:$0xff] }
  0x1e   : > { %3388 = vmatprep.subr.bf16.mxu0 %v3387_v18  ;;  %v3391_v31 = vpack.c.bf16 %v775_v29, %v773_v28  ;;  %v262_v32 = vld [vmem:[%s4077_s29 + $0x50] sm:$0xff]  ;;  %v772_v33 = vld [vmem:[%s4077_s29 + $0x1040] sm:$0xff]  ;;  %v265_v36 = vld [vmem:[%s4077_s29 + $0x68] sm:$0xff] }
  0x1f   : > { %v774_v34 = vld [vmem:[%s4077_s29 + $0x1050] sm:$0xff]  ;;  %2878 = vmatpush1.bf16.msra.mxu1 %v2877_v22  ;;  %v2881_v35 = vpack.c.bf16 %v262_v32, %v260_v30  ;;  %v267_v37 = vld [vmem:[%s4077_s29 + $0x78] sm:$0xff]  ;;  %v777_v38 = vld [vmem:[%s4077_s29 + $0x1068] sm:$0xff] }
  0x20   : > { %3390 = vmatpush1.bf16.msra.mxu0 %v3389_v26  ;;  %2880 = vmatprep.subr.bf16.mxu1 %v2879_v27  ;;  %v3393_v39 = vpack.c.bf16 %v774_v34, %v772_v33  ;;  %v2883_v40 = vpack.c.bf16 %v267_v37, %v265_v36  ;;  %v779_v41 = vld [vmem:[%s4077_s29 + $0x1078] sm:$0xff]  ;;  %v264_v42 = vld [vmem:[%s4077_s29 + $0x60] sm:$0xff]  ;;  %v266_v43 = vld [vmem:[%s4077_s29 + $0x70] sm:$0xff] }
  0x21   : > { %3392 = vmatprep.subr.bf16.mxu0 %v3391_v31  ;;  %v3395_v44 = vpack.c.bf16 %v779_v41, %v777_v38  ;;  %v776_v45 = vld [vmem:[%s4077_s29 + $0x1060] sm:$0xff]  ;;  %v778_v46 = vld [vmem:[%s4077_s29 + $0x1070] sm:$0xff]  ;;  %v269_v47 = vld [vmem:[%s4077_s29 + $0x88] sm:$0xff]  ;;  %v2885_v51 = vpack.c.bf16 %v266_v43, %v264_v42 }
  0x22   : > { %v271_v48 = vld [vmem:[%s4077_s29 + $0x98] sm:$0xff]  ;;  %v781_v49 = vld [vmem:[%s4077_s29 + $0x1088] sm:$0xff]  ;;  %v3397_v52 = vpack.c.bf16 %v778_v46, %v776_v45  ;;  %v268_v54 = vld [vmem:[%s4077_s29 + $0x80] sm:$0xff] }
  0x23   : > { %v783_v50 = vld [vmem:[%s4077_s29 + $0x1098] sm:$0xff]  ;;  %2882 = vmatpush1.bf16.msra.mxu1 %v2881_v35  ;;  %v2887_v53 = vpack.c.bf16 %v271_v48, %v269_v47  ;;  %v270_v55 = vld [vmem:[%s4077_s29 + $0x90] sm:$0xff]  ;;  %v780_v56 = vld [vmem:[%s4077_s29 + $0x1080] sm:$0xff]  ;;  %v4025_v47 = vmov 1983009808  }
  0x24   : > { %3394 = vmatpush1.bf16.msra.mxu0 %v3393_v39  ;;  %2884 = vmatprep.subr.bf16.mxu1 %v2883_v40  ;;  %v3399_v57 = vpack.c.bf16 %v783_v50, %v781_v49  ;;  %v782_v58 = vld [vmem:[%s4077_s29 + $0x1090] sm:$0xff]  ;;  %v273_v59 = vld [vmem:[%s4077_s29 + $0xa8] sm:$0xff]  ;;  %v275_v60 = vld [vmem:[%s4077_s29 + $0xb8] sm:$0xff]  ;;  %v2889_v63 = vpack.c.bf16 %v270_v55, %v268_v54  ;;  %v1286_v48 = vunpack.c.l.s4 %v4025_v47  ;;  %v1288_v49 = vlaneseq }
  0x25   : > { %3396 = vmatprep.subr.bf16.mxu0 %v3395_v44  ;;  %v785_v61 = vld [vmem:[%s4077_s29 + $0x10a8] sm:$0xff]  ;;  %v787_v62 = vld [vmem:[%s4077_s29 + $0x10b8] sm:$0xff]  ;;  %v3401_v0 = vpack.c.bf16 %v782_v58, %v780_v56  ;;  %v2891_v1 = vpack.c.bf16 %v275_v60, %v273_v59  ;;  %v272_v2 = vld [vmem:[%s4077_s29 + $0xa0] sm:$0xff] }
  0x26   : > { %v274_v3 = vld [vmem:[%s4077_s29 + $0xb0] sm:$0xff]  ;;  %v784_v4 = vld [vmem:[%s4077_s29 + $0x10a0] sm:$0xff]  ;;  %v3403_v5 = vpack.c.bf16 %v787_v62, %v785_v61  ;;  %v277_v7 = vld [vmem:[%s4077_s29 + $0xc8] sm:$0xff]  ;;  %v1287_v62 = vunpack.c.0.s8 %v1286_v48 }
  0x27   : > { %2886 = vmatpush1.bf16.msra.mxu1 %v2885_v51  ;;  %v786_v6 = vld [vmem:[%s4077_s29 + $0x10b0] sm:$0xff]  ;;  %v279_v8 = vld [vmem:[%s4077_s29 + $0xd8] sm:$0xff]  ;;  %v789_v9 = vld [vmem:[%s4077_s29 + $0x10c8] sm:$0xff]  ;;  %v2893_v11 = vpack.c.bf16 %v274_v3, %v272_v2 }
  0x28   : > { %3398 = vmatpush1.bf16.msra.mxu0 %v3397_v52  ;;  %2888 = vmatprep.subr.bf16.mxu1 %v2887_v53  ;;  %v791_v10 = vld [vmem:[%s4077_s29 + $0x10d8] sm:$0xff]  ;;  %v3405_v12 = vpack.c.bf16 %v786_v6, %v784_v4  ;;  %v2895_v13 = vpack.c.bf16 %v279_v8, %v277_v7  ;;  %v276_v14 = vld [vmem:[%s4077_s29 + $0xc0] sm:$0xff]  ;;  %v278_v15 = vld [vmem:[%s4077_s29 + $0xd0] sm:$0xff] }
  0x29   : > { %3400 = vmatprep.subr.bf16.mxu0 %v3399_v57  ;;  %v788_v16 = vld [vmem:[%s4077_s29 + $0x10c0] sm:$0xff]  ;;  %v3407_v17 = vpack.c.bf16 %v791_v10, %v789_v9  ;;  %v790_v18 = vld [vmem:[%s4077_s29 + $0x10d0] sm:$0xff]  ;;  %v281_v19 = vld [vmem:[%s4077_s29 + $0xe8] sm:$0xff]  ;;  %v2897_v23 = vpack.c.bf16 %v278_v15, %v276_v14 }
  0x2a   : > { %v283_v20 = vld [vmem:[%s4077_s29 + $0xf8] sm:$0xff]  ;;  %v793_v21 = vld [vmem:[%s4077_s29 + $0x10e8] sm:$0xff]  ;;  %v3409_v24 = vpack.c.bf16 %v790_v18, %v788_v16  ;;  %v280_v26 = vld [vmem:[%s4077_s29 + $0xe0] sm:$0xff] }
  0x2b   : > { %2890 = vmatpush1.bf16.msra.mxu1 %v2889_v63  ;;  %v795_v22 = vld [vmem:[%s4077_s29 + $0x10f8] sm:$0xff]  ;;  %v2899_v25 = vpack.c.bf16 %v283_v20, %v281_v19  ;;  %v282_v27 = vld [vmem:[%s4077_s29 + $0xf0] sm:$0xff]  ;;  %v792_v28 = vld [vmem:[%s4077_s29 + $0x10e0] sm:$0xff]  ;;  %v4164_v63 = vshrl.u32 %v1288_v49, 7 }
  0x2c   : > { %3402 = vmatpush1.bf16.msra.mxu0 %v3401_v0  ;;  %2892 = vmatprep.subr.bf16.mxu1 %v2891_v1  ;;  %v3411_v29 = vpack.c.bf16 %v795_v22, %v793_v21  ;;  %v794_v30 = vld [vmem:[%s4077_s29 + $0x10f0] sm:$0xff]  ;;  %v285_v31 = vld [vmem:[%s4077_s29 + $0x108] sm:$0xff]  ;;  %v287_v32 = vld [vmem:[%s4077_s29 + $0x118] sm:$0xff]  ;;  %v2901_v35 = vpack.c.bf16 %v282_v27, %v280_v26 }
  0x2d   : > { %3404 = vmatprep.subr.bf16.mxu0 %v3403_v5  ;;  %v797_v33 = vld [vmem:[%s4077_s29 + $0x1108] sm:$0xff]  ;;  %v799_v34 = vld [vmem:[%s4077_s29 + $0x1118] sm:$0xff]  ;;  %v3413_v36 = vpack.c.bf16 %v794_v30, %v792_v28  ;;  %v2903_v37 = vpack.c.bf16 %v287_v32, %v285_v31  ;;  %v284_v38 = vld [vmem:[%s4077_s29 + $0x100] sm:$0xff] }
  0x2e   : > { %v286_v39 = vld [vmem:[%s4077_s29 + $0x110] sm:$0xff]  ;;  %v796_v40 = vld [vmem:[%s4077_s29 + $0x1100] sm:$0xff]  ;;  %v3415_v41 = vpack.c.bf16 %v799_v34, %v797_v33  ;;  %v289_v43 = vld [vmem:[%s4077_s29 + $0x128] sm:$0xff] }
  0x2f   : > { %2894 = vmatpush1.bf16.msra.mxu1 %v2893_v11  ;;  %v798_v42 = vld [vmem:[%s4077_s29 + $0x1110] sm:$0xff]  ;;  %v291_v44 = vld [vmem:[%s4077_s29 + $0x138] sm:$0xff]  ;;  %v801_v45 = vld [vmem:[%s4077_s29 + $0x1128] sm:$0xff]  ;;  %v2905_v50 = vpack.c.bf16 %v286_v39, %v284_v38 }
  0x30   : > { %3406 = vmatpush1.bf16.msra.mxu0 %v3405_v12  ;;  %2896 = vmatprep.subr.bf16.mxu1 %v2895_v13  ;;  %v803_v46 = vld [vmem:[%s4077_s29 + $0x1138] sm:$0xff]  ;;  %v3417_v51 = vpack.c.bf16 %v798_v42, %v796_v40  ;;  %v2907_v52 = vpack.c.bf16 %v291_v44, %v289_v43  ;;  %v288_v53 = vld [vmem:[%s4077_s29 + $0x120] sm:$0xff]  ;;  %v290_v54 = vld [vmem:[%s4077_s29 + $0x130] sm:$0xff]  ;;  %v4175_v12 = vsub.s32 %v1287_v62, %v4164_v63 }
  0x31   : > { %3408 = vmatprep.subr.bf16.mxu0 %v3407_v17  ;;  %v800_v55 = vld [vmem:[%s4077_s29 + $0x1120] sm:$0xff]  ;;  %v3419_v56 = vpack.c.bf16 %v803_v46, %v801_v45  ;;  %v802_v57 = vld [vmem:[%s4077_s29 + $0x1130] sm:$0xff]  ;;  %v293_v58 = vld [vmem:[%s4077_s29 + $0x148] sm:$0xff]  ;;  %v2909_v0 = vpack.c.bf16 %v290_v54, %v288_v53 }
  0x32   : > { %v295_v59 = vld [vmem:[%s4077_s29 + $0x158] sm:$0xff]  ;;  %v805_v60 = vld [vmem:[%s4077_s29 + $0x1148] sm:$0xff]  ;;  %v3421_v1 = vpack.c.bf16 %v802_v57, %v800_v55  ;;  %v292_v3 = vld [vmem:[%s4077_s29 + $0x140] sm:$0xff] }
  0x33   : > { %2898 = vmatpush1.bf16.msra.mxu1 %v2897_v23  ;;  %v807_v61 = vld [vmem:[%s4077_s29 + $0x1158] sm:$0xff]  ;;  %v2911_v2 = vpack.c.bf16 %v295_v59, %v293_v58  ;;  %v294_v4 = vld [vmem:[%s4077_s29 + $0x150] sm:$0xff]  ;;  %v804_v5 = vld [vmem:[%s4077_s29 + $0x1140] sm:$0xff] }
  0x34   : > { %3410 = vmatpush1.bf16.msra.mxu0 %v3409_v24  ;;  %2900 = vmatprep.subr.bf16.mxu1 %v2899_v25  ;;  %v3423_v6 = vpack.c.bf16 %v807_v61, %v805_v60  ;;  %v806_v7 = vld [vmem:[%s4077_s29 + $0x1150] sm:$0xff]  ;;  %v297_v8 = vld [vmem:[%s4077_s29 + $0x168] sm:$0xff]  ;;  %v299_v9 = vld [vmem:[%s4077_s29 + $0x178] sm:$0xff]  ;;  %v2913_v13 = vpack.c.bf16 %v294_v4, %v292_v3 }
  0x35   : > { %3412 = vmatprep.subr.bf16.mxu0 %v3411_v29  ;;  %v809_v10 = vld [vmem:[%s4077_s29 + $0x1168] sm:$0xff]  ;;  %v811_v11 = vld [vmem:[%s4077_s29 + $0x1178] sm:$0xff]  ;;  %v296_v14 = vld [vmem:[%s4077_s29 + $0x160] sm:$0xff]  ;;  %v3425_v15 = vpack.c.bf16 %v806_v7, %v804_v5  ;;  %v2915_v16 = vpack.c.bf16 %v299_v9, %v297_v8 }
  0x36   : > { %v298_v17 = vld [vmem:[%s4077_s29 + $0x170] sm:$0xff]  ;;  %v808_v18 = vld [vmem:[%s4077_s29 + $0x1160] sm:$0xff]  ;;  %v3427_v20 = vpack.c.bf16 %v811_v11, %v809_v10  ;;  %v301_v21 = vld [vmem:[%s4077_s29 + $0x188] sm:$0xff] }
  0x37   : > { %2902 = vmatpush1.bf16.msra.mxu1 %v2901_v35  ;;  %v810_v19 = vld [vmem:[%s4077_s29 + $0x1170] sm:$0xff]  ;;  %v303_v22 = vld [vmem:[%s4077_s29 + $0x198] sm:$0xff]  ;;  %v4184_v23 = vld [vmem:[%s4072_s25] sm:$0xff]  ;;  %v2917_v28 = vpack.c.bf16 %v298_v17, %v296_v14 }
  0x38   : > { %3414 = vmatpush1.bf16.msra.mxu0 %v3413_v36  ;;  %2904 = vmatprep.subr.bf16.mxu1 %v2903_v37  ;;  %v813_v24 = vld [vmem:[%s4077_s29 + $0x1188] sm:$0xff]  ;;  %v815_v25 = vld [vmem:[%s4077_s29 + $0x1198] sm:$0xff]  ;;  %v4190_v26 = vrot.slane %v4184_v23, %v4175_v12  ;;  %v4193_v27 = vld [vmem:[%s4072_s25 + $0x20] sm:$0xff]  ;;  %v3429_v30 = vpack.c.bf16 %v810_v19, %v808_v18  ;;  %v2919_v31 = vpack.c.bf16 %v303_v22, %v301_v21 }
  0x39   : > { %3416 = vmatprep.subr.bf16.mxu0 %v3415_v41  ;;  %v4197_v29 = vrot.slane %v4193_v27, %v4175_v12  ;;  %v300_v32 = vld [vmem:[%s4077_s29 + $0x180] sm:$0xff]  ;;  %v302_v33 = vld [vmem:[%s4077_s29 + $0x190] sm:$0xff]  ;;  %v3431_v36 = vpack.c.bf16 %v815_v25, %v813_v24  ;;  %v305_v38 = vld [vmem:[%s4077_s29 + $0x1a8] sm:$0xff] }
  0x3a   : > { %v812_v34 = vld [vmem:[%s4077_s29 + $0x1180] sm:$0xff]  ;;  %v1299_v35 = vcombine.high %v4190_v26, %v4190_v26  ;;  %v814_v37 = vld [vmem:[%s4077_s29 + $0x1190] sm:$0xff]  ;;  %v307_v39 = vld [vmem:[%s4077_s29 + $0x1b8] sm:$0xff]  ;;  %v2921_v43 = vpack.c.bf16 %v302_v33, %v300_v32 }
  0x3b   : > { %2906 = vmatpush1.bf16.msra.mxu1 %v2905_v50  ;;  %v1367_v40 = vcombine.high %v4197_v29, %v4197_v29  ;;  %v817_v41 = vld [vmem:[%s4077_s29 + $0x11a8] sm:$0xff]  ;;  %v819_v42 = vld [vmem:[%s4077_s29 + $0x11b8] sm:$0xff]  ;;  %v3433_v44 = vpack.c.bf16 %v814_v37, %v812_v34  ;;  %v2923_v45 = vpack.c.bf16 %v307_v39, %v305_v38  ;;  %v304_v46 = vld [vmem:[%s4077_s29 + $0x1a0] sm:$0xff] }
  0x3c   : > { %3418 = vmatpush1.bf16.msra.mxu0 %v3417_v51  ;;  %2908 = vmatprep.subr.bf16.mxu1 %v2907_v52  ;;  %v306_v47 = vld [vmem:[%s4077_s29 + $0x1b0] sm:$0xff]  ;;  %v816_v48 = vld [vmem:[%s4077_s29 + $0x11a0] sm:$0xff]  ;;  %v3435_v49 = vpack.c.bf16 %v819_v42, %v817_v41  ;;  %v309_v51 = vld [vmem:[%s4077_s29 + $0x1c8] sm:$0xff] }
  0x3d   : > { %3420 = vmatprep.subr.bf16.mxu0 %v3419_v56  ;;  %1516 = vmatprep.mubr.f32.mxu1 %v1299_v35  ;;  %v818_v50 = vld [vmem:[%s4077_s29 + $0x11b0] sm:$0xff]  ;;  %v311_v52 = vld [vmem:[%s4077_s29 + $0x1d8] sm:$0xff]  ;;  %v821_v53 = vld [vmem:[%s4077_s29 + $0x11c8] sm:$0xff]  ;;  %v2925_v55 = vpack.c.bf16 %v306_v47, %v304_v46 }
  0x3e   : > { %2084 = vmatprep.mubr.f32.mxu0 %v1367_v40  ;;  %v823_v54 = vld [vmem:[%s4077_s29 + $0x11d8] sm:$0xff]  ;;  %v3437_v56 = vpack.c.bf16 %v818_v50, %v816_v48  ;;  %v2927_v57 = vpack.c.bf16 %v311_v52, %v309_v51  ;;  %v308_v58 = vld [vmem:[%s4077_s29 + $0x1c0] sm:$0xff]  ;;  %v310_v59 = vld [vmem:[%s4077_s29 + $0x1d0] sm:$0xff] }
  0x3f   : > { %2910 = vmatpush1.bf16.msra.mxu1 %v2909_v0  ;;  %v820_v60 = vld [vmem:[%s4077_s29 + $0x11c0] sm:$0xff]  ;;  %v3439_v61 = vpack.c.bf16 %v823_v54, %v821_v53  ;;  %v822_v62 = vld [vmem:[%s4077_s29 + $0x11d0] sm:$0xff]  ;;  %v313_v0 = vld [vmem:[%s4077_s29 + $0x1e8] sm:$0xff]  ;;  %v2929_v4 = vpack.c.bf16 %v310_v59, %v308_v58 }
  0x40   : > { %3422 = vmatpush1.bf16.msra.mxu0 %v3421_v1  ;;  %2912 = vmatprep.subr.bf16.mxu1 %v2911_v2  ;;  %v315_v1 = vld [vmem:[%s4077_s29 + $0x1f8] sm:$0xff]  ;;  %v825_v2 = vld [vmem:[%s4077_s29 + $0x11e8] sm:$0xff]  ;;  %v3441_v5 = vpack.c.bf16 %v822_v62, %v820_v60  ;;  %v312_v7 = vld [vmem:[%s4077_s29 + $0x1e0] sm:$0xff] }
  0x41   : > { %3424 = vmatprep.subr.bf16.mxu0 %v3423_v6  ;;  %v827_v3 = vld [vmem:[%s4077_s29 + $0x11f8] sm:$0xff]  ;;  %v2931_v6 = vpack.c.bf16 %v315_v1, %v313_v0  ;;  %v314_v8 = vld [vmem:[%s4077_s29 + $0x1f0] sm:$0xff]  ;;  %v824_v9 = vld [vmem:[%s4077_s29 + $0x11e0] sm:$0xff] }
  0x42   : > { %v3443_v10 = vpack.c.bf16 %v827_v3, %v825_v2  ;;  %v826_v11 = vld [vmem:[%s4077_s29 + $0x11f0] sm:$0xff]  ;;  %v317_v14 = vld [vmem:[%s4077_s29 + $0x208] sm:$0xff]  ;;  %v831_v18 = vld [vmem:[%s4077_s29 + $0x1218] sm:$0xff]  ;;  %v2933_v19 = vpack.c.bf16 %v314_v8, %v312_v7 }
  0x43   : > { %2914 = vmatpush1.bf16.msra.mxu1 %v2913_v13  ;;  %v1284_v13 = vcombine.high %v4184_v23, %v4184_v23  ;;  %v829_v17 = vld [vmem:[%s4077_s29 + $0x1208] sm:$0xff]  ;;  %v316_v22 = vld [vmem:[%s4077_s29 + $0x200] sm:$0xff]  ;;  %v318_v23 = vld [vmem:[%s4077_s29 + $0x210] sm:$0xff] }
  0x44   : > { %3426 = vmatpush1.bf16.msra.mxu0 %v3425_v15  ;;  %2916 = vmatprep.subr.bf16.mxu1 %v2915_v16  ;;  %v319_v15 = vld [vmem:[%s4077_s29 + $0x218] sm:$0xff]  ;;  %v1352_v16 = vcombine.high %v4193_v27, %v4193_v27  ;;  %v828_v24 = vld [vmem:[%s4077_s29 + $0x1200] sm:$0xff]  ;;  %v3447_v25 = vpack.c.bf16 %v831_v18, %v829_v17  ;;  %v830_v27 = vld [vmem:[%s4077_s29 + $0x1210] sm:$0xff]  ;;  %v2937_v35 = vpack.c.bf16 %v318_v23, %v316_v22 }
  0x45   : > { %3428 = vmatprep.subr.bf16.mxu0 %v3427_v20  ;;  %v3445_v20 = vpack.c.bf16 %v826_v11, %v824_v9  ;;  %v2935_v21 = vpack.c.bf16 %v319_v15, %v317_v14  ;;  %v833_v32 = vld [vmem:[%s4077_s29 + $0x1228] sm:$0xff]  ;;  %v835_v33 = vld [vmem:[%s4077_s29 + $0x1238] sm:$0xff]  ;;  %v320_v38 = vld [vmem:[%s4077_s29 + $0x220] sm:$0xff] }
  0x46   : > { %v4251_v34 = vrot.slane %v1352_v16, %v4175_v12  ;;  %v322_v39 = vld [vmem:[%s4077_s29 + $0x230] sm:$0xff]  ;;  %v832_v40 = vld [vmem:[%s4077_s29 + $0x1220] sm:$0xff]  ;;  %v3451_v41 = vpack.c.bf16 %v835_v33, %v833_v32  ;;  %v837_v46 = vld [vmem:[%s4077_s29 + $0x1248] sm:$0xff] }
  0x47   : > { %2918 = vmatpush1.bf16.msra.mxu1 %v2917_v28  ;;  %v321_v28 = vld [vmem:[%s4077_s29 + $0x228] sm:$0xff]  ;;  %v834_v42 = vld [vmem:[%s4077_s29 + $0x1230] sm:$0xff]  ;;  %v839_v47 = vld [vmem:[%s4077_s29 + $0x1258] sm:$0xff] }
  0x48   : > { %3430 = vmatpush1.bf16.msra.mxu0 %v3429_v30  ;;  %2920 = vmatprep.subr.bf16.mxu1 %v2919_v31  ;;  %v323_v30 = vld [vmem:[%s4077_s29 + $0x238] sm:$0xff]  ;;  %v4246_v31 = vrot.slane %v1284_v13, %v4175_v12  ;;  %v1368_v48 = vcombine.high %v4251_v34, %v4251_v34  ;;  %v3453_v50 = vpack.c.bf16 %v834_v42, %v832_v40  ;;  %v324_v52 = vld [vmem:[%s4077_s29 + $0x240] sm:$0xff]  ;;  %v330_v0 = vld [vmem:[%s4077_s29 + $0x270] sm:$0xff] }
  0x49   : > { %3432 = vmatprep.subr.bf16.mxu0 %v3431_v36  ;;  %v3449_v36 = vpack.c.bf16 %v830_v27, %v828_v24  ;;  %v2939_v37 = vpack.c.bf16 %v323_v30, %v321_v28  ;;  %v836_v53 = vld [vmem:[%s4077_s29 + $0x1240] sm:$0xff]  ;;  %v3455_v54 = vpack.c.bf16 %v839_v47, %v837_v46  ;;  %v843_v58 = vld [vmem:[%s4077_s29 + $0x1278] sm:$0xff]  ;;  %v842_v3 = vld [vmem:[%s4077_s29 + $0x1270] sm:$0xff] }
  0x4a   : > { %v328_v62 = vld [vmem:[%s4077_s29 + $0x260] sm:$0xff]  ;;  %v847_v7 = vld [vmem:[%s4077_s29 + $0x1298] sm:$0xff]  ;;  %v334_v13 = vld [vmem:[%s4077_s29 + $0x290] sm:$0xff] }
  0x4b   : > { %2922 = vmatpush1.bf16.msra.mxu1 %v2921_v43  ;;  %v325_v43 = vld [vmem:[%s4077_s29 + $0x248] sm:$0xff]  ;;  %v840_v1 = vld [vmem:[%s4077_s29 + $0x1260] sm:$0xff]  ;;  %v2949_v8 = vpack.c.bf16 %v330_v0, %v328_v62  ;;  %v846_v16 = vld [vmem:[%s4077_s29 + $0x1290] sm:$0xff] }
  0x4c   : > { %3434 = vmatpush1.bf16.msra.mxu0 %v3433_v44  ;;  %2924 = vmatprep.subr.bf16.mxu1 %v2923_v45  ;;  %v327_v44 = vld [vmem:[%s4077_s29 + $0x258] sm:$0xff]  ;;  %v1300_v45 = vcombine.high %v4246_v31, %v4246_v31  ;;  %v3461_v9 = vpack.c.bf16 %v842_v3, %v840_v1  ;;  %v332_v11 = vld [vmem:[%s4077_s29 + $0x280] sm:$0xff]  ;;  %v337_v17 = vld [vmem:[%s4077_s29 + $0x2a8] sm:$0xff] }
  0x4d   : > { %3436 = vmatprep.subr.bf16.mxu0 %v3435_v49  ;;  %v2941_v49 = vpack.c.bf16 %v322_v39, %v320_v38  ;;  %v2943_v51 = vpack.c.bf16 %v327_v44, %v325_v43  ;;  %v844_v14 = vld [vmem:[%s4077_s29 + $0x1280] sm:$0xff]  ;;  %v339_v18 = vld [vmem:[%s4077_s29 + $0x2b8] sm:$0xff]  ;;  %v850_v30 = vld [vmem:[%s4077_s29 + $0x12b0] sm:$0xff] }
  0x4e   : > { %v3465_v22 = vpack.c.bf16 %v846_v16, %v844_v14  ;;  %v2955_v23 = vpack.c.bf16 %v339_v18, %v337_v17  ;;  %v336_v24 = vld [vmem:[%s4077_s29 + $0x2a0] sm:$0xff]  ;;  %v341_v32 = vld [vmem:[%s4077_s29 + $0x2c8] sm:$0xff]  ;;  %v343_v33 = vld [vmem:[%s4077_s29 + $0x2d8] sm:$0xff] }
  0x4f   : > { %2926 = vmatpush1.bf16.msra.mxu1 %v2925_v55  ;;  %v838_v55 = vld [vmem:[%s4077_s29 + $0x1250] sm:$0xff]  ;;  %v848_v27 = vld [vmem:[%s4077_s29 + $0x12a0] sm:$0xff]  ;;  %v2959_v39 = vpack.c.bf16 %v343_v33, %v341_v32  ;;  %v347_v46 = vld [vmem:[%s4077_s29 + $0x2f8] sm:$0xff] }
  0x50   : > { %3438 = vmatpush1.bf16.msra.mxu0 %v3437_v56  ;;  %2928 = vmatprep.subr.bf16.mxu1 %v2927_v57  ;;  %v329_v56 = vld [vmem:[%s4077_s29 + $0x268] sm:$0xff]  ;;  %v331_v57 = vld [vmem:[%s4077_s29 + $0x278] sm:$0xff]  ;;  %v3457_v60 = vpack.c.bf16 %v838_v55, %v836_v53  ;;  %v3469_v38 = vpack.c.bf16 %v850_v30, %v848_v27  ;;  %v340_v40 = vld [vmem:[%s4077_s29 + $0x2c0] sm:$0xff] }
  0x51   : > { %3440 = vmatprep.subr.bf16.mxu0 %v3439_v61  ;;  %v2947_v61 = vpack.c.bf16 %v331_v57, %v329_v56  ;;  %v852_v42 = vld [vmem:[%s4077_s29 + $0x12c0] sm:$0xff]  ;;  %v854_v44 = vld [vmem:[%s4077_s29 + $0x12d0] sm:$0xff]  ;;  %v857_v47 = vld [vmem:[%s4077_s29 + $0x12e8] sm:$0xff] }
  0x52   : > { %v856_v53 = vld [vmem:[%s4077_s29 + $0x12e0] sm:$0xff]  ;;  %v858_v55 = vld [vmem:[%s4077_s29 + $0x12f0] sm:$0xff]  ;;  %v349_v56 = vld [vmem:[%s4077_s29 + $0x308] sm:$0xff] }
  0x53   : > { %2930 = vmatpush1.bf16.msra.mxu1 %v2929_v4  ;;  %v333_v4 = vld [vmem:[%s4077_s29 + $0x288] sm:$0xff]  ;;  %v351_v57 = vld [vmem:[%s4077_s29 + $0x318] sm:$0xff]  ;;  %v348_v62 = vld [vmem:[%s4077_s29 + $0x300] sm:$0xff] }
  0x54   : > { %3442 = vmatpush1.bf16.msra.mxu0 %v3441_v5  ;;  %2932 = vmatprep.subr.bf16.mxu1 %v2931_v6  ;;  %v335_v5 = vld [vmem:[%s4077_s29 + $0x298] sm:$0xff]  ;;  %v845_v6 = vld [vmem:[%s4077_s29 + $0x1288] sm:$0xff]  ;;  %v350_v0 = vld [vmem:[%s4077_s29 + $0x310] sm:$0xff] }
  0x55   : > { %3444 = vmatprep.subr.bf16.mxu0 %v3443_v10  ;;  %v2951_v10 = vpack.c.bf16 %v335_v5, %v333_v4  ;;  %v3463_v15 = vpack.c.bf16 %v847_v7, %v845_v6  ;;  %v860_v1 = vld [vmem:[%s4077_s29 + $0x1300] sm:$0xff]  ;;  %v862_v3 = vld [vmem:[%s4077_s29 + $0x1310] sm:$0xff]  ;;  %v353_v4 = vld [vmem:[%s4077_s29 + $0x328] sm:$0xff] }
  0x56   : > { %v355_v5 = vld [vmem:[%s4077_s29 + $0x338] sm:$0xff]  ;;  %v865_v6 = vld [vmem:[%s4077_s29 + $0x1328] sm:$0xff]  ;;  %v864_v14 = vld [vmem:[%s4077_s29 + $0x1320] sm:$0xff] }
  0x57   : > { %2934 = vmatpush1.bf16.msra.mxu1 %v2933_v19  ;;  %v849_v19 = vld [vmem:[%s4077_s29 + $0x12a8] sm:$0xff]  ;;  %v867_v7 = vld [vmem:[%s4077_s29 + $0x1338] sm:$0xff]  ;;  %v866_v16 = vld [vmem:[%s4077_s29 + $0x1330] sm:$0xff] }
  0x58   : > { %3446 = vmatpush1.bf16.msra.mxu0 %v3445_v20  ;;  %2936 = vmatprep.subr.bf16.mxu1 %v2935_v21  ;;  %v851_v20 = vld [vmem:[%s4077_s29 + $0x12b8] sm:$0xff]  ;;  %v2953_v21 = vpack.c.bf16 %v334_v13, %v332_v11  ;;  %v352_v11 = vld [vmem:[%s4077_s29 + $0x320] sm:$0xff]  ;;  %v354_v13 = vld [vmem:[%s4077_s29 + $0x330] sm:$0xff] }
  0x59   : > { %3448 = vmatprep.subr.bf16.mxu0 %v3447_v25  ;;  %v338_v25 = vld [vmem:[%s4077_s29 + $0x2b0] sm:$0xff]  ;;  %v3467_v28 = vpack.c.bf16 %v851_v20, %v849_v19  ;;  %v357_v17 = vld [vmem:[%s4077_s29 + $0x348] sm:$0xff]  ;;  %v359_v18 = vld [vmem:[%s4077_s29 + $0x358] sm:$0xff] }
  0x5a   : > { %1517 = vmatmul.mubr.f32.vlgmr.msra.gmra.mrb[0].mxu1 %v4190_v26  ;;  %v326_v26 = vld [vmem:[%s4077_s29 + $0x250] sm:$0xff]  ;;  %v869_v19 = vld [vmem:[%s4077_s29 + $0x1348] sm:$0xff]  ;;  %v871_v20 = vld [vmem:[%s4077_s29 + $0x1358] sm:$0xff] }
  0x5b   : > { %2938 = vmatpush1.bf16.msra.mxu1 %v2937_v35  ;;  %2085 = vmatmul.mubr.f32.vlgmr.msra.gmra.mrb[0].mxu0 %v4197_v29  ;;  %v841_v29 = vld [vmem:[%s4077_s29 + $0x1268] sm:$0xff]  ;;  %v2945_v59 = vpack.c.bf16 %v326_v26, %v324_v52  ;;  %v344_v52 = vld [vmem:[%s4077_s29 + $0x2e0] sm:$0xff]  ;;  %v346_v26 = vld [vmem:[%s4077_s29 + $0x2f0] sm:$0xff] }
  0x5c   : > { %3450 = vmatpush1.bf16.msra.mxu0 %v3449_v36  ;;  %2940 = vmatprep.subr.bf16.mxu1 %v2939_v37  ;;  %v3459_v2 = vpack.c.bf16 %v843_v58, %v841_v29  ;;  %v853_v35 = vld [vmem:[%s4077_s29 + $0x12c8] sm:$0xff]  ;;  %v855_v36 = vld [vmem:[%s4077_s29 + $0x12d8] sm:$0xff]  ;;  %v2957_v37 = vpack.c.bf16 %v338_v25, %v336_v24  ;;  %v356_v24 = vld [vmem:[%s4077_s29 + $0x340] sm:$0xff] }
  0x5d   : > { %3452 = vmatprep.subr.bf16.mxu0 %v3451_v41  ;;  %1587 = vmatprep.mubr.f32.mxu1 %v1300_v45  ;;  %v342_v41 = vld [vmem:[%s4077_s29 + $0x2d0] sm:$0xff]  ;;  %v3471_v43 = vpack.c.bf16 %v855_v36, %v853_v35  ;;  %v345_v45 = vld [vmem:[%s4077_s29 + $0x2e8] sm:$0xff]  ;;  %v863_v58 = vld [vmem:[%s4077_s29 + $0x1318] sm:$0xff] }
  0x5e   : > { %2155 = vmatprep.mubr.f32.mxu0 %v1368_v48  ;;  %v859_v48 = vld [vmem:[%s4077_s29 + $0x12f8] sm:$0xff]  ;;  %v861_v29 = vld [vmem:[%s4077_s29 + $0x1308] sm:$0xff]  ;;  %v358_v25 = vld [vmem:[%s4077_s29 + $0x350] sm:$0xff] }
  0x5f   : > { %2942 = vmatpush1.bf16.msra.mxu1 %v2941_v49  ;;  %v2961_v49 = vpack.c.bf16 %v342_v41, %v340_v40  ;;  %v868_v27 = vld [vmem:[%s4077_s29 + $0x1340] sm:$0xff]  ;;  %v870_v30 = vld [vmem:[%s4077_s29 + $0x1350] sm:$0xff]  ;;  %v361_v32 = vld [vmem:[%s4077_s29 + $0x368] sm:$0xff] }
  0x60   : > { %3454 = vmatpush1.bf16.msra.mxu0 %v3453_v50  ;;  %2944 = vmatprep.subr.bf16.mxu1 %v2943_v51  ;;  %v3473_v50 = vpack.c.bf16 %v854_v44, %v852_v42  ;;  %v2963_v51 = vpack.c.bf16 %v347_v46, %v345_v45  ;;  %v363_v33 = vld [vmem:[%s4077_s29 + $0x378] sm:$0xff]  ;;  %v873_v35 = vld [vmem:[%s4077_s29 + $0x1368] sm:$0xff]  ;;  %v360_v40 = vld [vmem:[%s4077_s29 + $0x360] sm:$0xff] }
  0x61   : > { %3456 = vmatprep.subr.bf16.mxu0 %v3455_v54  ;;  %v3475_v54 = vpack.c.bf16 %v859_v48, %v857_v47  ;;  %v875_v36 = vld [vmem:[%s4077_s29 + $0x1378] sm:$0xff]  ;;  %v362_v41 = vld [vmem:[%s4077_s29 + $0x370] sm:$0xff]  ;;  %v872_v42 = vld [vmem:[%s4077_s29 + $0x1360] sm:$0xff] }
  0x62   : > { %v874_v44 = vld [vmem:[%s4077_s29 + $0x1370] sm:$0xff]  ;;  %v365_v45 = vld [vmem:[%s4077_s29 + $0x388] sm:$0xff]  ;;  %v367_v46 = vld [vmem:[%s4077_s29 + $0x398] sm:$0xff] }
  0x63   : > { %2946 = vmatpush1.bf16.msra.mxu1 %v2945_v59  ;;  %v2965_v59 = vpack.c.bf16 %v346_v26, %v344_v52  ;;  %v877_v47 = vld [vmem:[%s4077_s29 + $0x1388] sm:$0xff]  ;;  %v879_v48 = vld [vmem:[%s4077_s29 + $0x1398] sm:$0xff]  ;;  %v364_v52 = vld [vmem:[%s4077_s29 + $0x380] sm:$0xff] }
  0x64   : > { %3458 = vmatpush1.bf16.msra.mxu0 %v3457_v60  ;;  %2948 = vmatprep.subr.bf16.mxu1 %v2947_v61  ;;  %v3477_v60 = vpack.c.bf16 %v858_v55, %v856_v53  ;;  %v2967_v61 = vpack.c.bf16 %v351_v57, %v349_v56  ;;  %v366_v26 = vld [vmem:[%s4077_s29 + $0x390] sm:$0xff]  ;;  %v876_v53 = vld [vmem:[%s4077_s29 + $0x1380] sm:$0xff]  ;;  %v369_v56 = vld [vmem:[%s4077_s29 + $0x3a8] sm:$0xff] }
  0x65   : > { %3460 = vmatprep.subr.bf16.mxu0 %v3459_v2  ;;  %v3479_v2 = vpack.c.bf16 %v863_v58, %v861_v29  ;;  %v878_v55 = vld [vmem:[%s4077_s29 + $0x1390] sm:$0xff]  ;;  %v371_v57 = vld [vmem:[%s4077_s29 + $0x3b8] sm:$0xff]  ;;  %v881_v29 = vld [vmem:[%s4077_s29 + $0x13a8] sm:$0xff] }
  0x66   : > { %v883_v58 = vld [vmem:[%s4077_s29 + $0x13b8] sm:$0xff] }
  0x67   : > { %2950 = vmatpush1.bf16.msra.mxu1 %v2949_v8  ;;  %v2969_v8 = vpack.c.bf16 %v350_v0, %v348_v62  ;;  %v368_v62 = vld [vmem:[%s4077_s29 + $0x3a0] sm:$0xff]  ;;  %v370_v0 = vld [vmem:[%s4077_s29 + $0x3b0] sm:$0xff] }
  0x68   : > { %3462 = vmatpush1.bf16.msra.mxu0 %v3461_v9  ;;  %2952 = vmatprep.subr.bf16.mxu1 %v2951_v10  ;;  %v3481_v9 = vpack.c.bf16 %v862_v3, %v860_v1  ;;  %v2971_v10 = vpack.c.bf16 %v355_v5, %v353_v4  ;;  %v880_v1 = vld [vmem:[%s4077_s29 + $0x13a0] sm:$0xff]  ;;  %v882_v3 = vld [vmem:[%s4077_s29 + $0x13b0] sm:$0xff]  ;;  %v373_v4 = vld [vmem:[%s4077_s29 + $0x3c8] sm:$0xff] }
  0x69   : > { %3464 = vmatprep.subr.bf16.mxu0 %v3463_v15  ;;  %v3483_v15 = vpack.c.bf16 %v867_v7, %v865_v6  ;;  %v375_v5 = vld [vmem:[%s4077_s29 + $0x3d8] sm:$0xff]  ;;  %v885_v6 = vld [vmem:[%s4077_s29 + $0x13c8] sm:$0xff] }
  0x6a   : > { %v887_v7 = vld [vmem:[%s4077_s29 + $0x13d8] sm:$0xff] }
  0x6b   : > { %2954 = vmatpush1.bf16.msra.mxu1 %v2953_v21  ;;  %v2973_v21 = vpack.c.bf16 %v354_v13, %v352_v11  ;;  %v372_v11 = vld [vmem:[%s4077_s29 + $0x3c0] sm:$0xff]  ;;  %v374_v13 = vld [vmem:[%s4077_s29 + $0x3d0] sm:$0xff] }
  0x6c   : > { %3466 = vmatpush1.bf16.msra.mxu0 %v3465_v22  ;;  %2956 = vmatprep.subr.bf16.mxu1 %v2955_v23  ;;  %v3485_v22 = vpack.c.bf16 %v866_v16, %v864_v14  ;;  %v2975_v23 = vpack.c.bf16 %v359_v18, %v357_v17  ;;  %v884_v14 = vld [vmem:[%s4077_s29 + $0x13c0] sm:$0xff]  ;;  %v886_v16 = vld [vmem:[%s4077_s29 + $0x13d0] sm:$0xff]  ;;  %v377_v17 = vld [vmem:[%s4077_s29 + $0x3e8] sm:$0xff] }
  0x6d   : > { %3468 = vmatprep.subr.bf16.mxu0 %v3467_v28  ;;  %v3487_v28 = vpack.c.bf16 %v871_v20, %v869_v19  ;;  %v379_v18 = vld [vmem:[%s4077_s29 + $0x3f8] sm:$0xff]  ;;  %v889_v19 = vld [vmem:[%s4077_s29 + $0x13e8] sm:$0xff] }
  0x6e   : > { %v891_v20 = vld [vmem:[%s4077_s29 + $0x13f8] sm:$0xff] }
  0x6f   : > { %2958 = vmatpush1.bf16.msra.mxu1 %v2957_v37  ;;  %v2977_v37 = vpack.c.bf16 %v358_v25, %v356_v24  ;;  %v376_v24 = vld [vmem:[%s4077_s29 + $0x3e0] sm:$0xff]  ;;  %v378_v25 = vld [vmem:[%s4077_s29 + $0x3f0] sm:$0xff] }
  0x70   : > { %3470 = vmatpush1.bf16.msra.mxu0 %v3469_v38  ;;  %2960 = vmatprep.subr.bf16.mxu1 %v2959_v39  ;;  %v3489_v38 = vpack.c.bf16 %v870_v30, %v868_v27  ;;  %v2979_v39 = vpack.c.bf16 %v363_v33, %v361_v32  ;;  %v888_v27 = vld [vmem:[%s4077_s29 + $0x13e0] sm:$0xff]  ;;  %v890_v30 = vld [vmem:[%s4077_s29 + $0x13f0] sm:$0xff]  ;;  %v381_v32 = vld [vmem:[%s4077_s29 + $0x408] sm:$0xff] }
  0x71   : > { %3472 = vmatprep.subr.bf16.mxu0 %v3471_v43  ;;  %v3491_v43 = vpack.c.bf16 %v875_v36, %v873_v35  ;;  %v383_v33 = vld [vmem:[%s4077_s29 + $0x418] sm:$0xff]  ;;  %v893_v35 = vld [vmem:[%s4077_s29 + $0x1408] sm:$0xff] }
  0x72   : > { %v895_v36 = vld [vmem:[%s4077_s29 + $0x1418] sm:$0xff] }
  0x73   : > { %2962 = vmatpush1.bf16.msra.mxu1 %v2961_v49  ;;  %v2981_v49 = vpack.c.bf16 %v362_v41, %v360_v40  ;;  %v380_v40 = vld [vmem:[%s4077_s29 + $0x400] sm:$0xff]  ;;  %v382_v41 = vld [vmem:[%s4077_s29 + $0x410] sm:$0xff] }
  0x74   : > { %3474 = vmatpush1.bf16.msra.mxu0 %v3473_v50  ;;  %2964 = vmatprep.subr.bf16.mxu1 %v2963_v51  ;;  %v3493_v50 = vpack.c.bf16 %v874_v44, %v872_v42  ;;  %v2983_v51 = vpack.c.bf16 %v367_v46, %v365_v45  ;;  %v892_v42 = vld [vmem:[%s4077_s29 + $0x1400] sm:$0xff]  ;;  %v894_v44 = vld [vmem:[%s4077_s29 + $0x1410] sm:$0xff]  ;;  %v385_v45 = vld [vmem:[%s4077_s29 + $0x428] sm:$0xff] }
  0x75   : > { %3476 = vmatprep.subr.bf16.mxu0 %v3475_v54  ;;  %v3495_v54 = vpack.c.bf16 %v879_v48, %v877_v47  ;;  %v387_v46 = vld [vmem:[%s4077_s29 + $0x438] sm:$0xff]  ;;  %v897_v47 = vld [vmem:[%s4077_s29 + $0x1428] sm:$0xff] }
  0x76   : > { %v899_v48 = vld [vmem:[%s4077_s29 + $0x1438] sm:$0xff] }
  0x77   : > { %2966 = vmatpush1.bf16.msra.mxu1 %v2965_v59  ;;  %v2985_v59 = vpack.c.bf16 %v366_v26, %v364_v52  ;;  %v3513_v52 = vpack.c.bf16 %v894_v44, %v892_v42  ;;  %v3003_v26 = vpack.c.bf16 %v387_v46, %v385_v45  ;;  %v400_v44 = vld [vmem:[%s4077_s29 + $0x4a0] sm:$0xff]  ;;  %v402_v45 = vld [vmem:[%s4077_s29 + $0x4b0] sm:$0xff] }
  0x78   : > { %3478 = vmatpush1.bf16.msra.mxu0 %v3477_v60  ;;  %2968 = vmatprep.subr.bf16.mxu1 %v2967_v61  ;;  %v3497_v60 = vpack.c.bf16 %v878_v55, %v876_v53  ;;  %v2987_v61 = vpack.c.bf16 %v371_v57, %v369_v56  ;;  %v386_v53 = vld [vmem:[%s4077_s29 + $0x430] sm:$0xff]  ;;  %v4398_v56 = vld [vmem:[%s4072_s25 + $0x28] sm:$0xff]  ;;  %v3515_v57 = vpack.c.bf16 %v899_v48, %v897_v47  ;;  %v912_v46 = vld [vmem:[%s4077_s29 + $0x14a0] sm:$0xff] }
  0x79   : > { %3480 = vmatprep.subr.bf16.mxu0 %v3479_v2  ;;  %v3499_v2 = vpack.c.bf16 %v883_v58, %v881_v29  ;;  %v898_v29 = vld [vmem:[%s4077_s29 + $0x1430] sm:$0xff]  ;;  %v389_v58 = vld [vmem:[%s4077_s29 + $0x448] sm:$0xff] }
  0x7a   : > { %v914_v48 = vld [vmem:[%s4077_s29 + $0x14b0] sm:$0xff] }
  0x7b   : > { %2970 = vmatpush1.bf16.msra.mxu1 %v2969_v8  ;;  %v2989_v8 = vpack.c.bf16 %v370_v0, %v368_v62  ;;  %v903_v62 = vld [vmem:[%s4077_s29 + $0x1458] sm:$0xff] }
  0x7c   : > { %3482 = vmatpush1.bf16.msra.mxu0 %v3481_v9  ;;  %2972 = vmatprep.subr.bf16.mxu1 %v2971_v10  ;;  %v3501_v9 = vpack.c.bf16 %v882_v3, %v880_v1  ;;  %v2991_v10 = vpack.c.bf16 %v375_v5, %v373_v4  ;;  %v388_v4 = vld [vmem:[%s4077_s29 + $0x440] sm:$0xff]  ;;  %v390_v5 = vld [vmem:[%s4077_s29 + $0x450] sm:$0xff] }
  0x7d   : > { %3484 = vmatprep.subr.bf16.mxu0 %v3483_v15  ;;  %v3503_v15 = vpack.c.bf16 %v887_v7, %v885_v6  ;;  %v900_v6 = vld [vmem:[%s4077_s29 + $0x1440] sm:$0xff] }
  0x7f   : > { %2974 = vmatpush1.bf16.msra.mxu1 %v2973_v21  ;;  %v2993_v21 = vpack.c.bf16 %v374_v13, %v372_v11  ;;  %v907_v11 = vld [vmem:[%s4077_s29 + $0x1478] sm:$0xff]  ;;  %v3009_v13 = vpack.c.bf16 %v390_v5, %v388_v4 }
  0x80   : > { %3486 = vmatpush1.bf16.msra.mxu0 %v3485_v22  ;;  %2976 = vmatprep.subr.bf16.mxu1 %v2975_v23  ;;  %v3505_v22 = vpack.c.bf16 %v886_v16, %v884_v14  ;;  %v2995_v23 = vpack.c.bf16 %v379_v18, %v377_v17  ;;  %v392_v16 = vld [vmem:[%s4077_s29 + $0x460] sm:$0xff]  ;;  %v394_v17 = vld [vmem:[%s4077_s29 + $0x470] sm:$0xff] }
  0x81   : > { %3488 = vmatprep.subr.bf16.mxu0 %v3487_v28  ;;  %v3507_v28 = vpack.c.bf16 %v891_v20, %v889_v19  ;;  %v904_v18 = vld [vmem:[%s4077_s29 + $0x1460] sm:$0xff]  ;;  %v906_v20 = vld [vmem:[%s4077_s29 + $0x1470] sm:$0xff] }
  0x83   : > { %2978 = vmatpush1.bf16.msra.mxu1 %v2977_v37  ;;  %v2997_v37 = vpack.c.bf16 %v378_v25, %v376_v24  ;;  %v911_v24 = vld [vmem:[%s4077_s29 + $0x1498] sm:$0xff]  ;;  %v3013_v25 = vpack.c.bf16 %v394_v17, %v392_v16 }
  0x84   : > { %3490 = vmatpush1.bf16.msra.mxu0 %v3489_v38  ;;  %2980 = vmatprep.subr.bf16.mxu1 %v2979_v39  ;;  %v3509_v38 = vpack.c.bf16 %v890_v30, %v888_v27  ;;  %v2999_v39 = vpack.c.bf16 %v383_v33, %v381_v32  ;;  %v3525_v27 = vpack.c.bf16 %v906_v20, %v904_v18  ;;  %v396_v30 = vld [vmem:[%s4077_s29 + $0x480] sm:$0xff]  ;;  %v398_v32 = vld [vmem:[%s4077_s29 + $0x490] sm:$0xff] }
  0x85   : > { %3492 = vmatprep.subr.bf16.mxu0 %v3491_v43  ;;  %v3511_v43 = vpack.c.bf16 %v895_v36, %v893_v35  ;;  %v908_v33 = vld [vmem:[%s4077_s29 + $0x1480] sm:$0xff]  ;;  %v910_v36 = vld [vmem:[%s4077_s29 + $0x1490] sm:$0xff] }
  0x86   : > { %v3529_v42 = vpack.c.bf16 %v910_v36, %v908_v33  ;;  %v412_v18 = vld [vmem:[%s4077_s29 + $0x500] sm:$0xff] }
  0x87   : > { %2982 = vmatpush1.bf16.msra.mxu1 %v2981_v49  ;;  %v3001_v49 = vpack.c.bf16 %v382_v41, %v380_v40  ;;  %v915_v40 = vld [vmem:[%s4077_s29 + $0x14b8] sm:$0xff]  ;;  %v3017_v41 = vpack.c.bf16 %v398_v32, %v396_v30  ;;  %v924_v20 = vld [vmem:[%s4077_s29 + $0x1500] sm:$0xff] }
  0x88   : > { %3494 = vmatpush1.bf16.msra.mxu0 %v3493_v50  ;;  %2984 = vmatprep.subr.bf16.mxu1 %v2983_v51  ;;  %v384_v50 = vld [vmem:[%s4077_s29 + $0x420] sm:$0xff]  ;;  %v4389_v51 = vld [vmem:[%s4072_s25 + $0x8] sm:$0xff] }
  0x89   : > { %3496 = vmatprep.subr.bf16.mxu0 %v3495_v54  ;;  %v896_v54 = vld [vmem:[%s4077_s29 + $0x1420] sm:$0xff]  ;;  %v4395_v55 = vrot.slane %v4389_v51, %v4175_v12  ;;  %v3005_v1 = vpack.c.bf16 %v386_v53, %v384_v50  ;;  %v407_v50 = vld [vmem:[%s4077_s29 + $0x4d8] sm:$0xff]  ;;  %v3021_v53 = vpack.c.bf16 %v402_v45, %v400_v44 }
  0x8a   : > { %v416_v33 = vld [vmem:[%s4077_s29 + $0x520] sm:$0xff] }
  0x8b   : > { %2986 = vmatpush1.bf16.msra.mxu1 %v2985_v59  ;;  %v391_v59 = vld [vmem:[%s4077_s29 + $0x458] sm:$0xff]  ;;  %v1316_v0 = vcombine.high %v4395_v55, %v4395_v55  ;;  %v928_v36 = vld [vmem:[%s4077_s29 + $0x1520] sm:$0xff] }
  0x8c   : > { %3498 = vmatpush1.bf16.msra.mxu0 %v3497_v60  ;;  %2988 = vmatprep.subr.bf16.mxu1 %v2987_v61  ;;  %v4405_v60 = vrot.slane %v4398_v56, %v4175_v12  ;;  %v901_v61 = vld [vmem:[%s4077_s29 + $0x1448] sm:$0xff]  ;;  %v3007_v3 = vpack.c.bf16 %v391_v59, %v389_v58  ;;  %v406_v58 = vld [vmem:[%s4077_s29 + $0x4d0] sm:$0xff]  ;;  %v916_v59 = vld [vmem:[%s4077_s29 + $0x14c0] sm:$0xff] }
  0x8d   : > { %3500 = vmatprep.subr.bf16.mxu0 %v3499_v2  ;;  %v3519_v7 = vpack.c.bf16 %v903_v62, %v901_v61  ;;  %v918_v62 = vld [vmem:[%s4077_s29 + $0x14d0] sm:$0xff] }
  0x8e   : > { %v1384_v2 = vcombine.high %v4405_v60, %v4405_v60  ;;  %v3537_v4 = vpack.c.bf16 %v918_v62, %v916_v59  ;;  %v424_v59 = vld [vmem:[%s4077_s29 + $0x560] sm:$0xff] }
  0x8f   : > { %2990 = vmatpush1.bf16.msra.mxu1 %v2989_v8  ;;  %v902_v8 = vld [vmem:[%s4077_s29 + $0x1450] sm:$0xff]  ;;  %v936_v62 = vld [vmem:[%s4077_s29 + $0x1560] sm:$0xff] }
  0x90   : > { %3502 = vmatpush1.bf16.msra.mxu0 %v3501_v9  ;;  %2992 = vmatprep.subr.bf16.mxu1 %v2991_v10  ;;  %v395_v9 = vld [vmem:[%s4077_s29 + $0x478] sm:$0xff]  ;;  %v905_v10 = vld [vmem:[%s4077_s29 + $0x1468] sm:$0xff]  ;;  %v3521_v14 = vpack.c.bf16 %v902_v8, %v900_v6  ;;  %v408_v6 = vld [vmem:[%s4077_s29 + $0x4e0] sm:$0xff] }
  0x91   : > { %3504 = vmatprep.subr.bf16.mxu0 %v3503_v15  ;;  %v3523_v19 = vpack.c.bf16 %v907_v11, %v905_v10  ;;  %v920_v8 = vld [vmem:[%s4077_s29 + $0x14e0] sm:$0xff]  ;;  %v413_v10 = vld [vmem:[%s4077_s29 + $0x508] sm:$0xff]  ;;  %v415_v11 = vld [vmem:[%s4077_s29 + $0x518] sm:$0xff] }
  0x92   : > { %v3031_v17 = vpack.c.bf16 %v415_v11, %v413_v10  ;;  %v942_v11 = vld [vmem:[%s4077_s29 + $0x1590] sm:$0xff] }
  0x93   : > { %2994 = vmatpush1.bf16.msra.mxu1 %v2993_v21  ;;  %v397_v21 = vld [vmem:[%s4077_s29 + $0x488] sm:$0xff] }
  0x94   : > { %3506 = vmatpush1.bf16.msra.mxu0 %v3505_v22  ;;  %2996 = vmatprep.subr.bf16.mxu1 %v2995_v23  ;;  %v399_v22 = vld [vmem:[%s4077_s29 + $0x498] sm:$0xff]  ;;  %v909_v23 = vld [vmem:[%s4077_s29 + $0x1488] sm:$0xff] }
  0x95   : > { %3508 = vmatprep.subr.bf16.mxu0 %v3507_v28  ;;  %v3015_v28 = vpack.c.bf16 %v399_v22, %v397_v21  ;;  %v3527_v35 = vpack.c.bf16 %v911_v24, %v909_v23  ;;  %v926_v22 = vld [vmem:[%s4077_s29 + $0x1510] sm:$0xff]  ;;  %v417_v23 = vld [vmem:[%s4077_s29 + $0x528] sm:$0xff]  ;;  %v419_v24 = vld [vmem:[%s4077_s29 + $0x538] sm:$0xff] }
  0x96   : > { %v3545_v30 = vpack.c.bf16 %v926_v22, %v924_v20  ;;  %v3035_v32 = vpack.c.bf16 %v419_v24, %v417_v23  ;;  %v432_v20 = vld [vmem:[%s4077_s29 + $0x5a0] sm:$0xff]  ;;  %v946_v24 = vld [vmem:[%s4077_s29 + $0x15b0] sm:$0xff] }
  0x97   : > { %2998 = vmatpush1.bf16.msra.mxu1 %v2997_v37  ;;  %v401_v37 = vld [vmem:[%s4077_s29 + $0x4a8] sm:$0xff]  ;;  %v944_v22 = vld [vmem:[%s4077_s29 + $0x15a0] sm:$0xff] }
  0x98   : > { %3510 = vmatpush1.bf16.msra.mxu0 %v3509_v38  ;;  %3000 = vmatprep.subr.bf16.mxu1 %v2999_v39  ;;  %v403_v38 = vld [vmem:[%s4077_s29 + $0x4b8] sm:$0xff]  ;;  %v913_v39 = vld [vmem:[%s4077_s29 + $0x14a8] sm:$0xff] }
  0x99   : > { %3512 = vmatprep.subr.bf16.mxu0 %v3511_v43  ;;  %v3019_v43 = vpack.c.bf16 %v403_v38, %v401_v37  ;;  %v3531_v47 = vpack.c.bf16 %v915_v40, %v913_v39  ;;  %v930_v38 = vld [vmem:[%s4077_s29 + $0x1530] sm:$0xff]  ;;  %v421_v39 = vld [vmem:[%s4077_s29 + $0x548] sm:$0xff]  ;;  %v423_v40 = vld [vmem:[%s4077_s29 + $0x558] sm:$0xff] }
  0x9a   : > { %1588 = vmatmul.mubr.f32.vlgmr.msra.gmra.mrb[0].mxu1 %v4246_v31  ;;  %v3517_v31 = vpack.c.bf16 %v898_v29, %v896_v54  ;;  %v3533_v54 = vpack.c.bf16 %v914_v48, %v912_v46  ;;  %v404_v29 = vld [vmem:[%s4077_s29 + $0x4c0] sm:$0xff]  ;;  %v3549_v44 = vpack.c.bf16 %v930_v38, %v928_v36  ;;  %v3039_v45 = vpack.c.bf16 %v423_v40, %v421_v39  ;;  %v950_v40 = vld [vmem:[%s4077_s29 + $0x15d0] sm:$0xff] }
  0x9b   : > { %3002 = vmatpush1.bf16.msra.mxu1 %v3001_v49  ;;  %2156 = vmatmul.mubr.f32.vlgmr.msra.gmra.mrb[0].mxu0 %v4251_v34  ;;  %v393_v34 = vld [vmem:[%s4077_s29 + $0x468] sm:$0xff]  ;;  %v420_v46 = vld [vmem:[%s4077_s29 + $0x540] sm:$0xff] }
  0x9c   : > { %3514 = vmatpush1.bf16.msra.mxu0 %v3513_v52  ;;  %3004 = vmatprep.subr.bf16.mxu1 %v3003_v26  ;;  %v3011_v15 = vpack.c.bf16 %v395_v9, %v393_v34  ;;  %v405_v49 = vld [vmem:[%s4077_s29 + $0x4c8] sm:$0xff]  ;;  %v919_v26 = vld [vmem:[%s4077_s29 + $0x14d8] sm:$0xff]  ;;  %v922_v9 = vld [vmem:[%s4077_s29 + $0x14f0] sm:$0xff] }
  0x9d   : > { %3516 = vmatprep.subr.bf16.mxu0 %v3515_v57  ;;  %1658 = vmatprep.mubr.f32.mxu1 %v1316_v0  ;;  %v917_v52 = vld [vmem:[%s4077_s29 + $0x14c8] sm:$0xff]  ;;  %v3023_v57 = vpack.c.bf16 %v407_v50, %v405_v49  ;;  %v3541_v16 = vpack.c.bf16 %v922_v9, %v920_v8  ;;  %v932_v48 = vld [vmem:[%s4077_s29 + $0x1540] sm:$0xff]  ;;  %v934_v50 = vld [vmem:[%s4077_s29 + $0x1550] sm:$0xff] }
  0x9e   : > { %2226 = vmatprep.mubr.f32.mxu0 %v1384_v2  ;;  %v3535_v61 = vpack.c.bf16 %v919_v26, %v917_v52  ;;  %v409_v0 = vld [vmem:[%s4077_s29 + $0x4e8] sm:$0xff]  ;;  %v427_v26 = vld [vmem:[%s4077_s29 + $0x578] sm:$0xff]  ;;  %v428_v8 = vld [vmem:[%s4077_s29 + $0x580] sm:$0xff] }
  0x9f   : > { %3006 = vmatpush1.bf16.msra.mxu1 %v3005_v1  ;;  %v411_v1 = vld [vmem:[%s4077_s29 + $0x4f8] sm:$0xff]  ;;  %v921_v2 = vld [vmem:[%s4077_s29 + $0x14e8] sm:$0xff]  ;;  %v940_v9 = vld [vmem:[%s4077_s29 + $0x1580] sm:$0xff] }
  0xa0   : > { %3518 = vmatpush1.bf16.msra.mxu0 %v3517_v31  ;;  %3008 = vmatprep.subr.bf16.mxu1 %v3007_v3  ;;  %v923_v31 = vld [vmem:[%s4077_s29 + $0x14f8] sm:$0xff]  ;;  %v3025_v3 = vpack.c.bf16 %v406_v58, %v404_v29  ;;  %v3027_v5 = vpack.c.bf16 %v411_v1, %v409_v0  ;;  %v425_v52 = vld [vmem:[%s4077_s29 + $0x568] sm:$0xff]  ;;  %v3553_v29 = vpack.c.bf16 %v934_v50, %v932_v48  ;;  %v938_v1 = vld [vmem:[%s4077_s29 + $0x1570] sm:$0xff] }
  0xa1   : > { %3520 = vmatprep.subr.bf16.mxu0 %v3519_v7  ;;  %v410_v7 = vld [vmem:[%s4077_s29 + $0x4f0] sm:$0xff]  ;;  %v3539_v34 = vpack.c.bf16 %v923_v31, %v921_v2  ;;  %v3043_v58 = vpack.c.bf16 %v427_v26, %v425_v52  ;;  %v429_v2 = vld [vmem:[%s4077_s29 + $0x588] sm:$0xff]  ;;  %v431_v31 = vld [vmem:[%s4077_s29 + $0x598] sm:$0xff] }
  0xa2   : > { %v436_v36 = vld [vmem:[%s4077_s29 + $0x5c0] sm:$0xff]  ;;  %v954_v26 = vld [vmem:[%s4077_s29 + $0x15f0] sm:$0xff] }
  0xa3   : > { %3010 = vmatpush1.bf16.msra.mxu1 %v3009_v13  ;;  %v925_v13 = vld [vmem:[%s4077_s29 + $0x1508] sm:$0xff]  ;;  %v948_v38 = vld [vmem:[%s4077_s29 + $0x15c0] sm:$0xff] }
  0xa4   : > { %3522 = vmatpush1.bf16.msra.mxu0 %v3521_v14  ;;  %3012 = vmatprep.subr.bf16.mxu1 %v3011_v15  ;;  %v927_v14 = vld [vmem:[%s4077_s29 + $0x1518] sm:$0xff]  ;;  %v3029_v15 = vpack.c.bf16 %v410_v7, %v408_v6  ;;  %v3557_v6 = vpack.c.bf16 %v938_v1, %v936_v62  ;;  %v3047_v7 = vpack.c.bf16 %v431_v31, %v429_v2  ;;  %v440_v48 = vld [vmem:[%s4077_s29 + $0x5e0] sm:$0xff]  ;;  %v446_v2 = vld [vmem:[%s4077_s29 + $0x610] sm:$0xff] }
  0xa5   : > { %3524 = vmatprep.subr.bf16.mxu0 %v3523_v19  ;;  %v414_v19 = vld [vmem:[%s4077_s29 + $0x510] sm:$0xff]  ;;  %v3543_v21 = vpack.c.bf16 %v927_v14, %v925_v13  ;;  %v433_v13 = vld [vmem:[%s4077_s29 + $0x5a8] sm:$0xff]  ;;  %v435_v14 = vld [vmem:[%s4077_s29 + $0x5b8] sm:$0xff] }
  0xa6   : > { %v952_v50 = vld [vmem:[%s4077_s29 + $0x15e0] sm:$0xff] }
  0xa7   : > { %3014 = vmatpush1.bf16.msra.mxu1 %v3013_v25  ;;  %v929_v25 = vld [vmem:[%s4077_s29 + $0x1528] sm:$0xff]  ;;  %v3573_v62 = vpack.c.bf16 %v954_v26, %v952_v50  ;;  %v444_v1 = vld [vmem:[%s4077_s29 + $0x600] sm:$0xff] }
  0xa8   : > { %3526 = vmatpush1.bf16.msra.mxu0 %v3525_v27  ;;  %3016 = vmatprep.subr.bf16.mxu1 %v3015_v28  ;;  %v931_v27 = vld [vmem:[%s4077_s29 + $0x1538] sm:$0xff]  ;;  %v3033_v28 = vpack.c.bf16 %v414_v19, %v412_v18  ;;  %v3561_v18 = vpack.c.bf16 %v942_v11, %v940_v9  ;;  %v3051_v19 = vpack.c.bf16 %v435_v14, %v433_v13  ;;  %v956_v31 = vld [vmem:[%s4077_s29 + $0x1600] sm:$0xff]  ;;  %v450_v13 = vld [vmem:[%s4077_s29 + $0x630] sm:$0xff] }
  0xa9   : > { %3528 = vmatprep.subr.bf16.mxu0 %v3527_v35  ;;  %v418_v35 = vld [vmem:[%s4077_s29 + $0x530] sm:$0xff]  ;;  %v3547_v37 = vpack.c.bf16 %v931_v27, %v929_v25  ;;  %v437_v25 = vld [vmem:[%s4077_s29 + $0x5c8] sm:$0xff]  ;;  %v439_v27 = vld [vmem:[%s4077_s29 + $0x5d8] sm:$0xff] }
  0xaa   : > { %v448_v11 = vld [vmem:[%s4077_s29 + $0x620] sm:$0xff] }
  0xab   : > { %3018 = vmatpush1.bf16.msra.mxu1 %v3017_v41  ;;  %v933_v41 = vld [vmem:[%s4077_s29 + $0x1548] sm:$0xff]  ;;  %v960_v14 = vld [vmem:[%s4077_s29 + $0x1620] sm:$0xff] }
  0xac   : > { %3530 = vmatpush1.bf16.msra.mxu0 %v3529_v42  ;;  %3020 = vmatprep.subr.bf16.mxu1 %v3019_v43  ;;  %v935_v42 = vld [vmem:[%s4077_s29 + $0x1558] sm:$0xff]  ;;  %v3037_v43 = vpack.c.bf16 %v418_v35, %v416_v33  ;;  %v3565_v33 = vpack.c.bf16 %v946_v24, %v944_v22  ;;  %v3055_v35 = vpack.c.bf16 %v439_v27, %v437_v25  ;;  %v452_v27 = vld [vmem:[%s4077_s29 + $0x640] sm:$0xff] }
  0xad   : > { %3532 = vmatprep.subr.bf16.mxu0 %v3531_v47  ;;  %v422_v47 = vld [vmem:[%s4077_s29 + $0x550] sm:$0xff]  ;;  %v3551_v49 = vpack.c.bf16 %v935_v42, %v933_v41  ;;  %v441_v41 = vld [vmem:[%s4077_s29 + $0x5e8] sm:$0xff]  ;;  %v443_v42 = vld [vmem:[%s4077_s29 + $0x5f8] sm:$0xff] }
  0xae   : > { %v460_v26 = vld [vmem:[%s4077_s29 + $0x680] sm:$0xff] }
  0xaf   : > { %3022 = vmatpush1.bf16.msra.mxu1 %v3021_v53  ;;  %v937_v53 = vld [vmem:[%s4077_s29 + $0x1568] sm:$0xff] }
  0xb0   : > { %3534 = vmatpush1.bf16.msra.mxu0 %v3533_v54  ;;  %3024 = vmatprep.subr.bf16.mxu1 %v3023_v57  ;;  %v939_v54 = vld [vmem:[%s4077_s29 + $0x1578] sm:$0xff]  ;;  %v3041_v57 = vpack.c.bf16 %v422_v47, %v420_v46  ;;  %v3569_v46 = vpack.c.bf16 %v950_v40, %v948_v38  ;;  %v3059_v47 = vpack.c.bf16 %v443_v42, %v441_v41  ;;  %v456_v40 = vld [vmem:[%s4077_s29 + $0x660] sm:$0xff]  ;;  %v458_v41 = vld [vmem:[%s4077_s29 + $0x670] sm:$0xff] }
  0xb1   : > { %3536 = vmatprep.subr.bf16.mxu0 %v3535_v61  ;;  %v426_v61 = vld [vmem:[%s4077_s29 + $0x570] sm:$0xff]  ;;  %v3555_v0 = vpack.c.bf16 %v939_v54, %v937_v53  ;;  %v445_v53 = vld [vmem:[%s4077_s29 + $0x608] sm:$0xff]  ;;  %v447_v54 = vld [vmem:[%s4077_s29 + $0x618] sm:$0xff] }
  0xb2   : > { %v968_v42 = vld [vmem:[%s4077_s29 + $0x1660] sm:$0xff] }
  0xb3   : > { %3026 = vmatpush1.bf16.msra.mxu1 %v3025_v3  ;;  %v941_v3 = vld [vmem:[%s4077_s29 + $0x1588] sm:$0xff] }
  0xb4   : > { %3538 = vmatpush1.bf16.msra.mxu0 %v3537_v4  ;;  %3028 = vmatprep.subr.bf16.mxu1 %v3027_v5  ;;  %v943_v4 = vld [vmem:[%s4077_s29 + $0x1598] sm:$0xff]  ;;  %v3045_v5 = vpack.c.bf16 %v426_v61, %v424_v59  ;;  %v1369_v59 = vcombine.high %v4398_v56, %v4398_v56 }
  0xb5   : > { %3540 = vmatprep.subr.bf16.mxu0 %v3539_v34  ;;  %v430_v34 = vld [vmem:[%s4077_s29 + $0x590] sm:$0xff]  ;;  %v3559_v10 = vpack.c.bf16 %v943_v4, %v941_v3  ;;  %v449_v4 = vld [vmem:[%s4077_s29 + $0x628] sm:$0xff] }
  0xb6   : > { %v958_v3 = vld [vmem:[%s4077_s29 + $0x1610] sm:$0xff] }
  0xb7   : > { %3030 = vmatpush1.bf16.msra.mxu1 %v3029_v15  ;;  %v945_v15 = vld [vmem:[%s4077_s29 + $0x15a8] sm:$0xff]  ;;  %v3577_v9 = vpack.c.bf16 %v958_v3, %v956_v31  ;;  %v464_v31 = vld [vmem:[%s4077_s29 + $0x6a0] sm:$0xff] }
  0xb8   : > { %3542 = vmatpush1.bf16.msra.mxu0 %v3541_v16  ;;  %3032 = vmatprep.subr.bf16.mxu1 %v3031_v17  ;;  %v947_v16 = vld [vmem:[%s4077_s29 + $0x15b8] sm:$0xff]  ;;  %v3049_v17 = vpack.c.bf16 %v430_v34, %v428_v8  ;;  %v4543_v8 = vrot.slane %v1369_v59, %v4175_v12  ;;  %v3065_v34 = vpack.c.bf16 %v446_v2, %v444_v1  ;;  %v976_v3 = vld [vmem:[%s4077_s29 + $0x16a0] sm:$0xff] }
  0xb9   : > { %3544 = vmatprep.subr.bf16.mxu0 %v3543_v21  ;;  %v434_v21 = vld [vmem:[%s4077_s29 + $0x5b0] sm:$0xff]  ;;  %v3563_v23 = vpack.c.bf16 %v947_v16, %v945_v15  ;;  %v467_v59 = vld [vmem:[%s4077_s29 + $0x6b8] sm:$0xff] }
  0xba   : > { %v962_v16 = vld [vmem:[%s4077_s29 + $0x1630] sm:$0xff]  ;;  %v1385_v22 = vcombine.high %v4543_v8, %v4543_v8 }
  0xbb   : > { %3034 = vmatpush1.bf16.msra.mxu1 %v3033_v28  ;;  %v949_v28 = vld [vmem:[%s4077_s29 + $0x15c8] sm:$0xff]  ;;  %v3581_v24 = vpack.c.bf16 %v962_v16, %v960_v14  ;;  %v468_v14 = vld [vmem:[%s4077_s29 + $0x6c0] sm:$0xff] }
  0xbc   : > { %3546 = vmatpush1.bf16.msra.mxu0 %v3545_v30  ;;  %3036 = vmatprep.subr.bf16.mxu1 %v3035_v32  ;;  %v951_v30 = vld [vmem:[%s4077_s29 + $0x15d8] sm:$0xff]  ;;  %v3053_v32 = vpack.c.bf16 %v434_v21, %v432_v20  ;;  %v965_v20 = vld [vmem:[%s4077_s29 + $0x1648] sm:$0xff]  ;;  %v980_v16 = vld [vmem:[%s4077_s29 + $0x16c0] sm:$0xff] }
  0xbd   : > { %3548 = vmatprep.subr.bf16.mxu0 %v3547_v37  ;;  %v438_v37 = vld [vmem:[%s4077_s29 + $0x5d0] sm:$0xff]  ;;  %v3567_v39 = vpack.c.bf16 %v951_v30, %v949_v28  ;;  %v967_v21 = vld [vmem:[%s4077_s29 + $0x1658] sm:$0xff]  ;;  %v964_v28 = vld [vmem:[%s4077_s29 + $0x1640] sm:$0xff] }
  0xbe   : > { %v3583_v30 = vpack.c.bf16 %v967_v21, %v965_v20  ;;  %v475_v20 = vld [vmem:[%s4077_s29 + $0x6f8] sm:$0xff]  ;;  %v985_v21 = vld [vmem:[%s4077_s29 + $0x16e8] sm:$0xff] }
  0xbf   : > { %3038 = vmatpush1.bf16.msra.mxu1 %v3037_v43  ;;  %v953_v43 = vld [vmem:[%s4077_s29 + $0x15e8] sm:$0xff] }
  0xc0   : > { %3550 = vmatpush1.bf16.msra.mxu0 %v3549_v44  ;;  %3040 = vmatprep.subr.bf16.mxu1 %v3039_v45  ;;  %v955_v44 = vld [vmem:[%s4077_s29 + $0x15f8] sm:$0xff]  ;;  %v3057_v45 = vpack.c.bf16 %v438_v37, %v436_v36 }
  0xc1   : > { %3552 = vmatprep.subr.bf16.mxu0 %v3551_v49  ;;  %v442_v49 = vld [vmem:[%s4077_s29 + $0x5f0] sm:$0xff]  ;;  %v3571_v52 = vpack.c.bf16 %v955_v44, %v953_v43  ;;  %v971_v36 = vld [vmem:[%s4077_s29 + $0x1678] sm:$0xff] }
  0xc2   : > { %v3061_v61 = vpack.c.bf16 %v442_v49, %v440_v48  ;;  %v970_v44 = vld [vmem:[%s4077_s29 + $0x1670] sm:$0xff]  ;;  %v975_v48 = vld [vmem:[%s4077_s29 + $0x1698] sm:$0xff]  ;;  %v3077_v49 = vpack.c.bf16 %v458_v41, %v456_v40  ;;  %v476_v40 = vld [vmem:[%s4077_s29 + $0x700] sm:$0xff] }
  0xc3   : > { %3042 = vmatpush1.bf16.msra.mxu1 %v3041_v57  ;;  %v1301_v57 = vcombine.high %v4389_v51, %v4389_v51  ;;  %v3589_v50 = vpack.c.bf16 %v970_v44, %v968_v42  ;;  %v478_v41 = vld [vmem:[%s4077_s29 + $0x710] sm:$0xff]  ;;  %v988_v42 = vld [vmem:[%s4077_s29 + $0x1700] sm:$0xff] }
  0xc4   : > { %3554 = vmatpush1.bf16.msra.mxu0 %v3553_v29  ;;  %3044 = vmatprep.subr.bf16.mxu1 %v3043_v58  ;;  %v957_v29 = vld [vmem:[%s4077_s29 + $0x1608] sm:$0xff]  ;;  %v959_v58 = vld [vmem:[%s4077_s29 + $0x1618] sm:$0xff]  ;;  %v990_v44 = vld [vmem:[%s4077_s29 + $0x1710] sm:$0xff] }
  0xc5   : > { %3556 = vmatprep.subr.bf16.mxu0 %v3555_v0  ;;  %v3063_v0 = vpack.c.bf16 %v447_v54, %v445_v53  ;;  %v3575_v51 = vpack.c.bf16 %v959_v58, %v957_v29  ;;  %v4538_v56 = vrot.slane %v1301_v57, %v4175_v12  ;;  %v462_v53 = vld [vmem:[%s4077_s29 + $0x690] sm:$0xff]  ;;  %v972_v54 = vld [vmem:[%s4077_s29 + $0x1680] sm:$0xff]  ;;  %v465_v58 = vld [vmem:[%s4077_s29 + $0x6a8] sm:$0xff] }
  0xc6   : > { %v974_v29 = vld [vmem:[%s4077_s29 + $0x1690] sm:$0xff]  ;;  %v3083_v2 = vpack.c.bf16 %v467_v59, %v465_v58  ;;  %v485_v58 = vld [vmem:[%s4077_s29 + $0x748] sm:$0xff]  ;;  %v487_v59 = vld [vmem:[%s4077_s29 + $0x758] sm:$0xff] }
  0xc7   : > { %3046 = vmatpush1.bf16.msra.mxu1 %v3045_v5  ;;  %v451_v5 = vld [vmem:[%s4077_s29 + $0x638] sm:$0xff]  ;;  %v3593_v1 = vpack.c.bf16 %v974_v29, %v972_v54  ;;  %v992_v54 = vld [vmem:[%s4077_s29 + $0x1720] sm:$0xff]  ;;  %v994_v29 = vld [vmem:[%s4077_s29 + $0x1730] sm:$0xff] }
  0xc8   : > { %3558 = vmatpush1.bf16.msra.mxu0 %v3557_v6  ;;  %3048 = vmatprep.subr.bf16.mxu1 %v3047_v7  ;;  %v961_v6 = vld [vmem:[%s4077_s29 + $0x1628] sm:$0xff]  ;;  %v963_v7 = vld [vmem:[%s4077_s29 + $0x1638] sm:$0xff] }
  0xc9   : > { %3560 = vmatprep.subr.bf16.mxu0 %v3559_v10  ;;  %v3067_v10 = vpack.c.bf16 %v451_v5, %v449_v4  ;;  %v3579_v15 = vpack.c.bf16 %v963_v7, %v961_v6  ;;  %v978_v5 = vld [vmem:[%s4077_s29 + $0x16b0] sm:$0xff]  ;;  %v469_v6 = vld [vmem:[%s4077_s29 + $0x6c8] sm:$0xff]  ;;  %v471_v7 = vld [vmem:[%s4077_s29 + $0x6d8] sm:$0xff] }
  0xcb   : > { %3050 = vmatpush1.bf16.msra.mxu1 %v3049_v17  ;;  %v453_v17 = vld [vmem:[%s4077_s29 + $0x648] sm:$0xff] }
  0xcc   : > { %3562 = vmatpush1.bf16.msra.mxu0 %v3561_v18  ;;  %3052 = vmatprep.subr.bf16.mxu1 %v3051_v19  ;;  %v455_v18 = vld [vmem:[%s4077_s29 + $0x658] sm:$0xff]  ;;  %v1317_v19 = vcombine.high %v4538_v56, %v4538_v56 }
  0xcd   : > { %3564 = vmatprep.subr.bf16.mxu0 %v3563_v23  ;;  %v3069_v23 = vpack.c.bf16 %v450_v13, %v448_v11  ;;  %v3071_v25 = vpack.c.bf16 %v455_v18, %v453_v17  ;;  %v3597_v11 = vpack.c.bf16 %v978_v5, %v976_v3  ;;  %v3087_v13 = vpack.c.bf16 %v471_v7, %v469_v6  ;;  %v982_v18 = vld [vmem:[%s4077_s29 + $0x16d0] sm:$0xff]  ;;  %v996_v3 = vld [vmem:[%s4077_s29 + $0x1740] sm:$0xff]  ;;  %v489_v6 = vld [vmem:[%s4077_s29 + $0x768] sm:$0xff] }
  0xce   : > { %v998_v5 = vld [vmem:[%s4077_s29 + $0x1750] sm:$0xff]  ;;  %v491_v7 = vld [vmem:[%s4077_s29 + $0x778] sm:$0xff] }
  0xcf   : > { %3054 = vmatpush1.bf16.msra.mxu1 %v3053_v32  ;;  %v966_v32 = vld [vmem:[%s4077_s29 + $0x1650] sm:$0xff] }
  0xd0   : > { %3566 = vmatpush1.bf16.msra.mxu0 %v3565_v33  ;;  %3056 = vmatprep.subr.bf16.mxu1 %v3055_v35  ;;  %v457_v33 = vld [vmem:[%s4077_s29 + $0x668] sm:$0xff]  ;;  %v459_v35 = vld [vmem:[%s4077_s29 + $0x678] sm:$0xff]  ;;  %v3585_v38 = vpack.c.bf16 %v966_v32, %v964_v28  ;;  %v984_v28 = vld [vmem:[%s4077_s29 + $0x16e0] sm:$0xff] }
  0xd1   : > { %3568 = vmatprep.subr.bf16.mxu0 %v3567_v39  ;;  %v3075_v39 = vpack.c.bf16 %v459_v35, %v457_v33  ;;  %v986_v32 = vld [vmem:[%s4077_s29 + $0x16f0] sm:$0xff]  ;;  %v477_v33 = vld [vmem:[%s4077_s29 + $0x708] sm:$0xff]  ;;  %v479_v35 = vld [vmem:[%s4077_s29 + $0x718] sm:$0xff] }
  0xd3   : > { %3058 = vmatpush1.bf16.msra.mxu1 %v3057_v45  ;;  %v461_v45 = vld [vmem:[%s4077_s29 + $0x688] sm:$0xff] }
  0xd4   : > { %3570 = vmatpush1.bf16.msra.mxu0 %v3569_v46  ;;  %3060 = vmatprep.subr.bf16.mxu1 %v3059_v47  ;;  %v463_v46 = vld [vmem:[%s4077_s29 + $0x698] sm:$0xff]  ;;  %v973_v47 = vld [vmem:[%s4077_s29 + $0x1688] sm:$0xff] }
  0xd5   : > { %3572 = vmatprep.subr.bf16.mxu0 %v3571_v52  ;;  %v3079_v52 = vpack.c.bf16 %v463_v46, %v461_v45  ;;  %v3591_v57 = vpack.c.bf16 %v975_v48, %v973_v47  ;;  %v481_v45 = vld [vmem:[%s4077_s29 + $0x728] sm:$0xff]  ;;  %v483_v46 = vld [vmem:[%s4077_s29 + $0x738] sm:$0xff] }
  0xd6   : > { %v993_v47 = vld [vmem:[%s4077_s29 + $0x1728] sm:$0xff]  ;;  %v995_v48 = vld [vmem:[%s4077_s29 + $0x1738] sm:$0xff] }
  0xd7   : > { %3062 = vmatpush1.bf16.msra.mxu1 %v3061_v61  ;;  %v977_v61 = vld [vmem:[%s4077_s29 + $0x16a8] sm:$0xff] }
  0xd8   : > { %3574 = vmatpush1.bf16.msra.mxu0 %v3573_v62  ;;  %3064 = vmatprep.subr.bf16.mxu1 %v3063_v0  ;;  %v979_v62 = vld [vmem:[%s4077_s29 + $0x16b8] sm:$0xff]  ;;  %v3081_v0 = vpack.c.bf16 %v462_v53, %v460_v26  ;;  %v480_v26 = vld [vmem:[%s4077_s29 + $0x720] sm:$0xff]  ;;  %v482_v53 = vld [vmem:[%s4077_s29 + $0x730] sm:$0xff] }
  0xd9   : > { %3576 = vmatprep.subr.bf16.mxu0 %v3575_v51  ;;  %v466_v51 = vld [vmem:[%s4077_s29 + $0x6b0] sm:$0xff]  ;;  %v3595_v4 = vpack.c.bf16 %v979_v62, %v977_v61  ;;  %v997_v61 = vld [vmem:[%s4077_s29 + $0x1748] sm:$0xff]  ;;  %v999_v62 = vld [vmem:[%s4077_s29 + $0x1758] sm:$0xff] }
  0xda   : > { %1659 = vmatmul.mubr.f32.vlgmr.msra.gmra.mrb[0].mxu1 %v4395_v55  ;;  %v454_v55 = vld [vmem:[%s4077_s29 + $0x650] sm:$0xff] }
  0xdb   : > { %3066 = vmatpush1.bf16.msra.mxu1 %v3065_v34  ;;  %2227 = vmatmul.mubr.f32.vlgmr.msra.gmra.mrb[0].mxu0 %v4405_v60  ;;  %v969_v60 = vld [vmem:[%s4077_s29 + $0x1668] sm:$0xff]  ;;  %v3073_v37 = vpack.c.bf16 %v454_v55, %v452_v27  ;;  %v472_v27 = vld [vmem:[%s4077_s29 + $0x6e0] sm:$0xff]  ;;  %v474_v55 = vld [vmem:[%s4077_s29 + $0x6f0] sm:$0xff] }
  0xdc   : > { %3578 = vmatpush1.bf16.msra.mxu0 %v3577_v9  ;;  %3068 = vmatprep.subr.bf16.mxu1 %v3067_v10  ;;  %v3587_v43 = vpack.c.bf16 %v971_v36, %v969_v60  ;;  %v981_v34 = vld [vmem:[%s4077_s29 + $0x16c8] sm:$0xff]  ;;  %v983_v9 = vld [vmem:[%s4077_s29 + $0x16d8] sm:$0xff]  ;;  %v3085_v10 = vpack.c.bf16 %v466_v51, %v464_v31  ;;  %v484_v31 = vld [vmem:[%s4077_s29 + $0x740] sm:$0xff] }
  0xdd   : > { %3580 = vmatprep.subr.bf16.mxu0 %v3579_v15  ;;  %1729 = vmatprep.mubr.f32.mxu1 %v1317_v19  ;;  %v470_v15 = vld [vmem:[%s4077_s29 + $0x6d0] sm:$0xff]  ;;  %v3599_v17 = vpack.c.bf16 %v983_v9, %v981_v34  ;;  %v473_v19 = vld [vmem:[%s4077_s29 + $0x6e8] sm:$0xff]  ;;  %v991_v36 = vld [vmem:[%s4077_s29 + $0x1718] sm:$0xff] }
  0xde   : > { %2297 = vmatprep.mubr.f32.mxu0 %v1385_v22  ;;  %v987_v22 = vld [vmem:[%s4077_s29 + $0x16f8] sm:$0xff]  ;;  %v989_v60 = vld [vmem:[%s4077_s29 + $0x1708] sm:$0xff]  ;;  %v486_v51 = vld [vmem:[%s4077_s29 + $0x750] sm:$0xff] }
  0xdf   : > { %3070 = vmatpush1.bf16.msra.mxu1 %v3069_v23  ;;  %v3089_v23 = vpack.c.bf16 %v470_v15, %v468_v14  ;;  %v1001_v34 = vld [vmem:[%s4077_s29 + $0x1768] sm:$0xff]  ;;  %v1003_v9 = vld [vmem:[%s4077_s29 + $0x1778] sm:$0xff]  ;;  %v488_v14 = vld [vmem:[%s4077_s29 + $0x760] sm:$0xff] }
  0xe0   : > { %3582 = vmatpush1.bf16.msra.mxu0 %v3581_v24  ;;  %3072 = vmatprep.subr.bf16.mxu1 %v3071_v25  ;;  %v3601_v24 = vpack.c.bf16 %v982_v18, %v980_v16  ;;  %v3091_v25 = vpack.c.bf16 %v475_v20, %v473_v19  ;;  %v490_v15 = vld [vmem:[%s4077_s29 + $0x770] sm:$0xff]  ;;  %v1000_v16 = vld [vmem:[%s4077_s29 + $0x1760] sm:$0xff]  ;;  %v493_v19 = vld [vmem:[%s4077_s29 + $0x788] sm:$0xff] }
  0xe1   : > { %3584 = vmatprep.subr.bf16.mxu0 %v3583_v30  ;;  %v3603_v30 = vpack.c.bf16 %v987_v22, %v985_v21  ;;  %v1002_v18 = vld [vmem:[%s4077_s29 + $0x1770] sm:$0xff]  ;;  %v495_v20 = vld [vmem:[%s4077_s29 + $0x798] sm:$0xff]  ;;  %v1005_v21 = vld [vmem:[%s4077_s29 + $0x1788] sm:$0xff] }
  0xe2   : > { %v1007_v22 = vld [vmem:[%s4077_s29 + $0x1798] sm:$0xff] }
  0xe3   : > { %3074 = vmatpush1.bf16.msra.mxu1 %v3073_v37  ;;  %v3093_v37 = vpack.c.bf16 %v474_v55, %v472_v27  ;;  %v492_v27 = vld [vmem:[%s4077_s29 + $0x780] sm:$0xff]  ;;  %v494_v55 = vld [vmem:[%s4077_s29 + $0x790] sm:$0xff] }
  0xe4   : > { %3586 = vmatpush1.bf16.msra.mxu0 %v3585_v38  ;;  %3076 = vmatprep.subr.bf16.mxu1 %v3075_v39  ;;  %v3605_v38 = vpack.c.bf16 %v986_v32, %v984_v28  ;;  %v3095_v39 = vpack.c.bf16 %v479_v35, %v477_v33  ;;  %v1004_v28 = vld [vmem:[%s4077_s29 + $0x1780] sm:$0xff]  ;;  %v1006_v32 = vld [vmem:[%s4077_s29 + $0x1790] sm:$0xff]  ;;  %v497_v33 = vld [vmem:[%s4077_s29 + $0x7a8] sm:$0xff] }
  0xe5   : > { %3588 = vmatprep.subr.bf16.mxu0 %v3587_v43  ;;  %v3607_v43 = vpack.c.bf16 %v991_v36, %v989_v60  ;;  %v499_v35 = vld [vmem:[%s4077_s29 + $0x7b8] sm:$0xff]  ;;  %v1009_v60 = vld [vmem:[%s4077_s29 + $0x17a8] sm:$0xff] }
  0xe6   : > { %v1011_v36 = vld [vmem:[%s4077_s29 + $0x17b8] sm:$0xff] }
  0xe7   : > { %3078 = vmatpush1.bf16.msra.mxu1 %v3077_v49  ;;  %v3097_v49 = vpack.c.bf16 %v478_v41, %v476_v40  ;;  %v496_v40 = vld [vmem:[%s4077_s29 + $0x7a0] sm:$0xff]  ;;  %v498_v41 = vld [vmem:[%s4077_s29 + $0x7b0] sm:$0xff] }
  0xe8   : > { %3590 = vmatpush1.bf16.msra.mxu0 %v3589_v50  ;;  %3080 = vmatprep.subr.bf16.mxu1 %v3079_v52  ;;  %v3609_v50 = vpack.c.bf16 %v990_v44, %v988_v42  ;;  %v3099_v52 = vpack.c.bf16 %v483_v46, %v481_v45  ;;  %v1008_v42 = vld [vmem:[%s4077_s29 + $0x17a0] sm:$0xff]  ;;  %v1010_v44 = vld [vmem:[%s4077_s29 + $0x17b0] sm:$0xff]  ;;  %v501_v45 = vld [vmem:[%s4077_s29 + $0x7c8] sm:$0xff] }
  0xe9   : > { %3592 = vmatprep.subr.bf16.mxu0 %v3591_v57  ;;  %v3611_v57 = vpack.c.bf16 %v995_v48, %v993_v47  ;;  %v503_v46 = vld [vmem:[%s4077_s29 + $0x7d8] sm:$0xff]  ;;  %v1013_v47 = vld [vmem:[%s4077_s29 + $0x17c8] sm:$0xff] }
  0xea   : > { %v1015_v48 = vld [vmem:[%s4077_s29 + $0x17d8] sm:$0xff] }
  0xeb   : > { %3082 = vmatpush1.bf16.msra.mxu1 %v3081_v0  ;;  %v3101_v0 = vpack.c.bf16 %v482_v53, %v480_v26  ;;  %v500_v26 = vld [vmem:[%s4077_s29 + $0x7c0] sm:$0xff]  ;;  %v502_v53 = vld [vmem:[%s4077_s29 + $0x7d0] sm:$0xff] }
  0xec   : > { %3594 = vmatpush1.bf16.msra.mxu0 %v3593_v1  ;;  %3084 = vmatprep.subr.bf16.mxu1 %v3083_v2  ;;  %v3613_v1 = vpack.c.bf16 %v994_v29, %v992_v54  ;;  %v3103_v2 = vpack.c.bf16 %v487_v59, %v485_v58  ;;  %v1012_v54 = vld [vmem:[%s4077_s29 + $0x17c0] sm:$0xff]  ;;  %v1014_v29 = vld [vmem:[%s4077_s29 + $0x17d0] sm:$0xff]  ;;  %v505_v58 = vld [vmem:[%s4077_s29 + $0x7e8] sm:$0xff] }
  0xed   : > { %3596 = vmatprep.subr.bf16.mxu0 %v3595_v4  ;;  %v3615_v4 = vpack.c.bf16 %v999_v62, %v997_v61  ;;  %v507_v59 = vld [vmem:[%s4077_s29 + $0x7f8] sm:$0xff]  ;;  %v1017_v61 = vld [vmem:[%s4077_s29 + $0x17e8] sm:$0xff] }
  0xee   : > { %v1019_v62 = vld [vmem:[%s4077_s29 + $0x17f8] sm:$0xff] }
  0xef   : > { %3086 = vmatpush1.bf16.msra.mxu1 %v3085_v10  ;;  %v3105_v10 = vpack.c.bf16 %v486_v51, %v484_v31  ;;  %v504_v31 = vld [vmem:[%s4077_s29 + $0x7e0] sm:$0xff]  ;;  %v506_v51 = vld [vmem:[%s4077_s29 + $0x7f0] sm:$0xff] }
  0xf0   : > { %3598 = vmatpush1.bf16.msra.mxu0 %v3597_v11  ;;  %3088 = vmatprep.subr.bf16.mxu1 %v3087_v13  ;;  %v3617_v11 = vpack.c.bf16 %v998_v5, %v996_v3  ;;  %v3107_v13 = vpack.c.bf16 %v491_v7, %v489_v6  ;;  %v1016_v3 = vld [vmem:[%s4077_s29 + $0x17e0] sm:$0xff]  ;;  %v1018_v5 = vld [vmem:[%s4077_s29 + $0x17f0] sm:$0xff]  ;;  %v509_v6 = vld [vmem:[%s4077_s29 + $0x808] sm:$0xff] }
  0xf1   : > { %3600 = vmatprep.subr.bf16.mxu0 %v3599_v17  ;;  %v3619_v17 = vpack.c.bf16 %v1003_v9, %v1001_v34  ;;  %v511_v7 = vld [vmem:[%s4077_s29 + $0x818] sm:$0xff]  ;;  %v1021_v34 = vld [vmem:[%s4077_s29 + $0x1808] sm:$0xff] }
  0xf2   : > { %v1023_v9 = vld [vmem:[%s4077_s29 + $0x1818] sm:$0xff] }
  0xf3   : > { %3090 = vmatpush1.bf16.msra.mxu1 %v3089_v23  ;;  %v3109_v23 = vpack.c.bf16 %v490_v15, %v488_v14  ;;  %v3637_v14 = vpack.c.bf16 %v1018_v5, %v1016_v3  ;;  %v3127_v15 = vpack.c.bf16 %v511_v7, %v509_v6  ;;  %v524_v5 = vld [vmem:[%s4077_s29 + $0x880] sm:$0xff]  ;;  %v526_v6 = vld [vmem:[%s4077_s29 + $0x890] sm:$0xff] }
  0xf4   : > { %3602 = vmatpush1.bf16.msra.mxu0 %v3601_v24  ;;  %3092 = vmatprep.subr.bf16.mxu1 %v3091_v25  ;;  %v3621_v24 = vpack.c.bf16 %v1002_v18, %v1000_v16  ;;  %v3111_v25 = vpack.c.bf16 %v495_v20, %v493_v19  ;;  %v508_v16 = vld [vmem:[%s4077_s29 + $0x800] sm:$0xff]  ;;  %v3639_v19 = vpack.c.bf16 %v1023_v9, %v1021_v34  ;;  %v1022_v20 = vld [vmem:[%s4077_s29 + $0x1810] sm:$0xff] }
  0xf5   : > { %3604 = vmatprep.subr.bf16.mxu0 %v3603_v30  ;;  %v3623_v30 = vpack.c.bf16 %v1007_v22, %v1005_v21  ;;  %v1020_v18 = vld [vmem:[%s4077_s29 + $0x1800] sm:$0xff]  ;;  %v513_v21 = vld [vmem:[%s4077_s29 + $0x828] sm:$0xff]  ;;  %v515_v22 = vld [vmem:[%s4077_s29 + $0x838] sm:$0xff] }
  0xf6   : > { %v1036_v7 = vld [vmem:[%s4077_s29 + $0x1880] sm:$0xff]  ;;  %v1038_v9 = vld [vmem:[%s4077_s29 + $0x1890] sm:$0xff] }
  0xf7   : > { %3094 = vmatpush1.bf16.msra.mxu1 %v3093_v37  ;;  %v3113_v37 = vpack.c.bf16 %v494_v55, %v492_v27 }
  0xf8   : > { %3606 = vmatpush1.bf16.msra.mxu0 %v3605_v38  ;;  %3096 = vmatprep.subr.bf16.mxu1 %v3095_v39  ;;  %v3625_v38 = vpack.c.bf16 %v1006_v32, %v1004_v28  ;;  %v3115_v39 = vpack.c.bf16 %v499_v35, %v497_v33  ;;  %v3641_v28 = vpack.c.bf16 %v1022_v20, %v1020_v18  ;;  %v512_v32 = vld [vmem:[%s4077_s29 + $0x820] sm:$0xff]  ;;  %v514_v33 = vld [vmem:[%s4077_s29 + $0x830] sm:$0xff] }
  0xf9   : > { %3608 = vmatprep.subr.bf16.mxu0 %v3607_v43  ;;  %v3627_v43 = vpack.c.bf16 %v1011_v36, %v1009_v60  ;;  %v1024_v35 = vld [vmem:[%s4077_s29 + $0x1820] sm:$0xff]  ;;  %v1026_v36 = vld [vmem:[%s4077_s29 + $0x1830] sm:$0xff]  ;;  %v3657_v18 = vpack.c.bf16 %v1038_v9, %v1036_v7 }
  0xfa   : > { %v528_v20 = vld [vmem:[%s4077_s29 + $0x8a0] sm:$0xff] }
  0xfb   : > { %3098 = vmatpush1.bf16.msra.mxu1 %v3097_v49  ;;  %v3117_v49 = vpack.c.bf16 %v498_v41, %v496_v40  ;;  %v1029_v40 = vld [vmem:[%s4077_s29 + $0x1848] sm:$0xff]  ;;  %v1031_v41 = vld [vmem:[%s4077_s29 + $0x1858] sm:$0xff]  ;;  %v544_v7 = vld [vmem:[%s4077_s29 + $0x920] sm:$0xff] }
  0xfc   : > { %3610 = vmatpush1.bf16.msra.mxu0 %v3609_v50  ;;  %3100 = vmatprep.subr.bf16.mxu1 %v3099_v52  ;;  %v3629_v50 = vpack.c.bf16 %v1010_v44, %v1008_v42  ;;  %v3119_v52 = vpack.c.bf16 %v503_v46, %v501_v45  ;;  %v3645_v44 = vpack.c.bf16 %v1026_v36, %v1024_v35  ;;  %v516_v46 = vld [vmem:[%s4077_s29 + $0x840] sm:$0xff] }
  0xfd   : > { %3612 = vmatprep.subr.bf16.mxu0 %v3611_v57  ;;  %v3631_v57 = vpack.c.bf16 %v1015_v48, %v1013_v47  ;;  %v1028_v47 = vld [vmem:[%s4077_s29 + $0x1840] sm:$0xff]  ;;  %v3647_v48 = vpack.c.bf16 %v1031_v41, %v1029_v40  ;;  %v1046_v40 = vld [vmem:[%s4077_s29 + $0x18d0] sm:$0xff]  ;;  %v537_v41 = vld [vmem:[%s4077_s29 + $0x8e8] sm:$0xff] }
  0xfe   : > { %v532_v36 = vld [vmem:[%s4077_s29 + $0x8c0] sm:$0xff] }
  0xff   : > { %3102 = vmatpush1.bf16.msra.mxu1 %v3101_v0  ;;  %v3121_v0 = vpack.c.bf16 %v502_v53, %v500_v26  ;;  %v1035_v26 = vld [vmem:[%s4077_s29 + $0x1878] sm:$0xff]  ;;  %v1056_v9 = vld [vmem:[%s4077_s29 + $0x1920] sm:$0xff] }
 0x100   : > { %3614 = vmatpush1.bf16.msra.mxu0 %v3613_v1  ;;  %3104 = vmatprep.subr.bf16.mxu1 %v3103_v2  ;;  %v3633_v1 = vpack.c.bf16 %v1014_v29, %v1012_v54  ;;  %v3123_v2 = vpack.c.bf16 %v507_v59, %v505_v58  ;;  %v520_v29 = vld [vmem:[%s4077_s29 + $0x860] sm:$0xff]  ;;  %v522_v58 = vld [vmem:[%s4077_s29 + $0x870] sm:$0xff] }
 0x101   : > { %3616 = vmatprep.subr.bf16.mxu0 %v3615_v4  ;;  %v3635_v4 = vpack.c.bf16 %v1019_v62, %v1017_v61  ;;  %v1032_v59 = vld [vmem:[%s4077_s29 + $0x1860] sm:$0xff]  ;;  %v1034_v62 = vld [vmem:[%s4077_s29 + $0x1870] sm:$0xff] }
 0x102   : > { %v3653_v3 = vpack.c.bf16 %v1034_v62, %v1032_v59  ;;  %v540_v59 = vld [vmem:[%s4077_s29 + $0x900] sm:$0xff] }
 0x103   : > { %3106 = vmatpush1.bf16.msra.mxu1 %v3105_v10  ;;  %v4672_v10 = vld [vmem:[%s4072_s25 + $0x10] sm:$0xff]  ;;  %v1052_v62 = vld [vmem:[%s4077_s29 + $0x1900] sm:$0xff] }
 0x104   : > { %3618 = vmatpush1.bf16.msra.mxu0 %v3617_v11  ;;  %3108 = vmatprep.subr.bf16.mxu1 %v3107_v13  ;;  %v3125_v11 = vpack.c.bf16 %v506_v51, %v504_v31  ;;  %v4675_v13 = vld [vmem:[%s4072_s25 + $0x30] sm:$0xff]  ;;  %v1039_v31 = vld [vmem:[%s4077_s29 + $0x1898] sm:$0xff]  ;;  %v3141_v51 = vpack.c.bf16 %v522_v58, %v520_v29 }
 0x105   : > { %3620 = vmatprep.subr.bf16.mxu0 %v3619_v17  ;;  %v510_v17 = vld [vmem:[%s4077_s29 + $0x810] sm:$0xff]  ;;  %v4691_v27 = vrot.slane %v4675_v13, %v4175_v12 }
 0x106   : > { %v3129_v55 = vpack.c.bf16 %v510_v17, %v508_v16  ;;  %v1043_v16 = vld [vmem:[%s4077_s29 + $0x18b8] sm:$0xff]  ;;  %v3145_v17 = vpack.c.bf16 %v526_v6, %v524_v5 }
 0x107   : > { %3110 = vmatpush1.bf16.msra.mxu1 %v3109_v23  ;;  %v4685_v23 = vrot.slane %v4672_v10, %v4175_v12  ;;  %v1401_v42 = vcombine.high %v4691_v27, %v4691_v27 }
 0x108   : > { %3622 = vmatpush1.bf16.msra.mxu0 %v3621_v24  ;;  %3112 = vmatprep.subr.bf16.mxu1 %v3111_v25  ;;  %v1025_v24 = vld [vmem:[%s4077_s29 + $0x1828] sm:$0xff]  ;;  %v1027_v25 = vld [vmem:[%s4077_s29 + $0x1838] sm:$0xff] }
 0x109   : > { %3624 = vmatprep.subr.bf16.mxu0 %v3623_v30  ;;  %v3131_v30 = vpack.c.bf16 %v515_v22, %v513_v21  ;;  %v3643_v60 = vpack.c.bf16 %v1027_v25, %v1025_v24  ;;  %v530_v21 = vld [vmem:[%s4077_s29 + $0x8b0] sm:$0xff]  ;;  %v1040_v22 = vld [vmem:[%s4077_s29 + $0x18a0] sm:$0xff] }
 0x10a   : > { %v1042_v25 = vld [vmem:[%s4077_s29 + $0x18b0] sm:$0xff] }
 0x10b   : > { %3114 = vmatpush1.bf16.msra.mxu1 %v3113_v37  ;;  %v517_v37 = vld [vmem:[%s4077_s29 + $0x848] sm:$0xff]  ;;  %v3661_v35 = vpack.c.bf16 %v1042_v25, %v1040_v22  ;;  %v548_v22 = vld [vmem:[%s4077_s29 + $0x940] sm:$0xff] }
 0x10c   : > { %3626 = vmatpush1.bf16.msra.mxu0 %v3625_v38  ;;  %3116 = vmatprep.subr.bf16.mxu1 %v3115_v39  ;;  %v519_v38 = vld [vmem:[%s4077_s29 + $0x858] sm:$0xff]  ;;  %v1333_v39 = vcombine.high %v4685_v23, %v4685_v23  ;;  %v1060_v25 = vld [vmem:[%s4077_s29 + $0x1940] sm:$0xff] }
 0x10d   : > { %3628 = vmatprep.subr.bf16.mxu0 %v3627_v43  ;;  %v3133_v43 = vpack.c.bf16 %v514_v33, %v512_v32  ;;  %v3135_v45 = vpack.c.bf16 %v519_v38, %v517_v37  ;;  %v1047_v32 = vld [vmem:[%s4077_s29 + $0x18d8] sm:$0xff]  ;;  %v3149_v33 = vpack.c.bf16 %v530_v21, %v528_v20  ;;  %v534_v37 = vld [vmem:[%s4077_s29 + $0x8d0] sm:$0xff]  ;;  %v1044_v38 = vld [vmem:[%s4077_s29 + $0x18c0] sm:$0xff] }
 0x10f   : > { %3118 = vmatpush1.bf16.msra.mxu1 %v3117_v49  ;;  %v1030_v49 = vld [vmem:[%s4077_s29 + $0x1850] sm:$0xff] }
 0x110   : > { %3630 = vmatpush1.bf16.msra.mxu0 %v3629_v50  ;;  %3120 = vmatprep.subr.bf16.mxu1 %v3119_v52  ;;  %v521_v50 = vld [vmem:[%s4077_s29 + $0x868] sm:$0xff]  ;;  %v523_v52 = vld [vmem:[%s4077_s29 + $0x878] sm:$0xff]  ;;  %v3649_v54 = vpack.c.bf16 %v1030_v49, %v1028_v47  ;;  %v536_v47 = vld [vmem:[%s4077_s29 + $0x8e0] sm:$0xff] }
 0x111   : > { %3632 = vmatprep.subr.bf16.mxu0 %v3631_v57  ;;  %v3139_v57 = vpack.c.bf16 %v523_v52, %v521_v50  ;;  %v1048_v49 = vld [vmem:[%s4077_s29 + $0x18e0] sm:$0xff]  ;;  %v1050_v52 = vld [vmem:[%s4077_s29 + $0x18f0] sm:$0xff] }
 0x112   : > { %v3669_v29 = vpack.c.bf16 %v1050_v52, %v1048_v49  ;;  %v556_v49 = vld [vmem:[%s4077_s29 + $0x980] sm:$0xff] }
 0x113   : > { %3122 = vmatpush1.bf16.msra.mxu1 %v3121_v0  ;;  %v525_v0 = vld [vmem:[%s4077_s29 + $0x888] sm:$0xff]  ;;  %v1068_v52 = vld [vmem:[%s4077_s29 + $0x1980] sm:$0xff] }
 0x114   : > { %3634 = vmatpush1.bf16.msra.mxu0 %v3633_v1  ;;  %3124 = vmatprep.subr.bf16.mxu1 %v3123_v2  ;;  %v527_v1 = vld [vmem:[%s4077_s29 + $0x898] sm:$0xff]  ;;  %v1037_v2 = vld [vmem:[%s4077_s29 + $0x1888] sm:$0xff] }
 0x115   : > { %3636 = vmatprep.subr.bf16.mxu0 %v3635_v4  ;;  %v3143_v4 = vpack.c.bf16 %v527_v1, %v525_v0  ;;  %v3655_v34 = vpack.c.bf16 %v1039_v31, %v1037_v2  ;;  %v1054_v1 = vld [vmem:[%s4077_s29 + $0x1910] sm:$0xff]  ;;  %v545_v2 = vld [vmem:[%s4077_s29 + $0x928] sm:$0xff]  ;;  %v547_v31 = vld [vmem:[%s4077_s29 + $0x938] sm:$0xff] }
 0x116   : > { %v3673_v5 = vpack.c.bf16 %v1054_v1, %v1052_v62  ;;  %v3163_v6 = vpack.c.bf16 %v547_v31, %v545_v2  ;;  %v560_v62 = vld [vmem:[%s4077_s29 + $0x9a0] sm:$0xff]  ;;  %v1074_v31 = vld [vmem:[%s4077_s29 + $0x19b0] sm:$0xff] }
 0x117   : > { %3126 = vmatpush1.bf16.msra.mxu1 %v3125_v11  ;;  %v529_v11 = vld [vmem:[%s4077_s29 + $0x8a8] sm:$0xff]  ;;  %v1072_v1 = vld [vmem:[%s4077_s29 + $0x19a0] sm:$0xff] }
 0x118   : > { %3638 = vmatpush1.bf16.msra.mxu0 %v3637_v14  ;;  %3128 = vmatprep.subr.bf16.mxu1 %v3127_v15  ;;  %v531_v14 = vld [vmem:[%s4077_s29 + $0x8b8] sm:$0xff]  ;;  %v1041_v15 = vld [vmem:[%s4077_s29 + $0x18a8] sm:$0xff] }
 0x119   : > { %3640 = vmatprep.subr.bf16.mxu0 %v3639_v19  ;;  %v3147_v19 = vpack.c.bf16 %v531_v14, %v529_v11  ;;  %v3659_v24 = vpack.c.bf16 %v1043_v16, %v1041_v15  ;;  %v1058_v14 = vld [vmem:[%s4077_s29 + $0x1930] sm:$0xff]  ;;  %v549_v15 = vld [vmem:[%s4077_s29 + $0x948] sm:$0xff]  ;;  %v551_v16 = vld [vmem:[%s4077_s29 + $0x958] sm:$0xff] }
 0x11a   : > { %1730 = vmatmul.mubr.f32.vlgmr.msra.gmra.mrb[0].mxu1 %v4538_v56  ;;  %v518_v56 = vld [vmem:[%s4077_s29 + $0x850] sm:$0xff]  ;;  %v3677_v20 = vpack.c.bf16 %v1058_v14, %v1056_v9  ;;  %v3167_v21 = vpack.c.bf16 %v551_v16, %v549_v15  ;;  %v564_v9 = vld [vmem:[%s4077_s29 + $0x9c0] sm:$0xff] }
 0x11b   : > { %3130 = vmatpush1.bf16.msra.mxu1 %v3129_v55  ;;  %2298 = vmatmul.mubr.f32.vlgmr.msra.gmra.mrb[0].mxu0 %v4543_v8  ;;  %v1033_v8 = vld [vmem:[%s4077_s29 + $0x1868] sm:$0xff]  ;;  %v3137_v53 = vpack.c.bf16 %v518_v56, %v516_v46  ;;  %v3665_v46 = vpack.c.bf16 %v1046_v40, %v1044_v38  ;;  %v552_v38 = vld [vmem:[%s4077_s29 + $0x960] sm:$0xff]  ;;  %v1078_v16 = vld [vmem:[%s4077_s29 + $0x19d0] sm:$0xff] }
 0x11c   : > { %3642 = vmatpush1.bf16.msra.mxu0 %v3641_v28  ;;  %3132 = vmatprep.subr.bf16.mxu1 %v3131_v30  ;;  %v3651_v61 = vpack.c.bf16 %v1035_v26, %v1033_v8  ;;  %v533_v55 = vld [vmem:[%s4077_s29 + $0x8c8] sm:$0xff]  ;;  %v535_v28 = vld [vmem:[%s4077_s29 + $0x8d8] sm:$0xff]  ;;  %v1064_v40 = vld [vmem:[%s4077_s29 + $0x1960] sm:$0xff] }
 0x11d   : > { %3644 = vmatprep.subr.bf16.mxu0 %v3643_v60  ;;  %1800 = vmatprep.mubr.f32.mxu1 %v1333_v39  ;;  %v1045_v30 = vld [vmem:[%s4077_s29 + $0x18c8] sm:$0xff]  ;;  %v3151_v60 = vpack.c.bf16 %v535_v28, %v533_v55  ;;  %v543_v26 = vld [vmem:[%s4077_s29 + $0x918] sm:$0xff]  ;;  %v1062_v28 = vld [vmem:[%s4077_s29 + $0x1950] sm:$0xff] }
 0x11e   : > { %2368 = vmatprep.mubr.f32.mxu0 %v1401_v42  ;;  %v3663_v39 = vpack.c.bf16 %v1047_v32, %v1045_v30  ;;  %v539_v42 = vld [vmem:[%s4077_s29 + $0x8f8] sm:$0xff]  ;;  %v541_v8 = vld [vmem:[%s4077_s29 + $0x908] sm:$0xff]  ;;  %v1076_v14 = vld [vmem:[%s4077_s29 + $0x19c0] sm:$0xff] }
 0x11f   : > { %3134 = vmatpush1.bf16.msra.mxu1 %v3133_v43  ;;  %v1049_v43 = vld [vmem:[%s4077_s29 + $0x18e8] sm:$0xff]  ;;  %v3155_v56 = vpack.c.bf16 %v539_v42, %v537_v41  ;;  %v3159_v58 = vpack.c.bf16 %v543_v26, %v541_v8  ;;  %v555_v32 = vld [vmem:[%s4077_s29 + $0x978] sm:$0xff]  ;;  %v1066_v42 = vld [vmem:[%s4077_s29 + $0x1970] sm:$0xff] }
 0x120   : > { %3646 = vmatpush1.bf16.msra.mxu0 %v3645_v44  ;;  %3136 = vmatprep.subr.bf16.mxu1 %v3135_v45  ;;  %v1051_v44 = vld [vmem:[%s4077_s29 + $0x18f8] sm:$0xff]  ;;  %v3153_v45 = vpack.c.bf16 %v534_v37, %v532_v36  ;;  %v553_v30 = vld [vmem:[%s4077_s29 + $0x968] sm:$0xff]  ;;  %v3681_v36 = vpack.c.bf16 %v1062_v28, %v1060_v25  ;;  %v1070_v26 = vld [vmem:[%s4077_s29 + $0x1990] sm:$0xff] }
 0x121   : > { %3648 = vmatprep.subr.bf16.mxu0 %v3647_v48  ;;  %v538_v48 = vld [vmem:[%s4077_s29 + $0x8f0] sm:$0xff]  ;;  %v3667_v50 = vpack.c.bf16 %v1051_v44, %v1049_v43  ;;  %v3171_v37 = vpack.c.bf16 %v555_v32, %v553_v30  ;;  %v557_v43 = vld [vmem:[%s4077_s29 + $0x988] sm:$0xff]  ;;  %v559_v44 = vld [vmem:[%s4077_s29 + $0x998] sm:$0xff] }
 0x122   : > { %v568_v25 = vld [vmem:[%s4077_s29 + $0x9e0] sm:$0xff]  ;;  %v1082_v32 = vld [vmem:[%s4077_s29 + $0x19f0] sm:$0xff] }
 0x123   : > { %3138 = vmatpush1.bf16.msra.mxu1 %v3137_v53  ;;  %v1053_v53 = vld [vmem:[%s4077_s29 + $0x1908] sm:$0xff]  ;;  %v1080_v28 = vld [vmem:[%s4077_s29 + $0x19e0] sm:$0xff] }
 0x124   : > { %3650 = vmatpush1.bf16.msra.mxu0 %v3649_v54  ;;  %3140 = vmatprep.subr.bf16.mxu1 %v3139_v57  ;;  %v1055_v54 = vld [vmem:[%s4077_s29 + $0x1918] sm:$0xff]  ;;  %v3157_v57 = vpack.c.bf16 %v538_v48, %v536_v47  ;;  %v3685_v47 = vpack.c.bf16 %v1066_v42, %v1064_v40  ;;  %v3175_v48 = vpack.c.bf16 %v559_v44, %v557_v43  ;;  %v572_v42 = vld [vmem:[%s4077_s29 + $0xa00] sm:$0xff]  ;;  %v574_v43 = vld [vmem:[%s4077_s29 + $0xa10] sm:$0xff] }
 0x125   : > { %3652 = vmatprep.subr.bf16.mxu0 %v3651_v61  ;;  %v542_v61 = vld [vmem:[%s4077_s29 + $0x910] sm:$0xff]  ;;  %v3671_v0 = vpack.c.bf16 %v1055_v54, %v1053_v53  ;;  %v561_v53 = vld [vmem:[%s4077_s29 + $0x9a8] sm:$0xff]  ;;  %v563_v54 = vld [vmem:[%s4077_s29 + $0x9b8] sm:$0xff]  ;;  %v3701_v40 = vpack.c.bf16 %v1082_v32, %v1080_v28 }
 0x126   : > { %v1084_v44 = vld [vmem:[%s4077_s29 + $0x1a00] sm:$0xff] }
 0x127   : > { %3142 = vmatpush1.bf16.msra.mxu1 %v3141_v51  ;;  %v1057_v51 = vld [vmem:[%s4077_s29 + $0x1928] sm:$0xff]  ;;  %v588_v32 = vld [vmem:[%s4077_s29 + $0xa80] sm:$0xff] }
 0x128   : > { %3654 = vmatpush1.bf16.msra.mxu0 %v3653_v3  ;;  %3144 = vmatprep.subr.bf16.mxu1 %v3143_v4  ;;  %v1059_v3 = vld [vmem:[%s4077_s29 + $0x1938] sm:$0xff]  ;;  %v3161_v4 = vpack.c.bf16 %v542_v61, %v540_v59  ;;  %v3689_v59 = vpack.c.bf16 %v1070_v26, %v1068_v52  ;;  %v3179_v61 = vpack.c.bf16 %v563_v54, %v561_v53  ;;  %v576_v26 = vld [vmem:[%s4077_s29 + $0xa20] sm:$0xff]  ;;  %v578_v53 = vld [vmem:[%s4077_s29 + $0xa30] sm:$0xff] }
 0x129   : > { %3656 = vmatprep.subr.bf16.mxu0 %v3655_v34  ;;  %v546_v34 = vld [vmem:[%s4077_s29 + $0x930] sm:$0xff]  ;;  %v3675_v11 = vpack.c.bf16 %v1059_v3, %v1057_v51  ;;  %v565_v51 = vld [vmem:[%s4077_s29 + $0x9c8] sm:$0xff]  ;;  %v567_v3 = vld [vmem:[%s4077_s29 + $0x9d8] sm:$0xff] }
 0x12a   : > { %v1088_v54 = vld [vmem:[%s4077_s29 + $0x1a20] sm:$0xff] }
 0x12b   : > { %3146 = vmatpush1.bf16.msra.mxu1 %v3145_v17  ;;  %v1061_v17 = vld [vmem:[%s4077_s29 + $0x1948] sm:$0xff] }
 0x12c   : > { %3658 = vmatpush1.bf16.msra.mxu0 %v3657_v18  ;;  %3148 = vmatprep.subr.bf16.mxu1 %v3147_v19  ;;  %v1063_v18 = vld [vmem:[%s4077_s29 + $0x1958] sm:$0xff]  ;;  %v3165_v19 = vpack.c.bf16 %v546_v34, %v544_v7  ;;  %v3693_v7 = vpack.c.bf16 %v1074_v31, %v1072_v1  ;;  %v3183_v34 = vpack.c.bf16 %v567_v3, %v565_v51  ;;  %v580_v3 = vld [vmem:[%s4077_s29 + $0xa40] sm:$0xff] }
 0x12d   : > { %3660 = vmatprep.subr.bf16.mxu0 %v3659_v24  ;;  %v550_v24 = vld [vmem:[%s4077_s29 + $0x950] sm:$0xff]  ;;  %v3679_v55 = vpack.c.bf16 %v1063_v18, %v1061_v17  ;;  %v569_v17 = vld [vmem:[%s4077_s29 + $0x9e8] sm:$0xff]  ;;  %v571_v18 = vld [vmem:[%s4077_s29 + $0x9f8] sm:$0xff] }
 0x12f   : > { %3150 = vmatpush1.bf16.msra.mxu1 %v3149_v33  ;;  %v1065_v33 = vld [vmem:[%s4077_s29 + $0x1968] sm:$0xff] }
 0x130   : > { %3662 = vmatpush1.bf16.msra.mxu0 %v3661_v35  ;;  %3152 = vmatprep.subr.bf16.mxu1 %v3151_v60  ;;  %v1067_v35 = vld [vmem:[%s4077_s29 + $0x1978] sm:$0xff]  ;;  %v3169_v60 = vpack.c.bf16 %v550_v24, %v548_v22  ;;  %v3697_v22 = vpack.c.bf16 %v1078_v16, %v1076_v14  ;;  %v3187_v24 = vpack.c.bf16 %v571_v18, %v569_v17  ;;  %v584_v16 = vld [vmem:[%s4077_s29 + $0xa60] sm:$0xff]  ;;  %v586_v17 = vld [vmem:[%s4077_s29 + $0xa70] sm:$0xff] }
 0x131   : > { %3664 = vmatprep.subr.bf16.mxu0 %v3663_v39  ;;  %v554_v39 = vld [vmem:[%s4077_s29 + $0x970] sm:$0xff]  ;;  %v3683_v41 = vpack.c.bf16 %v1067_v35, %v1065_v33  ;;  %v573_v33 = vld [vmem:[%s4077_s29 + $0xa08] sm:$0xff]  ;;  %v575_v35 = vld [vmem:[%s4077_s29 + $0xa18] sm:$0xff] }
 0x132   : > { %v1096_v18 = vld [vmem:[%s4077_s29 + $0x1a60] sm:$0xff] }
 0x133   : > { %3154 = vmatpush1.bf16.msra.mxu1 %v3153_v45  ;;  %v1069_v45 = vld [vmem:[%s4077_s29 + $0x1988] sm:$0xff] }
 0x134   : > { %3666 = vmatpush1.bf16.msra.mxu0 %v3665_v46  ;;  %3156 = vmatprep.subr.bf16.mxu1 %v3155_v56  ;;  %v1071_v46 = vld [vmem:[%s4077_s29 + $0x1998] sm:$0xff]  ;;  %v3173_v56 = vpack.c.bf16 %v554_v39, %v552_v38  ;;  %v1386_v38 = vcombine.high %v4675_v13, %v4675_v13 }
 0x135   : > { %3668 = vmatprep.subr.bf16.mxu0 %v3667_v50  ;;  %v558_v50 = vld [vmem:[%s4077_s29 + $0x990] sm:$0xff]  ;;  %v3687_v8 = vpack.c.bf16 %v1071_v46, %v1069_v45  ;;  %v577_v46 = vld [vmem:[%s4077_s29 + $0xa28] sm:$0xff] }
 0x136   : > { %v1086_v45 = vld [vmem:[%s4077_s29 + $0x1a10] sm:$0xff] }
 0x137   : > { %3158 = vmatpush1.bf16.msra.mxu1 %v3157_v57  ;;  %v1073_v57 = vld [vmem:[%s4077_s29 + $0x19a8] sm:$0xff]  ;;  %v3705_v52 = vpack.c.bf16 %v1086_v45, %v1084_v44  ;;  %v592_v44 = vld [vmem:[%s4077_s29 + $0xaa0] sm:$0xff] }
 0x138   : > { %3670 = vmatpush1.bf16.msra.mxu0 %v3669_v29  ;;  %3160 = vmatprep.subr.bf16.mxu1 %v3159_v58  ;;  %v1075_v29 = vld [vmem:[%s4077_s29 + $0x19b8] sm:$0xff]  ;;  %v3177_v58 = vpack.c.bf16 %v558_v50, %v556_v49  ;;  %v4835_v49 = vrot.slane %v1386_v38, %v4175_v12  ;;  %v3193_v50 = vpack.c.bf16 %v574_v43, %v572_v42  ;;  %v1104_v45 = vld [vmem:[%s4077_s29 + $0x1aa0] sm:$0xff] }
 0x139   : > { %3672 = vmatprep.subr.bf16.mxu0 %v3671_v0  ;;  %v562_v0 = vld [vmem:[%s4077_s29 + $0x9b0] sm:$0xff]  ;;  %v3691_v2 = vpack.c.bf16 %v1075_v29, %v1073_v57  ;;  %v595_v38 = vld [vmem:[%s4077_s29 + $0xab8] sm:$0xff] }
 0x13a   : > { %v1090_v29 = vld [vmem:[%s4077_s29 + $0x1a30] sm:$0xff]  ;;  %v1402_v1 = vcombine.high %v4835_v49, %v4835_v49 }
 0x13b   : > { %3162 = vmatpush1.bf16.msra.mxu1 %v3161_v4  ;;  %v1077_v4 = vld [vmem:[%s4077_s29 + $0x19c8] sm:$0xff]  ;;  %v3709_v31 = vpack.c.bf16 %v1090_v29, %v1088_v54  ;;  %v596_v54 = vld [vmem:[%s4077_s29 + $0xac0] sm:$0xff] }
 0x13c   : > { %3674 = vmatpush1.bf16.msra.mxu0 %v3673_v5  ;;  %3164 = vmatprep.subr.bf16.mxu1 %v3163_v6  ;;  %v1079_v5 = vld [vmem:[%s4077_s29 + $0x19d8] sm:$0xff]  ;;  %v3181_v6 = vpack.c.bf16 %v562_v0, %v560_v62  ;;  %v1093_v62 = vld [vmem:[%s4077_s29 + $0x1a48] sm:$0xff]  ;;  %v1108_v29 = vld [vmem:[%s4077_s29 + $0x1ac0] sm:$0xff] }
 0x13d   : > { %3676 = vmatprep.subr.bf16.mxu0 %v3675_v11  ;;  %v566_v11 = vld [vmem:[%s4077_s29 + $0x9d0] sm:$0xff]  ;;  %v3695_v15 = vpack.c.bf16 %v1079_v5, %v1077_v4  ;;  %v1095_v0 = vld [vmem:[%s4077_s29 + $0x1a58] sm:$0xff]  ;;  %v1092_v4 = vld [vmem:[%s4077_s29 + $0x1a40] sm:$0xff] }
 0x13e   : > { %v3711_v5 = vpack.c.bf16 %v1095_v0, %v1093_v62  ;;  %v603_v62 = vld [vmem:[%s4077_s29 + $0xaf8] sm:$0xff]  ;;  %v1113_v0 = vld [vmem:[%s4077_s29 + $0x1ae8] sm:$0xff] }
 0x13f   : > { %3166 = vmatpush1.bf16.msra.mxu1 %v3165_v19  ;;  %v1081_v19 = vld [vmem:[%s4077_s29 + $0x19e8] sm:$0xff] }
 0x140   : > { %3678 = vmatpush1.bf16.msra.mxu0 %v3677_v20  ;;  %3168 = vmatprep.subr.bf16.mxu1 %v3167_v21  ;;  %v1083_v20 = vld [vmem:[%s4077_s29 + $0x19f8] sm:$0xff]  ;;  %v3185_v21 = vpack.c.bf16 %v566_v11, %v564_v9 }
 0x141   : > { %3680 = vmatprep.subr.bf16.mxu0 %v3679_v55  ;;  %v570_v55 = vld [vmem:[%s4077_s29 + $0x9f0] sm:$0xff]  ;;  %v3699_v30 = vpack.c.bf16 %v1083_v20, %v1081_v19  ;;  %v1099_v9 = vld [vmem:[%s4077_s29 + $0x1a78] sm:$0xff] }
 0x142   : > { %v3189_v39 = vpack.c.bf16 %v570_v55, %v568_v25  ;;  %v1098_v20 = vld [vmem:[%s4077_s29 + $0x1a70] sm:$0xff]  ;;  %v1103_v25 = vld [vmem:[%s4077_s29 + $0x1a98] sm:$0xff]  ;;  %v3205_v55 = vpack.c.bf16 %v586_v17, %v584_v16  ;;  %v604_v16 = vld [vmem:[%s4077_s29 + $0xb00] sm:$0xff] }
 0x143   : > { %3170 = vmatpush1.bf16.msra.mxu1 %v3169_v60  ;;  %v1318_v60 = vcombine.high %v4672_v10, %v4672_v10  ;;  %v3717_v28 = vpack.c.bf16 %v1098_v20, %v1096_v18  ;;  %v606_v17 = vld [vmem:[%s4077_s29 + $0xb10] sm:$0xff]  ;;  %v1116_v18 = vld [vmem:[%s4077_s29 + $0x1b00] sm:$0xff] }
 0x144   : > { %3682 = vmatpush1.bf16.msra.mxu0 %v3681_v36  ;;  %3172 = vmatprep.subr.bf16.mxu1 %v3171_v37  ;;  %v1085_v36 = vld [vmem:[%s4077_s29 + $0x1a08] sm:$0xff]  ;;  %v1087_v37 = vld [vmem:[%s4077_s29 + $0x1a18] sm:$0xff]  ;;  %v1118_v20 = vld [vmem:[%s4077_s29 + $0x1b10] sm:$0xff] }
 0x145   : > { %3684 = vmatprep.subr.bf16.mxu0 %v3683_v41  ;;  %v3191_v41 = vpack.c.bf16 %v575_v35, %v573_v33  ;;  %v3703_v10 = vpack.c.bf16 %v1087_v37, %v1085_v36  ;;  %v4830_v13 = vrot.slane %v1318_v60, %v4175_v12  ;;  %v590_v33 = vld [vmem:[%s4077_s29 + $0xa90] sm:$0xff]  ;;  %v1100_v35 = vld [vmem:[%s4077_s29 + $0x1a80] sm:$0xff]  ;;  %v593_v37 = vld [vmem:[%s4077_s29 + $0xaa8] sm:$0xff] }
 0x146   : > { %v1102_v36 = vld [vmem:[%s4077_s29 + $0x1a90] sm:$0xff]  ;;  %v3211_v43 = vpack.c.bf16 %v595_v38, %v593_v37  ;;  %v613_v37 = vld [vmem:[%s4077_s29 + $0xb48] sm:$0xff]  ;;  %v615_v38 = vld [vmem:[%s4077_s29 + $0xb58] sm:$0xff] }
 0x147   : > { %3174 = vmatpush1.bf16.msra.mxu1 %v3173_v56  ;;  %v579_v56 = vld [vmem:[%s4077_s29 + $0xa38] sm:$0xff]  ;;  %v3721_v42 = vpack.c.bf16 %v1102_v36, %v1100_v35  ;;  %v1120_v35 = vld [vmem:[%s4077_s29 + $0x1b20] sm:$0xff]  ;;  %v1122_v36 = vld [vmem:[%s4077_s29 + $0x1b30] sm:$0xff] }
 0x148   : > { %3686 = vmatpush1.bf16.msra.mxu0 %v3685_v47  ;;  %3176 = vmatprep.subr.bf16.mxu1 %v3175_v48  ;;  %v1089_v47 = vld [vmem:[%s4077_s29 + $0x1a28] sm:$0xff]  ;;  %v1091_v48 = vld [vmem:[%s4077_s29 + $0x1a38] sm:$0xff] }
 0x149   : > { %3688 = vmatprep.subr.bf16.mxu0 %v3687_v8  ;;  %v3195_v8 = vpack.c.bf16 %v579_v56, %v577_v46  ;;  %v3707_v57 = vpack.c.bf16 %v1091_v48, %v1089_v47  ;;  %v1106_v56 = vld [vmem:[%s4077_s29 + $0x1ab0] sm:$0xff]  ;;  %v597_v47 = vld [vmem:[%s4077_s29 + $0xac8] sm:$0xff]  ;;  %v599_v48 = vld [vmem:[%s4077_s29 + $0xad8] sm:$0xff] }
 0x14b   : > { %3178 = vmatpush1.bf16.msra.mxu1 %v3177_v58  ;;  %v581_v58 = vld [vmem:[%s4077_s29 + $0xa48] sm:$0xff] }
 0x14c   : > { %3690 = vmatpush1.bf16.msra.mxu0 %v3689_v59  ;;  %3180 = vmatprep.subr.bf16.mxu1 %v3179_v61  ;;  %v583_v59 = vld [vmem:[%s4077_s29 + $0xa58] sm:$0xff]  ;;  %v1334_v61 = vcombine.high %v4830_v13, %v4830_v13 }
 0x14d   : > { %3692 = vmatprep.subr.bf16.mxu0 %v3691_v2  ;;  %v3197_v2 = vpack.c.bf16 %v578_v53, %v576_v26  ;;  %v3199_v51 = vpack.c.bf16 %v583_v59, %v581_v58  ;;  %v3725_v26 = vpack.c.bf16 %v1106_v56, %v1104_v45  ;;  %v3215_v53 = vpack.c.bf16 %v599_v48, %v597_v47  ;;  %v1110_v59 = vld [vmem:[%s4077_s29 + $0x1ad0] sm:$0xff]  ;;  %v1124_v45 = vld [vmem:[%s4077_s29 + $0x1b40] sm:$0xff]  ;;  %v617_v47 = vld [vmem:[%s4077_s29 + $0xb68] sm:$0xff] }
 0x14e   : > { %v1126_v56 = vld [vmem:[%s4077_s29 + $0x1b50] sm:$0xff]  ;;  %v619_v48 = vld [vmem:[%s4077_s29 + $0xb78] sm:$0xff] }
 0x14f   : > { %3182 = vmatpush1.bf16.msra.mxu1 %v3181_v6  ;;  %v1094_v6 = vld [vmem:[%s4077_s29 + $0x1a50] sm:$0xff] }
 0x150   : > { %3694 = vmatpush1.bf16.msra.mxu0 %v3693_v7  ;;  %3184 = vmatprep.subr.bf16.mxu1 %v3183_v34  ;;  %v585_v7 = vld [vmem:[%s4077_s29 + $0xa68] sm:$0xff]  ;;  %v587_v34 = vld [vmem:[%s4077_s29 + $0xa78] sm:$0xff]  ;;  %v3713_v14 = vpack.c.bf16 %v1094_v6, %v1092_v4  ;;  %v1112_v4 = vld [vmem:[%s4077_s29 + $0x1ae0] sm:$0xff] }
 0x151   : > { %3696 = vmatprep.subr.bf16.mxu0 %v3695_v15  ;;  %v3203_v15 = vpack.c.bf16 %v587_v34, %v585_v7  ;;  %v1114_v6 = vld [vmem:[%s4077_s29 + $0x1af0] sm:$0xff]  ;;  %v605_v7 = vld [vmem:[%s4077_s29 + $0xb08] sm:$0xff]  ;;  %v607_v34 = vld [vmem:[%s4077_s29 + $0xb18] sm:$0xff] }
 0x153   : > { %3186 = vmatpush1.bf16.msra.mxu1 %v3185_v21  ;;  %v589_v21 = vld [vmem:[%s4077_s29 + $0xa88] sm:$0xff] }
 0x154   : > { %3698 = vmatpush1.bf16.msra.mxu0 %v3697_v22  ;;  %3188 = vmatprep.subr.bf16.mxu1 %v3187_v24  ;;  %v591_v22 = vld [vmem:[%s4077_s29 + $0xa98] sm:$0xff]  ;;  %v1101_v24 = vld [vmem:[%s4077_s29 + $0x1a88] sm:$0xff] }
 0x155   : > { %3700 = vmatprep.subr.bf16.mxu0 %v3699_v30  ;;  %v3207_v30 = vpack.c.bf16 %v591_v22, %v589_v21  ;;  %v3719_v60 = vpack.c.bf16 %v1103_v25, %v1101_v24  ;;  %v609_v21 = vld [vmem:[%s4077_s29 + $0xb28] sm:$0xff]  ;;  %v611_v22 = vld [vmem:[%s4077_s29 + $0xb38] sm:$0xff] }
 0x156   : > { %v1121_v24 = vld [vmem:[%s4077_s29 + $0x1b28] sm:$0xff]  ;;  %v1123_v25 = vld [vmem:[%s4077_s29 + $0x1b38] sm:$0xff] }
 0x157   : > { %3190 = vmatpush1.bf16.msra.mxu1 %v3189_v39  ;;  %v1105_v39 = vld [vmem:[%s4077_s29 + $0x1aa8] sm:$0xff] }
 0x158   : > { %3702 = vmatpush1.bf16.msra.mxu0 %v3701_v40  ;;  %3192 = vmatprep.subr.bf16.mxu1 %v3191_v41  ;;  %v1107_v40 = vld [vmem:[%s4077_s29 + $0x1ab8] sm:$0xff]  ;;  %v3209_v41 = vpack.c.bf16 %v590_v33, %v588_v32  ;;  %v608_v32 = vld [vmem:[%s4077_s29 + $0xb20] sm:$0xff]  ;;  %v610_v33 = vld [vmem:[%s4077_s29 + $0xb30] sm:$0xff] }
 0x159   : > { %3704 = vmatprep.subr.bf16.mxu0 %v3703_v10  ;;  %v594_v10 = vld [vmem:[%s4077_s29 + $0xab0] sm:$0xff]  ;;  %v3723_v46 = vpack.c.bf16 %v1107_v40, %v1105_v39  ;;  %v1125_v39 = vld [vmem:[%s4077_s29 + $0x1b48] sm:$0xff]  ;;  %v1127_v40 = vld [vmem:[%s4077_s29 + $0x1b58] sm:$0xff] }
 0x15a   : > { %1801 = vmatmul.mubr.f32.vlgmr.msra.gmra.mrb[0].mxu1 %v4685_v23  ;;  %v582_v23 = vld [vmem:[%s4077_s29 + $0xa50] sm:$0xff] }
 0x15b   : > { %3194 = vmatpush1.bf16.msra.mxu1 %v3193_v50  ;;  %2369 = vmatmul.mubr.f32.vlgmr.msra.gmra.mrb[0].mxu0 %v4691_v27  ;;  %v1097_v27 = vld [vmem:[%s4077_s29 + $0x1a68] sm:$0xff]  ;;  %v3201_v11 = vpack.c.bf16 %v582_v23, %v580_v3  ;;  %v600_v3 = vld [vmem:[%s4077_s29 + $0xae0] sm:$0xff]  ;;  %v602_v23 = vld [vmem:[%s4077_s29 + $0xaf0] sm:$0xff] }
 0x15c   : > { %3706 = vmatpush1.bf16.msra.mxu0 %v3705_v52  ;;  %3196 = vmatprep.subr.bf16.mxu1 %v3195_v8  ;;  %v3715_v19 = vpack.c.bf16 %v1099_v9, %v1097_v27  ;;  %v1109_v50 = vld [vmem:[%s4077_s29 + $0x1ac8] sm:$0xff]  ;;  %v1111_v52 = vld [vmem:[%s4077_s29 + $0x1ad8] sm:$0xff]  ;;  %v3213_v8 = vpack.c.bf16 %v594_v10, %v592_v44  ;;  %v612_v44 = vld [vmem:[%s4077_s29 + $0xb40] sm:$0xff] }
 0x15d   : > { %3708 = vmatprep.subr.bf16.mxu0 %v3707_v57  ;;  %1871 = vmatprep.mubr.f32.mxu1 %v1334_v61  ;;  %v598_v57 = vld [vmem:[%s4077_s29 + $0xad0] sm:$0xff]  ;;  %v3727_v58 = vpack.c.bf16 %v1111_v52, %v1109_v50  ;;  %v601_v61 = vld [vmem:[%s4077_s29 + $0xae8] sm:$0xff]  ;;  %v1119_v9 = vld [vmem:[%s4077_s29 + $0x1b18] sm:$0xff] }
 0x15e   : > { %2439 = vmatprep.mubr.f32.mxu0 %v1402_v1  ;;  %v1115_v1 = vld [vmem:[%s4077_s29 + $0x1af8] sm:$0xff]  ;;  %v1117_v27 = vld [vmem:[%s4077_s29 + $0x1b08] sm:$0xff]  ;;  %v614_v10 = vld [vmem:[%s4077_s29 + $0xb50] sm:$0xff] }
 0x15f   : > { %3198 = vmatpush1.bf16.msra.mxu1 %v3197_v2  ;;  %v3217_v2 = vpack.c.bf16 %v598_v57, %v596_v54  ;;  %v1129_v50 = vld [vmem:[%s4077_s29 + $0x1b68] sm:$0xff]  ;;  %v1131_v52 = vld [vmem:[%s4077_s29 + $0x1b78] sm:$0xff]  ;;  %v616_v54 = vld [vmem:[%s4077_s29 + $0xb60] sm:$0xff] }
 0x160   : > { %3710 = vmatpush1.bf16.msra.mxu0 %v3709_v31  ;;  %3200 = vmatprep.subr.bf16.mxu1 %v3199_v51  ;;  %v3729_v31 = vpack.c.bf16 %v1110_v59, %v1108_v29  ;;  %v3219_v51 = vpack.c.bf16 %v603_v62, %v601_v61  ;;  %v618_v57 = vld [vmem:[%s4077_s29 + $0xb70] sm:$0xff]  ;;  %v1128_v29 = vld [vmem:[%s4077_s29 + $0x1b60] sm:$0xff]  ;;  %v621_v61 = vld [vmem:[%s4077_s29 + $0xb88] sm:$0xff] }
 0x161   : > { %3712 = vmatprep.subr.bf16.mxu0 %v3711_v5  ;;  %v3731_v5 = vpack.c.bf16 %v1115_v1, %v1113_v0  ;;  %v1130_v59 = vld [vmem:[%s4077_s29 + $0x1b70] sm:$0xff]  ;;  %v623_v62 = vld [vmem:[%s4077_s29 + $0xb98] sm:$0xff]  ;;  %v1133_v0 = vld [vmem:[%s4077_s29 + $0x1b88] sm:$0xff] }
 0x162   : > { %v1135_v1 = vld [vmem:[%s4077_s29 + $0x1b98] sm:$0xff] }
 0x163   : > { %3202 = vmatpush1.bf16.msra.mxu1 %v3201_v11  ;;  %v3221_v11 = vpack.c.bf16 %v602_v23, %v600_v3  ;;  %v620_v3 = vld [vmem:[%s4077_s29 + $0xb80] sm:$0xff]  ;;  %v622_v23 = vld [vmem:[%s4077_s29 + $0xb90] sm:$0xff] }
 0x164   : > { %3714 = vmatpush1.bf16.msra.mxu0 %v3713_v14  ;;  %3204 = vmatprep.subr.bf16.mxu1 %v3203_v15  ;;  %v3733_v14 = vpack.c.bf16 %v1114_v6, %v1112_v4  ;;  %v3223_v15 = vpack.c.bf16 %v607_v34, %v605_v7  ;;  %v1132_v4 = vld [vmem:[%s4077_s29 + $0x1b80] sm:$0xff]  ;;  %v1134_v6 = vld [vmem:[%s4077_s29 + $0x1b90] sm:$0xff]  ;;  %v625_v7 = vld [vmem:[%s4077_s29 + $0xba8] sm:$0xff] }
 0x165   : > { %3716 = vmatprep.subr.bf16.mxu0 %v3715_v19  ;;  %v3735_v19 = vpack.c.bf16 %v1119_v9, %v1117_v27  ;;  %v627_v34 = vld [vmem:[%s4077_s29 + $0xbb8] sm:$0xff]  ;;  %v1137_v27 = vld [vmem:[%s4077_s29 + $0x1ba8] sm:$0xff] }
 0x166   : > { %v1139_v9 = vld [vmem:[%s4077_s29 + $0x1bb8] sm:$0xff] }
 0x167   : > { %3206 = vmatpush1.bf16.msra.mxu1 %v3205_v55  ;;  %v3225_v55 = vpack.c.bf16 %v606_v17, %v604_v16  ;;  %v624_v16 = vld [vmem:[%s4077_s29 + $0xba0] sm:$0xff]  ;;  %v626_v17 = vld [vmem:[%s4077_s29 + $0xbb0] sm:$0xff] }
 0x168   : > { %3718 = vmatpush1.bf16.msra.mxu0 %v3717_v28  ;;  %3208 = vmatprep.subr.bf16.mxu1 %v3207_v30  ;;  %v3737_v28 = vpack.c.bf16 %v1118_v20, %v1116_v18  ;;  %v3227_v30 = vpack.c.bf16 %v611_v22, %v609_v21  ;;  %v1136_v18 = vld [vmem:[%s4077_s29 + $0x1ba0] sm:$0xff]  ;;  %v1138_v20 = vld [vmem:[%s4077_s29 + $0x1bb0] sm:$0xff]  ;;  %v629_v21 = vld [vmem:[%s4077_s29 + $0xbc8] sm:$0xff] }
 0x169   : > { %3720 = vmatprep.subr.bf16.mxu0 %v3719_v60  ;;  %v3739_v60 = vpack.c.bf16 %v1123_v25, %v1121_v24  ;;  %v631_v22 = vld [vmem:[%s4077_s29 + $0xbd8] sm:$0xff]  ;;  %v1141_v24 = vld [vmem:[%s4077_s29 + $0x1bc8] sm:$0xff] }
 0x16a   : > { %v1143_v25 = vld [vmem:[%s4077_s29 + $0x1bd8] sm:$0xff] }
 0x16b   : > { %3210 = vmatpush1.bf16.msra.mxu1 %v3209_v41  ;;  %v3229_v41 = vpack.c.bf16 %v610_v33, %v608_v32  ;;  %v628_v32 = vld [vmem:[%s4077_s29 + $0xbc0] sm:$0xff]  ;;  %v630_v33 = vld [vmem:[%s4077_s29 + $0xbd0] sm:$0xff] }
 0x16c   : > { %3722 = vmatpush1.bf16.msra.mxu0 %v3721_v42  ;;  %3212 = vmatprep.subr.bf16.mxu1 %v3211_v43  ;;  %v3741_v42 = vpack.c.bf16 %v1122_v36, %v1120_v35  ;;  %v3231_v43 = vpack.c.bf16 %v615_v38, %v613_v37  ;;  %v1140_v35 = vld [vmem:[%s4077_s29 + $0x1bc0] sm:$0xff]  ;;  %v1142_v36 = vld [vmem:[%s4077_s29 + $0x1bd0] sm:$0xff]  ;;  %v633_v37 = vld [vmem:[%s4077_s29 + $0xbe8] sm:$0xff] }
 0x16d   : > { %3724 = vmatprep.subr.bf16.mxu0 %v3723_v46  ;;  %v3743_v46 = vpack.c.bf16 %v1127_v40, %v1125_v39  ;;  %v635_v38 = vld [vmem:[%s4077_s29 + $0xbf8] sm:$0xff]  ;;  %v1145_v39 = vld [vmem:[%s4077_s29 + $0x1be8] sm:$0xff] }
 0x16e   : > { %v1147_v40 = vld [vmem:[%s4077_s29 + $0x1bf8] sm:$0xff] }
 0x16f   : > { %3214 = vmatpush1.bf16.msra.mxu1 %v3213_v8  ;;  %v3233_v8 = vpack.c.bf16 %v614_v10, %v612_v44  ;;  %v632_v44 = vld [vmem:[%s4077_s29 + $0xbe0] sm:$0xff]  ;;  %v634_v10 = vld [vmem:[%s4077_s29 + $0xbf0] sm:$0xff] }
 0x170   : > { %3726 = vmatpush1.bf16.msra.mxu0 %v3725_v26  ;;  %3216 = vmatprep.subr.bf16.mxu1 %v3215_v53  ;;  %v3745_v26 = vpack.c.bf16 %v1126_v56, %v1124_v45  ;;  %v3235_v53 = vpack.c.bf16 %v619_v48, %v617_v47  ;;  %v1144_v45 = vld [vmem:[%s4077_s29 + $0x1be0] sm:$0xff]  ;;  %v1146_v56 = vld [vmem:[%s4077_s29 + $0x1bf0] sm:$0xff]  ;;  %v637_v47 = vld [vmem:[%s4077_s29 + $0xc08] sm:$0xff] }
 0x171   : > { %3728 = vmatprep.subr.bf16.mxu0 %v3727_v58  ;;  %v3747_v58 = vpack.c.bf16 %v1131_v52, %v1129_v50  ;;  %v639_v48 = vld [vmem:[%s4077_s29 + $0xc18] sm:$0xff]  ;;  %v1149_v50 = vld [vmem:[%s4077_s29 + $0x1c08] sm:$0xff] }
 0x172   : > { %v1151_v52 = vld [vmem:[%s4077_s29 + $0x1c18] sm:$0xff] }
 0x173   : > { %3218 = vmatpush1.bf16.msra.mxu1 %v3217_v2  ;;  %v3237_v2 = vpack.c.bf16 %v618_v57, %v616_v54  ;;  %v3765_v54 = vpack.c.bf16 %v1146_v56, %v1144_v45  ;;  %v3255_v57 = vpack.c.bf16 %v639_v48, %v637_v47  ;;  %v652_v56 = vld [vmem:[%s4077_s29 + $0xc80] sm:$0xff]  ;;  %v654_v47 = vld [vmem:[%s4077_s29 + $0xc90] sm:$0xff] }
 0x174   : > { %3730 = vmatpush1.bf16.msra.mxu0 %v3729_v31  ;;  %3220 = vmatprep.subr.bf16.mxu1 %v3219_v51  ;;  %v3749_v31 = vpack.c.bf16 %v1130_v59, %v1128_v29  ;;  %v3239_v51 = vpack.c.bf16 %v623_v62, %v621_v61  ;;  %v636_v29 = vld [vmem:[%s4077_s29 + $0xc00] sm:$0xff]  ;;  %v3767_v61 = vpack.c.bf16 %v1151_v52, %v1149_v50  ;;  %v1150_v62 = vld [vmem:[%s4077_s29 + $0x1c10] sm:$0xff] }
 0x175   : > { %3732 = vmatprep.subr.bf16.mxu0 %v3731_v5  ;;  %v3751_v5 = vpack.c.bf16 %v1135_v1, %v1133_v0  ;;  %v1148_v59 = vld [vmem:[%s4077_s29 + $0x1c00] sm:$0xff]  ;;  %v641_v0 = vld [vmem:[%s4077_s29 + $0xc28] sm:$0xff]  ;;  %v643_v1 = vld [vmem:[%s4077_s29 + $0xc38] sm:$0xff] }
 0x176   : > { %v1164_v48 = vld [vmem:[%s4077_s29 + $0x1c80] sm:$0xff]  ;;  %v1166_v52 = vld [vmem:[%s4077_s29 + $0x1c90] sm:$0xff] }
 0x177   : > { %3222 = vmatpush1.bf16.msra.mxu1 %v3221_v11  ;;  %v3241_v11 = vpack.c.bf16 %v622_v23, %v620_v3 }
 0x178   : > { %3734 = vmatpush1.bf16.msra.mxu0 %v3733_v14  ;;  %3224 = vmatprep.subr.bf16.mxu1 %v3223_v15  ;;  %v3753_v14 = vpack.c.bf16 %v1134_v6, %v1132_v4  ;;  %v3243_v15 = vpack.c.bf16 %v627_v34, %v625_v7  ;;  %v3769_v4 = vpack.c.bf16 %v1150_v62, %v1148_v59  ;;  %v640_v6 = vld [vmem:[%s4077_s29 + $0xc20] sm:$0xff]  ;;  %v642_v7 = vld [vmem:[%s4077_s29 + $0xc30] sm:$0xff] }
 0x179   : > { %3736 = vmatprep.subr.bf16.mxu0 %v3735_v19  ;;  %v3755_v19 = vpack.c.bf16 %v1139_v9, %v1137_v27  ;;  %v1152_v34 = vld [vmem:[%s4077_s29 + $0x1c20] sm:$0xff]  ;;  %v1154_v9 = vld [vmem:[%s4077_s29 + $0x1c30] sm:$0xff]  ;;  %v3785_v59 = vpack.c.bf16 %v1166_v52, %v1164_v48 }
 0x17a   : > { %v656_v62 = vld [vmem:[%s4077_s29 + $0xca0] sm:$0xff] }
 0x17b   : > { %3226 = vmatpush1.bf16.msra.mxu1 %v3225_v55  ;;  %v3245_v55 = vpack.c.bf16 %v626_v17, %v624_v16  ;;  %v1157_v16 = vld [vmem:[%s4077_s29 + $0x1c48] sm:$0xff]  ;;  %v1159_v17 = vld [vmem:[%s4077_s29 + $0x1c58] sm:$0xff]  ;;  %v672_v48 = vld [vmem:[%s4077_s29 + $0xd20] sm:$0xff] }
 0x17c   : > { %3738 = vmatpush1.bf16.msra.mxu0 %v3737_v28  ;;  %3228 = vmatprep.subr.bf16.mxu1 %v3227_v30  ;;  %v3757_v28 = vpack.c.bf16 %v1138_v20, %v1136_v18  ;;  %v3247_v30 = vpack.c.bf16 %v631_v22, %v629_v21  ;;  %v3773_v20 = vpack.c.bf16 %v1154_v9, %v1152_v34  ;;  %v644_v22 = vld [vmem:[%s4077_s29 + $0xc40] sm:$0xff] }
 0x17d   : > { %3740 = vmatprep.subr.bf16.mxu0 %v3739_v60  ;;  %v3759_v60 = vpack.c.bf16 %v1143_v25, %v1141_v24  ;;  %v1156_v24 = vld [vmem:[%s4077_s29 + $0x1c40] sm:$0xff]  ;;  %v3775_v25 = vpack.c.bf16 %v1159_v17, %v1157_v16  ;;  %v1174_v16 = vld [vmem:[%s4077_s29 + $0x1cd0] sm:$0xff]  ;;  %v665_v17 = vld [vmem:[%s4077_s29 + $0xce8] sm:$0xff] }
 0x17e   : > { %v660_v9 = vld [vmem:[%s4077_s29 + $0xcc0] sm:$0xff] }
 0x17f   : > { %3230 = vmatpush1.bf16.msra.mxu1 %v3229_v41  ;;  %v3249_v41 = vpack.c.bf16 %v630_v33, %v628_v32  ;;  %v1163_v32 = vld [vmem:[%s4077_s29 + $0x1c78] sm:$0xff]  ;;  %v1184_v52 = vld [vmem:[%s4077_s29 + $0x1d20] sm:$0xff] }
 0x180   : > { %3742 = vmatpush1.bf16.msra.mxu0 %v3741_v42  ;;  %3232 = vmatprep.subr.bf16.mxu1 %v3231_v43  ;;  %v3761_v42 = vpack.c.bf16 %v1142_v36, %v1140_v35  ;;  %v3251_v43 = vpack.c.bf16 %v635_v38, %v633_v37  ;;  %v648_v36 = vld [vmem:[%s4077_s29 + $0xc60] sm:$0xff]  ;;  %v650_v37 = vld [vmem:[%s4077_s29 + $0xc70] sm:$0xff] }
 0x181   : > { %3744 = vmatprep.subr.bf16.mxu0 %v3743_v46  ;;  %v3763_v46 = vpack.c.bf16 %v1147_v40, %v1145_v39  ;;  %v1160_v38 = vld [vmem:[%s4077_s29 + $0x1c60] sm:$0xff]  ;;  %v1162_v40 = vld [vmem:[%s4077_s29 + $0x1c70] sm:$0xff] }
 0x182   : > { %v3781_v45 = vpack.c.bf16 %v1162_v40, %v1160_v38  ;;  %v668_v38 = vld [vmem:[%s4077_s29 + $0xd00] sm:$0xff] }
 0x183   : > { %3234 = vmatpush1.bf16.msra.mxu1 %v3233_v8  ;;  %v4964_v8 = vld [vmem:[%s4072_s25 + $0x18] sm:$0xff]  ;;  %v1180_v40 = vld [vmem:[%s4077_s29 + $0x1d00] sm:$0xff] }
 0x184   : > { %3746 = vmatpush1.bf16.msra.mxu0 %v3745_v26  ;;  %3236 = vmatprep.subr.bf16.mxu1 %v3235_v53  ;;  %v3253_v26 = vpack.c.bf16 %v634_v10, %v632_v44  ;;  %v4967_v53 = vld [vmem:[%s4072_s25 + $0x38] sm:$0xff]  ;;  %v3269_v10 = vpack.c.bf16 %v650_v37, %v648_v36 }
 0x185   : > { %3748 = vmatprep.subr.bf16.mxu0 %v3747_v58  ;;  %v638_v58 = vld [vmem:[%s4077_s29 + $0xc10] sm:$0xff]  ;;  %v4983_v3 = vrot.slane %v4967_v53, %v4175_v12  ;;  %v1167_v44 = vld [vmem:[%s4077_s29 + $0x1c98] sm:$0xff] }
 0x186   : > { %v3257_v23 = vpack.c.bf16 %v638_v58, %v636_v29  ;;  %v1171_v29 = vld [vmem:[%s4077_s29 + $0x1cb8] sm:$0xff]  ;;  %v3273_v58 = vpack.c.bf16 %v654_v47, %v652_v56 }
 0x187   : > { %3238 = vmatpush1.bf16.msra.mxu1 %v3237_v2  ;;  %v4977_v2 = vrot.slane %v4964_v8, %v4175_v12  ;;  %v1418_v18 = vcombine.high %v4983_v3, %v4983_v3 }
 0x188   : > { %3750 = vmatpush1.bf16.msra.mxu0 %v3749_v31  ;;  %3240 = vmatprep.subr.bf16.mxu1 %v3239_v51  ;;  %v1153_v31 = vld [vmem:[%s4077_s29 + $0x1c28] sm:$0xff]  ;;  %v1155_v51 = vld [vmem:[%s4077_s29 + $0x1c38] sm:$0xff] }
 0x189   : > { %3752 = vmatprep.subr.bf16.mxu0 %v3751_v5  ;;  %v3259_v5 = vpack.c.bf16 %v643_v1, %v641_v0  ;;  %v3771_v27 = vpack.c.bf16 %v1155_v51, %v1153_v31  ;;  %v658_v0 = vld [vmem:[%s4077_s29 + $0xcb0] sm:$0xff]  ;;  %v1168_v1 = vld [vmem:[%s4077_s29 + $0x1ca0] sm:$0xff] }
 0x18a   : > { %v1170_v51 = vld [vmem:[%s4077_s29 + $0x1cb0] sm:$0xff] }
 0x18b   : > { %3242 = vmatpush1.bf16.msra.mxu1 %v3241_v11  ;;  %v645_v11 = vld [vmem:[%s4077_s29 + $0xc48] sm:$0xff]  ;;  %v3789_v34 = vpack.c.bf16 %v1170_v51, %v1168_v1  ;;  %v676_v1 = vld [vmem:[%s4077_s29 + $0xd40] sm:$0xff] }
 0x18c   : > { %3754 = vmatpush1.bf16.msra.mxu0 %v3753_v14  ;;  %3244 = vmatprep.subr.bf16.mxu1 %v3243_v15  ;;  %v647_v14 = vld [vmem:[%s4077_s29 + $0xc58] sm:$0xff]  ;;  %v1350_v15 = vcombine.high %v4977_v2, %v4977_v2  ;;  %v1188_v51 = vld [vmem:[%s4077_s29 + $0x1d40] sm:$0xff] }
 0x18d   : > { %3756 = vmatprep.subr.bf16.mxu0 %v3755_v19  ;;  %v3261_v19 = vpack.c.bf16 %v642_v7, %v640_v6  ;;  %v3263_v21 = vpack.c.bf16 %v647_v14, %v645_v11  ;;  %v1175_v6 = vld [vmem:[%s4077_s29 + $0x1cd8] sm:$0xff]  ;;  %v3277_v7 = vpack.c.bf16 %v658_v0, %v656_v62  ;;  %v662_v11 = vld [vmem:[%s4077_s29 + $0xcd0] sm:$0xff]  ;;  %v1172_v14 = vld [vmem:[%s4077_s29 + $0x1cc0] sm:$0xff] }
 0x18f   : > { %3246 = vmatpush1.bf16.msra.mxu1 %v3245_v55  ;;  %v1158_v55 = vld [vmem:[%s4077_s29 + $0x1c50] sm:$0xff] }
 0x190   : > { %3758 = vmatpush1.bf16.msra.mxu0 %v3757_v28  ;;  %3248 = vmatprep.subr.bf16.mxu1 %v3247_v30  ;;  %v649_v28 = vld [vmem:[%s4077_s29 + $0xc68] sm:$0xff]  ;;  %v651_v30 = vld [vmem:[%s4077_s29 + $0xc78] sm:$0xff]  ;;  %v3777_v35 = vpack.c.bf16 %v1158_v55, %v1156_v24  ;;  %v664_v24 = vld [vmem:[%s4077_s29 + $0xce0] sm:$0xff] }
 0x191   : > { %3760 = vmatprep.subr.bf16.mxu0 %v3759_v60  ;;  %v3267_v60 = vpack.c.bf16 %v651_v30, %v649_v28  ;;  %v1176_v55 = vld [vmem:[%s4077_s29 + $0x1ce0] sm:$0xff]  ;;  %v1178_v30 = vld [vmem:[%s4077_s29 + $0x1cf0] sm:$0xff] }
 0x192   : > { %v3797_v36 = vpack.c.bf16 %v1178_v30, %v1176_v55  ;;  %v684_v55 = vld [vmem:[%s4077_s29 + $0xd80] sm:$0xff] }
 0x193   : > { %3250 = vmatpush1.bf16.msra.mxu1 %v3249_v41  ;;  %v653_v41 = vld [vmem:[%s4077_s29 + $0xc88] sm:$0xff]  ;;  %v1196_v30 = vld [vmem:[%s4077_s29 + $0x1d80] sm:$0xff] }
 0x194   : > { %3762 = vmatpush1.bf16.msra.mxu0 %v3761_v42  ;;  %3252 = vmatprep.subr.bf16.mxu1 %v3251_v43  ;;  %v655_v42 = vld [vmem:[%s4077_s29 + $0xc98] sm:$0xff]  ;;  %v1165_v43 = vld [vmem:[%s4077_s29 + $0x1c88] sm:$0xff] }
 0x195   : > { %3764 = vmatprep.subr.bf16.mxu0 %v3763_v46  ;;  %v3271_v46 = vpack.c.bf16 %v655_v42, %v653_v41  ;;  %v3783_v50 = vpack.c.bf16 %v1167_v44, %v1165_v43  ;;  %v1182_v42 = vld [vmem:[%s4077_s29 + $0x1d10] sm:$0xff]  ;;  %v673_v43 = vld [vmem:[%s4077_s29 + $0xd28] sm:$0xff]  ;;  %v675_v44 = vld [vmem:[%s4077_s29 + $0xd38] sm:$0xff] }
 0x196   : > { %v3801_v56 = vpack.c.bf16 %v1182_v42, %v1180_v40  ;;  %v3291_v47 = vpack.c.bf16 %v675_v44, %v673_v43  ;;  %v688_v40 = vld [vmem:[%s4077_s29 + $0xda0] sm:$0xff]  ;;  %v1202_v44 = vld [vmem:[%s4077_s29 + $0x1db0] sm:$0xff] }
 0x197   : > { %3254 = vmatpush1.bf16.msra.mxu1 %v3253_v26  ;;  %v657_v26 = vld [vmem:[%s4077_s29 + $0xca8] sm:$0xff]  ;;  %v1200_v42 = vld [vmem:[%s4077_s29 + $0x1da0] sm:$0xff] }
 0x198   : > { %3766 = vmatpush1.bf16.msra.mxu0 %v3765_v54  ;;  %3256 = vmatprep.subr.bf16.mxu1 %v3255_v57  ;;  %v659_v54 = vld [vmem:[%s4077_s29 + $0xcb8] sm:$0xff]  ;;  %v1169_v57 = vld [vmem:[%s4077_s29 + $0x1ca8] sm:$0xff] }
 0x199   : > { %3768 = vmatprep.subr.bf16.mxu0 %v3767_v61  ;;  %v3275_v61 = vpack.c.bf16 %v659_v54, %v657_v26  ;;  %v3787_v31 = vpack.c.bf16 %v1171_v29, %v1169_v57  ;;  %v1186_v54 = vld [vmem:[%s4077_s29 + $0x1d30] sm:$0xff]  ;;  %v677_v57 = vld [vmem:[%s4077_s29 + $0xd48] sm:$0xff]  ;;  %v679_v29 = vld [vmem:[%s4077_s29 + $0xd58] sm:$0xff] }
 0x19a   : > { %1872 = vmatmul.mubr.f32.vlgmr.msra.gmra.mrb[0].mxu1 %v4830_v13  ;;  %v646_v13 = vld [vmem:[%s4077_s29 + $0xc50] sm:$0xff]  ;;  %v3805_v62 = vpack.c.bf16 %v1186_v54, %v1184_v52  ;;  %v3295_v0 = vpack.c.bf16 %v679_v29, %v677_v57  ;;  %v692_v52 = vld [vmem:[%s4077_s29 + $0xdc0] sm:$0xff] }
 0x19b   : > { %3258 = vmatpush1.bf16.msra.mxu1 %v3257_v23  ;;  %2440 = vmatmul.mubr.f32.vlgmr.msra.gmra.mrb[0].mxu0 %v4835_v49  ;;  %v1161_v49 = vld [vmem:[%s4077_s29 + $0x1c68] sm:$0xff]  ;;  %v3265_v33 = vpack.c.bf16 %v646_v13, %v644_v22  ;;  %v3793_v22 = vpack.c.bf16 %v1174_v16, %v1172_v14  ;;  %v680_v14 = vld [vmem:[%s4077_s29 + $0xd60] sm:$0xff]  ;;  %v1206_v29 = vld [vmem:[%s4077_s29 + $0x1dd0] sm:$0xff] }
 0x19c   : > { %3770 = vmatpush1.bf16.msra.mxu0 %v3769_v4  ;;  %3260 = vmatprep.subr.bf16.mxu1 %v3259_v5  ;;  %v3779_v39 = vpack.c.bf16 %v1163_v32, %v1161_v49  ;;  %v661_v23 = vld [vmem:[%s4077_s29 + $0xcc8] sm:$0xff]  ;;  %v663_v4 = vld [vmem:[%s4077_s29 + $0xcd8] sm:$0xff]  ;;  %v1192_v16 = vld [vmem:[%s4077_s29 + $0x1d60] sm:$0xff] }
 0x19d   : > { %3772 = vmatprep.subr.bf16.mxu0 %v3771_v27  ;;  %1942 = vmatprep.mubr.f32.mxu1 %v1350_v15  ;;  %v1173_v5 = vld [vmem:[%s4077_s29 + $0x1cc8] sm:$0xff]  ;;  %v3279_v27 = vpack.c.bf16 %v663_v4, %v661_v23  ;;  %v671_v32 = vld [vmem:[%s4077_s29 + $0xd18] sm:$0xff]  ;;  %v1190_v4 = vld [vmem:[%s4077_s29 + $0x1d50] sm:$0xff] }
 0x19e   : > { %2510 = vmatprep.mubr.f32.mxu0 %v1418_v18  ;;  %v3791_v15 = vpack.c.bf16 %v1175_v6, %v1173_v5  ;;  %v667_v18 = vld [vmem:[%s4077_s29 + $0xcf8] sm:$0xff]  ;;  %v669_v49 = vld [vmem:[%s4077_s29 + $0xd08] sm:$0xff]  ;;  %v1204_v54 = vld [vmem:[%s4077_s29 + $0x1dc0] sm:$0xff] }
 0x19f   : > { %3262 = vmatpush1.bf16.msra.mxu1 %v3261_v19  ;;  %v1177_v19 = vld [vmem:[%s4077_s29 + $0x1ce8] sm:$0xff]  ;;  %v3283_v13 = vpack.c.bf16 %v667_v18, %v665_v17  ;;  %v3287_v37 = vpack.c.bf16 %v671_v32, %v669_v49  ;;  %v683_v6 = vld [vmem:[%s4077_s29 + $0xd78] sm:$0xff]  ;;  %v1194_v18 = vld [vmem:[%s4077_s29 + $0x1d70] sm:$0xff] }
 0x1a0   : > { %3774 = vmatpush1.bf16.msra.mxu0 %v3773_v20  ;;  %3264 = vmatprep.subr.bf16.mxu1 %v3263_v21  ;;  %v1179_v20 = vld [vmem:[%s4077_s29 + $0x1cf8] sm:$0xff]  ;;  %v3281_v21 = vpack.c.bf16 %v662_v11, %v660_v9  ;;  %v681_v5 = vld [vmem:[%s4077_s29 + $0xd68] sm:$0xff]  ;;  %v3809_v9 = vpack.c.bf16 %v1190_v4, %v1188_v51  ;;  %v1198_v32 = vld [vmem:[%s4077_s29 + $0x1d90] sm:$0xff] }
 0x1a1   : > { %3776 = vmatprep.subr.bf16.mxu0 %v3775_v25  ;;  %v666_v25 = vld [vmem:[%s4077_s29 + $0xcf0] sm:$0xff]  ;;  %v3795_v28 = vpack.c.bf16 %v1179_v20, %v1177_v19  ;;  %v3299_v11 = vpack.c.bf16 %v683_v6, %v681_v5  ;;  %v685_v19 = vld [vmem:[%s4077_s29 + $0xd88] sm:$0xff]  ;;  %v687_v20 = vld [vmem:[%s4077_s29 + $0xd98] sm:$0xff] }
 0x1a2   : > { %v696_v51 = vld [vmem:[%s4077_s29 + $0xde0] sm:$0xff]  ;;  %v1210_v6 = vld [vmem:[%s4077_s29 + $0x1df0] sm:$0xff] }
 0x1a3   : > { %3266 = vmatpush1.bf16.msra.mxu1 %v3265_v33  ;;  %v1181_v33 = vld [vmem:[%s4077_s29 + $0x1d08] sm:$0xff]  ;;  %v1208_v4 = vld [vmem:[%s4077_s29 + $0x1de0] sm:$0xff] }
 0x1a4   : > { %3778 = vmatpush1.bf16.msra.mxu0 %v3777_v35  ;;  %3268 = vmatprep.subr.bf16.mxu1 %v3267_v60  ;;  %v1183_v35 = vld [vmem:[%s4077_s29 + $0x1d18] sm:$0xff]  ;;  %v3285_v60 = vpack.c.bf16 %v666_v25, %v664_v24  ;;  %v3813_v24 = vpack.c.bf16 %v1194_v18, %v1192_v16  ;;  %v3303_v25 = vpack.c.bf16 %v687_v20, %v685_v19  ;;  %v700_v18 = vld [vmem:[%s4077_s29 + $0xe00] sm:$0xff]  ;;  %v702_v19 = vld [vmem:[%s4077_s29 + $0xe10] sm:$0xff] }
 0x1a5   : > { %3780 = vmatprep.subr.bf16.mxu0 %v3779_v39  ;;  %v670_v39 = vld [vmem:[%s4077_s29 + $0xd10] sm:$0xff]  ;;  %v3799_v41 = vpack.c.bf16 %v1183_v35, %v1181_v33  ;;  %v689_v33 = vld [vmem:[%s4077_s29 + $0xda8] sm:$0xff]  ;;  %v691_v35 = vld [vmem:[%s4077_s29 + $0xdb8] sm:$0xff]  ;;  %v3829_v16 = vpack.c.bf16 %v1210_v6, %v1208_v4 }
 0x1a6   : > { %v1212_v20 = vld [vmem:[%s4077_s29 + $0x1e00] sm:$0xff] }
 0x1a7   : > { %3270 = vmatpush1.bf16.msra.mxu1 %v3269_v10  ;;  %v1185_v10 = vld [vmem:[%s4077_s29 + $0x1d28] sm:$0xff]  ;;  %v716_v6 = vld [vmem:[%s4077_s29 + $0xe80] sm:$0xff] }
 0x1a8   : > { %3782 = vmatpush1.bf16.msra.mxu0 %v3781_v45  ;;  %3272 = vmatprep.subr.bf16.mxu1 %v3271_v46  ;;  %v1187_v45 = vld [vmem:[%s4077_s29 + $0x1d38] sm:$0xff]  ;;  %v3289_v46 = vpack.c.bf16 %v670_v39, %v668_v38  ;;  %v3817_v38 = vpack.c.bf16 %v1198_v32, %v1196_v30  ;;  %v3307_v39 = vpack.c.bf16 %v691_v35, %v689_v33  ;;  %v704_v32 = vld [vmem:[%s4077_s29 + $0xe20] sm:$0xff]  ;;  %v706_v33 = vld [vmem:[%s4077_s29 + $0xe30] sm:$0xff] }
 0x1a9   : > { %3784 = vmatprep.subr.bf16.mxu0 %v3783_v50  ;;  %v674_v50 = vld [vmem:[%s4077_s29 + $0xd30] sm:$0xff]  ;;  %v3803_v26 = vpack.c.bf16 %v1187_v45, %v1185_v10  ;;  %v693_v10 = vld [vmem:[%s4077_s29 + $0xdc8] sm:$0xff]  ;;  %v695_v45 = vld [vmem:[%s4077_s29 + $0xdd8] sm:$0xff] }
 0x1aa   : > { %v1216_v35 = vld [vmem:[%s4077_s29 + $0x1e20] sm:$0xff] }
 0x1ab   : > { %3274 = vmatpush1.bf16.msra.mxu1 %v3273_v58  ;;  %v1189_v58 = vld [vmem:[%s4077_s29 + $0x1d48] sm:$0xff] }
 0x1ac   : > { %3786 = vmatpush1.bf16.msra.mxu0 %v3785_v59  ;;  %3276 = vmatprep.subr.bf16.mxu1 %v3275_v61  ;;  %v1191_v59 = vld [vmem:[%s4077_s29 + $0x1d58] sm:$0xff]  ;;  %v3293_v61 = vpack.c.bf16 %v674_v50, %v672_v48  ;;  %v3821_v48 = vpack.c.bf16 %v1202_v44, %v1200_v42  ;;  %v3311_v50 = vpack.c.bf16 %v695_v45, %v693_v10  ;;  %v708_v45 = vld [vmem:[%s4077_s29 + $0xe40] sm:$0xff] }
 0x1ad   : > { %3788 = vmatprep.subr.bf16.mxu0 %v3787_v31  ;;  %v678_v31 = vld [vmem:[%s4077_s29 + $0xd50] sm:$0xff]  ;;  %v3807_v23 = vpack.c.bf16 %v1191_v59, %v1189_v58  ;;  %v697_v58 = vld [vmem:[%s4077_s29 + $0xde8] sm:$0xff]  ;;  %v699_v59 = vld [vmem:[%s4077_s29 + $0xdf8] sm:$0xff] }
 0x1af   : > { %3278 = vmatpush1.bf16.msra.mxu1 %v3277_v7  ;;  %v1193_v7 = vld [vmem:[%s4077_s29 + $0x1d68] sm:$0xff] }
 0x1b0   : > { %3790 = vmatpush1.bf16.msra.mxu0 %v3789_v34  ;;  %3280 = vmatprep.subr.bf16.mxu1 %v3279_v27  ;;  %v1195_v34 = vld [vmem:[%s4077_s29 + $0x1d78] sm:$0xff]  ;;  %v3297_v27 = vpack.c.bf16 %v678_v31, %v676_v1  ;;  %v3825_v1 = vpack.c.bf16 %v1206_v29, %v1204_v54  ;;  %v3315_v31 = vpack.c.bf16 %v699_v59, %v697_v58  ;;  %v712_v29 = vld [vmem:[%s4077_s29 + $0xe60] sm:$0xff]  ;;  %v714_v58 = vld [vmem:[%s4077_s29 + $0xe70] sm:$0xff] }
 0x1b1   : > { %3792 = vmatprep.subr.bf16.mxu0 %v3791_v15  ;;  %v682_v15 = vld [vmem:[%s4077_s29 + $0xd70] sm:$0xff]  ;;  %v3811_v17 = vpack.c.bf16 %v1195_v34, %v1193_v7  ;;  %v701_v7 = vld [vmem:[%s4077_s29 + $0xe08] sm:$0xff]  ;;  %v703_v34 = vld [vmem:[%s4077_s29 + $0xe18] sm:$0xff] }
 0x1b2   : > { %v1224_v59 = vld [vmem:[%s4077_s29 + $0x1e60] sm:$0xff] }
 0x1b3   : > { %3282 = vmatpush1.bf16.msra.mxu1 %v3281_v21  ;;  %v1197_v21 = vld [vmem:[%s4077_s29 + $0x1d88] sm:$0xff] }
 0x1b4   : > { %3794 = vmatpush1.bf16.msra.mxu0 %v3793_v22  ;;  %3284 = vmatprep.subr.bf16.mxu1 %v3283_v13  ;;  %v1199_v22 = vld [vmem:[%s4077_s29 + $0x1d98] sm:$0xff]  ;;  %v3301_v13 = vpack.c.bf16 %v682_v15, %v680_v14  ;;  %v1403_v14 = vcombine.high %v4967_v53, %v4967_v53 }
 0x1b5   : > { %3796 = vmatprep.subr.bf16.mxu0 %v3795_v28  ;;  %v686_v28 = vld [vmem:[%s4077_s29 + $0xd90] sm:$0xff]  ;;  %v3815_v49 = vpack.c.bf16 %v1199_v22, %v1197_v21  ;;  %v705_v22 = vld [vmem:[%s4077_s29 + $0xe28] sm:$0xff] }
 0x1b6   : > { %v1214_v21 = vld [vmem:[%s4077_s29 + $0x1e10] sm:$0xff] }
 0x1b7   : > { %3286 = vmatpush1.bf16.msra.mxu1 %v3285_v60  ;;  %v1201_v60 = vld [vmem:[%s4077_s29 + $0x1da8] sm:$0xff]  ;;  %v3833_v30 = vpack.c.bf16 %v1214_v21, %v1212_v20  ;;  %v720_v20 = vld [vmem:[%s4077_s29 + $0xea0] sm:$0xff] }
 0x1b8   : > { %3798 = vmatpush1.bf16.msra.mxu0 %v3797_v36  ;;  %3288 = vmatprep.subr.bf16.mxu1 %v3287_v37  ;;  %v1203_v36 = vld [vmem:[%s4077_s29 + $0x1db8] sm:$0xff]  ;;  %v3305_v37 = vpack.c.bf16 %v686_v28, %v684_v55  ;;  %v5127_v55 = vrot.slane %v1403_v14, %v4175_v12  ;;  %v3321_v28 = vpack.c.bf16 %v702_v19, %v700_v18  ;;  %v1232_v21 = vld [vmem:[%s4077_s29 + $0x1ea0] sm:$0xff] }
 0x1b9   : > { %3800 = vmatprep.subr.bf16.mxu0 %v3799_v41  ;;  %v690_v41 = vld [vmem:[%s4077_s29 + $0xdb0] sm:$0xff]  ;;  %v3819_v43 = vpack.c.bf16 %v1203_v36, %v1201_v60  ;;  %v723_v14 = vld [vmem:[%s4077_s29 + $0xeb8] sm:$0xff] }
 0x1ba   : > { %v1218_v36 = vld [vmem:[%s4077_s29 + $0x1e30] sm:$0xff]  ;;  %v1419_v42 = vcombine.high %v5127_v55, %v5127_v55 }
 0x1bb   : > { %3290 = vmatpush1.bf16.msra.mxu1 %v3289_v46  ;;  %v1205_v46 = vld [vmem:[%s4077_s29 + $0x1dc8] sm:$0xff]  ;;  %v3837_v44 = vpack.c.bf16 %v1218_v36, %v1216_v35  ;;  %v724_v35 = vld [vmem:[%s4077_s29 + $0xec0] sm:$0xff] }
 0x1bc   : > { %3802 = vmatpush1.bf16.msra.mxu0 %v3801_v56  ;;  %3292 = vmatprep.subr.bf16.mxu1 %v3291_v47  ;;  %v1207_v56 = vld [vmem:[%s4077_s29 + $0x1dd8] sm:$0xff]  ;;  %v3309_v47 = vpack.c.bf16 %v690_v41, %v688_v40  ;;  %v1221_v40 = vld [vmem:[%s4077_s29 + $0x1e48] sm:$0xff]  ;;  %v1236_v36 = vld [vmem:[%s4077_s29 + $0x1ec0] sm:$0xff] }
 0x1bd   : > { %3804 = vmatprep.subr.bf16.mxu0 %v3803_v26  ;;  %v694_v26 = vld [vmem:[%s4077_s29 + $0xdd0] sm:$0xff]  ;;  %v3823_v57 = vpack.c.bf16 %v1207_v56, %v1205_v46  ;;  %v1223_v41 = vld [vmem:[%s4077_s29 + $0x1e58] sm:$0xff]  ;;  %v1220_v46 = vld [vmem:[%s4077_s29 + $0x1e40] sm:$0xff] }
 0x1be   : > { %v3839_v56 = vpack.c.bf16 %v1223_v41, %v1221_v40  ;;  %v731_v40 = vld [vmem:[%s4077_s29 + $0xef8] sm:$0xff]  ;;  %v1241_v41 = vld [vmem:[%s4077_s29 + $0x1ee8] sm:$0xff] }
 0x1bf   : > { %3294 = vmatpush1.bf16.msra.mxu1 %v3293_v61  ;;  %v1209_v61 = vld [vmem:[%s4077_s29 + $0x1de8] sm:$0xff] }
 0x1c0   : > { %3806 = vmatpush1.bf16.msra.mxu0 %v3805_v62  ;;  %3296 = vmatprep.subr.bf16.mxu1 %v3295_v0  ;;  %v1211_v62 = vld [vmem:[%s4077_s29 + $0x1df8] sm:$0xff]  ;;  %v3313_v0 = vpack.c.bf16 %v694_v26, %v692_v52 }
 0x1c1   : > { %3808 = vmatprep.subr.bf16.mxu0 %v3807_v23  ;;  %v698_v23 = vld [vmem:[%s4077_s29 + $0xdf0] sm:$0xff]  ;;  %v3827_v5 = vpack.c.bf16 %v1211_v62, %v1209_v61  ;;  %v1227_v52 = vld [vmem:[%s4077_s29 + $0x1e78] sm:$0xff] }
 0x1c2   : > { %v3317_v15 = vpack.c.bf16 %v698_v23, %v696_v51  ;;  %v1226_v62 = vld [vmem:[%s4077_s29 + $0x1e70] sm:$0xff]  ;;  %v1231_v51 = vld [vmem:[%s4077_s29 + $0x1e98] sm:$0xff]  ;;  %v3333_v23 = vpack.c.bf16 %v714_v58, %v712_v29  ;;  %v732_v29 = vld [vmem:[%s4077_s29 + $0xf00] sm:$0xff] }
 0x1c3   : > { %3298 = vmatpush1.bf16.msra.mxu1 %v3297_v27  ;;  %v1335_v27 = vcombine.high %v4964_v8, %v4964_v8  ;;  %v3845_v4 = vpack.c.bf16 %v1226_v62, %v1224_v59  ;;  %v734_v58 = vld [vmem:[%s4077_s29 + $0xf10] sm:$0xff]  ;;  %v1244_v59 = vld [vmem:[%s4077_s29 + $0x1f00] sm:$0xff] }
 0x1c4   : > { %3810 = vmatpush1.bf16.msra.mxu0 %v3809_v9  ;;  %3300 = vmatprep.subr.bf16.mxu1 %v3299_v11  ;;  %v1213_v9 = vld [vmem:[%s4077_s29 + $0x1e08] sm:$0xff]  ;;  %v1215_v11 = vld [vmem:[%s4077_s29 + $0x1e18] sm:$0xff]  ;;  %v1246_v62 = vld [vmem:[%s4077_s29 + $0x1f10] sm:$0xff] }
 0x1c5   : > { %3812 = vmatprep.subr.bf16.mxu0 %v3811_v17  ;;  %v3319_v17 = vpack.c.bf16 %v703_v34, %v701_v7  ;;  %v3831_v8 = vpack.c.bf16 %v1215_v11, %v1213_v9  ;;  %v5122_v53 = vrot.slane %v1335_v27, %v4175_v12  ;;  %v718_v7 = vld [vmem:[%s4077_s29 + $0xe90] sm:$0xff]  ;;  %v1228_v34 = vld [vmem:[%s4077_s29 + $0x1e80] sm:$0xff]  ;;  %v721_v11 = vld [vmem:[%s4077_s29 + $0xea8] sm:$0xff] }
 0x1c6   : > { %v1230_v9 = vld [vmem:[%s4077_s29 + $0x1e90] sm:$0xff]  ;;  %v3339_v19 = vpack.c.bf16 %v723_v14, %v721_v11  ;;  %v741_v11 = vld [vmem:[%s4077_s29 + $0xf48] sm:$0xff]  ;;  %v743_v14 = vld [vmem:[%s4077_s29 + $0xf58] sm:$0xff] }
 0x1c7   : > { %3302 = vmatpush1.bf16.msra.mxu1 %v3301_v13  ;;  %v707_v13 = vld [vmem:[%s4077_s29 + $0xe38] sm:$0xff]  ;;  %v3849_v18 = vpack.c.bf16 %v1230_v9, %v1228_v34  ;;  %v1248_v34 = vld [vmem:[%s4077_s29 + $0x1f20] sm:$0xff]  ;;  %v1250_v9 = vld [vmem:[%s4077_s29 + $0x1f30] sm:$0xff] }
 0x1c8   : > { %3814 = vmatpush1.bf16.msra.mxu0 %v3813_v24  ;;  %3304 = vmatprep.subr.bf16.mxu1 %v3303_v25  ;;  %v1217_v24 = vld [vmem:[%s4077_s29 + $0x1e28] sm:$0xff]  ;;  %v1219_v25 = vld [vmem:[%s4077_s29 + $0x1e38] sm:$0xff] }
 0x1c9   : > { %3816 = vmatprep.subr.bf16.mxu0 %v3815_v49  ;;  %v3323_v49 = vpack.c.bf16 %v707_v13, %v705_v22  ;;  %v3835_v60 = vpack.c.bf16 %v1219_v25, %v1217_v24  ;;  %v1234_v13 = vld [vmem:[%s4077_s29 + $0x1eb0] sm:$0xff]  ;;  %v725_v24 = vld [vmem:[%s4077_s29 + $0xec8] sm:$0xff]  ;;  %v727_v25 = vld [vmem:[%s4077_s29 + $0xed8] sm:$0xff] }
 0x1cb   : > { %3306 = vmatpush1.bf16.msra.mxu1 %v3305_v37  ;;  %v709_v37 = vld [vmem:[%s4077_s29 + $0xe48] sm:$0xff] }
 0x1cc   : > { %3818 = vmatpush1.bf16.msra.mxu0 %v3817_v38  ;;  %3308 = vmatprep.subr.bf16.mxu1 %v3307_v39  ;;  %v711_v38 = vld [vmem:[%s4077_s29 + $0xe58] sm:$0xff]  ;;  %v1351_v39 = vcombine.high %v5122_v53, %v5122_v53 }
 0x1cd   : > { %3820 = vmatprep.subr.bf16.mxu0 %v3819_v43  ;;  %v3325_v43 = vpack.c.bf16 %v706_v33, %v704_v32  ;;  %v3327_v10 = vpack.c.bf16 %v711_v38, %v709_v37  ;;  %v3853_v32 = vpack.c.bf16 %v1234_v13, %v1232_v21  ;;  %v3343_v33 = vpack.c.bf16 %v727_v25, %v725_v24  ;;  %v1238_v38 = vld [vmem:[%s4077_s29 + $0x1ed0] sm:$0xff]  ;;  %v1252_v21 = vld [vmem:[%s4077_s29 + $0x1f40] sm:$0xff]  ;;  %v745_v24 = vld [vmem:[%s4077_s29 + $0xf68] sm:$0xff] }
 0x1ce   : > { %v1254_v13 = vld [vmem:[%s4077_s29 + $0x1f50] sm:$0xff]  ;;  %v747_v25 = vld [vmem:[%s4077_s29 + $0xf78] sm:$0xff] }
 0x1cf   : > { %3310 = vmatpush1.bf16.msra.mxu1 %v3309_v47  ;;  %v1222_v47 = vld [vmem:[%s4077_s29 + $0x1e50] sm:$0xff] }
 0x1d0   : > { %3822 = vmatpush1.bf16.msra.mxu0 %v3821_v48  ;;  %3312 = vmatprep.subr.bf16.mxu1 %v3311_v50  ;;  %v713_v48 = vld [vmem:[%s4077_s29 + $0xe68] sm:$0xff]  ;;  %v715_v50 = vld [vmem:[%s4077_s29 + $0xe78] sm:$0xff]  ;;  %v3841_v54 = vpack.c.bf16 %v1222_v47, %v1220_v46  ;;  %v1240_v46 = vld [vmem:[%s4077_s29 + $0x1ee0] sm:$0xff] }
 0x1d1   : > { %3824 = vmatprep.subr.bf16.mxu0 %v3823_v57  ;;  %v3331_v57 = vpack.c.bf16 %v715_v50, %v713_v48  ;;  %v1242_v47 = vld [vmem:[%s4077_s29 + $0x1ef0] sm:$0xff]  ;;  %v733_v48 = vld [vmem:[%s4077_s29 + $0xf08] sm:$0xff]  ;;  %v735_v50 = vld [vmem:[%s4077_s29 + $0xf18] sm:$0xff] }
 0x1d3   : > { %3314 = vmatpush1.bf16.msra.mxu1 %v3313_v0  ;;  %v717_v0 = vld [vmem:[%s4077_s29 + $0xe88] sm:$0xff] }
 0x1d4   : > { %3826 = vmatpush1.bf16.msra.mxu0 %v3825_v1  ;;  %3316 = vmatprep.subr.bf16.mxu1 %v3315_v31  ;;  %v719_v1 = vld [vmem:[%s4077_s29 + $0xe98] sm:$0xff]  ;;  %v1229_v31 = vld [vmem:[%s4077_s29 + $0x1e88] sm:$0xff] }
 0x1d5   : > { %3828 = vmatprep.subr.bf16.mxu0 %v3827_v5  ;;  %v3335_v5 = vpack.c.bf16 %v719_v1, %v717_v0  ;;  %v3847_v27 = vpack.c.bf16 %v1231_v51, %v1229_v31  ;;  %v737_v0 = vld [vmem:[%s4077_s29 + $0xf28] sm:$0xff]  ;;  %v739_v1 = vld [vmem:[%s4077_s29 + $0xf38] sm:$0xff] }
 0x1d6   : > { %v1249_v31 = vld [vmem:[%s4077_s29 + $0x1f28] sm:$0xff]  ;;  %v1251_v51 = vld [vmem:[%s4077_s29 + $0x1f38] sm:$0xff] }
 0x1d7   : > { %3318 = vmatpush1.bf16.msra.mxu1 %v3317_v15  ;;  %v1233_v15 = vld [vmem:[%s4077_s29 + $0x1ea8] sm:$0xff] }
 0x1d8   : > { %3830 = vmatpush1.bf16.msra.mxu0 %v3829_v16  ;;  %3320 = vmatprep.subr.bf16.mxu1 %v3319_v17  ;;  %v1235_v16 = vld [vmem:[%s4077_s29 + $0x1eb8] sm:$0xff]  ;;  %v3337_v17 = vpack.c.bf16 %v718_v7, %v716_v6  ;;  %v736_v6 = vld [vmem:[%s4077_s29 + $0xf20] sm:$0xff]  ;;  %v738_v7 = vld [vmem:[%s4077_s29 + $0xf30] sm:$0xff] }
 0x1d9   : > { %3832 = vmatprep.subr.bf16.mxu0 %v3831_v8  ;;  %v722_v8 = vld [vmem:[%s4077_s29 + $0xeb0] sm:$0xff]  ;;  %v3851_v22 = vpack.c.bf16 %v1235_v16, %v1233_v15  ;;  %v1253_v15 = vld [vmem:[%s4077_s29 + $0x1f48] sm:$0xff]  ;;  %v1255_v16 = vld [vmem:[%s4077_s29 + $0x1f58] sm:$0xff] }
 0x1da   : > { %1943 = vmatmul.mubr.f32.vlgmr.msra.gmra.mrb[0].mxu1 %v4977_v2  ;;  %v710_v2 = vld [vmem:[%s4077_s29 + $0xe50] sm:$0xff] }
 0x1db   : > { %3322 = vmatpush1.bf16.msra.mxu1 %v3321_v28  ;;  %2511 = vmatmul.mubr.f32.vlgmr.msra.gmra.mrb[0].mxu0 %v4983_v3  ;;  %v1225_v3 = vld [vmem:[%s4077_s29 + $0x1e68] sm:$0xff]  ;;  %v3329_v26 = vpack.c.bf16 %v710_v2, %v708_v45  ;;  %v728_v45 = vld [vmem:[%s4077_s29 + $0xee0] sm:$0xff]  ;;  %v730_v2 = vld [vmem:[%s4077_s29 + $0xef0] sm:$0xff] }
 0x1dc   : > { %3834 = vmatpush1.bf16.msra.mxu0 %v3833_v30  ;;  %3324 = vmatprep.subr.bf16.mxu1 %v3323_v49  ;;  %v3843_v61 = vpack.c.bf16 %v1227_v52, %v1225_v3  ;;  %v1237_v28 = vld [vmem:[%s4077_s29 + $0x1ec8] sm:$0xff]  ;;  %v1239_v30 = vld [vmem:[%s4077_s29 + $0x1ed8] sm:$0xff]  ;;  %v3341_v49 = vpack.c.bf16 %v722_v8, %v720_v20  ;;  %v740_v20 = vld [vmem:[%s4077_s29 + $0xf40] sm:$0xff] }
 0x1dd   : > { %3836 = vmatprep.subr.bf16.mxu0 %v3835_v60  ;;  %2013 = vmatprep.mubr.f32.mxu1 %v1351_v39  ;;  %v726_v60 = vld [vmem:[%s4077_s29 + $0xed0] sm:$0xff]  ;;  %v3855_v37 = vpack.c.bf16 %v1239_v30, %v1237_v28  ;;  %v729_v39 = vld [vmem:[%s4077_s29 + $0xee8] sm:$0xff]  ;;  %v1247_v52 = vld [vmem:[%s4077_s29 + $0x1f18] sm:$0xff] }
 0x1de   : > { %2581 = vmatprep.mubr.f32.mxu0 %v1419_v42  ;;  %v1243_v42 = vld [vmem:[%s4077_s29 + $0x1ef8] sm:$0xff]  ;;  %v1245_v3 = vld [vmem:[%s4077_s29 + $0x1f08] sm:$0xff]  ;;  %v742_v8 = vld [vmem:[%s4077_s29 + $0xf50] sm:$0xff] }
 0x1df   : > { %3326 = vmatpush1.bf16.msra.mxu1 %v3325_v43  ;;  %v3345_v43 = vpack.c.bf16 %v726_v60, %v724_v35  ;;  %v1257_v28 = vld [vmem:[%s4077_s29 + $0x1f68] sm:$0xff]  ;;  %v1259_v30 = vld [vmem:[%s4077_s29 + $0x1f78] sm:$0xff]  ;;  %v744_v35 = vld [vmem:[%s4077_s29 + $0xf60] sm:$0xff] }
 0x1e0   : > { %3838 = vmatpush1.bf16.msra.mxu0 %v3837_v44  ;;  %3328 = vmatprep.subr.bf16.mxu1 %v3327_v10  ;;  %v3857_v44 = vpack.c.bf16 %v1238_v38, %v1236_v36  ;;  %v3347_v10 = vpack.c.bf16 %v731_v40, %v729_v39  ;;  %v746_v60 = vld [vmem:[%s4077_s29 + $0xf70] sm:$0xff]  ;;  %v1256_v36 = vld [vmem:[%s4077_s29 + $0x1f60] sm:$0xff]  ;;  %v749_v39 = vld [vmem:[%s4077_s29 + $0xf88] sm:$0xff] }
 0x1e1   : > { %3840 = vmatprep.subr.bf16.mxu0 %v3839_v56  ;;  %v3859_v56 = vpack.c.bf16 %v1243_v42, %v1241_v41  ;;  %v1258_v38 = vld [vmem:[%s4077_s29 + $0x1f70] sm:$0xff]  ;;  %v751_v40 = vld [vmem:[%s4077_s29 + $0xf98] sm:$0xff]  ;;  %v1261_v41 = vld [vmem:[%s4077_s29 + $0x1f88] sm:$0xff] }
 0x1e2   : > { %v1263_v42 = vld [vmem:[%s4077_s29 + $0x1f98] sm:$0xff] }
 0x1e3   : > { %3330 = vmatpush1.bf16.msra.mxu1 %v3329_v26  ;;  %v3349_v26 = vpack.c.bf16 %v730_v2, %v728_v45  ;;  %v748_v45 = vld [vmem:[%s4077_s29 + $0xf80] sm:$0xff]  ;;  %v750_v2 = vld [vmem:[%s4077_s29 + $0xf90] sm:$0xff] }
 0x1e4   : > { %3842 = vmatpush1.bf16.msra.mxu0 %v3841_v54  ;;  %3332 = vmatprep.subr.bf16.mxu1 %v3331_v57  ;;  %v3861_v54 = vpack.c.bf16 %v1242_v47, %v1240_v46  ;;  %v3351_v57 = vpack.c.bf16 %v735_v50, %v733_v48  ;;  %v1260_v46 = vld [vmem:[%s4077_s29 + $0x1f80] sm:$0xff]  ;;  %v1262_v47 = vld [vmem:[%s4077_s29 + $0x1f90] sm:$0xff]  ;;  %v753_v48 = vld [vmem:[%s4077_s29 + $0xfa8] sm:$0xff] }
 0x1e5   : > { %3844 = vmatprep.subr.bf16.mxu0 %v3843_v61  ;;  %v3863_v61 = vpack.c.bf16 %v1247_v52, %v1245_v3  ;;  %v755_v50 = vld [vmem:[%s4077_s29 + $0xfb8] sm:$0xff]  ;;  %v1265_v3 = vld [vmem:[%s4077_s29 + $0x1fa8] sm:$0xff] }
 0x1e6   : > { %v1267_v52 = vld [vmem:[%s4077_s29 + $0x1fb8] sm:$0xff] }
 0x1e7   : > { %3334 = vmatpush1.bf16.msra.mxu1 %v3333_v23  ;;  %v3353_v23 = vpack.c.bf16 %v734_v58, %v732_v29  ;;  %v752_v29 = vld [vmem:[%s4077_s29 + $0xfa0] sm:$0xff]  ;;  %v754_v58 = vld [vmem:[%s4077_s29 + $0xfb0] sm:$0xff] }
 0x1e8   : > { %3846 = vmatpush1.bf16.msra.mxu0 %v3845_v4  ;;  %3336 = vmatprep.subr.bf16.mxu1 %v3335_v5  ;;  %v3865_v4 = vpack.c.bf16 %v1246_v62, %v1244_v59  ;;  %v3355_v5 = vpack.c.bf16 %v739_v1, %v737_v0  ;;  %v1264_v59 = vld [vmem:[%s4077_s29 + $0x1fa0] sm:$0xff]  ;;  %v1266_v62 = vld [vmem:[%s4077_s29 + $0x1fb0] sm:$0xff]  ;;  %v757_v0 = vld [vmem:[%s4077_s29 + $0xfc8] sm:$0xff] }
 0x1e9   : > { %3848 = vmatprep.subr.bf16.mxu0 %v3847_v27  ;;  %v3867_v27 = vpack.c.bf16 %v1251_v51, %v1249_v31  ;;  %v759_v1 = vld [vmem:[%s4077_s29 + $0xfd8] sm:$0xff]  ;;  %v1269_v31 = vld [vmem:[%s4077_s29 + $0x1fc8] sm:$0xff] }
 0x1ea   : > { %v1271_v51 = vld [vmem:[%s4077_s29 + $0x1fd8] sm:$0xff] }
 0x1eb   : > { %3338 = vmatpush1.bf16.msra.mxu1 %v3337_v17  ;;  %v3357_v17 = vpack.c.bf16 %v738_v7, %v736_v6  ;;  %v756_v6 = vld [vmem:[%s4077_s29 + $0xfc0] sm:$0xff]  ;;  %v758_v7 = vld [vmem:[%s4077_s29 + $0xfd0] sm:$0xff] }
 0x1ec   : > { %3850 = vmatpush1.bf16.msra.mxu0 %v3849_v18  ;;  %3340 = vmatprep.subr.bf16.mxu1 %v3339_v19  ;;  %v3869_v18 = vpack.c.bf16 %v1250_v9, %v1248_v34  ;;  %v3359_v19 = vpack.c.bf16 %v743_v14, %v741_v11  ;;  %v1268_v34 = vld [vmem:[%s4077_s29 + $0x1fc0] sm:$0xff]  ;;  %v1270_v9 = vld [vmem:[%s4077_s29 + $0x1fd0] sm:$0xff]  ;;  %v761_v11 = vld [vmem:[%s4077_s29 + $0xfe8] sm:$0xff] }
 0x1ed   : > { %3852 = vmatprep.subr.bf16.mxu0 %v3851_v22  ;;  %v3871_v22 = vpack.c.bf16 %v1255_v16, %v1253_v15  ;;  %v763_v14 = vld [vmem:[%s4077_s29 + $0xff8] sm:$0xff]  ;;  %v1273_v15 = vld [vmem:[%s4077_s29 + $0x1fe8] sm:$0xff] }
 0x1ee   : > { %v1275_v16 = vld [vmem:[%s4077_s29 + $0x1ff8] sm:$0xff] }
 0x1ef   : > { %3342 = vmatpush1.bf16.msra.mxu1 %v3341_v49  ;;  %v3361_v49 = vpack.c.bf16 %v742_v8, %v740_v20  ;;  %v760_v20 = vld [vmem:[%s4077_s29 + $0xfe0] sm:$0xff]  ;;  %v762_v8 = vld [vmem:[%s4077_s29 + $0xff0] sm:$0xff] }
 0x1f0   : > { %3854 = vmatpush1.bf16.msra.mxu0 %v3853_v32  ;;  %3344 = vmatprep.subr.bf16.mxu1 %v3343_v33  ;;  %v3873_v32 = vpack.c.bf16 %v1254_v13, %v1252_v21  ;;  %v3363_v33 = vpack.c.bf16 %v747_v25, %v745_v24  ;;  %v3891_v21 = vpack.c.bf16 %v1275_v16, %v1273_v15  ;;  %v1274_v13 = vld [vmem:[%s4077_s29 + $0x1ff0] sm:$0xff]  ;;  %v2638_v16 = vld [vmem:[%s5393_s3 + $0x58] sm:$0xff] (!%p2829_p6) }
 0x1f1   : > { %3856 = vmatprep.subr.bf16.mxu0 %v3855_v37  ;;  %v3875_v37 = vpack.c.bf16 %v1259_v30, %v1257_v28  ;;  %v3381_v24 = vpack.c.bf16 %v762_v8, %v760_v20  ;;  %v2637_v15 = vld [vmem:[%s5393_s3 + $0x50] sm:$0xff] (!%p2829_p6) }
 0x1f2   : > { %v3917_v20 = vpack.c.bf16 (!%p2829_p6), %v2638_v16, %v2637_v15 }
 0x1f3   : > { %3346 = vmatpush1.bf16.msra.mxu1 %v3345_v43  ;;  %v3365_v43 = vpack.c.bf16 %v746_v60, %v744_v35 }
 0x1f4   : > { %3858 = vmatpush1.bf16.msra.mxu0 %v3857_v44  ;;  %3348 = vmatprep.subr.bf16.mxu1 %v3347_v10  ;;  %v3877_v44 = vpack.c.bf16 %v1258_v38, %v1256_v36  ;;  %v3367_v10 = vpack.c.bf16 %v751_v40, %v749_v39  ;;  %v243_v36 = vld [vmem:[#allocation2] sm:$0xf] }
 0x1f5   : > { %3860 = vmatprep.subr.bf16.mxu0 %v3859_v56  ;;  %v3879_v56 = vpack.c.bf16 %v1263_v42, %v1261_v41  ;;  %v2627_v39 = vld [vmem:[%s5393_s3] sm:$0xff] (!%p2829_p6)  ;;  %v2628_v41 = vld [vmem:[%s5393_s3 + $0x8] sm:$0xff] (!%p2829_p6)  ;;  %v2645_v42 = vld [vmem:[%s5393_s3 + $0x90] sm:$0xff] (!%p2829_p6) }
 0x1f7   : > { %3350 = vmatpush1.bf16.msra.mxu1 %v3349_v26  ;;  %v3369_v26 = vpack.c.bf16 %v750_v2, %v748_v45  ;;  %v2629_v45 = vld [vmem:[%s5393_s3 + $0x10] sm:$0xff] (!%p2829_p6)  ;;  %v2630_v2 = vld [vmem:[%s5393_s3 + $0x18] sm:$0xff] (!%p2829_p6) }
 0x1f8   : > { %3862 = vmatpush1.bf16.msra.mxu0 %v3861_v54  ;;  %3352 = vmatprep.subr.bf16.mxu1 %v3351_v57  ;;  %v3881_v54 = vpack.c.bf16 %v1262_v47, %v1260_v46  ;;  %v3371_v57 = vpack.c.bf16 %v755_v50, %v753_v48  ;;  %v2647_v46 = vld [vmem:[%s5393_s3 + $0xa0] sm:$0xff] (!%p2829_p6)  ;;  %v3901_v47 = vpack.c.bf16 (!%p2829_p6), %v2630_v2, %v2629_v45 }
 0x1f9   : > { %3864 = vmatprep.subr.bf16.mxu0 %v3863_v61  ;;  %v3883_v61 = vpack.c.bf16 %v1267_v52, %v1265_v3  ;;  %v2631_v50 = vld [vmem:[%s5393_s3 + $0x20] sm:$0xff] (!%p2829_p6)  ;;  %v2632_v3 = vld [vmem:[%s5393_s3 + $0x28] sm:$0xff] (!%p2829_p6)  ;;  %v2649_v52 = vld [vmem:[%s5393_s3 + $0xb0] sm:$0xff] (!%p2829_p6) }
 0x1fb   : > { %3354 = vmatpush1.bf16.msra.mxu1 %v3353_v23  ;;  %v3373_v23 = vpack.c.bf16 %v754_v58, %v752_v29  ;;  %v2614_v29 = vsub.s32 (!%p2829_p6), 1, %v4164_v63 }
 0x1fc   : > { %3866 = vmatpush1.bf16.msra.mxu0 %v3865_v4  ;;  %3356 = vmatprep.subr.bf16.mxu1 %v3355_v5  ;;  %v3885_v4 = vpack.c.bf16 %v1266_v62, %v1264_v59  ;;  %v3375_v5 = vpack.c.bf16 %v759_v1, %v757_v0  ;;  %v2633_v59 = vld [vmem:[%s5393_s3 + $0x30] sm:$0xff] (!%p2829_p6)  ;;  %v2651_v62 = vld [vmem:[%s5393_s3 + $0xc0] sm:$0xff] (!%p2829_p6)  ;;  %v2652_v0 = vld [vmem:[%s5393_s3 + $0xc8] sm:$0xff] (!%p2829_p6) }
 0x1fd   : > { %3868 = vmatprep.subr.bf16.mxu0 %v3867_v27  ;;  %v3887_v27 = vpack.c.bf16 %v1271_v51, %v1269_v31 }
 0x1ff   : > { %3358 = vmatpush1.bf16.msra.mxu1 %v3357_v17  ;;  %v3377_v17 = vpack.c.bf16 %v758_v7, %v756_v6  ;;  %v2653_v6 = vld [vmem:[%s5393_s3 + $0xd0] sm:$0xff] (!%p2829_p6)  ;;  %v2654_v7 = vld [vmem:[%s5393_s3 + $0xd8] sm:$0xff] (!%p2829_p6) }
 0x200   : > { %3870 = vmatpush1.bf16.msra.mxu0 %v3869_v18  ;;  %3360 = vmatprep.subr.bf16.mxu1 %v3359_v19  ;;  %v3889_v18 = vpack.c.bf16 %v1270_v9, %v1268_v34  ;;  %v3379_v19 = vpack.c.bf16 %v763_v14, %v761_v11  ;;  %v3915_v14 = vpack.c.bf16 (!%p2829_p6), %v2654_v7, %v2653_v6 }
 0x201   : > { %3872 = vmatprep.subr.bf16.mxu0 %v3871_v22  ;;  %v1272_v22 = vld [vmem:[%s4077_s29 + $0x1fe0] sm:$0xff] }
 0x202   : > { %v3893_v25 = vpack.c.bf16 %v1274_v13, %v1272_v22  ;;  %v2639_v22 = vld [vmem:[%s5393_s3 + $0x60] sm:$0xff] (!%p2829_p6)  ;;  %v2640_v13 = vld [vmem:[%s5393_s3 + $0x68] sm:$0xff] (!%p2829_p6) }
 0x203   : > { %3362 = vmatpush1.bf16.msra.mxu1 %v3361_v49 }
 0x204   : > { %3874 = vmatpush1.bf16.msra.mxu0 %v3873_v32  ;;  %3364 = vmatprep.subr.bf16.mxu1 %v3363_v33 }
 0x205   : > { %3876 = vmatprep.subr.bf16.mxu0 %v3875_v37 }
 0x207   : > { %3366 = vmatpush1.bf16.msra.mxu1 %v3365_v43  ;;  %v2646_v43 = vld [vmem:[%s5393_s3 + $0x98] sm:$0xff] (!%p2829_p6) }
 0x208   : > { %3878 = vmatpush1.bf16.msra.mxu0 %v3877_v44  ;;  %3368 = vmatprep.subr.bf16.mxu1 %v3367_v10  ;;  %v3897_v44 = vpack.c.bf16 (!%p2829_p6), %v2628_v41, %v2627_v39  ;;  %v3899_v10 = vpack.c.bf16 (!%p2829_p6), %v2646_v43, %v2645_v42 }
 0x209   : > { %3880 = vmatprep.subr.bf16.mxu0 %v3879_v56  ;;  %v2648_v56 = vld [vmem:[%s5393_s3 + $0xa8] sm:$0xff] (!%p2829_p6) }
 0x20a   : > { %v3903_v48 = vpack.c.bf16 (!%p2829_p6), %v2648_v56, %v2647_v46 }
 0x20b   : > { %3370 = vmatpush1.bf16.msra.mxu1 %v3369_v26  ;;  %v2650_v26 = vld [vmem:[%s5393_s3 + $0xb8] sm:$0xff] (!%p2829_p6) }
 0x20c   : > { %3882 = vmatpush1.bf16.msra.mxu0 %v3881_v54  ;;  %3372 = vmatprep.subr.bf16.mxu1 %v3371_v57  ;;  %v3905_v54 = vpack.c.bf16 (!%p2829_p6), %v2632_v3, %v2631_v50  ;;  %v2610_v57 = vsub.s32 (!%p2829_p6), 0, %v4164_v63  ;;  %v3907_v58 = vpack.c.bf16 (!%p2829_p6), %v2650_v26, %v2649_v52  ;;  %v2606_v63 = vld [vmem:[%s5392_s2] sm:$0x3] (!%p2829_p6) }
 0x20d   : > { %3884 = vmatprep.subr.bf16.mxu0 %v3883_v61  ;;  %v2634_v61 = vld [vmem:[%s5393_s3 + $0x38] sm:$0xff] (!%p2829_p6)  ;;  %v2615_v51 = vrot.slane (!%p2829_p6), %v2606_v63, %v2614_v29 }
 0x20e   : > { %v3909_v1 = vpack.c.bf16 (!%p2829_p6), %v2634_v61, %v2633_v59  ;;  %v2611_v31 = vrot.slane (!%p2829_p6), %v2606_v63, %v2610_v57 }
 0x20f   : > { %3374 = vmatpush1.bf16.msra.mxu1 %v3373_v23  ;;  %v3911_v23 = vpack.c.bf16 (!%p2829_p6), %v2652_v0, %v2651_v62 }
 0x210   : > { %3886 = vmatpush1.bf16.msra.mxu0 %v3885_v4  ;;  %3376 = vmatprep.subr.bf16.mxu1 %v3375_v5  ;;  %v2635_v4 = vld [vmem:[%s5393_s3 + $0x40] sm:$0xff] (!%p2829_p6)  ;;  %v2636_v5 = vld [vmem:[%s5393_s3 + $0x48] sm:$0xff] (!%p2829_p6)  ;;  %v2616_v34 = vcombine.low (!%p2829_p6), %v2611_v31, %v2615_v51 }
 0x211   : > { %3888 = vmatprep.subr.bf16.mxu0 %v3887_v27  ;;  %v3913_v9 = vpack.c.bf16 (!%p2829_p6), %v2636_v5, %v2635_v4 }
 0x212   : > { %v2623_v11 = vrot.slane (!%p2829_p6), %v2616_v34, %v4175_v12 }
 0x213   : > { %3378 = vmatpush1.bf16.msra.mxu1 %v3377_v17  ;;  %v2655_v17 = vld [vmem:[%s5393_s3 + $0xe0] sm:$0xff] (!%p2829_p6) }
 0x214   : > { %3890 = vmatpush1.bf16.msra.mxu0 %v3889_v18  ;;  %3380 = vmatprep.subr.bf16.mxu1 %v3379_v19  ;;  %v2656_v18 = vld [vmem:[%s5393_s3 + $0xe8] sm:$0xff] (!%p2829_p6) }
 0x215   : > { %3892 = vmatprep.subr.bf16.mxu0 %v3891_v21  ;;  %v3919_v21 = vpack.c.bf16 (!%p2829_p6), %v2656_v18, %v2655_v17 }
 0x217   : > { %3382 = vmatpush1.bf16.msra.mxu1 %v3381_v24  ;;  %v2657_v24 = vld [vmem:[%s5393_s3 + $0xf0] sm:$0xff] (!%p2829_p6) }
 0x218   : > { %3894 = vmatpush1.bf16.msra.mxu0 %v3893_v25  ;;  %v2658_v25 = vld [vmem:[%s5393_s3 + $0xf8] sm:$0xff] (!%p2829_p6) }
 0x21a   : > { %2014 = vmatmul.mubr.f32.vlgmr.msra.gmra.mrb[0].mxu1 %v5122_v53  ;;  %v2643_v53 = vld [vmem:[%s5393_s3 + $0x80] sm:$0xff] (!%p2829_p6) }
 0x21b   : > { %2582 = vmatmul.mubr.f32.vlgmr.msra.gmra.mrb[0].mxu0 %v5127_v55  ;;  %v2644_v55 = vld [vmem:[%s5393_s3 + $0x88] sm:$0xff] (!%p2829_p6) }
 0x21c   : > { %v3895_v40 = vpack.c.bf16 (!%p2829_p6), %v2644_v55, %v2643_v53 }
 0x21e   : > { %3896 = vmatprep.subr.bf16.mxu0 (!%p2829_p6), %v3895_v40 }
 0x21f   : > { %3898 = vmatpush3.bf16.msra.mxu0 (!%p2829_p6), %v3897_v44 }
 0x220   : > { %3900 = vmatprep.subr.bf16.mxu0 (!%p2829_p6), %v3899_v10 }
 0x223   : > { %3902 = vmatpush3.bf16.msra.mxu0 (!%p2829_p6), %v3901_v47 }
 0x224   : > { %3904 = vmatprep.subr.bf16.mxu0 (!%p2829_p6), %v3903_v48 }
 0x227   : > { %3906 = vmatpush3.bf16.msra.mxu0 (!%p2829_p6), %v3905_v54 }
 0x228   : > { %3908 = vmatprep.subr.bf16.mxu0 (!%p2829_p6), %v3907_v58 }
 0x22b   : > { %3910 = vmatpush3.bf16.msra.mxu0 (!%p2829_p6), %v3909_v1 }
 0x22c   : > { %3912 = vmatprep.subr.bf16.mxu0 (!%p2829_p6), %v3911_v23 }
 0x22f   : > { %3914 = vmatpush3.bf16.msra.mxu0 (!%p2829_p6), %v3913_v9 }
 0x230   : > { %3916 = vmatprep.subr.bf16.mxu0 (!%p2829_p6), %v3915_v14 }
 0x233   : > { %3918 = vmatpush3.bf16.msra.mxu0 (!%p2829_p6), %v3917_v20 }
 0x234   : > { %3920 = vmatprep.subr.bf16.mxu0 (!%p2829_p6), %v3919_v21 }
 0x2ed   : > { %v2015_v28 = vpop.f32.mrb[0].mxu1 }
 0x2ee   : > { %v2583_v30 = vpop.f32.mrb[0].mxu0  ;;  %v2017_v49 = vpop.f32.mrb[1].mxu1 }
 0x2ef   : > { %v3927_v32 = vadd.f32 %v2583_v30, %v2015_v28  ;;  %v2585_v33 = vpop.f32.mrb[1].mxu0  ;;  %v3921_v30 = vpack.c.bf16 (!%p2829_p6), %v2640_v13, %v2639_v22 }
 0x2f0   : > { %v3928_v35 = vadd.f32 %v2585_v33, %v2017_v49  ;;  %v2641_v33 = vld [vmem:[%s5393_s3 + $0x70] sm:$0xff] (!%p2829_p6) }
 0x2f1   : > { %3922 = vmatpush3.bf16.msra.mxu0 (!%p2829_p6), %v3921_v30 }
 0x2f2   : > { %v2590_v60 = vcombine.low %v3927_v32, %v3928_v35  ;;  %2604 = sbr.rel (%p2829_p6) target bundleno = 1311 (0x51f), region = 48  ;;  %v3923_v32 = vpack.c.bf16 (!%p2829_p6), %v2658_v25, %v2657_v24  ;;  %v2642_v35 = vld [vmem:[%s5393_s3 + $0x78] sm:$0xff] (!%p2829_p6) }
 0x2f4   : > { %v2597_v37 = vrot.slane %v2590_v60, %v4175_v12  ;;  %v3925_v60 = vpack.c.bf16 (!%p2829_p6), %v2642_v35, %v2641_v33  ;;  %3924 = vmatprep.subr.bf16.mxu0 (!%p2829_p6), %v3923_v32 }
 0x2f6   : > { %v2599_v38 = vadd.f32 %v2597_v37, %v243_v36  ;;  %3926 = vmatpush3.bf16.msra.mxu0 (!%p2829_p6), %v3925_v60  ;;  %v2830_v37 = vld [vmem:[%s5394_s4] ss:$0 sm:$0xff] (!%p2829_p6) }
 0x2f8   : > { %2600 = vst [vmem:[#allocation2] sm:$0xf] %v2599_v38 }
 0x2ff   : > { %v2605_v27 = vld [vmem:[#allocation2] sm:$0xf] }
 0x300   : > { %v2625_v19 = vadd.f32 %v2623_v11, %v2605_v27 }
 0x302   : > { %v2626_v8 = vmax.f32 %v2625_v19, 0.0 }
 0x304   : > { %v2673_v28 = vrot.slane %v2626_v8, %v4175_v12 }
 0x306   : > { %v2674_v49 = vcombine.high %v2673_v28, %v2673_v28 }
 0x308   : > { %2741 = vmatprep.mubr.f32.mxu0 %v2674_v49 }
 0x309   : > { %2742 = vmatmul.mubr.f32.vlgmr.msra.gmra.mrb[0].mxu0 %v2673_v28 }
 0x3dc   : > { %v2868_v12 = vpop.f32.mrb[0].mxu0 }
 0x3dd   : > { %v2869_v36 = vpop.f32.mrb[1].mxu0 }
 0x3de   : > { %v2870_v38 = vadd.f32 %v2869_v36, %v2868_v12 }
 0x3e0   : > { %v2744_v53 = vadd.f32 %v2870_v38, %v2830_v37 }
 0x3e2   : > { %v2748_v55 = vsel %vm2747_vm0, %v2744_v53, -inf }
 0x3e3   : > { %2749 = vmax.xlane.f32.xlu0 %v2748_v55 }
 0x470   : > { %v2750_v39 = vpop.xlane.xlu0 %2749 }
 0x471   : > { %v2751_v40 = vsub.f32 %v2744_v53, %v2750_v39 }
 0x473   : > { %v2752_v41 = vmul.f32 1.442695, %v2751_v40 }
 0x475   : > { %3982 = vpow2.f32 %v2752_v41 }
 0x47f   : > { %v3983_v42 = vpop.eup %3982 }
 0x480   : > { %v2754_v43 = vsel %vm2747_vm0, %v3983_v42, 0.0 }
 0x481   : > { %2755 = vadd.xlane.f32.xlu0 %v2754_v43 }
 0x50e   : > { %v2756_v44 = vpop.xlane.xlu0 %2755 }
 0x50f   : > { %3984 = vlog2.f32 %v2756_v44 }
 0x519   : > { %v3985_v10 = vpop.eup %3984 }
 0x51a   : > { %v2758_v45 = vmul.f32 0.6931472, %v3985_v10 }
 0x51c   : > { %v2759_v2 = vsub.f32 %v2751_v40, %v2758_v45 }
 0x51e   : > { %2760 = vst.msk [vmem:[#allocation3] sm:$0x3] %vm2747_vm0, %v2759_v2 }
 0x51f PF: > { %p3961_p7 = scmp.eq.s32.totalorder %s4063_s19, 3  ;;  %s4026_s29 = smov [#allocation3]  }
 0x520   : > { %s2768_s30 = sshll.u32 %s4026_s29, 4  ;;  %s2769_s30 = int_to_ptr.vmem [resolvable:$true] %s2768_s30 }
 0x521   : > { %s3986_s6 = scalar_lea.vmem %s2769_s30, 32  ;;  %p3993_p11 = scmp.lt.s32.totalorder %s2769_s30, %s2769_s30 }
 0x522   : > { %p3987_p8 = scmp.ne.s32.totalorder %s2769_s30, %s3986_s6  ;;  %p3994_p12 = scmp.lt.s32.totalorder %s3986_s6, %s3986_s6 }
 0x524   : > { %p3988_p9 = pnand %p3987_p8, %p3961_p7  ;;  %p3995_p13 = por %p3994_p12, %p3993_p11 }
 0x526   : > { %p3989_p10 = pneg %p3988_p9 }
 0x528   : > { %p3996_p0 = pnand %p3995_p13, %p3989_p10 }
 0x52a   : > { %3999 = shalt.err (!%p3996_p0)
}
 0x52b   : > { %s4000_s9 = scalar_lea.hbm %s5395_s5, 32 }
 0x52c   : > { %p4001_p1 = scmp.ne.s32.totalorder %s5395_s5, %s4000_s9  ;;  %p4006_p4 = scmp.lt.u32.totalorder %s4000_s9, %s5395_s5 }
 0x52e   : > { %p4002_p2 = pnand %p4001_p1, %p3961_p7 }
 0x530   : > { %p4003_p3 = pneg %p4002_p2 }
 0x532   : > { %p4008_p5 = pnand %p4006_p4, %p4003_p3 }
 0x534   : > { %4011 = shalt.err (!%p4008_p5)
}
 0x535   : > { %3958 = dma.vmem_to_hbm [thread:$0]  (%p3961_p7), %s2769_s30, 32, %s5395_s5, [#allocation4]  }
 0x536   : > { %4017 = dma.done.wait (%p3961_p7), [#allocation4], 32  }
 0x537   : > { %4019 = vsyncadd (%p3961_p7), [#allocation4], 4294967264 }
 0x538 PF: > { %s16_s18 = sadd.s32 1, %s4022_s18  }
 0x539   : > { %p13_p6 = scmp.ge.s32.totalorder %s16_s18, 6  }
 0x53b   :  { %15 = sbr.rel (!%p13_p6) target bundleno = 1 (0x1), region = 78 }
 0x542   :  { %2781 = vsyncpa [#allocation4], 1 }
 0x543   :  { %2783 = vsyncpa [#allocation4 + $0x1], 1 }

</bundles_post_ra>
